<compile_context>
chip_gen: v5e
topology: v5e:2x2
jax: 0.10.0
libtpu: 0.0.40
codegen_flags: <defaults>
</compile_context>

<pallas_src>
import functools

import jax
import jax.numpy as jnp
import numpy as np
from jax import lax
from jax.experimental import pallas as pl
from jax.experimental.pallas import tpu as pltpu

SOS_TOKEN_IDX = 0


def _decoder_block_kernel(
    emb_ref,                      # (TBLK, BBLK, E)   bf16 embedded decoder inputs
    keys_ref,                     # (BBLK, S, K)      f32
    vals_ref,                     # (BBLK, S, V)      f32
    maskadd_ref,                  # (BBLK, S)         f32 additive mask (0 / -1e9)
    w_e_ref, w_c_ref, w_h0_ref, b0_ref,    # layer 0: (E,4H),(V,4H),(H,4H) bf16, (1,4H) f32
    w_x1_ref, w_h1_ref, b1_ref,            # layer 1: (H,4H),(H,4H) bf16, (1,4H) f32
    w_x2_ref, w_h2_ref, b2_ref,            # layer 2: (H,4H),(H,4H) bf16, (1,4H) f32
    w_q_ref, b_q_ref,                      # (H,K) bf16, (1,K) f32
    w_ho_ref, w_vo_ref, b_out_ref,         # (H,E_pad),(V,E_pad) bf16, (1,E_pad) f32
    out_ref,                               # (TBLK, BBLK, E_pad) bf16 ("comb" activations)
    h_scr, c_scr, ctx_scr,                 # VMEM: (3,BBLK,H), (3,BBLK,H), (BBLK,V) f32
    *, tblk, H,
):
    # New batch tile starts at time-block 0: reset recurrent state (params_h0/params_c0
    # are zero Parameters; initial context is zeros).
    @pl.when(pl.program_id(1) == 0)
    def _():
        h_scr[...] = jnp.zeros_like(h_scr)
        c_scr[...] = jnp.zeros_like(c_scr)
        ctx_scr[...] = jnp.zeros_like(ctx_scr)

    bblk = maskadd_ref.shape[0]
    K = w_q_ref.shape[1]
    E_pad = w_ho_ref.shape[1]

    # Hoist grid-invariant loads and bias broadcasts out of the unrolled time loop
    # (JAX does not CSE broadcast_in_dim).
    keys = keys_ref[...]
    vals = vals_ref[...]
    mask_add = maskadd_ref[...]
    w_e = w_e_ref[...]; w_c = w_c_ref[...]; w_h0 = w_h0_ref[...]
    w_x1 = w_x1_ref[...]; w_h1 = w_h1_ref[...]
    w_x2 = w_x2_ref[...]; w_h2 = w_h2_ref[...]
    w_q = w_q_ref[...]
    w_ho = w_ho_ref[...]; w_vo = w_vo_ref[...]
    b0 = jnp.broadcast_to(b0_ref[...], (bblk, 4 * H))
    b1 = jnp.broadcast_to(b1_ref[...], (bblk, 4 * H))
    b2 = jnp.broadcast_to(b2_ref[...], (bblk, 4 * H))
    b_q = jnp.broadcast_to(b_q_ref[...], (bblk, K))
    b_out = jnp.broadcast_to(b_out_ref[...], (bblk, E_pad))

    def gates_to_hc(gates, layer):
        # Gate columns are pre-ordered [i, f, o, g]: one sigmoid over the contiguous
        # first 3H lanes, tanh only on the last H.
        sig = jax.nn.sigmoid(gates[:, :3 * H])
        i = sig[:, 0 * H:1 * H]
        f = sig[:, 1 * H:2 * H]
        o = sig[:, 2 * H:3 * H]
        g = jnp.tanh(gates[:, 3 * H:])
        c_new = f * c_scr[layer] + i * g
        h_new = o * jnp.tanh(c_new)
        h_scr[layer] = h_new
        c_scr[layer] = c_new
        return h_new

    def step(i, carry):
        emb = emb_ref[i]                                     # (BBLK, E) bf16
        ctx_bf = ctx_scr[...].astype(jnp.bfloat16)

        # Layer 0: gates = emb@W_e + ctx@W_c + h_prev@W_h + b   (no lane-dim concat)
        g0 = (jnp.dot(emb, w_e, preferred_element_type=jnp.float32)
              + jnp.dot(ctx_bf, w_c, preferred_element_type=jnp.float32)
              + jnp.dot(h_scr[0].astype(jnp.bfloat16), w_h0,
                        preferred_element_type=jnp.float32)
              + b0)
        h0 = gates_to_hc(g0, 0)

        g1 = (jnp.dot(h0.astype(jnp.bfloat16), w_x1, preferred_element_type=jnp.float32)
              + jnp.dot(h_scr[1].astype(jnp.bfloat16), w_h1,
                        preferred_element_type=jnp.float32)
              + b1)
        h1 = gates_to_hc(g1, 1)

        g2 = (jnp.dot(h1.astype(jnp.bfloat16), w_x2, preferred_element_type=jnp.float32)
              + jnp.dot(h_scr[2].astype(jnp.bfloat16), w_h2,
                        preferred_element_type=jnp.float32)
              + b2)
        h2 = gates_to_hc(g2, 2)
        h_bf = h2.astype(jnp.bfloat16)

        # Attention: query on MXU; energy/context on VPU + XLU reduce (keeps the MXU-push
        # slot for the LSTM/out dots instead of bblk singleton-row matmuls per step).
        q = jnp.dot(h_bf, w_q, preferred_element_type=jnp.float32) + b_q     # (BBLK, K)
        energy = jnp.sum(q[:, None, :] * keys, axis=-1) + mask_add            # (BBLK, S)
        m = jnp.max(energy, axis=-1, keepdims=True)
        e = jnp.exp(energy - m)
        attn = e * pl.reciprocal(jnp.sum(e, axis=-1, keepdims=True), approx=True)
        new_ctx = jnp.sum(attn[:, :, None] * vals, axis=1)                    # (BBLK, V)
        ctx_scr[...] = new_ctx

        # Output MLP [hidden; context] -> embedding_size, as accumulated dots.
        comb = (jnp.dot(h_bf, w_ho, preferred_element_type=jnp.float32)
                + jnp.dot(new_ctx.astype(jnp.bfloat16), w_vo,
                          preferred_element_type=jnp.float32)
                + b_out)                                                      # (BBLK, E_pad)
        out_ref[i] = comb.astype(out_ref.dtype)                               # bf16 writeback
        return carry

    lax.fori_loop(0, tblk, step, 0, unroll=True)


def _pick_batch_block(B):
    # Fatten the MXU M dimension: aim for 128/256 rows per tile and >=2 tiles when the
    # batch allows it (two TensorCores on v7x via the "parallel" grid axis).
    for cand in (256, 128):
        if B % cand == 0 and B // cand >= 2:
            return cand
    for cand in (256, 128):
        if B % cand == 0:
            return cand
    return B


def _vmem_limit_bytes():
    # Generation-aware VMEM limit: physical capacity minus headroom (v7x has 64 MiB/TC).
    try:
        cap = int(pltpu.get_tpu_info().vmem_capacity_bytes)
    except Exception:
        cap = 64 * 1024 * 1024
    return int(min(max(cap - 16 * 1024 * 1024, 32 * 1024 * 1024), 112 * 1024 * 1024))


def decoder_rnn_forward(params, decoder_targets, encoder_keys, encoder_values,
                        encoder_lens, teacher_forcing_ratio=1.0, max_len=10,
                        time_block=8, batch_block=None):
    """Teacher-forced DecoderRNN.forward. Returns (decoder_outputs, ret_dict)."""
    assert teacher_forcing_ratio >= 1.0, "only the teacher-forcing path is implemented"
    T, B = decoder_targets.shape
    _, S, K = encoder_keys.shape
    V = encoder_values.shape[-1]
    O, E = params["embedding"].shape
    H = params["w_hh"][0].shape[1]                 # w_hh: (4H, H)
    max_target_len = T if T > 1 else max_len
    nsteps = max_target_len - 1

    bblk = _pick_batch_block(B) if batch_block is None else batch_block
    assert B % bblk == 0 and (bblk % 8 == 0 or bblk == B)
    tblk = max(1, min(time_block, nsteps))
    nsteps_pad = -(-nsteps // tblk) * tblk
    E_pad = -(-E // 128) * 128                     # lane-dense kernel output

    # ---- glue: embedding gather for teacher-forced inputs, additive mask, weight prep ----
    emb_in = params["embedding"][decoder_targets[:nsteps]].astype(jnp.bfloat16)  # (nsteps,B,E)
    if nsteps_pad > nsteps:
        emb_in = jnp.pad(emb_in, ((0, nsteps_pad - nsteps), (0, 0), (0, 0)))
    keys_f = encoder_keys.astype(jnp.float32)
    vals_f = encoder_values.astype(jnp.float32)
    valid = jnp.arange(S)[None, :] < encoder_lens[:, None]
    mask_add = jnp.where(valid, 0.0, -1e9).astype(jnp.float32)                   # (B, S)

    def reorder_cols(w):   # (in, 4H) PyTorch gate order [i,f,g,o] -> [i,f,o,g]
        return jnp.concatenate([w[:, :2 * H], w[:, 3 * H:], w[:, 2 * H:3 * H]], axis=1)

    def reorder_bias(b):   # (4H,) -> [i,f,o,g]
        return jnp.concatenate([b[:2 * H], b[3 * H:], b[2 * H:3 * H]])

    def bf(x):
        return x.astype(jnp.bfloat16)

    # Layer 0 input weights split into embedding / context halves (input = cat(emb, ctx)).
    w_ih0_T = params["w_ih"][0].T                         # (E+V, 4H)
    w_e = bf(reorder_cols(w_ih0_T[:E]))
    w_c = bf(reorder_cols(w_ih0_T[E:]))
    w_h0 = bf(reorder_cols(params["w_hh"][0].T))
    b0 = reorder_bias(params["b_ih"][0] + params["b_hh"][0]).reshape(1, 4 * H).astype(jnp.float32)

    w_x1 = bf(reorder_cols(params["w_ih"][1].T))
    w_h1 = bf(reorder_cols(params["w_hh"][1].T))
    b1 = reorder_bias(params["b_ih"][1] + params["b_hh"][1]).reshape(1, 4 * H).astype(jnp.float32)

    w_x2 = bf(reorder_cols(params["w_ih"][2].T))
    w_h2 = bf(reorder_cols(params["w_hh"][2].T))
    b2 = reorder_bias(params["b_ih"][2] + params["b_hh"][2]).reshape(1, 4 * H).astype(jnp.float32)

    w_q = bf(params["w_q"].T)                             # (H, K)
    b_q = params["b_q"].reshape(1, K).astype(jnp.float32)

    # Output MLP split into hidden / context halves, padded to E_pad (zero columns).
    w_out_T = params["w_out"].T                           # (H+V, E)
    w_ho = bf(jnp.pad(w_out_T[:H], ((0, 0), (0, E_pad - E))))
    w_vo = bf(jnp.pad(w_out_T[H:], ((0, 0), (0, E_pad - E))))
    b_out = jnp.pad(params["b_out"], (0, E_pad - E)).reshape(1, E_pad).astype(jnp.float32)

    grid = (B // bblk, nsteps_pad // tblk)                # (batch: parallel, time: arbitrary)

    def inv(shape):
        n = len(shape)
        # TODO(synk): pipeline_mode=pl.Buffered(1) would halve residency of these
        #             grid-invariant operands; skipped for lowering robustness.
        return pl.BlockSpec(shape, lambda b, t, n=n: (0,) * n)

    in_specs = [
        pl.BlockSpec((tblk, bblk, E), lambda b, t: (t, b, 0)),   # embedded inputs
        pl.BlockSpec((bblk, S, K), lambda b, t: (b, 0, 0)),      # encoder keys
        pl.BlockSpec((bblk, S, V), lambda b, t: (b, 0, 0)),      # encoder values
        pl.BlockSpec((bblk, S), lambda b, t: (b, 0)),            # additive mask
        inv(w_e.shape), inv(w_c.shape), inv(w_h0.shape), inv(b0.shape),
        inv(w_x1.shape), inv(w_h1.shape), inv(b1.shape),
        inv(w_x2.shape), inv(w_h2.shape), inv(b2.shape),
        inv(w_q.shape), inv(b_q.shape),
        inv(w_ho.shape), inv(w_vo.shape), inv(b_out.shape),
    ]

    kernel = functools.partial(_decoder_block_kernel, tblk=tblk, H=H)
    comb = pl.pallas_call(
        kernel,
        out_shape=jax.ShapeDtypeStruct((nsteps_pad, B, E_pad), jnp.bfloat16),
        grid_spec=pltpu.PrefetchScalarGridSpec(
            num_scalar_prefetch=0,
            grid=grid,
            in_specs=in_specs,
            out_specs=pl.BlockSpec((tblk, bblk, E_pad), lambda b, t: (t, b, 0)),
            scratch_shapes=[
                pltpu.VMEM((3, bblk, H), jnp.float32),   # h state per layer
                pltpu.VMEM((3, bblk, H), jnp.float32),   # c state per layer
                pltpu.VMEM((bblk, V), jnp.float32),      # attention context
            ],
        ),
        compiler_params=pltpu.CompilerParams(
            dimension_semantics=("parallel", "arbitrary"),
            vmem_limit_bytes=_vmem_limit_bytes(),
        ),
    )(emb_in, keys_f, vals_f, mask_add,
      w_e, w_c, w_h0, b0,
      w_x1, w_h1, b1,
      w_x2, w_h2, b2,
      w_q, b_q,
      w_ho, w_vo, b_out)

    # Tied vocab projection as one big post-kernel GEMM (off the serial recurrence).
    comb = comb[:nsteps, :, :E]                                           # (nsteps, B, E)
    emb_T = params["embedding"].T.astype(jnp.bfloat16)                    # (E, O)
    decoder_outputs = (jnp.einsum("tbe,eo->tbo", comb, emb_T,
                                  preferred_element_type=jnp.float32)
                       + params["b_proj"].astype(jnp.float32))

    ret_dict = {
        "sequence": [jnp.full((B, 1), SOS_TOKEN_IDX, dtype=jnp.int32)],
        "length": [int(max_target_len)] * B,
    }
    return decoder_outputs, ret_dict


def _reference_forward(params, decoder_targets, encoder_keys, encoder_values, encoder_lens):
    """Pure-JAX f32 reference mirroring the PyTorch module (for correctness check)."""
    T, B = decoder_targets.shape
    _, S, K = encoder_keys.shape
    V = encoder_values.shape[-1]
    O, E = params["embedding"].shape
    H = params["w_hh"][0].shape[1]
    mask = (jnp.arange(S)[None, :] < encoder_lens[:, None])

    h = [jnp.zeros((B, H), jnp.float32) for _ in range(3)]
    c = [jnp.zeros((B, H), jnp.float32) for _ in range(3)]
    ctx = jnp.zeros((B, V), jnp.float32)
    outs = []
    for t in range(T - 1):
        emb = params["embedding"][decoder_targets[t]]
        x = jnp.concatenate([emb, ctx], axis=1)
        for l in range(3):
            gates = (x @ params["w_ih"][l].T + params["b_ih"][l]
                     + h[l] @ params["w_hh"][l].T + params["b_hh"][l])
            i, f, g, o = jnp.split(gates, 4, axis=1)
            c[l] = jax.nn.sigmoid(f) * c[l] + jax.nn.sigmoid(i) * jnp.tanh(g)
            h[l] = jax.nn.sigmoid(o) * jnp.tanh(c[l])
            x = h[l]
        q = x @ params["w_q"].T + params["b_q"]
        energy = jnp.where(mask, jnp.einsum("bsk,bk->bs", encoder_keys, q), -1e9)
        attn = jax.nn.softmax(energy, axis=-1)
        ctx = jnp.einsum("bs,bsv->bv", attn, encoder_values)
        comb = jnp.concatenate([x, ctx], axis=1) @ params["w_out"].T + params["b_out"]
        outs.append(comb @ params["embedding"].T + params["b_proj"])
    return jnp.stack(outs)


def _init_params(key, output_size, embedding_size, hidden_size, key_size, value_size):
    ks = jax.random.split(key, 16)
    s = 0.1
    p = {
        "embedding": s * jax.random.normal(ks[0], (output_size, embedding_size), jnp.float32),
        "w_ih": [], "w_hh": [], "b_ih": [], "b_hh": [],
        "w_q": s * jax.random.normal(ks[1], (key_size, hidden_size), jnp.float32),
        "b_q": s * jax.random.normal(ks[2], (key_size,), jnp.float32),
        "w_out": s * jax.random.normal(ks[3], (embedding_size, hidden_size + value_size), jnp.float32),
        "b_out": s * jax.random.normal(ks[4], (embedding_size,), jnp.float32),
        "b_proj": s * jax.random.normal(ks[5], (output_size,), jnp.float32),
    }
    in_sizes = [value_size + embedding_size, hidden_size, hidden_size]
    for l in range(3):
        p["w_ih"].append(s * jax.random.normal(ks[6 + l], (4 * hidden_size, in_sizes[l]), jnp.float32))
        p["w_hh"].append(s * jax.random.normal(ks[9 + l], (4 * hidden_size, hidden_size), jnp.float32))
        p["b_ih"].append(s * jax.random.normal(ks[12 + l], (4 * hidden_size,), jnp.float32))
        p["b_hh"].append(jnp.zeros((4 * hidden_size,), jnp.float32))
    return p


if __name__ == "__main__":
    OUTPUT_SIZE, EMB, HID, KEYS, VALS = 32, 32, 32, 32, 32
    B, S, T, MAX_LEN = 32, 8, 9, 10

    root = jax.random.PRNGKey(0)
    kp, kt, kk, kv = jax.random.split(root, 4)
    params = _init_params(kp, OUTPUT_SIZE, EMB, HID, KEYS, VALS)

    decoder_targets = jax.random.randint(kt, (T, B), 0, OUTPUT_SIZE, dtype=jnp.int32)
    encoder_keys = jax.random.normal(kk, (B, S, KEYS), jnp.float32)
    encoder_values = jax.random.normal(kv, (B, S, VALS), jnp.float32)
    encoder_lens = jnp.array(([S, S - 1, S, S - 2, S, S - 3, S, S - 1] * 4)[:B], jnp.int32)

    # batch_block=16 / time_block=4 -> grid (2, 2): exercises both the batch-tile axis
    # (state reset per tile) and state carry across time blocks; 16 rows keeps bf16
    # sublane packing clean at this toy size (production sizes pick 128/256 automatically).
    outs, ret = decoder_rnn_forward(params, decoder_targets, encoder_keys,
                                    encoder_values, encoder_lens,
                                    teacher_forcing_ratio=1.0, max_len=MAX_LEN,
                                    time_block=4, batch_block=16)
    outs = jax.block_until_ready(outs)

    ref = _reference_forward(params, decoder_targets, encoder_keys, encoder_values, encoder_lens)
    np.testing.assert_allclose(np.asarray(outs), np.asarray(ref), rtol=2e-2, atol=2e-2)
    assert outs.shape == (T - 1, B, OUTPUT_SIZE)
    print("KERNEL_OK")
</pallas_src>

<mosaic_0001>
module attributes {stable_mosaic.version = 11 : i64} {
  func.func @_decoder_block_kernel(%arg0: i32, %arg1: i32, %arg2: memref<4x16x32xbf16, #tpu.memory_space<vmem>>, %arg3: memref<16x8x32xf32, #tpu.memory_space<vmem>>, %arg4: memref<16x8x32xf32, #tpu.memory_space<vmem>>, %arg5: memref<16x8xf32, #tpu.memory_space<vmem>>, %arg6: memref<32x128xbf16, #tpu.memory_space<vmem>>, %arg7: memref<32x128xbf16, #tpu.memory_space<vmem>>, %arg8: memref<32x128xbf16, #tpu.memory_space<vmem>>, %arg9: memref<1x128xf32, #tpu.memory_space<vmem>>, %arg10: memref<32x128xbf16, #tpu.memory_space<vmem>>, %arg11: memref<32x128xbf16, #tpu.memory_space<vmem>>, %arg12: memref<1x128xf32, #tpu.memory_space<vmem>>, %arg13: memref<32x128xbf16, #tpu.memory_space<vmem>>, %arg14: memref<32x128xbf16, #tpu.memory_space<vmem>>, %arg15: memref<1x128xf32, #tpu.memory_space<vmem>>, %arg16: memref<32x32xbf16, #tpu.memory_space<vmem>>, %arg17: memref<1x32xf32, #tpu.memory_space<vmem>>, %arg18: memref<32x128xbf16, #tpu.memory_space<vmem>>, %arg19: memref<32x128xbf16, #tpu.memory_space<vmem>>, %arg20: memref<1x128xf32, #tpu.memory_space<vmem>>, %arg21: memref<4x16x128xbf16, #tpu.memory_space<vmem>>, %arg22: memref<3x16x32xf32, #tpu.memory_space<vmem>>, %arg23: memref<3x16x32xf32, #tpu.memory_space<vmem>>, %arg24: memref<16x32xf32, #tpu.memory_space<vmem>>) attributes {dimension_semantics = [#tpu.dimension_semantics<parallel>, #tpu.dimension_semantics<arbitrary>], iteration_bounds = array<i64: 2, 2>, scalar_prefetch = 0 : i64, scratch_operands = 3 : i64, tpu.core_type = #tpu.core_type<tc>, window_params = [{transform_indices = @transform_0, window_bounds = array<i64: 4, 16, 32>}, {transform_indices = @transform_1, window_bounds = array<i64: 16, 8, 32>}, {transform_indices = @transform_2, window_bounds = array<i64: 16, 8, 32>}, {transform_indices = @transform_3, window_bounds = array<i64: 16, 8>}, {pipeline_mode = #tpu.pipeline_mode<synchronous>, transform_indices = @transform_4, window_bounds = array<i64: 32, 128>}, {pipeline_mode = #tpu.pipeline_mode<synchronous>, transform_indices = @transform_5, window_bounds = array<i64: 32, 128>}, {pipeline_mode = #tpu.pipeline_mode<synchronous>, transform_indices = @transform_6, window_bounds = array<i64: 32, 128>}, {pipeline_mode = #tpu.pipeline_mode<synchronous>, transform_indices = @transform_7, window_bounds = array<i64: 1, 128>}, {pipeline_mode = #tpu.pipeline_mode<synchronous>, transform_indices = @transform_8, window_bounds = array<i64: 32, 128>}, {pipeline_mode = #tpu.pipeline_mode<synchronous>, transform_indices = @transform_9, window_bounds = array<i64: 32, 128>}, {pipeline_mode = #tpu.pipeline_mode<synchronous>, transform_indices = @transform_10, window_bounds = array<i64: 1, 128>}, {pipeline_mode = #tpu.pipeline_mode<synchronous>, transform_indices = @transform_11, window_bounds = array<i64: 32, 128>}, {pipeline_mode = #tpu.pipeline_mode<synchronous>, transform_indices = @transform_12, window_bounds = array<i64: 32, 128>}, {pipeline_mode = #tpu.pipeline_mode<synchronous>, transform_indices = @transform_13, window_bounds = array<i64: 1, 128>}, {pipeline_mode = #tpu.pipeline_mode<synchronous>, transform_indices = @transform_14, window_bounds = array<i64: 32, 32>}, {pipeline_mode = #tpu.pipeline_mode<synchronous>, transform_indices = @transform_15, window_bounds = array<i64: 1, 32>}, {pipeline_mode = #tpu.pipeline_mode<synchronous>, transform_indices = @transform_16, window_bounds = array<i64: 32, 128>}, {pipeline_mode = #tpu.pipeline_mode<synchronous>, transform_indices = @transform_17, window_bounds = array<i64: 32, 128>}, {pipeline_mode = #tpu.pipeline_mode<synchronous>, transform_indices = @transform_18, window_bounds = array<i64: 1, 128>}, {transform_indices = @transform_19, window_bounds = array<i64: 4, 16, 128>}]} {
    %c0_i32 = arith.constant 0 : i32
    %0 = arith.cmpi eq, %arg1, %c0_i32 : i32
    %1 = arith.extui %0 : i1 to i32
    %c0_i32_0 = arith.constant 0 : i32
    %2 = arith.cmpi ne, %1, %c0_i32_0 : i32
    scf.if %2 {
      %cst_280 = arith.constant 0.000000e+00 : f32
      %571 = vector.broadcast %cst_280 : f32 to vector<3x16x32xf32>
      %c0_281 = arith.constant 0 : index
      %c0_282 = arith.constant 0 : index
      %c0_283 = arith.constant 0 : index
      %572 = vector.load %arg22[%c0_281, %c0_282, %c0_283] : memref<3x16x32xf32, #tpu.memory_space<vmem>>, vector<3x16x32xf32>
      tpu.vector_store %arg22[%c0_281, %c0_282, %c0_283], %571 {strides = array<i32>} : memref<3x16x32xf32, #tpu.memory_space<vmem>>, vector<3x16x32xf32>,
      %cst_284 = arith.constant 0.000000e+00 : f32
      %573 = vector.broadcast %cst_284 : f32 to vector<3x16x32xf32>
      %c0_285 = arith.constant 0 : index
      %c0_286 = arith.constant 0 : index
      %c0_287 = arith.constant 0 : index
      %574 = vector.load %arg23[%c0_285, %c0_286, %c0_287] : memref<3x16x32xf32, #tpu.memory_space<vmem>>, vector<3x16x32xf32>
      tpu.vector_store %arg23[%c0_285, %c0_286, %c0_287], %573 {strides = array<i32>} : memref<3x16x32xf32, #tpu.memory_space<vmem>>, vector<3x16x32xf32>,
      %cst_288 = arith.constant 0.000000e+00 : f32
      %575 = vector.broadcast %cst_288 : f32 to vector<16x32xf32>
      %c0_289 = arith.constant 0 : index
      %c0_290 = arith.constant 0 : index
      %576 = vector.load %arg24[%c0_289, %c0_290] : memref<16x32xf32, #tpu.memory_space<vmem>>, vector<16x32xf32>
      tpu.vector_store %arg24[%c0_289, %c0_290], %575 {strides = array<i32>} : memref<16x32xf32, #tpu.memory_space<vmem>>, vector<16x32xf32>,
    } else {
    }
    %c0 = arith.constant 0 : index
    %c0_1 = arith.constant 0 : index
    %c0_2 = arith.constant 0 : index
    %3 = vector.load %arg3[%c0, %c0_1, %c0_2] : memref<16x8x32xf32, #tpu.memory_space<vmem>>, vector<16x8x32xf32>
    %c0_3 = arith.constant 0 : index
    %c0_4 = arith.constant 0 : index
    %c0_5 = arith.constant 0 : index
    %4 = vector.load %arg4[%c0_3, %c0_4, %c0_5] : memref<16x8x32xf32, #tpu.memory_space<vmem>>, vector<16x8x32xf32>
    %c0_6 = arith.constant 0 : index
    %c0_7 = arith.constant 0 : index
    %5 = vector.load %arg5[%c0_6, %c0_7] : memref<16x8xf32, #tpu.memory_space<vmem>>, vector<16x8xf32>
    %c0_8 = arith.constant 0 : index
    %c0_9 = arith.constant 0 : index
    %6 = vector.load %arg6[%c0_8, %c0_9] : memref<32x128xbf16, #tpu.memory_space<vmem>>, vector<32x128xbf16>
    %c0_10 = arith.constant 0 : index
    %c0_11 = arith.constant 0 : index
    %7 = vector.load %arg7[%c0_10, %c0_11] : memref<32x128xbf16, #tpu.memory_space<vmem>>, vector<32x128xbf16>
    %c0_12 = arith.constant 0 : index
    %c0_13 = arith.constant 0 : index
    %8 = vector.load %arg8[%c0_12, %c0_13] : memref<32x128xbf16, #tpu.memory_space<vmem>>, vector<32x128xbf16>
    %c0_14 = arith.constant 0 : index
    %c0_15 = arith.constant 0 : index
    %9 = vector.load %arg10[%c0_14, %c0_15] : memref<32x128xbf16, #tpu.memory_space<vmem>>, vector<32x128xbf16>
    %c0_16 = arith.constant 0 : index
    %c0_17 = arith.constant 0 : index
    %10 = vector.load %arg11[%c0_16, %c0_17] : memref<32x128xbf16, #tpu.memory_space<vmem>>, vector<32x128xbf16>
    %c0_18 = arith.constant 0 : index
    %c0_19 = arith.constant 0 : index
    %11 = vector.load %arg13[%c0_18, %c0_19] : memref<32x128xbf16, #tpu.memory_space<vmem>>, vector<32x128xbf16>
    %c0_20 = arith.constant 0 : index
    %c0_21 = arith.constant 0 : index
    %12 = vector.load %arg14[%c0_20, %c0_21] : memref<32x128xbf16, #tpu.memory_space<vmem>>, vector<32x128xbf16>
    %c0_22 = arith.constant 0 : index
    %c0_23 = arith.constant 0 : index
    %13 = vector.load %arg16[%c0_22, %c0_23] : memref<32x32xbf16, #tpu.memory_space<vmem>>, vector<32x32xbf16>
    %c0_24 = arith.constant 0 : index
    %c0_25 = arith.constant 0 : index
    %14 = vector.load %arg18[%c0_24, %c0_25] : memref<32x128xbf16, #tpu.memory_space<vmem>>, vector<32x128xbf16>
    %c0_26 = arith.constant 0 : index
    %c0_27 = arith.constant 0 : index
    %15 = vector.load %arg19[%c0_26, %c0_27] : memref<32x128xbf16, #tpu.memory_space<vmem>>, vector<32x128xbf16>
    %c0_28 = arith.constant 0 : index
    %c0_29 = arith.constant 0 : index
    %16 = vector.load %arg9[%c0_28, %c0_29] : memref<1x128xf32, #tpu.memory_space<vmem>>, vector<1x128xf32>
    %17 = vector.shape_cast %16 : vector<1x128xf32> to vector<1x128xf32>
    %18 = vector.broadcast %17 : vector<1x128xf32> to vector<16x128xf32>
    %c0_30 = arith.constant 0 : index
    %c0_31 = arith.constant 0 : index
    %19 = vector.load %arg12[%c0_30, %c0_31] : memref<1x128xf32, #tpu.memory_space<vmem>>, vector<1x128xf32>
    %20 = vector.shape_cast %19 : vector<1x128xf32> to vector<1x128xf32>
    %21 = vector.broadcast %20 : vector<1x128xf32> to vector<16x128xf32>
    %c0_32 = arith.constant 0 : index
    %c0_33 = arith.constant 0 : index
    %22 = vector.load %arg15[%c0_32, %c0_33] : memref<1x128xf32, #tpu.memory_space<vmem>>, vector<1x128xf32>
    %23 = vector.shape_cast %22 : vector<1x128xf32> to vector<1x128xf32>
    %24 = vector.broadcast %23 : vector<1x128xf32> to vector<16x128xf32>
    %c0_34 = arith.constant 0 : index
    %c0_35 = arith.constant 0 : index
    %25 = vector.load %arg17[%c0_34, %c0_35] : memref<1x32xf32, #tpu.memory_space<vmem>>, vector<1x32xf32>
    %26 = vector.shape_cast %25 : vector<1x32xf32> to vector<1x32xf32>
    %27 = vector.broadcast %26 : vector<1x32xf32> to vector<16x32xf32>
    %c0_36 = arith.constant 0 : index
    %c0_37 = arith.constant 0 : index
    %28 = vector.load %arg20[%c0_36, %c0_37] : memref<1x128xf32, #tpu.memory_space<vmem>>, vector<1x128xf32>
    %29 = vector.shape_cast %28 : vector<1x128xf32> to vector<1x128xf32>
    %30 = vector.broadcast %29 : vector<1x128xf32> to vector<16x128xf32>
    %c0_i32_38 = arith.constant 0 : i32
    %31 = arith.index_cast %c0_i32_38 : i32 to index
    %c0_39 = arith.constant 0 : index
    %c0_40 = arith.constant 0 : index
    %32 = vector.load %arg2[%31, %c0_39, %c0_40] : memref<4x16x32xbf16, #tpu.memory_space<vmem>>, vector<1x16x32xbf16>
    %33 = vector.shape_cast %32 : vector<1x16x32xbf16> to vector<16x32xbf16>
    %c0_41 = arith.constant 0 : index
    %c0_42 = arith.constant 0 : index
    %34 = vector.load %arg24[%c0_41, %c0_42] : memref<16x32xf32, #tpu.memory_space<vmem>>, vector<16x32xf32>
    %35 = arith.truncf %34 : vector<16x32xf32> to vector<16x32xbf16>
    %cst = arith.constant dense<0.000000e+00> : vector<16x128xf32>
    %36 = tpu.matmul %33, %6, %cst {dimension_numbers = #tpu.dot_dimension_numbers<[1], [0], [0], [1], [0, 0, 1, 1], [], []>} : vector<16x32xbf16>, vector<32x128xbf16>, vector<16x128xf32> -> vector<16x128xf32>
    %cst_43 = arith.constant dense<0.000000e+00> : vector<16x128xf32>
    %37 = tpu.matmul %35, %7, %cst_43 {dimension_numbers = #tpu.dot_dimension_numbers<[1], [0], [0], [1], [0, 0, 1, 1], [], []>} : vector<16x32xbf16>, vector<32x128xbf16>, vector<16x128xf32> -> vector<16x128xf32>
    %38 = arith.addf %36, %37 : vector<16x128xf32>
    %c0_44 = arith.constant 0 : index
    %c0_45 = arith.constant 0 : index
    %c0_46 = arith.constant 0 : index
    %39 = vector.load %arg22[%c0_44, %c0_45, %c0_46] : memref<3x16x32xf32, #tpu.memory_space<vmem>>, vector<1x16x32xf32>
    %40 = vector.shape_cast %39 : vector<1x16x32xf32> to vector<16x32xf32>
    %41 = arith.truncf %40 : vector<16x32xf32> to vector<16x32xbf16>
    %cst_47 = arith.constant dense<0.000000e+00> : vector<16x128xf32>
    %42 = tpu.matmul %41, %8, %cst_47 {dimension_numbers = #tpu.dot_dimension_numbers<[1], [0], [0], [1], [0, 0, 1, 1], [], []>} : vector<16x32xbf16>, vector<32x128xbf16>, vector<16x128xf32> -> vector<16x128xf32>
    %43 = arith.addf %38, %42 : vector<16x128xf32>
    %44 = arith.addf %43, %18 : vector<16x128xf32>
    %45 = vector.extract_strided_slice %44 {offsets = [0, 0], sizes = [16, 96], strides = [1, 1]} : vector<16x128xf32> to vector<16x96xf32>
    %46 = arith.negf %45 : vector<16x96xf32>
    %47 = math.exp %46 : vector<16x96xf32>
    %cst_48 = arith.constant 1.000000e+00 : f32
    %48 = vector.broadcast %cst_48 : f32 to vector<16x96xf32>
    %49 = arith.addf %48, %47 : vector<16x96xf32>
    %50 = arith.divf %48, %49 : vector<16x96xf32>
    %51 = vector.extract_strided_slice %50 {offsets = [0, 0], sizes = [16, 32], strides = [1, 1]} : vector<16x96xf32> to vector<16x32xf32>
    %52 = vector.extract_strided_slice %50 {offsets = [0, 32], sizes = [16, 32], strides = [1, 1]} : vector<16x96xf32> to vector<16x32xf32>
    %53 = vector.extract_strided_slice %50 {offsets = [0, 64], sizes = [16, 32], strides = [1, 1]} : vector<16x96xf32> to vector<16x32xf32>
    %54 = vector.extract_strided_slice %44 {offsets = [0, 96], sizes = [16, 32], strides = [1, 1]} : vector<16x128xf32> to vector<16x32xf32>
    %55 = math.tanh %54 : vector<16x32xf32>
    %c0_49 = arith.constant 0 : index
    %c0_50 = arith.constant 0 : index
    %c0_51 = arith.constant 0 : index
    %56 = vector.load %arg23[%c0_49, %c0_50, %c0_51] : memref<3x16x32xf32, #tpu.memory_space<vmem>>, vector<1x16x32xf32>
    %57 = vector.shape_cast %56 : vector<1x16x32xf32> to vector<16x32xf32>
    %58 = arith.mulf %52, %57 : vector<16x32xf32>
    %59 = arith.mulf %51, %55 : vector<16x32xf32>
    %60 = arith.addf %58, %59 : vector<16x32xf32>
    %61 = math.tanh %60 : vector<16x32xf32>
    %62 = arith.mulf %53, %61 : vector<16x32xf32>
    %c0_52 = arith.constant 0 : index
    %c0_53 = arith.constant 0 : index
    %c0_54 = arith.constant 0 : index
    %63 = vector.load %arg22[%c0_52, %c0_53, %c0_54] : memref<3x16x32xf32, #tpu.memory_space<vmem>>, vector<1x16x32xf32>
    %64 = vector.shape_cast %63 : vector<1x16x32xf32> to vector<16x32xf32>
    %65 = vector.shape_cast %62 : vector<16x32xf32> to vector<1x16x32xf32>
    tpu.vector_store %arg22[%c0_52, %c0_53, %c0_54], %65 {strides = array<i32>} : memref<3x16x32xf32, #tpu.memory_space<vmem>>, vector<1x16x32xf32>,
    %c0_55 = arith.constant 0 : index
    %c0_56 = arith.constant 0 : index
    %c0_57 = arith.constant 0 : index
    %66 = vector.load %arg23[%c0_55, %c0_56, %c0_57] : memref<3x16x32xf32, #tpu.memory_space<vmem>>, vector<1x16x32xf32>
    %67 = vector.shape_cast %66 : vector<1x16x32xf32> to vector<16x32xf32>
    %68 = vector.shape_cast %60 : vector<16x32xf32> to vector<1x16x32xf32>
    tpu.vector_store %arg23[%c0_55, %c0_56, %c0_57], %68 {strides = array<i32>} : memref<3x16x32xf32, #tpu.memory_space<vmem>>, vector<1x16x32xf32>,
    %69 = arith.truncf %62 : vector<16x32xf32> to vector<16x32xbf16>
    %cst_58 = arith.constant dense<0.000000e+00> : vector<16x128xf32>
    %70 = tpu.matmul %69, %9, %cst_58 {dimension_numbers = #tpu.dot_dimension_numbers<[1], [0], [0], [1], [0, 0, 1, 1], [], []>} : vector<16x32xbf16>, vector<32x128xbf16>, vector<16x128xf32> -> vector<16x128xf32>
    %c1 = arith.constant 1 : index
    %c0_59 = arith.constant 0 : index
    %c0_60 = arith.constant 0 : index
    %71 = vector.load %arg22[%c1, %c0_59, %c0_60] : memref<3x16x32xf32, #tpu.memory_space<vmem>>, vector<1x16x32xf32>
    %72 = vector.shape_cast %71 : vector<1x16x32xf32> to vector<16x32xf32>
    %73 = arith.truncf %72 : vector<16x32xf32> to vector<16x32xbf16>
    %cst_61 = arith.constant dense<0.000000e+00> : vector<16x128xf32>
    %74 = tpu.matmul %73, %10, %cst_61 {dimension_numbers = #tpu.dot_dimension_numbers<[1], [0], [0], [1], [0, 0, 1, 1], [], []>} : vector<16x32xbf16>, vector<32x128xbf16>, vector<16x128xf32> -> vector<16x128xf32>
    %75 = arith.addf %70, %74 : vector<16x128xf32>
    %76 = arith.addf %75, %21 : vector<16x128xf32>
    %77 = vector.extract_strided_slice %76 {offsets = [0, 0], sizes = [16, 96], strides = [1, 1]} : vector<16x128xf32> to vector<16x96xf32>
    %78 = arith.negf %77 : vector<16x96xf32>
    %79 = math.exp %78 : vector<16x96xf32>
    %cst_62 = arith.constant 1.000000e+00 : f32
    %80 = vector.broadcast %cst_62 : f32 to vector<16x96xf32>
    %81 = arith.addf %80, %79 : vector<16x96xf32>
    %82 = arith.divf %80, %81 : vector<16x96xf32>
    %83 = vector.extract_strided_slice %82 {offsets = [0, 0], sizes = [16, 32], strides = [1, 1]} : vector<16x96xf32> to vector<16x32xf32>
    %84 = vector.extract_strided_slice %82 {offsets = [0, 32], sizes = [16, 32], strides = [1, 1]} : vector<16x96xf32> to vector<16x32xf32>
    %85 = vector.extract_strided_slice %82 {offsets = [0, 64], sizes = [16, 32], strides = [1, 1]} : vector<16x96xf32> to vector<16x32xf32>
    %86 = vector.extract_strided_slice %76 {offsets = [0, 96], sizes = [16, 32], strides = [1, 1]} : vector<16x128xf32> to vector<16x32xf32>
    %87 = math.tanh %86 : vector<16x32xf32>
    %c1_63 = arith.constant 1 : index
    %c0_64 = arith.constant 0 : index
    %c0_65 = arith.constant 0 : index
    %88 = vector.load %arg23[%c1_63, %c0_64, %c0_65] : memref<3x16x32xf32, #tpu.memory_space<vmem>>, vector<1x16x32xf32>
    %89 = vector.shape_cast %88 : vector<1x16x32xf32> to vector<16x32xf32>
    %90 = arith.mulf %84, %89 : vector<16x32xf32>
    %91 = arith.mulf %83, %87 : vector<16x32xf32>
    %92 = arith.addf %90, %91 : vector<16x32xf32>
    %93 = math.tanh %92 : vector<16x32xf32>
    %94 = arith.mulf %85, %93 : vector<16x32xf32>
    %c1_66 = arith.constant 1 : index
    %c0_67 = arith.constant 0 : index
    %c0_68 = arith.constant 0 : index
    %95 = vector.load %arg22[%c1_66, %c0_67, %c0_68] : memref<3x16x32xf32, #tpu.memory_space<vmem>>, vector<1x16x32xf32>
    %96 = vector.shape_cast %95 : vector<1x16x32xf32> to vector<16x32xf32>
    %97 = vector.shape_cast %94 : vector<16x32xf32> to vector<1x16x32xf32>
    tpu.vector_store %arg22[%c1_66, %c0_67, %c0_68], %97 {strides = array<i32>} : memref<3x16x32xf32, #tpu.memory_space<vmem>>, vector<1x16x32xf32>,
    %c1_69 = arith.constant 1 : index
    %c0_70 = arith.constant 0 : index
    %c0_71 = arith.constant 0 : index
    %98 = vector.load %arg23[%c1_69, %c0_70, %c0_71] : memref<3x16x32xf32, #tpu.memory_space<vmem>>, vector<1x16x32xf32>
    %99 = vector.shape_cast %98 : vector<1x16x32xf32> to vector<16x32xf32>
    %100 = vector.shape_cast %92 : vector<16x32xf32> to vector<1x16x32xf32>
    tpu.vector_store %arg23[%c1_69, %c0_70, %c0_71], %100 {strides = array<i32>} : memref<3x16x32xf32, #tpu.memory_space<vmem>>, vector<1x16x32xf32>,
    %101 = arith.truncf %94 : vector<16x32xf32> to vector<16x32xbf16>
    %cst_72 = arith.constant dense<0.000000e+00> : vector<16x128xf32>
    %102 = tpu.matmul %101, %11, %cst_72 {dimension_numbers = #tpu.dot_dimension_numbers<[1], [0], [0], [1], [0, 0, 1, 1], [], []>} : vector<16x32xbf16>, vector<32x128xbf16>, vector<16x128xf32> -> vector<16x128xf32>
    %c2 = arith.constant 2 : index
    %c0_73 = arith.constant 0 : index
    %c0_74 = arith.constant 0 : index
    %103 = vector.load %arg22[%c2, %c0_73, %c0_74] : memref<3x16x32xf32, #tpu.memory_space<vmem>>, vector<1x16x32xf32>
    %104 = vector.shape_cast %103 : vector<1x16x32xf32> to vector<16x32xf32>
    %105 = arith.truncf %104 : vector<16x32xf32> to vector<16x32xbf16>
    %cst_75 = arith.constant dense<0.000000e+00> : vector<16x128xf32>
    %106 = tpu.matmul %105, %12, %cst_75 {dimension_numbers = #tpu.dot_dimension_numbers<[1], [0], [0], [1], [0, 0, 1, 1], [], []>} : vector<16x32xbf16>, vector<32x128xbf16>, vector<16x128xf32> -> vector<16x128xf32>
    %107 = arith.addf %102, %106 : vector<16x128xf32>
    %108 = arith.addf %107, %24 : vector<16x128xf32>
    %109 = vector.extract_strided_slice %108 {offsets = [0, 0], sizes = [16, 96], strides = [1, 1]} : vector<16x128xf32> to vector<16x96xf32>
    %110 = arith.negf %109 : vector<16x96xf32>
    %111 = math.exp %110 : vector<16x96xf32>
    %cst_76 = arith.constant 1.000000e+00 : f32
    %112 = vector.broadcast %cst_76 : f32 to vector<16x96xf32>
    %113 = arith.addf %112, %111 : vector<16x96xf32>
    %114 = arith.divf %112, %113 : vector<16x96xf32>
    %115 = vector.extract_strided_slice %114 {offsets = [0, 0], sizes = [16, 32], strides = [1, 1]} : vector<16x96xf32> to vector<16x32xf32>
    %116 = vector.extract_strided_slice %114 {offsets = [0, 32], sizes = [16, 32], strides = [1, 1]} : vector<16x96xf32> to vector<16x32xf32>
    %117 = vector.extract_strided_slice %114 {offsets = [0, 64], sizes = [16, 32], strides = [1, 1]} : vector<16x96xf32> to vector<16x32xf32>
    %118 = vector.extract_strided_slice %108 {offsets = [0, 96], sizes = [16, 32], strides = [1, 1]} : vector<16x128xf32> to vector<16x32xf32>
    %119 = math.tanh %118 : vector<16x32xf32>
    %c2_77 = arith.constant 2 : index
    %c0_78 = arith.constant 0 : index
    %c0_79 = arith.constant 0 : index
    %120 = vector.load %arg23[%c2_77, %c0_78, %c0_79] : memref<3x16x32xf32, #tpu.memory_space<vmem>>, vector<1x16x32xf32>
    %121 = vector.shape_cast %120 : vector<1x16x32xf32> to vector<16x32xf32>
    %122 = arith.mulf %116, %121 : vector<16x32xf32>
    %123 = arith.mulf %115, %119 : vector<16x32xf32>
    %124 = arith.addf %122, %123 : vector<16x32xf32>
    %125 = math.tanh %124 : vector<16x32xf32>
    %126 = arith.mulf %117, %125 : vector<16x32xf32>
    %c2_80 = arith.constant 2 : index
    %c0_81 = arith.constant 0 : index
    %c0_82 = arith.constant 0 : index
    %127 = vector.load %arg22[%c2_80, %c0_81, %c0_82] : memref<3x16x32xf32, #tpu.memory_space<vmem>>, vector<1x16x32xf32>
    %128 = vector.shape_cast %127 : vector<1x16x32xf32> to vector<16x32xf32>
    %129 = vector.shape_cast %126 : vector<16x32xf32> to vector<1x16x32xf32>
    tpu.vector_store %arg22[%c2_80, %c0_81, %c0_82], %129 {strides = array<i32>} : memref<3x16x32xf32, #tpu.memory_space<vmem>>, vector<1x16x32xf32>,
    %c2_83 = arith.constant 2 : index
    %c0_84 = arith.constant 0 : index
    %c0_85 = arith.constant 0 : index
    %130 = vector.load %arg23[%c2_83, %c0_84, %c0_85] : memref<3x16x32xf32, #tpu.memory_space<vmem>>, vector<1x16x32xf32>
    %131 = vector.shape_cast %130 : vector<1x16x32xf32> to vector<16x32xf32>
    %132 = vector.shape_cast %124 : vector<16x32xf32> to vector<1x16x32xf32>
    tpu.vector_store %arg23[%c2_83, %c0_84, %c0_85], %132 {strides = array<i32>} : memref<3x16x32xf32, #tpu.memory_space<vmem>>, vector<1x16x32xf32>,
    %133 = arith.truncf %126 : vector<16x32xf32> to vector<16x32xbf16>
    %cst_86 = arith.constant dense<0.000000e+00> : vector<16x32xf32>
    %134 = tpu.matmul %133, %13, %cst_86 {dimension_numbers = #tpu.dot_dimension_numbers<[1], [0], [0], [1], [0, 0, 1, 1], [], []>} : vector<16x32xbf16>, vector<32x32xbf16>, vector<16x32xf32> -> vector<16x32xf32>
    %135 = arith.addf %134, %27 : vector<16x32xf32>
    %136 = vector.shape_cast %135 : vector<16x32xf32> to vector<16x1x32xf32>
    %137 = vector.broadcast %136 : vector<16x1x32xf32> to vector<16x8x32xf32>
    %138 = arith.mulf %137, %3 : vector<16x8x32xf32>
    %cst_87 = arith.constant dense<0.000000e+00> : vector<16x8xf32>
    %139 = vector.multi_reduction <add>, %138, %cst_87 [2] : vector<16x8x32xf32> to vector<16x8xf32>
    %140 = arith.addf %139, %5 : vector<16x8xf32>
    %cst_88 = arith.constant dense<0xFF800000> : vector<16xf32>
    %141 = vector.multi_reduction <maximumf>, %140, %cst_88 [1] : vector<16x8xf32> to vector<16xf32>
    %142 = vector.shape_cast %141 : vector<16xf32> to vector<16x1xf32>
    %143 = vector.broadcast %142 : vector<16x1xf32> to vector<16x8xf32>
    %144 = arith.subf %140, %143 : vector<16x8xf32>
    %145 = math.exp %144 : vector<16x8xf32>
    %cst_89 = arith.constant dense<0.000000e+00> : vector<16xf32>
    %146 = vector.multi_reduction <add>, %145, %cst_89 [1] : vector<16x8xf32> to vector<16xf32>
    %147 = vector.shape_cast %146 : vector<16xf32> to vector<16x1xf32>
    %148 = tpu.reciprocal %147 {approx = true} : vector<16x1xf32> -> vector<16x1xf32>
    %149 = vector.broadcast %148 : vector<16x1xf32> to vector<16x8xf32>
    %150 = arith.mulf %145, %149 : vector<16x8xf32>
    %151 = vector.shape_cast %150 : vector<16x8xf32> to vector<16x8x1xf32>
    %152 = vector.broadcast %151 : vector<16x8x1xf32> to vector<16x8x32xf32>
    %153 = arith.mulf %152, %4 : vector<16x8x32xf32>
    %cst_90 = arith.constant dense<0.000000e+00> : vector<16x32xf32>
    %154 = vector.multi_reduction <add>, %153, %cst_90 [1] : vector<16x8x32xf32> to vector<16x32xf32>
    %c0_91 = arith.constant 0 : index
    %c0_92 = arith.constant 0 : index
    %155 = vector.load %arg24[%c0_91, %c0_92] : memref<16x32xf32, #tpu.memory_space<vmem>>, vector<16x32xf32>
    tpu.vector_store %arg24[%c0_91, %c0_92], %154 {strides = array<i32>} : memref<16x32xf32, #tpu.memory_space<vmem>>, vector<16x32xf32>,
    %cst_93 = arith.constant dense<0.000000e+00> : vector<16x128xf32>
    %156 = tpu.matmul %133, %14, %cst_93 {dimension_numbers = #tpu.dot_dimension_numbers<[1], [0], [0], [1], [0, 0, 1, 1], [], []>} : vector<16x32xbf16>, vector<32x128xbf16>, vector<16x128xf32> -> vector<16x128xf32>
    %157 = arith.truncf %154 : vector<16x32xf32> to vector<16x32xbf16>
    %cst_94 = arith.constant dense<0.000000e+00> : vector<16x128xf32>
    %158 = tpu.matmul %157, %15, %cst_94 {dimension_numbers = #tpu.dot_dimension_numbers<[1], [0], [0], [1], [0, 0, 1, 1], [], []>} : vector<16x32xbf16>, vector<32x128xbf16>, vector<16x128xf32> -> vector<16x128xf32>
    %159 = arith.addf %156, %158 : vector<16x128xf32>
    %160 = arith.addf %159, %30 : vector<16x128xf32>
    %161 = arith.truncf %160 : vector<16x128xf32> to vector<16x128xbf16>
    %162 = arith.index_cast %c0_i32_38 : i32 to index
    %c0_95 = arith.constant 0 : index
    %c0_96 = arith.constant 0 : index
    %163 = vector.load %arg21[%162, %c0_95, %c0_96] : memref<4x16x128xbf16, #tpu.memory_space<vmem>>, vector<1x16x128xbf16>
    %164 = vector.shape_cast %163 : vector<1x16x128xbf16> to vector<16x128xbf16>
    %165 = vector.shape_cast %161 : vector<16x128xbf16> to vector<1x16x128xbf16>
    tpu.vector_store %arg21[%162, %c0_95, %c0_96], %165 {strides = array<i32>} : memref<4x16x128xbf16, #tpu.memory_space<vmem>>, vector<1x16x128xbf16>,
    %c1_i32 = arith.constant 1 : i32
    %166 = arith.index_cast %c1_i32 : i32 to index
    %c0_97 = arith.constant 0 : index
    %c0_98 = arith.constant 0 : index
    %167 = vector.load %arg2[%166, %c0_97, %c0_98] : memref<4x16x32xbf16, #tpu.memory_space<vmem>>, vector<1x16x32xbf16>
    %168 = vector.shape_cast %167 : vector<1x16x32xbf16> to vector<16x32xbf16>
    %c0_99 = arith.constant 0 : index
    %c0_100 = arith.constant 0 : index
    %169 = vector.load %arg24[%c0_99, %c0_100] : memref<16x32xf32, #tpu.memory_space<vmem>>, vector<16x32xf32>
    %170 = arith.truncf %169 : vector<16x32xf32> to vector<16x32xbf16>
    %cst_101 = arith.constant dense<0.000000e+00> : vector<16x128xf32>
    %171 = tpu.matmul %168, %6, %cst_101 {dimension_numbers = #tpu.dot_dimension_numbers<[1], [0], [0], [1], [0, 0, 1, 1], [], []>} : vector<16x32xbf16>, vector<32x128xbf16>, vector<16x128xf32> -> vector<16x128xf32>
    %cst_102 = arith.constant dense<0.000000e+00> : vector<16x128xf32>
    %172 = tpu.matmul %170, %7, %cst_102 {dimension_numbers = #tpu.dot_dimension_numbers<[1], [0], [0], [1], [0, 0, 1, 1], [], []>} : vector<16x32xbf16>, vector<32x128xbf16>, vector<16x128xf32> -> vector<16x128xf32>
    %173 = arith.addf %171, %172 : vector<16x128xf32>
    %c0_103 = arith.constant 0 : index
    %c0_104 = arith.constant 0 : index
    %c0_105 = arith.constant 0 : index
    %174 = vector.load %arg22[%c0_103, %c0_104, %c0_105] : memref<3x16x32xf32, #tpu.memory_space<vmem>>, vector<1x16x32xf32>
    %175 = vector.shape_cast %174 : vector<1x16x32xf32> to vector<16x32xf32>
    %176 = arith.truncf %175 : vector<16x32xf32> to vector<16x32xbf16>
    %cst_106 = arith.constant dense<0.000000e+00> : vector<16x128xf32>
    %177 = tpu.matmul %176, %8, %cst_106 {dimension_numbers = #tpu.dot_dimension_numbers<[1], [0], [0], [1], [0, 0, 1, 1], [], []>} : vector<16x32xbf16>, vector<32x128xbf16>, vector<16x128xf32> -> vector<16x128xf32>
    %178 = arith.addf %173, %177 : vector<16x128xf32>
    %179 = arith.addf %178, %18 : vector<16x128xf32>
    %180 = vector.extract_strided_slice %179 {offsets = [0, 0], sizes = [16, 96], strides = [1, 1]} : vector<16x128xf32> to vector<16x96xf32>
    %181 = arith.negf %180 : vector<16x96xf32>
    %182 = math.exp %181 : vector<16x96xf32>
    %cst_107 = arith.constant 1.000000e+00 : f32
    %183 = vector.broadcast %cst_107 : f32 to vector<16x96xf32>
    %184 = arith.addf %183, %182 : vector<16x96xf32>
    %185 = arith.divf %183, %184 : vector<16x96xf32>
    %186 = vector.extract_strided_slice %185 {offsets = [0, 0], sizes = [16, 32], strides = [1, 1]} : vector<16x96xf32> to vector<16x32xf32>
    %187 = vector.extract_strided_slice %185 {offsets = [0, 32], sizes = [16, 32], strides = [1, 1]} : vector<16x96xf32> to vector<16x32xf32>
    %188 = vector.extract_strided_slice %185 {offsets = [0, 64], sizes = [16, 32], strides = [1, 1]} : vector<16x96xf32> to vector<16x32xf32>
    %189 = vector.extract_strided_slice %179 {offsets = [0, 96], sizes = [16, 32], strides = [1, 1]} : vector<16x128xf32> to vector<16x32xf32>
    %190 = math.tanh %189 : vector<16x32xf32>
    %c0_108 = arith.constant 0 : index
    %c0_109 = arith.constant 0 : index
    %c0_110 = arith.constant 0 : index
    %191 = vector.load %arg23[%c0_108, %c0_109, %c0_110] : memref<3x16x32xf32, #tpu.memory_space<vmem>>, vector<1x16x32xf32>
    %192 = vector.shape_cast %191 : vector<1x16x32xf32> to vector<16x32xf32>
    %193 = arith.mulf %187, %192 : vector<16x32xf32>
    %194 = arith.mulf %186, %190 : vector<16x32xf32>
    %195 = arith.addf %193, %194 : vector<16x32xf32>
    %196 = math.tanh %195 : vector<16x32xf32>
    %197 = arith.mulf %188, %196 : vector<16x32xf32>
    %c0_111 = arith.constant 0 : index
    %c0_112 = arith.constant 0 : index
    %c0_113 = arith.constant 0 : index
    %198 = vector.load %arg22[%c0_111, %c0_112, %c0_113] : memref<3x16x32xf32, #tpu.memory_space<vmem>>, vector<1x16x32xf32>
    %199 = vector.shape_cast %198 : vector<1x16x32xf32> to vector<16x32xf32>
    %200 = vector.shape_cast %197 : vector<16x32xf32> to vector<1x16x32xf32>
    tpu.vector_store %arg22[%c0_111, %c0_112, %c0_113], %200 {strides = array<i32>} : memref<3x16x32xf32, #tpu.memory_space<vmem>>, vector<1x16x32xf32>,
    %c0_114 = arith.constant 0 : index
    %c0_115 = arith.constant 0 : index
    %c0_116 = arith.constant 0 : index
    %201 = vector.load %arg23[%c0_114, %c0_115, %c0_116] : memref<3x16x32xf32, #tpu.memory_space<vmem>>, vector<1x16x32xf32>
    %202 = vector.shape_cast %201 : vector<1x16x32xf32> to vector<16x32xf32>
    %203 = vector.shape_cast %195 : vector<16x32xf32> to vector<1x16x32xf32>
    tpu.vector_store %arg23[%c0_114, %c0_115, %c0_116], %203 {strides = array<i32>} : memref<3x16x32xf32, #tpu.memory_space<vmem>>, vector<1x16x32xf32>,
    %204 = arith.truncf %197 : vector<16x32xf32> to vector<16x32xbf16>
    %cst_117 = arith.constant dense<0.000000e+00> : vector<16x128xf32>
    %205 = tpu.matmul %204, %9, %cst_117 {dimension_numbers = #tpu.dot_dimension_numbers<[1], [0], [0], [1], [0, 0, 1, 1], [], []>} : vector<16x32xbf16>, vector<32x128xbf16>, vector<16x128xf32> -> vector<16x128xf32>
    %c1_118 = arith.constant 1 : index
    %c0_119 = arith.constant 0 : index
    %c0_120 = arith.constant 0 : index
    %206 = vector.load %arg22[%c1_118, %c0_119, %c0_120] : memref<3x16x32xf32, #tpu.memory_space<vmem>>, vector<1x16x32xf32>
    %207 = vector.shape_cast %206 : vector<1x16x32xf32> to vector<16x32xf32>
    %208 = arith.truncf %207 : vector<16x32xf32> to vector<16x32xbf16>
    %cst_121 = arith.constant dense<0.000000e+00> : vector<16x128xf32>
    %209 = tpu.matmul %208, %10, %cst_121 {dimension_numbers = #tpu.dot_dimension_numbers<[1], [0], [0], [1], [0, 0, 1, 1], [], []>} : vector<16x32xbf16>, vector<32x128xbf16>, vector<16x128xf32> -> vector<16x128xf32>
    %210 = arith.addf %205, %209 : vector<16x128xf32>
    %211 = arith.addf %210, %21 : vector<16x128xf32>
    %212 = vector.extract_strided_slice %211 {offsets = [0, 0], sizes = [16, 96], strides = [1, 1]} : vector<16x128xf32> to vector<16x96xf32>
    %213 = arith.negf %212 : vector<16x96xf32>
    %214 = math.exp %213 : vector<16x96xf32>
    %cst_122 = arith.constant 1.000000e+00 : f32
    %215 = vector.broadcast %cst_122 : f32 to vector<16x96xf32>
    %216 = arith.addf %215, %214 : vector<16x96xf32>
    %217 = arith.divf %215, %216 : vector<16x96xf32>
    %218 = vector.extract_strided_slice %217 {offsets = [0, 0], sizes = [16, 32], strides = [1, 1]} : vector<16x96xf32> to vector<16x32xf32>
    %219 = vector.extract_strided_slice %217 {offsets = [0, 32], sizes = [16, 32], strides = [1, 1]} : vector<16x96xf32> to vector<16x32xf32>
    %220 = vector.extract_strided_slice %217 {offsets = [0, 64], sizes = [16, 32], strides = [1, 1]} : vector<16x96xf32> to vector<16x32xf32>
    %221 = vector.extract_strided_slice %211 {offsets = [0, 96], sizes = [16, 32], strides = [1, 1]} : vector<16x128xf32> to vector<16x32xf32>
    %222 = math.tanh %221 : vector<16x32xf32>
    %c1_123 = arith.constant 1 : index
    %c0_124 = arith.constant 0 : index
    %c0_125 = arith.constant 0 : index
    %223 = vector.load %arg23[%c1_123, %c0_124, %c0_125] : memref<3x16x32xf32, #tpu.memory_space<vmem>>, vector<1x16x32xf32>
    %224 = vector.shape_cast %223 : vector<1x16x32xf32> to vector<16x32xf32>
    %225 = arith.mulf %219, %224 : vector<16x32xf32>
    %226 = arith.mulf %218, %222 : vector<16x32xf32>
    %227 = arith.addf %225, %226 : vector<16x32xf32>
    %228 = math.tanh %227 : vector<16x32xf32>
    %229 = arith.mulf %220, %228 : vector<16x32xf32>
    %c1_126 = arith.constant 1 : index
    %c0_127 = arith.constant 0 : index
    %c0_128 = arith.constant 0 : index
    %230 = vector.load %arg22[%c1_126, %c0_127, %c0_128] : memref<3x16x32xf32, #tpu.memory_space<vmem>>, vector<1x16x32xf32>
    %231 = vector.shape_cast %230 : vector<1x16x32xf32> to vector<16x32xf32>
    %232 = vector.shape_cast %229 : vector<16x32xf32> to vector<1x16x32xf32>
    tpu.vector_store %arg22[%c1_126, %c0_127, %c0_128], %232 {strides = array<i32>} : memref<3x16x32xf32, #tpu.memory_space<vmem>>, vector<1x16x32xf32>,
    %c1_129 = arith.constant 1 : index
    %c0_130 = arith.constant 0 : index
    %c0_131 = arith.constant 0 : index
    %233 = vector.load %arg23[%c1_129, %c0_130, %c0_131] : memref<3x16x32xf32, #tpu.memory_space<vmem>>, vector<1x16x32xf32>
    %234 = vector.shape_cast %233 : vector<1x16x32xf32> to vector<16x32xf32>
    %235 = vector.shape_cast %227 : vector<16x32xf32> to vector<1x16x32xf32>
    tpu.vector_store %arg23[%c1_129, %c0_130, %c0_131], %235 {strides = array<i32>} : memref<3x16x32xf32, #tpu.memory_space<vmem>>, vector<1x16x32xf32>,
    %236 = arith.truncf %229 : vector<16x32xf32> to vector<16x32xbf16>
    %cst_132 = arith.constant dense<0.000000e+00> : vector<16x128xf32>
    %237 = tpu.matmul %236, %11, %cst_132 {dimension_numbers = #tpu.dot_dimension_numbers<[1], [0], [0], [1], [0, 0, 1, 1], [], []>} : vector<16x32xbf16>, vector<32x128xbf16>, vector<16x128xf32> -> vector<16x128xf32>
    %c2_133 = arith.constant 2 : index
    %c0_134 = arith.constant 0 : index
    %c0_135 = arith.constant 0 : index
    %238 = vector.load %arg22[%c2_133, %c0_134, %c0_135] : memref<3x16x32xf32, #tpu.memory_space<vmem>>, vector<1x16x32xf32>
    %239 = vector.shape_cast %238 : vector<1x16x32xf32> to vector<16x32xf32>
    %240 = arith.truncf %239 : vector<16x32xf32> to vector<16x32xbf16>
    %cst_136 = arith.constant dense<0.000000e+00> : vector<16x128xf32>
    %241 = tpu.matmul %240, %12, %cst_136 {dimension_numbers = #tpu.dot_dimension_numbers<[1], [0], [0], [1], [0, 0, 1, 1], [], []>} : vector<16x32xbf16>, vector<32x128xbf16>, vector<16x128xf32> -> vector<16x128xf32>
    %242 = arith.addf %237, %241 : vector<16x128xf32>
    %243 = arith.addf %242, %24 : vector<16x128xf32>
    %244 = vector.extract_strided_slice %243 {offsets = [0, 0], sizes = [16, 96], strides = [1, 1]} : vector<16x128xf32> to vector<16x96xf32>
    %245 = arith.negf %244 : vector<16x96xf32>
    %246 = math.exp %245 : vector<16x96xf32>
    %cst_137 = arith.constant 1.000000e+00 : f32
    %247 = vector.broadcast %cst_137 : f32 to vector<16x96xf32>
    %248 = arith.addf %247, %246 : vector<16x96xf32>
    %249 = arith.divf %247, %248 : vector<16x96xf32>
    %250 = vector.extract_strided_slice %249 {offsets = [0, 0], sizes = [16, 32], strides = [1, 1]} : vector<16x96xf32> to vector<16x32xf32>
    %251 = vector.extract_strided_slice %249 {offsets = [0, 32], sizes = [16, 32], strides = [1, 1]} : vector<16x96xf32> to vector<16x32xf32>
    %252 = vector.extract_strided_slice %249 {offsets = [0, 64], sizes = [16, 32], strides = [1, 1]} : vector<16x96xf32> to vector<16x32xf32>
    %253 = vector.extract_strided_slice %243 {offsets = [0, 96], sizes = [16, 32], strides = [1, 1]} : vector<16x128xf32> to vector<16x32xf32>
    %254 = math.tanh %253 : vector<16x32xf32>
    %c2_138 = arith.constant 2 : index
    %c0_139 = arith.constant 0 : index
    %c0_140 = arith.constant 0 : index
    %255 = vector.load %arg23[%c2_138, %c0_139, %c0_140] : memref<3x16x32xf32, #tpu.memory_space<vmem>>, vector<1x16x32xf32>
    %256 = vector.shape_cast %255 : vector<1x16x32xf32> to vector<16x32xf32>
    %257 = arith.mulf %251, %256 : vector<16x32xf32>
    %258 = arith.mulf %250, %254 : vector<16x32xf32>
    %259 = arith.addf %257, %258 : vector<16x32xf32>
    %260 = math.tanh %259 : vector<16x32xf32>
    %261 = arith.mulf %252, %260 : vector<16x32xf32>
    %c2_141 = arith.constant 2 : index
    %c0_142 = arith.constant 0 : index
    %c0_143 = arith.constant 0 : index
    %262 = vector.load %arg22[%c2_141, %c0_142, %c0_143] : memref<3x16x32xf32, #tpu.memory_space<vmem>>, vector<1x16x32xf32>
    %263 = vector.shape_cast %262 : vector<1x16x32xf32> to vector<16x32xf32>
    %264 = vector.shape_cast %261 : vector<16x32xf32> to vector<1x16x32xf32>
    tpu.vector_store %arg22[%c2_141, %c0_142, %c0_143], %264 {strides = array<i32>} : memref<3x16x32xf32, #tpu.memory_space<vmem>>, vector<1x16x32xf32>,
    %c2_144 = arith.constant 2 : index
    %c0_145 = arith.constant 0 : index
    %c0_146 = arith.constant 0 : index
    %265 = vector.load %arg23[%c2_144, %c0_145, %c0_146] : memref<3x16x32xf32, #tpu.memory_space<vmem>>, vector<1x16x32xf32>
    %266 = vector.shape_cast %265 : vector<1x16x32xf32> to vector<16x32xf32>
    %267 = vector.shape_cast %259 : vector<16x32xf32> to vector<1x16x32xf32>
    tpu.vector_store %arg23[%c2_144, %c0_145, %c0_146], %267 {strides = array<i32>} : memref<3x16x32xf32, #tpu.memory_space<vmem>>, vector<1x16x32xf32>,
    %268 = arith.truncf %261 : vector<16x32xf32> to vector<16x32xbf16>
    %cst_147 = arith.constant dense<0.000000e+00> : vector<16x32xf32>
    %269 = tpu.matmul %268, %13, %cst_147 {dimension_numbers = #tpu.dot_dimension_numbers<[1], [0], [0], [1], [0, 0, 1, 1], [], []>} : vector<16x32xbf16>, vector<32x32xbf16>, vector<16x32xf32> -> vector<16x32xf32>
    %270 = arith.addf %269, %27 : vector<16x32xf32>
    %271 = vector.shape_cast %270 : vector<16x32xf32> to vector<16x1x32xf32>
    %272 = vector.broadcast %271 : vector<16x1x32xf32> to vector<16x8x32xf32>
    %273 = arith.mulf %272, %3 : vector<16x8x32xf32>
    %cst_148 = arith.constant dense<0.000000e+00> : vector<16x8xf32>
    %274 = vector.multi_reduction <add>, %273, %cst_148 [2] : vector<16x8x32xf32> to vector<16x8xf32>
    %275 = arith.addf %274, %5 : vector<16x8xf32>
    %cst_149 = arith.constant dense<0xFF800000> : vector<16xf32>
    %276 = vector.multi_reduction <maximumf>, %275, %cst_149 [1] : vector<16x8xf32> to vector<16xf32>
    %277 = vector.shape_cast %276 : vector<16xf32> to vector<16x1xf32>
    %278 = vector.broadcast %277 : vector<16x1xf32> to vector<16x8xf32>
    %279 = arith.subf %275, %278 : vector<16x8xf32>
    %280 = math.exp %279 : vector<16x8xf32>
    %cst_150 = arith.constant dense<0.000000e+00> : vector<16xf32>
    %281 = vector.multi_reduction <add>, %280, %cst_150 [1] : vector<16x8xf32> to vector<16xf32>
    %282 = vector.shape_cast %281 : vector<16xf32> to vector<16x1xf32>
    %283 = tpu.reciprocal %282 {approx = true} : vector<16x1xf32> -> vector<16x1xf32>
    %284 = vector.broadcast %283 : vector<16x1xf32> to vector<16x8xf32>
    %285 = arith.mulf %280, %284 : vector<16x8xf32>
    %286 = vector.shape_cast %285 : vector<16x8xf32> to vector<16x8x1xf32>
    %287 = vector.broadcast %286 : vector<16x8x1xf32> to vector<16x8x32xf32>
    %288 = arith.mulf %287, %4 : vector<16x8x32xf32>
    %cst_151 = arith.constant dense<0.000000e+00> : vector<16x32xf32>
    %289 = vector.multi_reduction <add>, %288, %cst_151 [1] : vector<16x8x32xf32> to vector<16x32xf32>
    %c0_152 = arith.constant 0 : index
    %c0_153 = arith.constant 0 : index
    %290 = vector.load %arg24[%c0_152, %c0_153] : memref<16x32xf32, #tpu.memory_space<vmem>>, vector<16x32xf32>
    tpu.vector_store %arg24[%c0_152, %c0_153], %289 {strides = array<i32>} : memref<16x32xf32, #tpu.memory_space<vmem>>, vector<16x32xf32>,
    %cst_154 = arith.constant dense<0.000000e+00> : vector<16x128xf32>
    %291 = tpu.matmul %268, %14, %cst_154 {dimension_numbers = #tpu.dot_dimension_numbers<[1], [0], [0], [1], [0, 0, 1, 1], [], []>} : vector<16x32xbf16>, vector<32x128xbf16>, vector<16x128xf32> -> vector<16x128xf32>
    %292 = arith.truncf %289 : vector<16x32xf32> to vector<16x32xbf16>
    %cst_155 = arith.constant dense<0.000000e+00> : vector<16x128xf32>
    %293 = tpu.matmul %292, %15, %cst_155 {dimension_numbers = #tpu.dot_dimension_numbers<[1], [0], [0], [1], [0, 0, 1, 1], [], []>} : vector<16x32xbf16>, vector<32x128xbf16>, vector<16x128xf32> -> vector<16x128xf32>
    %294 = arith.addf %291, %293 : vector<16x128xf32>
    %295 = arith.addf %294, %30 : vector<16x128xf32>
    %296 = arith.truncf %295 : vector<16x128xf32> to vector<16x128xbf16>
    %297 = arith.index_cast %c1_i32 : i32 to index
    %c0_156 = arith.constant 0 : index
    %c0_157 = arith.constant 0 : index
    %298 = vector.load %arg21[%297, %c0_156, %c0_157] : memref<4x16x128xbf16, #tpu.memory_space<vmem>>, vector<1x16x128xbf16>
    %299 = vector.shape_cast %298 : vector<1x16x128xbf16> to vector<16x128xbf16>
    %300 = vector.shape_cast %296 : vector<16x128xbf16> to vector<1x16x128xbf16>
    tpu.vector_store %arg21[%297, %c0_156, %c0_157], %300 {strides = array<i32>} : memref<4x16x128xbf16, #tpu.memory_space<vmem>>, vector<1x16x128xbf16>,
    %c2_i32 = arith.constant 2 : i32
    %301 = arith.index_cast %c2_i32 : i32 to index
    %c0_158 = arith.constant 0 : index
    %c0_159 = arith.constant 0 : index
    %302 = vector.load %arg2[%301, %c0_158, %c0_159] : memref<4x16x32xbf16, #tpu.memory_space<vmem>>, vector<1x16x32xbf16>
    %303 = vector.shape_cast %302 : vector<1x16x32xbf16> to vector<16x32xbf16>
    %c0_160 = arith.constant 0 : index
    %c0_161 = arith.constant 0 : index
    %304 = vector.load %arg24[%c0_160, %c0_161] : memref<16x32xf32, #tpu.memory_space<vmem>>, vector<16x32xf32>
    %305 = arith.truncf %304 : vector<16x32xf32> to vector<16x32xbf16>
    %cst_162 = arith.constant dense<0.000000e+00> : vector<16x128xf32>
    %306 = tpu.matmul %303, %6, %cst_162 {dimension_numbers = #tpu.dot_dimension_numbers<[1], [0], [0], [1], [0, 0, 1, 1], [], []>} : vector<16x32xbf16>, vector<32x128xbf16>, vector<16x128xf32> -> vector<16x128xf32>
    %cst_163 = arith.constant dense<0.000000e+00> : vector<16x128xf32>
    %307 = tpu.matmul %305, %7, %cst_163 {dimension_numbers = #tpu.dot_dimension_numbers<[1], [0], [0], [1], [0, 0, 1, 1], [], []>} : vector<16x32xbf16>, vector<32x128xbf16>, vector<16x128xf32> -> vector<16x128xf32>
    %308 = arith.addf %306, %307 : vector<16x128xf32>
    %c0_164 = arith.constant 0 : index
    %c0_165 = arith.constant 0 : index
    %c0_166 = arith.constant 0 : index
    %309 = vector.load %arg22[%c0_164, %c0_165, %c0_166] : memref<3x16x32xf32, #tpu.memory_space<vmem>>, vector<1x16x32xf32>
    %310 = vector.shape_cast %309 : vector<1x16x32xf32> to vector<16x32xf32>
    %311 = arith.truncf %310 : vector<16x32xf32> to vector<16x32xbf16>
    %cst_167 = arith.constant dense<0.000000e+00> : vector<16x128xf32>
    %312 = tpu.matmul %311, %8, %cst_167 {dimension_numbers = #tpu.dot_dimension_numbers<[1], [0], [0], [1], [0, 0, 1, 1], [], []>} : vector<16x32xbf16>, vector<32x128xbf16>, vector<16x128xf32> -> vector<16x128xf32>
    %313 = arith.addf %308, %312 : vector<16x128xf32>
    %314 = arith.addf %313, %18 : vector<16x128xf32>
    %315 = vector.extract_strided_slice %314 {offsets = [0, 0], sizes = [16, 96], strides = [1, 1]} : vector<16x128xf32> to vector<16x96xf32>
    %316 = arith.negf %315 : vector<16x96xf32>
    %317 = math.exp %316 : vector<16x96xf32>
    %cst_168 = arith.constant 1.000000e+00 : f32
    %318 = vector.broadcast %cst_168 : f32 to vector<16x96xf32>
    %319 = arith.addf %318, %317 : vector<16x96xf32>
    %320 = arith.divf %318, %319 : vector<16x96xf32>
    %321 = vector.extract_strided_slice %320 {offsets = [0, 0], sizes = [16, 32], strides = [1, 1]} : vector<16x96xf32> to vector<16x32xf32>
    %322 = vector.extract_strided_slice %320 {offsets = [0, 32], sizes = [16, 32], strides = [1, 1]} : vector<16x96xf32> to vector<16x32xf32>
    %323 = vector.extract_strided_slice %320 {offsets = [0, 64], sizes = [16, 32], strides = [1, 1]} : vector<16x96xf32> to vector<16x32xf32>
    %324 = vector.extract_strided_slice %314 {offsets = [0, 96], sizes = [16, 32], strides = [1, 1]} : vector<16x128xf32> to vector<16x32xf32>
    %325 = math.tanh %324 : vector<16x32xf32>
    %c0_169 = arith.constant 0 : index
    %c0_170 = arith.constant 0 : index
    %c0_171 = arith.constant 0 : index
    %326 = vector.load %arg23[%c0_169, %c0_170, %c0_171] : memref<3x16x32xf32, #tpu.memory_space<vmem>>, vector<1x16x32xf32>
    %327 = vector.shape_cast %326 : vector<1x16x32xf32> to vector<16x32xf32>
    %328 = arith.mulf %322, %327 : vector<16x32xf32>
    %329 = arith.mulf %321, %325 : vector<16x32xf32>
    %330 = arith.addf %328, %329 : vector<16x32xf32>
    %331 = math.tanh %330 : vector<16x32xf32>
    %332 = arith.mulf %323, %331 : vector<16x32xf32>
    %c0_172 = arith.constant 0 : index
    %c0_173 = arith.constant 0 : index
    %c0_174 = arith.constant 0 : index
    %333 = vector.load %arg22[%c0_172, %c0_173, %c0_174] : memref<3x16x32xf32, #tpu.memory_space<vmem>>, vector<1x16x32xf32>
    %334 = vector.shape_cast %333 : vector<1x16x32xf32> to vector<16x32xf32>
    %335 = vector.shape_cast %332 : vector<16x32xf32> to vector<1x16x32xf32>
    tpu.vector_store %arg22[%c0_172, %c0_173, %c0_174], %335 {strides = array<i32>} : memref<3x16x32xf32, #tpu.memory_space<vmem>>, vector<1x16x32xf32>,
    %c0_175 = arith.constant 0 : index
    %c0_176 = arith.constant 0 : index
    %c0_177 = arith.constant 0 : index
    %336 = vector.load %arg23[%c0_175, %c0_176, %c0_177] : memref<3x16x32xf32, #tpu.memory_space<vmem>>, vector<1x16x32xf32>
    %337 = vector.shape_cast %336 : vector<1x16x32xf32> to vector<16x32xf32>
    %338 = vector.shape_cast %330 : vector<16x32xf32> to vector<1x16x32xf32>
    tpu.vector_store %arg23[%c0_175, %c0_176, %c0_177], %338 {strides = array<i32>} : memref<3x16x32xf32, #tpu.memory_space<vmem>>, vector<1x16x32xf32>,
    %339 = arith.truncf %332 : vector<16x32xf32> to vector<16x32xbf16>
    %cst_178 = arith.constant dense<0.000000e+00> : vector<16x128xf32>
    %340 = tpu.matmul %339, %9, %cst_178 {dimension_numbers = #tpu.dot_dimension_numbers<[1], [0], [0], [1], [0, 0, 1, 1], [], []>} : vector<16x32xbf16>, vector<32x128xbf16>, vector<16x128xf32> -> vector<16x128xf32>
    %c1_179 = arith.constant 1 : index
    %c0_180 = arith.constant 0 : index
    %c0_181 = arith.constant 0 : index
    %341 = vector.load %arg22[%c1_179, %c0_180, %c0_181] : memref<3x16x32xf32, #tpu.memory_space<vmem>>, vector<1x16x32xf32>
    %342 = vector.shape_cast %341 : vector<1x16x32xf32> to vector<16x32xf32>
    %343 = arith.truncf %342 : vector<16x32xf32> to vector<16x32xbf16>
    %cst_182 = arith.constant dense<0.000000e+00> : vector<16x128xf32>
    %344 = tpu.matmul %343, %10, %cst_182 {dimension_numbers = #tpu.dot_dimension_numbers<[1], [0], [0], [1], [0, 0, 1, 1], [], []>} : vector<16x32xbf16>, vector<32x128xbf16>, vector<16x128xf32> -> vector<16x128xf32>
    %345 = arith.addf %340, %344 : vector<16x128xf32>
    %346 = arith.addf %345, %21 : vector<16x128xf32>
    %347 = vector.extract_strided_slice %346 {offsets = [0, 0], sizes = [16, 96], strides = [1, 1]} : vector<16x128xf32> to vector<16x96xf32>
    %348 = arith.negf %347 : vector<16x96xf32>
    %349 = math.exp %348 : vector<16x96xf32>
    %cst_183 = arith.constant 1.000000e+00 : f32
    %350 = vector.broadcast %cst_183 : f32 to vector<16x96xf32>
    %351 = arith.addf %350, %349 : vector<16x96xf32>
    %352 = arith.divf %350, %351 : vector<16x96xf32>
    %353 = vector.extract_strided_slice %352 {offsets = [0, 0], sizes = [16, 32], strides = [1, 1]} : vector<16x96xf32> to vector<16x32xf32>
    %354 = vector.extract_strided_slice %352 {offsets = [0, 32], sizes = [16, 32], strides = [1, 1]} : vector<16x96xf32> to vector<16x32xf32>
    %355 = vector.extract_strided_slice %352 {offsets = [0, 64], sizes = [16, 32], strides = [1, 1]} : vector<16x96xf32> to vector<16x32xf32>
    %356 = vector.extract_strided_slice %346 {offsets = [0, 96], sizes = [16, 32], strides = [1, 1]} : vector<16x128xf32> to vector<16x32xf32>
    %357 = math.tanh %356 : vector<16x32xf32>
    %c1_184 = arith.constant 1 : index
    %c0_185 = arith.constant 0 : index
    %c0_186 = arith.constant 0 : index
    %358 = vector.load %arg23[%c1_184, %c0_185, %c0_186] : memref<3x16x32xf32, #tpu.memory_space<vmem>>, vector<1x16x32xf32>
    %359 = vector.shape_cast %358 : vector<1x16x32xf32> to vector<16x32xf32>
    %360 = arith.mulf %354, %359 : vector<16x32xf32>
    %361 = arith.mulf %353, %357 : vector<16x32xf32>
    %362 = arith.addf %360, %361 : vector<16x32xf32>
    %363 = math.tanh %362 : vector<16x32xf32>
    %364 = arith.mulf %355, %363 : vector<16x32xf32>
    %c1_187 = arith.constant 1 : index
    %c0_188 = arith.constant 0 : index
    %c0_189 = arith.constant 0 : index
    %365 = vector.load %arg22[%c1_187, %c0_188, %c0_189] : memref<3x16x32xf32, #tpu.memory_space<vmem>>, vector<1x16x32xf32>
    %366 = vector.shape_cast %365 : vector<1x16x32xf32> to vector<16x32xf32>
    %367 = vector.shape_cast %364 : vector<16x32xf32> to vector<1x16x32xf32>
    tpu.vector_store %arg22[%c1_187, %c0_188, %c0_189], %367 {strides = array<i32>} : memref<3x16x32xf32, #tpu.memory_space<vmem>>, vector<1x16x32xf32>,
    %c1_190 = arith.constant 1 : index
    %c0_191 = arith.constant 0 : index
    %c0_192 = arith.constant 0 : index
    %368 = vector.load %arg23[%c1_190, %c0_191, %c0_192] : memref<3x16x32xf32, #tpu.memory_space<vmem>>, vector<1x16x32xf32>
    %369 = vector.shape_cast %368 : vector<1x16x32xf32> to vector<16x32xf32>
    %370 = vector.shape_cast %362 : vector<16x32xf32> to vector<1x16x32xf32>
    tpu.vector_store %arg23[%c1_190, %c0_191, %c0_192], %370 {strides = array<i32>} : memref<3x16x32xf32, #tpu.memory_space<vmem>>, vector<1x16x32xf32>,
    %371 = arith.truncf %364 : vector<16x32xf32> to vector<16x32xbf16>
    %cst_193 = arith.constant dense<0.000000e+00> : vector<16x128xf32>
    %372 = tpu.matmul %371, %11, %cst_193 {dimension_numbers = #tpu.dot_dimension_numbers<[1], [0], [0], [1], [0, 0, 1, 1], [], []>} : vector<16x32xbf16>, vector<32x128xbf16>, vector<16x128xf32> -> vector<16x128xf32>
    %c2_194 = arith.constant 2 : index
    %c0_195 = arith.constant 0 : index
    %c0_196 = arith.constant 0 : index
    %373 = vector.load %arg22[%c2_194, %c0_195, %c0_196] : memref<3x16x32xf32, #tpu.memory_space<vmem>>, vector<1x16x32xf32>
    %374 = vector.shape_cast %373 : vector<1x16x32xf32> to vector<16x32xf32>
    %375 = arith.truncf %374 : vector<16x32xf32> to vector<16x32xbf16>
    %cst_197 = arith.constant dense<0.000000e+00> : vector<16x128xf32>
    %376 = tpu.matmul %375, %12, %cst_197 {dimension_numbers = #tpu.dot_dimension_numbers<[1], [0], [0], [1], [0, 0, 1, 1], [], []>} : vector<16x32xbf16>, vector<32x128xbf16>, vector<16x128xf32> -> vector<16x128xf32>
    %377 = arith.addf %372, %376 : vector<16x128xf32>
    %378 = arith.addf %377, %24 : vector<16x128xf32>
    %379 = vector.extract_strided_slice %378 {offsets = [0, 0], sizes = [16, 96], strides = [1, 1]} : vector<16x128xf32> to vector<16x96xf32>
    %380 = arith.negf %379 : vector<16x96xf32>
    %381 = math.exp %380 : vector<16x96xf32>
    %cst_198 = arith.constant 1.000000e+00 : f32
    %382 = vector.broadcast %cst_198 : f32 to vector<16x96xf32>
    %383 = arith.addf %382, %381 : vector<16x96xf32>
    %384 = arith.divf %382, %383 : vector<16x96xf32>
    %385 = vector.extract_strided_slice %384 {offsets = [0, 0], sizes = [16, 32], strides = [1, 1]} : vector<16x96xf32> to vector<16x32xf32>
    %386 = vector.extract_strided_slice %384 {offsets = [0, 32], sizes = [16, 32], strides = [1, 1]} : vector<16x96xf32> to vector<16x32xf32>
    %387 = vector.extract_strided_slice %384 {offsets = [0, 64], sizes = [16, 32], strides = [1, 1]} : vector<16x96xf32> to vector<16x32xf32>
    %388 = vector.extract_strided_slice %378 {offsets = [0, 96], sizes = [16, 32], strides = [1, 1]} : vector<16x128xf32> to vector<16x32xf32>
    %389 = math.tanh %388 : vector<16x32xf32>
    %c2_199 = arith.constant 2 : index
    %c0_200 = arith.constant 0 : index
    %c0_201 = arith.constant 0 : index
    %390 = vector.load %arg23[%c2_199, %c0_200, %c0_201] : memref<3x16x32xf32, #tpu.memory_space<vmem>>, vector<1x16x32xf32>
    %391 = vector.shape_cast %390 : vector<1x16x32xf32> to vector<16x32xf32>
    %392 = arith.mulf %386, %391 : vector<16x32xf32>
    %393 = arith.mulf %385, %389 : vector<16x32xf32>
    %394 = arith.addf %392, %393 : vector<16x32xf32>
    %395 = math.tanh %394 : vector<16x32xf32>
    %396 = arith.mulf %387, %395 : vector<16x32xf32>
    %c2_202 = arith.constant 2 : index
    %c0_203 = arith.constant 0 : index
    %c0_204 = arith.constant 0 : index
    %397 = vector.load %arg22[%c2_202, %c0_203, %c0_204] : memref<3x16x32xf32, #tpu.memory_space<vmem>>, vector<1x16x32xf32>
    %398 = vector.shape_cast %397 : vector<1x16x32xf32> to vector<16x32xf32>
    %399 = vector.shape_cast %396 : vector<16x32xf32> to vector<1x16x32xf32>
    tpu.vector_store %arg22[%c2_202, %c0_203, %c0_204], %399 {strides = array<i32>} : memref<3x16x32xf32, #tpu.memory_space<vmem>>, vector<1x16x32xf32>,
    %c2_205 = arith.constant 2 : index
    %c0_206 = arith.constant 0 : index
    %c0_207 = arith.constant 0 : index
    %400 = vector.load %arg23[%c2_205, %c0_206, %c0_207] : memref<3x16x32xf32, #tpu.memory_space<vmem>>, vector<1x16x32xf32>
    %401 = vector.shape_cast %400 : vector<1x16x32xf32> to vector<16x32xf32>
    %402 = vector.shape_cast %394 : vector<16x32xf32> to vector<1x16x32xf32>
    tpu.vector_store %arg23[%c2_205, %c0_206, %c0_207], %402 {strides = array<i32>} : memref<3x16x32xf32, #tpu.memory_space<vmem>>, vector<1x16x32xf32>,
    %403 = arith.truncf %396 : vector<16x32xf32> to vector<16x32xbf16>
    %cst_208 = arith.constant dense<0.000000e+00> : vector<16x32xf32>
    %404 = tpu.matmul %403, %13, %cst_208 {dimension_numbers = #tpu.dot_dimension_numbers<[1], [0], [0], [1], [0, 0, 1, 1], [], []>} : vector<16x32xbf16>, vector<32x32xbf16>, vector<16x32xf32> -> vector<16x32xf32>
    %405 = arith.addf %404, %27 : vector<16x32xf32>
    %406 = vector.shape_cast %405 : vector<16x32xf32> to vector<16x1x32xf32>
    %407 = vector.broadcast %406 : vector<16x1x32xf32> to vector<16x8x32xf32>
    %408 = arith.mulf %407, %3 : vector<16x8x32xf32>
    %cst_209 = arith.constant dense<0.000000e+00> : vector<16x8xf32>
    %409 = vector.multi_reduction <add>, %408, %cst_209 [2] : vector<16x8x32xf32> to vector<16x8xf32>
    %410 = arith.addf %409, %5 : vector<16x8xf32>
    %cst_210 = arith.constant dense<0xFF800000> : vector<16xf32>
    %411 = vector.multi_reduction <maximumf>, %410, %cst_210 [1] : vector<16x8xf32> to vector<16xf32>
    %412 = vector.shape_cast %411 : vector<16xf32> to vector<16x1xf32>
    %413 = vector.broadcast %412 : vector<16x1xf32> to vector<16x8xf32>
    %414 = arith.subf %410, %413 : vector<16x8xf32>
    %415 = math.exp %414 : vector<16x8xf32>
    %cst_211 = arith.constant dense<0.000000e+00> : vector<16xf32>
    %416 = vector.multi_reduction <add>, %415, %cst_211 [1] : vector<16x8xf32> to vector<16xf32>
    %417 = vector.shape_cast %416 : vector<16xf32> to vector<16x1xf32>
    %418 = tpu.reciprocal %417 {approx = true} : vector<16x1xf32> -> vector<16x1xf32>
    %419 = vector.broadcast %418 : vector<16x1xf32> to vector<16x8xf32>
    %420 = arith.mulf %415, %419 : vector<16x8xf32>
    %421 = vector.shape_cast %420 : vector<16x8xf32> to vector<16x8x1xf32>
    %422 = vector.broadcast %421 : vector<16x8x1xf32> to vector<16x8x32xf32>
    %423 = arith.mulf %422, %4 : vector<16x8x32xf32>
    %cst_212 = arith.constant dense<0.000000e+00> : vector<16x32xf32>
    %424 = vector.multi_reduction <add>, %423, %cst_212 [1] : vector<16x8x32xf32> to vector<16x32xf32>
    %c0_213 = arith.constant 0 : index
    %c0_214 = arith.constant 0 : index
    %425 = vector.load %arg24[%c0_213, %c0_214] : memref<16x32xf32, #tpu.memory_space<vmem>>, vector<16x32xf32>
    tpu.vector_store %arg24[%c0_213, %c0_214], %424 {strides = array<i32>} : memref<16x32xf32, #tpu.memory_space<vmem>>, vector<16x32xf32>,
    %cst_215 = arith.constant dense<0.000000e+00> : vector<16x128xf32>
    %426 = tpu.matmul %403, %14, %cst_215 {dimension_numbers = #tpu.dot_dimension_numbers<[1], [0], [0], [1], [0, 0, 1, 1], [], []>} : vector<16x32xbf16>, vector<32x128xbf16>, vector<16x128xf32> -> vector<16x128xf32>
    %427 = arith.truncf %424 : vector<16x32xf32> to vector<16x32xbf16>
    %cst_216 = arith.constant dense<0.000000e+00> : vector<16x128xf32>
    %428 = tpu.matmul %427, %15, %cst_216 {dimension_numbers = #tpu.dot_dimension_numbers<[1], [0], [0], [1], [0, 0, 1, 1], [], []>} : vector<16x32xbf16>, vector<32x128xbf16>, vector<16x128xf32> -> vector<16x128xf32>
    %429 = arith.addf %426, %428 : vector<16x128xf32>
    %430 = arith.addf %429, %30 : vector<16x128xf32>
    %431 = arith.truncf %430 : vector<16x128xf32> to vector<16x128xbf16>
    %432 = arith.index_cast %c2_i32 : i32 to index
    %c0_217 = arith.constant 0 : index
    %c0_218 = arith.constant 0 : index
    %433 = vector.load %arg21[%432, %c0_217, %c0_218] : memref<4x16x128xbf16, #tpu.memory_space<vmem>>, vector<1x16x128xbf16>
    %434 = vector.shape_cast %433 : vector<1x16x128xbf16> to vector<16x128xbf16>
    %435 = vector.shape_cast %431 : vector<16x128xbf16> to vector<1x16x128xbf16>
    tpu.vector_store %arg21[%432, %c0_217, %c0_218], %435 {strides = array<i32>} : memref<4x16x128xbf16, #tpu.memory_space<vmem>>, vector<1x16x128xbf16>,
    %c3_i32 = arith.constant 3 : i32
    %436 = arith.index_cast %c3_i32 : i32 to index
    %c0_219 = arith.constant 0 : index
    %c0_220 = arith.constant 0 : index
    %437 = vector.load %arg2[%436, %c0_219, %c0_220] : memref<4x16x32xbf16, #tpu.memory_space<vmem>>, vector<1x16x32xbf16>
    %438 = vector.shape_cast %437 : vector<1x16x32xbf16> to vector<16x32xbf16>
    %c0_221 = arith.constant 0 : index
    %c0_222 = arith.constant 0 : index
    %439 = vector.load %arg24[%c0_221, %c0_222] : memref<16x32xf32, #tpu.memory_space<vmem>>, vector<16x32xf32>
    %440 = arith.truncf %439 : vector<16x32xf32> to vector<16x32xbf16>
    %cst_223 = arith.constant dense<0.000000e+00> : vector<16x128xf32>
    %441 = tpu.matmul %438, %6, %cst_223 {dimension_numbers = #tpu.dot_dimension_numbers<[1], [0], [0], [1], [0, 0, 1, 1], [], []>} : vector<16x32xbf16>, vector<32x128xbf16>, vector<16x128xf32> -> vector<16x128xf32>
    %cst_224 = arith.constant dense<0.000000e+00> : vector<16x128xf32>
    %442 = tpu.matmul %440, %7, %cst_224 {dimension_numbers = #tpu.dot_dimension_numbers<[1], [0], [0], [1], [0, 0, 1, 1], [], []>} : vector<16x32xbf16>, vector<32x128xbf16>, vector<16x128xf32> -> vector<16x128xf32>
    %443 = arith.addf %441, %442 : vector<16x128xf32>
    %c0_225 = arith.constant 0 : index
    %c0_226 = arith.constant 0 : index
    %c0_227 = arith.constant 0 : index
    %444 = vector.load %arg22[%c0_225, %c0_226, %c0_227] : memref<3x16x32xf32, #tpu.memory_space<vmem>>, vector<1x16x32xf32>
    %445 = vector.shape_cast %444 : vector<1x16x32xf32> to vector<16x32xf32>
    %446 = arith.truncf %445 : vector<16x32xf32> to vector<16x32xbf16>
    %cst_228 = arith.constant dense<0.000000e+00> : vector<16x128xf32>
    %447 = tpu.matmul %446, %8, %cst_228 {dimension_numbers = #tpu.dot_dimension_numbers<[1], [0], [0], [1], [0, 0, 1, 1], [], []>} : vector<16x32xbf16>, vector<32x128xbf16>, vector<16x128xf32> -> vector<16x128xf32>
    %448 = arith.addf %443, %447 : vector<16x128xf32>
    %449 = arith.addf %448, %18 : vector<16x128xf32>
    %450 = vector.extract_strided_slice %449 {offsets = [0, 0], sizes = [16, 96], strides = [1, 1]} : vector<16x128xf32> to vector<16x96xf32>
    %451 = arith.negf %450 : vector<16x96xf32>
    %452 = math.exp %451 : vector<16x96xf32>
    %cst_229 = arith.constant 1.000000e+00 : f32
    %453 = vector.broadcast %cst_229 : f32 to vector<16x96xf32>
    %454 = arith.addf %453, %452 : vector<16x96xf32>
    %455 = arith.divf %453, %454 : vector<16x96xf32>
    %456 = vector.extract_strided_slice %455 {offsets = [0, 0], sizes = [16, 32], strides = [1, 1]} : vector<16x96xf32> to vector<16x32xf32>
    %457 = vector.extract_strided_slice %455 {offsets = [0, 32], sizes = [16, 32], strides = [1, 1]} : vector<16x96xf32> to vector<16x32xf32>
    %458 = vector.extract_strided_slice %455 {offsets = [0, 64], sizes = [16, 32], strides = [1, 1]} : vector<16x96xf32> to vector<16x32xf32>
    %459 = vector.extract_strided_slice %449 {offsets = [0, 96], sizes = [16, 32], strides = [1, 1]} : vector<16x128xf32> to vector<16x32xf32>
    %460 = math.tanh %459 : vector<16x32xf32>
    %c0_230 = arith.constant 0 : index
    %c0_231 = arith.constant 0 : index
    %c0_232 = arith.constant 0 : index
    %461 = vector.load %arg23[%c0_230, %c0_231, %c0_232] : memref<3x16x32xf32, #tpu.memory_space<vmem>>, vector<1x16x32xf32>
    %462 = vector.shape_cast %461 : vector<1x16x32xf32> to vector<16x32xf32>
    %463 = arith.mulf %457, %462 : vector<16x32xf32>
    %464 = arith.mulf %456, %460 : vector<16x32xf32>
    %465 = arith.addf %463, %464 : vector<16x32xf32>
    %466 = math.tanh %465 : vector<16x32xf32>
    %467 = arith.mulf %458, %466 : vector<16x32xf32>
    %c0_233 = arith.constant 0 : index
    %c0_234 = arith.constant 0 : index
    %c0_235 = arith.constant 0 : index
    %468 = vector.load %arg22[%c0_233, %c0_234, %c0_235] : memref<3x16x32xf32, #tpu.memory_space<vmem>>, vector<1x16x32xf32>
    %469 = vector.shape_cast %468 : vector<1x16x32xf32> to vector<16x32xf32>
    %470 = vector.shape_cast %467 : vector<16x32xf32> to vector<1x16x32xf32>
    tpu.vector_store %arg22[%c0_233, %c0_234, %c0_235], %470 {strides = array<i32>} : memref<3x16x32xf32, #tpu.memory_space<vmem>>, vector<1x16x32xf32>,
    %c0_236 = arith.constant 0 : index
    %c0_237 = arith.constant 0 : index
    %c0_238 = arith.constant 0 : index
    %471 = vector.load %arg23[%c0_236, %c0_237, %c0_238] : memref<3x16x32xf32, #tpu.memory_space<vmem>>, vector<1x16x32xf32>
    %472 = vector.shape_cast %471 : vector<1x16x32xf32> to vector<16x32xf32>
    %473 = vector.shape_cast %465 : vector<16x32xf32> to vector<1x16x32xf32>
    tpu.vector_store %arg23[%c0_236, %c0_237, %c0_238], %473 {strides = array<i32>} : memref<3x16x32xf32, #tpu.memory_space<vmem>>, vector<1x16x32xf32>,
    %474 = arith.truncf %467 : vector<16x32xf32> to vector<16x32xbf16>
    %cst_239 = arith.constant dense<0.000000e+00> : vector<16x128xf32>
    %475 = tpu.matmul %474, %9, %cst_239 {dimension_numbers = #tpu.dot_dimension_numbers<[1], [0], [0], [1], [0, 0, 1, 1], [], []>} : vector<16x32xbf16>, vector<32x128xbf16>, vector<16x128xf32> -> vector<16x128xf32>
    %c1_240 = arith.constant 1 : index
    %c0_241 = arith.constant 0 : index
    %c0_242 = arith.constant 0 : index
    %476 = vector.load %arg22[%c1_240, %c0_241, %c0_242] : memref<3x16x32xf32, #tpu.memory_space<vmem>>, vector<1x16x32xf32>
    %477 = vector.shape_cast %476 : vector<1x16x32xf32> to vector<16x32xf32>
    %478 = arith.truncf %477 : vector<16x32xf32> to vector<16x32xbf16>
    %cst_243 = arith.constant dense<0.000000e+00> : vector<16x128xf32>
    %479 = tpu.matmul %478, %10, %cst_243 {dimension_numbers = #tpu.dot_dimension_numbers<[1], [0], [0], [1], [0, 0, 1, 1], [], []>} : vector<16x32xbf16>, vector<32x128xbf16>, vector<16x128xf32> -> vector<16x128xf32>
    %480 = arith.addf %475, %479 : vector<16x128xf32>
    %481 = arith.addf %480, %21 : vector<16x128xf32>
    %482 = vector.extract_strided_slice %481 {offsets = [0, 0], sizes = [16, 96], strides = [1, 1]} : vector<16x128xf32> to vector<16x96xf32>
    %483 = arith.negf %482 : vector<16x96xf32>
    %484 = math.exp %483 : vector<16x96xf32>
    %cst_244 = arith.constant 1.000000e+00 : f32
    %485 = vector.broadcast %cst_244 : f32 to vector<16x96xf32>
    %486 = arith.addf %485, %484 : vector<16x96xf32>
    %487 = arith.divf %485, %486 : vector<16x96xf32>
    %488 = vector.extract_strided_slice %487 {offsets = [0, 0], sizes = [16, 32], strides = [1, 1]} : vector<16x96xf32> to vector<16x32xf32>
    %489 = vector.extract_strided_slice %487 {offsets = [0, 32], sizes = [16, 32], strides = [1, 1]} : vector<16x96xf32> to vector<16x32xf32>
    %490 = vector.extract_strided_slice %487 {offsets = [0, 64], sizes = [16, 32], strides = [1, 1]} : vector<16x96xf32> to vector<16x32xf32>
    %491 = vector.extract_strided_slice %481 {offsets = [0, 96], sizes = [16, 32], strides = [1, 1]} : vector<16x128xf32> to vector<16x32xf32>
    %492 = math.tanh %491 : vector<16x32xf32>
    %c1_245 = arith.constant 1 : index
    %c0_246 = arith.constant 0 : index
    %c0_247 = arith.constant 0 : index
    %493 = vector.load %arg23[%c1_245, %c0_246, %c0_247] : memref<3x16x32xf32, #tpu.memory_space<vmem>>, vector<1x16x32xf32>
    %494 = vector.shape_cast %493 : vector<1x16x32xf32> to vector<16x32xf32>
    %495 = arith.mulf %489, %494 : vector<16x32xf32>
    %496 = arith.mulf %488, %492 : vector<16x32xf32>
    %497 = arith.addf %495, %496 : vector<16x32xf32>
    %498 = math.tanh %497 : vector<16x32xf32>
    %499 = arith.mulf %490, %498 : vector<16x32xf32>
    %c1_248 = arith.constant 1 : index
    %c0_249 = arith.constant 0 : index
    %c0_250 = arith.constant 0 : index
    %500 = vector.load %arg22[%c1_248, %c0_249, %c0_250] : memref<3x16x32xf32, #tpu.memory_space<vmem>>, vector<1x16x32xf32>
    %501 = vector.shape_cast %500 : vector<1x16x32xf32> to vector<16x32xf32>
    %502 = vector.shape_cast %499 : vector<16x32xf32> to vector<1x16x32xf32>
    tpu.vector_store %arg22[%c1_248, %c0_249, %c0_250], %502 {strides = array<i32>} : memref<3x16x32xf32, #tpu.memory_space<vmem>>, vector<1x16x32xf32>,
    %c1_251 = arith.constant 1 : index
    %c0_252 = arith.constant 0 : index
    %c0_253 = arith.constant 0 : index
    %503 = vector.load %arg23[%c1_251, %c0_252, %c0_253] : memref<3x16x32xf32, #tpu.memory_space<vmem>>, vector<1x16x32xf32>
    %504 = vector.shape_cast %503 : vector<1x16x32xf32> to vector<16x32xf32>
    %505 = vector.shape_cast %497 : vector<16x32xf32> to vector<1x16x32xf32>
    tpu.vector_store %arg23[%c1_251, %c0_252, %c0_253], %505 {strides = array<i32>} : memref<3x16x32xf32, #tpu.memory_space<vmem>>, vector<1x16x32xf32>,
    %506 = arith.truncf %499 : vector<16x32xf32> to vector<16x32xbf16>
    %cst_254 = arith.constant dense<0.000000e+00> : vector<16x128xf32>
    %507 = tpu.matmul %506, %11, %cst_254 {dimension_numbers = #tpu.dot_dimension_numbers<[1], [0], [0], [1], [0, 0, 1, 1], [], []>} : vector<16x32xbf16>, vector<32x128xbf16>, vector<16x128xf32> -> vector<16x128xf32>
    %c2_255 = arith.constant 2 : index
    %c0_256 = arith.constant 0 : index
    %c0_257 = arith.constant 0 : index
    %508 = vector.load %arg22[%c2_255, %c0_256, %c0_257] : memref<3x16x32xf32, #tpu.memory_space<vmem>>, vector<1x16x32xf32>
    %509 = vector.shape_cast %508 : vector<1x16x32xf32> to vector<16x32xf32>
    %510 = arith.truncf %509 : vector<16x32xf32> to vector<16x32xbf16>
    %cst_258 = arith.constant dense<0.000000e+00> : vector<16x128xf32>
    %511 = tpu.matmul %510, %12, %cst_258 {dimension_numbers = #tpu.dot_dimension_numbers<[1], [0], [0], [1], [0, 0, 1, 1], [], []>} : vector<16x32xbf16>, vector<32x128xbf16>, vector<16x128xf32> -> vector<16x128xf32>
    %512 = arith.addf %507, %511 : vector<16x128xf32>
    %513 = arith.addf %512, %24 : vector<16x128xf32>
    %514 = vector.extract_strided_slice %513 {offsets = [0, 0], sizes = [16, 96], strides = [1, 1]} : vector<16x128xf32> to vector<16x96xf32>
    %515 = arith.negf %514 : vector<16x96xf32>
    %516 = math.exp %515 : vector<16x96xf32>
    %cst_259 = arith.constant 1.000000e+00 : f32
    %517 = vector.broadcast %cst_259 : f32 to vector<16x96xf32>
    %518 = arith.addf %517, %516 : vector<16x96xf32>
    %519 = arith.divf %517, %518 : vector<16x96xf32>
    %520 = vector.extract_strided_slice %519 {offsets = [0, 0], sizes = [16, 32], strides = [1, 1]} : vector<16x96xf32> to vector<16x32xf32>
    %521 = vector.extract_strided_slice %519 {offsets = [0, 32], sizes = [16, 32], strides = [1, 1]} : vector<16x96xf32> to vector<16x32xf32>
    %522 = vector.extract_strided_slice %519 {offsets = [0, 64], sizes = [16, 32], strides = [1, 1]} : vector<16x96xf32> to vector<16x32xf32>
    %523 = vector.extract_strided_slice %513 {offsets = [0, 96], sizes = [16, 32], strides = [1, 1]} : vector<16x128xf32> to vector<16x32xf32>
    %524 = math.tanh %523 : vector<16x32xf32>
    %c2_260 = arith.constant 2 : index
    %c0_261 = arith.constant 0 : index
    %c0_262 = arith.constant 0 : index
    %525 = vector.load %arg23[%c2_260, %c0_261, %c0_262] : memref<3x16x32xf32, #tpu.memory_space<vmem>>, vector<1x16x32xf32>
    %526 = vector.shape_cast %525 : vector<1x16x32xf32> to vector<16x32xf32>
    %527 = arith.mulf %521, %526 : vector<16x32xf32>
    %528 = arith.mulf %520, %524 : vector<16x32xf32>
    %529 = arith.addf %527, %528 : vector<16x32xf32>
    %530 = math.tanh %529 : vector<16x32xf32>
    %531 = arith.mulf %522, %530 : vector<16x32xf32>
    %c2_263 = arith.constant 2 : index
    %c0_264 = arith.constant 0 : index
    %c0_265 = arith.constant 0 : index
    %532 = vector.load %arg22[%c2_263, %c0_264, %c0_265] : memref<3x16x32xf32, #tpu.memory_space<vmem>>, vector<1x16x32xf32>
    %533 = vector.shape_cast %532 : vector<1x16x32xf32> to vector<16x32xf32>
    %534 = vector.shape_cast %531 : vector<16x32xf32> to vector<1x16x32xf32>
    tpu.vector_store %arg22[%c2_263, %c0_264, %c0_265], %534 {strides = array<i32>} : memref<3x16x32xf32, #tpu.memory_space<vmem>>, vector<1x16x32xf32>,
    %c2_266 = arith.constant 2 : index
    %c0_267 = arith.constant 0 : index
    %c0_268 = arith.constant 0 : index
    %535 = vector.load %arg23[%c2_266, %c0_267, %c0_268] : memref<3x16x32xf32, #tpu.memory_space<vmem>>, vector<1x16x32xf32>
    %536 = vector.shape_cast %535 : vector<1x16x32xf32> to vector<16x32xf32>
    %537 = vector.shape_cast %529 : vector<16x32xf32> to vector<1x16x32xf32>
    tpu.vector_store %arg23[%c2_266, %c0_267, %c0_268], %537 {strides = array<i32>} : memref<3x16x32xf32, #tpu.memory_space<vmem>>, vector<1x16x32xf32>,
    %538 = arith.truncf %531 : vector<16x32xf32> to vector<16x32xbf16>
    %cst_269 = arith.constant dense<0.000000e+00> : vector<16x32xf32>
    %539 = tpu.matmul %538, %13, %cst_269 {dimension_numbers = #tpu.dot_dimension_numbers<[1], [0], [0], [1], [0, 0, 1, 1], [], []>} : vector<16x32xbf16>, vector<32x32xbf16>, vector<16x32xf32> -> vector<16x32xf32>
    %540 = arith.addf %539, %27 : vector<16x32xf32>
    %541 = vector.shape_cast %540 : vector<16x32xf32> to vector<16x1x32xf32>
    %542 = vector.broadcast %541 : vector<16x1x32xf32> to vector<16x8x32xf32>
    %543 = arith.mulf %542, %3 : vector<16x8x32xf32>
    %cst_270 = arith.constant dense<0.000000e+00> : vector<16x8xf32>
    %544 = vector.multi_reduction <add>, %543, %cst_270 [2] : vector<16x8x32xf32> to vector<16x8xf32>
    %545 = arith.addf %544, %5 : vector<16x8xf32>
    %cst_271 = arith.constant dense<0xFF800000> : vector<16xf32>
    %546 = vector.multi_reduction <maximumf>, %545, %cst_271 [1] : vector<16x8xf32> to vector<16xf32>
    %547 = vector.shape_cast %546 : vector<16xf32> to vector<16x1xf32>
    %548 = vector.broadcast %547 : vector<16x1xf32> to vector<16x8xf32>
    %549 = arith.subf %545, %548 : vector<16x8xf32>
    %550 = math.exp %549 : vector<16x8xf32>
    %cst_272 = arith.constant dense<0.000000e+00> : vector<16xf32>
    %551 = vector.multi_reduction <add>, %550, %cst_272 [1] : vector<16x8xf32> to vector<16xf32>
    %552 = vector.shape_cast %551 : vector<16xf32> to vector<16x1xf32>
    %553 = tpu.reciprocal %552 {approx = true} : vector<16x1xf32> -> vector<16x1xf32>
    %554 = vector.broadcast %553 : vector<16x1xf32> to vector<16x8xf32>
    %555 = arith.mulf %550, %554 : vector<16x8xf32>
    %556 = vector.shape_cast %555 : vector<16x8xf32> to vector<16x8x1xf32>
    %557 = vector.broadcast %556 : vector<16x8x1xf32> to vector<16x8x32xf32>
    %558 = arith.mulf %557, %4 : vector<16x8x32xf32>
    %cst_273 = arith.constant dense<0.000000e+00> : vector<16x32xf32>
    %559 = vector.multi_reduction <add>, %558, %cst_273 [1] : vector<16x8x32xf32> to vector<16x32xf32>
    %c0_274 = arith.constant 0 : index
    %c0_275 = arith.constant 0 : index
    %560 = vector.load %arg24[%c0_274, %c0_275] : memref<16x32xf32, #tpu.memory_space<vmem>>, vector<16x32xf32>
    tpu.vector_store %arg24[%c0_274, %c0_275], %559 {strides = array<i32>} : memref<16x32xf32, #tpu.memory_space<vmem>>, vector<16x32xf32>,
    %cst_276 = arith.constant dense<0.000000e+00> : vector<16x128xf32>
    %561 = tpu.matmul %538, %14, %cst_276 {dimension_numbers = #tpu.dot_dimension_numbers<[1], [0], [0], [1], [0, 0, 1, 1], [], []>} : vector<16x32xbf16>, vector<32x128xbf16>, vector<16x128xf32> -> vector<16x128xf32>
    %562 = arith.truncf %559 : vector<16x32xf32> to vector<16x32xbf16>
    %cst_277 = arith.constant dense<0.000000e+00> : vector<16x128xf32>
    %563 = tpu.matmul %562, %15, %cst_277 {dimension_numbers = #tpu.dot_dimension_numbers<[1], [0], [0], [1], [0, 0, 1, 1], [], []>} : vector<16x32xbf16>, vector<32x128xbf16>, vector<16x128xf32> -> vector<16x128xf32>
    %564 = arith.addf %561, %563 : vector<16x128xf32>
    %565 = arith.addf %564, %30 : vector<16x128xf32>
    %566 = arith.truncf %565 : vector<16x128xf32> to vector<16x128xbf16>
    %567 = arith.index_cast %c3_i32 : i32 to index
    %c0_278 = arith.constant 0 : index
    %c0_279 = arith.constant 0 : index
    %568 = vector.load %arg21[%567, %c0_278, %c0_279] : memref<4x16x128xbf16, #tpu.memory_space<vmem>>, vector<1x16x128xbf16>
    %569 = vector.shape_cast %568 : vector<1x16x128xbf16> to vector<16x128xbf16>
    %570 = vector.shape_cast %566 : vector<16x128xbf16> to vector<1x16x128xbf16>
    tpu.vector_store %arg21[%567, %c0_278, %c0_279], %570 {strides = array<i32>} : memref<4x16x128xbf16, #tpu.memory_space<vmem>>, vector<1x16x128xbf16>,
    %c4_i32 = arith.constant 4 : i32
    return
  }
  func.func @transform_0(%arg0: i32, %arg1: i32) -> (i32, i32, i32) {
    %c0_i32 = arith.constant 0 : i32
    %c0_i32_0 = arith.constant 0 : i32
    return %arg1, %arg0, %c0_i32 : i32, i32, i32
  }
  func.func @transform_1(%arg0: i32, %arg1: i32) -> (i32, i32, i32) {
    %c0_i32 = arith.constant 0 : i32
    %c0_i32_0 = arith.constant 0 : i32
    %c0_i32_1 = arith.constant 0 : i32
    return %arg0, %c0_i32, %c0_i32_0 : i32, i32, i32
  }
  func.func @transform_2(%arg0: i32, %arg1: i32) -> (i32, i32, i32) {
    %c0_i32 = arith.constant 0 : i32
    %c0_i32_0 = arith.constant 0 : i32
    %c0_i32_1 = arith.constant 0 : i32
    return %arg0, %c0_i32, %c0_i32_0 : i32, i32, i32
  }
  func.func @transform_3(%arg0: i32, %arg1: i32) -> (i32, i32) {
    %c0_i32 = arith.constant 0 : i32
    %c0_i32_0 = arith.constant 0 : i32
    return %arg0, %c0_i32 : i32, i32
  }
  func.func @transform_4(%arg0: i32, %arg1: i32) -> (i32, i32) {
    %c0_i32 = arith.constant 0 : i32
    %c0_i32_0 = arith.constant 0 : i32
    %c0_i32_1 = arith.constant 0 : i32
    return %c0_i32, %c0_i32_0 : i32, i32
  }
  func.func @transform_5(%arg0: i32, %arg1: i32) -> (i32, i32) {
    %c0_i32 = arith.constant 0 : i32
    %c0_i32_0 = arith.constant 0 : i32
    %c0_i32_1 = arith.constant 0 : i32
    return %c0_i32, %c0_i32_0 : i32, i32
  }
  func.func @transform_6(%arg0: i32, %arg1: i32) -> (i32, i32) {
    %c0_i32 = arith.constant 0 : i32
    %c0_i32_0 = arith.constant 0 : i32
    %c0_i32_1 = arith.constant 0 : i32
    return %c0_i32, %c0_i32_0 : i32, i32
  }
  func.func @transform_7(%arg0: i32, %arg1: i32) -> (i32, i32) {
    %c0_i32 = arith.constant 0 : i32
    %c0_i32_0 = arith.constant 0 : i32
    %c0_i32_1 = arith.constant 0 : i32
    return %c0_i32, %c0_i32_0 : i32, i32
  }
  func.func @transform_8(%arg0: i32, %arg1: i32) -> (i32, i32) {
    %c0_i32 = arith.constant 0 : i32
    %c0_i32_0 = arith.constant 0 : i32
    %c0_i32_1 = arith.constant 0 : i32
    return %c0_i32, %c0_i32_0 : i32, i32
  }
  func.func @transform_9(%arg0: i32, %arg1: i32) -> (i32, i32) {
    %c0_i32 = arith.constant 0 : i32
    %c0_i32_0 = arith.constant 0 : i32
    %c0_i32_1 = arith.constant 0 : i32
    return %c0_i32, %c0_i32_0 : i32, i32
  }
  func.func @transform_10(%arg0: i32, %arg1: i32) -> (i32, i32) {
    %c0_i32 = arith.constant 0 : i32
    %c0_i32_0 = arith.constant 0 : i32
    %c0_i32_1 = arith.constant 0 : i32
    return %c0_i32, %c0_i32_0 : i32, i32
  }
  func.func @transform_11(%arg0: i32, %arg1: i32) -> (i32, i32) {
    %c0_i32 = arith.constant 0 : i32
    %c0_i32_0 = arith.constant 0 : i32
    %c0_i32_1 = arith.constant 0 : i32
    return %c0_i32, %c0_i32_0 : i32, i32
  }
  func.func @transform_12(%arg0: i32, %arg1: i32) -> (i32, i32) {
    %c0_i32 = arith.constant 0 : i32
    %c0_i32_0 = arith.constant 0 : i32
    %c0_i32_1 = arith.constant 0 : i32
    return %c0_i32, %c0_i32_0 : i32, i32
  }
  func.func @transform_13(%arg0: i32, %arg1: i32) -> (i32, i32) {
    %c0_i32 = arith.constant 0 : i32
    %c0_i32_0 = arith.constant 0 : i32
    %c0_i32_1 = arith.constant 0 : i32
    return %c0_i32, %c0_i32_0 : i32, i32
  }
  func.func @transform_14(%arg0: i32, %arg1: i32) -> (i32, i32) {
    %c0_i32 = arith.constant 0 : i32
    %c0_i32_0 = arith.constant 0 : i32
    %c0_i32_1 = arith.constant 0 : i32
    return %c0_i32, %c0_i32_0 : i32, i32
  }
  func.func @transform_15(%arg0: i32, %arg1: i32) -> (i32, i32) {
    %c0_i32 = arith.constant 0 : i32
    %c0_i32_0 = arith.constant 0 : i32
    %c0_i32_1 = arith.constant 0 : i32
    return %c0_i32, %c0_i32_0 : i32, i32
  }
  func.func @transform_16(%arg0: i32, %arg1: i32) -> (i32, i32) {
    %c0_i32 = arith.constant 0 : i32
    %c0_i32_0 = arith.constant 0 : i32
    %c0_i32_1 = arith.constant 0 : i32
    return %c0_i32, %c0_i32_0 : i32, i32
  }
  func.func @transform_17(%arg0: i32, %arg1: i32) -> (i32, i32) {
    %c0_i32 = arith.constant 0 : i32
    %c0_i32_0 = arith.constant 0 : i32
    %c0_i32_1 = arith.constant 0 : i32
    return %c0_i32, %c0_i32_0 : i32, i32
  }
  func.func @transform_18(%arg0: i32, %arg1: i32) -> (i32, i32) {
    %c0_i32 = arith.constant 0 : i32
    %c0_i32_0 = arith.constant 0 : i32
    %c0_i32_1 = arith.constant 0 : i32
    return %c0_i32, %c0_i32_0 : i32, i32
  }
  func.func @transform_19(%arg0: i32, %arg1: i32) -> (i32, i32, i32) {
    %c0_i32 = arith.constant 0 : i32
    %c0_i32_0 = arith.constant 0 : i32
    return %arg1, %arg0, %c0_i32 : i32, i32, i32
  }
}

</mosaic_0001>

<bundles_post_ra>
// kernel: tpu_custom_call.1
= control target key start
LH: loop header
LB: loop body
LE: loop exit
PB: predicated region body
PF: predicated region fallthrough
CT: control target
= control target key end

     0   :  { %s10642_s0 = inlined_call_operand.hbm [shape: bf16[8,32,32], index: 0, kind: input, shape index: {}]   ;;  %s10643_s1 = inlined_call_operand.hbm [shape: f32[32,8,32], index: 1, kind: input, shape index: {}]   ;;  %s10644_s2 = inlined_call_operand.hbm [shape: f32[32,8,32], index: 2, kind: input, shape index: {}]   ;;  %s10645_s3 = inlined_call_operand.vmem [shape: f32[32,8], index: 3, kind: input, shape index: {}]   ;;  %s10646_s4 = inlined_call_operand.vmem [shape: bf16[32,128], index: 4, kind: input, shape index: {}]   ;;  %s10647_s5 = inlined_call_operand.vmem [shape: bf16[32,128], index: 5, kind: input, shape index: {}]   ;;  %s10648_s6 = inlined_call_operand.hbm [shape: bf16[32,128], index: 6, kind: input, shape index: {}]   ;;  %s10649_s7 = inlined_call_operand.hbm [shape: f32[1,128], index: 7, kind: input, shape index: {}]   ;;  %s10650_s8 = inlined_call_operand.hbm [shape: bf16[32,128], index: 8, kind: input, shape index: {}]   ;;  %s10651_s9 = inlined_call_operand.vmem [shape: bf16[32,128], index: 9, kind: input, shape index: {}]   ;;  %s10652_s10 = inlined_call_operand.vmem [shape: f32[1,128], index: 10, kind: input, shape index: {}]   ;;  %s10653_s11 = inlined_call_operand.hbm [shape: bf16[32,128], index: 11, kind: input, shape index: {}]   ;;  %s10654_s12 = inlined_call_operand.hbm [shape: bf16[32,128], index: 12, kind: input, shape index: {}]   ;;  %s10655_s13 = inlined_call_operand.vmem [shape: f32[1,128], index: 13, kind: input, shape index: {}]   ;;  %s10656_s14 = inlined_call_operand.hbm [shape: bf16[32,32], index: 14, kind: input, shape index: {}]   ;;  %s10657_s15 = inlined_call_operand.vmem [shape: f32[1,32], index: 15, kind: input, shape index: {}]   ;;  %s10658_s16 = inlined_call_operand.hbm [shape: bf16[32,128], index: 16, kind: input, shape index: {}]   ;;  %s10659_s17 = inlined_call_operand.hbm [shape: bf16[32,128], index: 17, kind: input, shape index: {}]   ;;  %s10660_s18 = inlined_call_operand.vmem [shape: f32[1,128], index: 18, kind: input, shape index: {}]   ;;  %s10661_s19 = inlined_call_operand.hbm [shape: bf16[8,32,128], index: 19, kind: output, shape index: {}]  }
   0x1   :  { %10695 = sst [smem:[#allocation54_spill]] %s10642_s0 }
   0x2   :  { %10696 = sst [smem:[#allocation55_spill]] %s10643_s1 }
   0x3   :  { %10697 = sst [smem:[#allocation56_spill]] %s10644_s2 }
   0x4   :  { %10698 = sst [smem:[#allocation57_spill]] %s10645_s3 }
   0x5   :  { %10699 = sst [smem:[#allocation58_spill]] %s10646_s4 }
   0x6   :  { %10700 = sst [smem:[#allocation59_spill]] %s10647_s5 }
   0x7   :  { %10701 = sst [smem:[#allocation60_spill]] %s10648_s6 }
   0x8   :  { %10702 = sst [smem:[#allocation61_spill]] %s10649_s7 }
   0x9   :  { %10703 = sst [smem:[#allocation62_spill]] %s10650_s8 }
   0xa   :  { %10704 = sst [smem:[#allocation63_spill]] %s10651_s9 }
   0xb   :  { %10705 = sst [smem:[#allocation64_spill]] %s10652_s10 }
   0xc   :  { %10706 = sst [smem:[#allocation65_spill]] %s10653_s11 }
   0xd   :  { %10707 = sst [smem:[#allocation66_spill]] %s10654_s12 }
   0xe   :  { %10708 = sst [smem:[#allocation67_spill]] %s10655_s13 }
   0xf   :  { %10709 = sst [smem:[#allocation68_spill]] %s10656_s14 }
  0x10   :  { %10710 = sst [smem:[#allocation69_spill]] %s10657_s15 }
  0x11   :  { %10711 = sst [smem:[#allocation70_spill]] %s10660_s18 }
  0x12   :  { %10712 = sst [smem:[#allocation71_spill]] %s10661_s19 }
  0x13   :  { %24 = vsyncpa [#allocation6], 0 }
  0x14   :  { %26 = vsyncpa [#allocation6 + $0x1], 0 }
  0x15   :  { %27 = vsyncpa [#allocation9], 0 }
  0x16   :  { %29 = vsyncpa [#allocation9 + $0x1], 0 }
  0x17   :  { %30 = vsyncpa [#allocation12], 0 }
  0x18   :  { %31 = vsyncpa [#allocation15], 0 }
  0x19   :  { %32 = vsyncpa [#allocation18], 0 }
  0x1a   :  { %33 = vsyncpa [#allocation21], 0 }
  0x1b   :  { %34 = vsyncpa [#allocation7], 0 }
  0x1c   :  { %36 = vsyncpa [#allocation7 + $0x1], 0  ;;  %s8266_s0 = smov 0   ;;  %s8268_s30 = smov 0  }
  0x1d   :  { %s8270_s20 = smov 0   ;;  %s8272_s21 = smov 0  }
  0x1e   :  { %s8274_s1 = smov 0   ;;  %s8276_s22 = smov 0  }
  0x1f   :  { %s8278_s2 = smov 0   ;;  %s8280_s23 = smov 0  }
  0x20   :  { %s8282_s24 = smov 0   ;;  %s8284_s25 = smov 0  }
  0x21   :  { %s8286_s3 = smov 0  }
  0x22 LB: > { %10713 = sst [smem:[#allocation36_spill]] %s8098_s30  ;;  %s8322_s26 = sadd.s32 4294967295, %s8134_s3   ;;  %s8134_s3 = sphi %s8286_s3, %s42_s3   ;;  %s8130_s25 = sphi %s8284_s25, %s10808_s25   ;;  %s8126_s24 = sphi %s8282_s24, %s10807_s24   ;;  %s8122_s23 = sphi %s8280_s23, %s10806_s23   ;;  %s8118_s2 = sphi %s8278_s2, %s10805_s2   ;;  %s8114_s22 = sphi %s8276_s22, %s10804_s22   ;;  %s8110_s1 = sphi %s8274_s1, %s10803_s1   ;;  %s8106_s21 = sphi %s8272_s21, %s10802_s21   ;;  %s8102_s20 = sphi %s8270_s20, %s10801_s20   ;;  %s8098_s30 = sphi %s8268_s30, %s10800_s30   ;;  %s8094_s0 = sphi %s8266_s0, %s10795_s0  }
  0x23   : > { %10714 = sst [smem:[#allocation37_spill]] %s8106_s21  ;;  %s6735_s27 = sadd.s32 4294967294, %s8134_s3  }
  0x24   : > { %10715 = sst [smem:[#allocation38_spill]] %s8118_s2  ;;  %s51_s28 = sadd.s32 1, %s8126_s24 }
  0x25   : > { %10716 = sst [smem:[#allocation39_spill]] %s8122_s23  ;;  %s54_s29 = sadd.s32 1, %s8130_s25 }
  0x26   : > { %10717 = sst [smem:[#allocation40_spill]] %s8322_s26  ;;  %p52_p0 = scmp.ge.s32.totalorder %s51_s28, 2 }
  0x27   : > { %s63_s19 = sadd.s32 1, %s8114_s22  ;;  %p70_p1 = scmp.ne.s32.totalorder %s8114_s22, %s8110_s1 }
  0x28   : > { %p71_p2 = scmp.eq.s32.totalorder %s8134_s3, 0  ;;  %s10810_s28 = smov (%p52_p0, %s51_s28), 0 }
  0x29   : > { %10718 = sst [smem:[#allocation41_spill]] %s10810_s28  ;;  %s10812_s29 = smov (!%p52_p0, %s54_s29), %s8130_s25 }
  0x2a   : > { %s58_s18 = ssub.s32 %s8126_s24, %s10810_s28  ;;  %p8341_p3 = por %p71_p2, %p70_p1 }
  0x2b   : > { %p56_p4 = scmp.ge.s32.totalorder %s10812_s29, 2  ;;  %p10670_p5 = scmp.ne.s32.totalorder %s8110_s1, %s8106_s21 }
  0x2c   : > { %p77_p6 = scmp.eq.s32.totalorder %s8322_s26, 0  ;;  %s89_s13 = sadd.s32 1, %s8102_s20 }
  0x2d   : > { %s10814_s29 = smov (%p56_p4, %s10812_s29), 0  ;;  %p96_p8 = scmp.ne.s32.totalorder %s8102_s20, %s8098_s30 }
  0x2e   : > { %10720 = sst [smem:[#allocation42_spill]] %s10814_s29  ;;  %p8356_p7 = por %p77_p6, %p10670_p5 }
  0x2f   : > { %s59_s10 = ssub.s32 %s8130_s25, %s10814_s29  ;;  %p102_p9 = scmp.ne.s32.totalorder %s8098_s30, %s8094_s0 }
  0x30   : > { %s10721_s28 = scalar_select %p8356_p7, 1, 0 }
  0x31   : > { %s60_s9 = sor.u32 %s59_s10, %s58_s18  ;;  %p87_p10 = scmp.eq.s32.totalorder %s59_s10, 0 }
  0x32   : > { %p61_p11 = scmp.eq.s32.totalorder %s60_s9, 0  ;;  %p8368_p12 = por %p96_p8, %p71_p2 }
  0x33   : > { %s8373_s5 = scalar_select %p87_p10, %s8102_s20, %s89_s13  }
  0x34   : > { %s8376_s2 = scalar_select %p61_p11, %s8114_s22, %s63_s19  }
  0x35   : > { %10723 = sst [smem:[#allocation43_spill]] %s8373_s5  ;;  %p8380_p13 = por %p102_p9, %p77_p6 }
  0x36   : > { %10724 = sst [smem:[#allocation44_spill]] %s8376_s2  ;;  %p495_p0 = scmp.eq.s32.totalorder %s8322_s26, 3 }
  0x37   : > { %s10725_s23 = scalar_select %p8380_p13, 1, 0 }
  0x38   : > { %p501_p4 = scmp.eq.s32.totalorder %s6735_s27, 3  ;;  %p6736_p5 = scmp.ge.s32.totalorder %s8134_s3, 1 }
  0x39   : > { %10726 = sst [smem:[#allocation45_spill]] %s10725_s23  ;;  %p8389_p7 = por %p495_p0, %p70_p1 }
  0x3a   : > { %p508_p2 = scmp.lt.s32.totalorder %s8134_s3, 5  ;;  %p10729_p8 = scmp.ne.s32.totalorder %s8110_s1, %s8106_s21 }
  0x3b   : > { %s10727_s9 = scalar_select %p8389_p7, 1, 0 }
  0x3c   : > { %p8397_p10 = por %p501_p4, %p10729_p8  ;;  %p8401_p11 = pnand %p6736_p5, %p508_p2 }
  0x3d   : > { %10728 = sst [smem:[#allocation46_spill]] %s10727_s9  ;;  %s8136_s27 = smov [#allocation11]  }
  0x3e   : > { %s10730_s10 = scalar_select %p8397_p10, 1, 0 }
  0x3f   : > { %s10733_s6 = sld [smem:[#allocation60_spill]]  ;;  %p7058_p1 = pneg %p8401_p11 }
  0x40   : > { %10731 = sst [smem:[#allocation47_spill]] %s10730_s10  ;;  %s527_s29 = sshll.u32 %s8136_s27, 4  ;;  %s528_s29 = int_to_ptr.vmem [resolvable:$true] %s527_s29 }
  0x41   : > { %p8412_p9 = pnand %p7058_p1, %p77_p6  ;;  %s10735_s8 = sld [smem:[#allocation62_spill]] }
  0x42   : > { %s8137_s18 = smov 64   ;;  %s8138_s19 = smov 4  }
  0x43   : > { %s8139_s27 = smov [#allocation14]   ;;  %s10736_s12 = sld [smem:[#allocation66_spill]] }
  0x44   : > { %s8140_s26 = smov [#allocation17]   ;;  %s8141_s23 = smov [#allocation20]  }
  0x45   : > { %s525_s0 = sshll.u32 %s10733_s6, 4  ;;  %s553_s6 = sshll.u32 %s8139_s27, 4  ;;  %s526_s0 = int_to_ptr.hbm [resolvable:$true] %s525_s0  ;;  %s554_s6 = int_to_ptr.vmem [resolvable:$true] %s553_s6 }
  0x46   : > { %7061 = dma.hbm_to_vmem [thread:$0]  (!%p8412_p9), %s526_s0, 256, %s528_s29, [#allocation12], %s8137_s18, %s8137_s18, %s8138_s19  }
  0x47   : > { %s551_s21 = sshll.u32 %s10735_s8, 4  ;;  %s619_s8 = sshll.u32 %s10658_s16, 4  ;;  %s552_s21 = int_to_ptr.hbm [resolvable:$true] %s551_s21  ;;  %s620_s8 = int_to_ptr.hbm [resolvable:$true] %s619_s8 }
  0x48   : > { %7067 = dma.hbm_to_vmem [thread:$0]  (!%p8412_p9), %s552_s21, 256, %s554_s6, [#allocation15], %s8137_s18, %s8137_s18, %s8138_s19  }
  0x49   : > { %s585_s30 = sshll.u32 %s10736_s12, 4  ;;  %s587_s29 = sshll.u32 %s8140_s26, 4  ;;  %s586_s30 = int_to_ptr.hbm [resolvable:$true] %s585_s30  ;;  %s588_s29 = int_to_ptr.vmem [resolvable:$true] %s587_s29 }
  0x4a   : > { %7073 = dma.hbm_to_vmem [thread:$0]  (!%p8412_p9), %s586_s30, 256, %s588_s29, [#allocation18], %s8137_s18, %s8137_s18, %s8138_s19  }
  0x4b   : > { %s621_s9 = sshll.u32 %s8141_s23, 4  ;;  %s10737_s7 = sld [smem:[#allocation61_spill]]  ;;  %s622_s9 = int_to_ptr.vmem [resolvable:$true] %s621_s9 }
  0x4c   : > { %7079 = dma.hbm_to_vmem [thread:$0]  (!%p8412_p9), %s620_s8, 256, %s622_s9, [#allocation21], %s8137_s18, %s8137_s18, %s8138_s19  }
  0x4d   : > { %s10738_s11 = sld [smem:[#allocation65_spill]]  ;;  %s8142_s10 = smov [#allocation13]  }
  0x4e   : > { %s542_s30 = sshll.u32 %s8142_s10, 4  ;;  %s8143_s29 = smov [#allocation16]   ;;  %s543_s30 = int_to_ptr.vmem [resolvable:$true] %s542_s30 }
  0x4f   : > { %s573_s23 = sshll.u32 %s8143_s29, 4  ;;  %s10739_s14 = sld [smem:[#allocation68_spill]]  ;;  %s574_s23 = int_to_ptr.vmem [resolvable:$true] %s573_s23 }
  0x50   : > { %s633_s21 = sshll.u32 %s10659_s17, 4  ;;  %s8144_s26 = smov [#allocation19]   ;;  %s634_s21 = int_to_ptr.hbm [resolvable:$true] %s633_s21 }
  0x51   : > { %s540_s6 = sshll.u32 %s10737_s7, 4  ;;  %s8145_s10 = smov [#allocation22]   ;;  %s541_s6 = int_to_ptr.hbm [resolvable:$true] %s540_s6 }
  0x52   : > { %7064 = dma.hbm_to_vmem [thread:$0]  (!%p8412_p9), %s541_s6, 16, %s543_s30, [#allocation12]  }
  0x53   : > { %s571_s5 = sshll.u32 %s10738_s11, 4  ;;  %s604_s6 = sshll.u32 %s8144_s26, 4  ;;  %s572_s5 = int_to_ptr.hbm [resolvable:$true] %s571_s5  ;;  %s605_s6 = int_to_ptr.vmem [resolvable:$true] %s604_s6 }
  0x54   : > { %7070 = dma.hbm_to_vmem [thread:$0]  (!%p8412_p9), %s572_s5, 256, %s574_s23, [#allocation15], %s8137_s18, %s8137_s18, %s8138_s19  }
  0x55   : > { %s602_s7 = sshll.u32 %s10739_s14, 4  ;;  %s635_s30 = sshll.u32 %s8145_s10, 4  ;;  %s603_s7 = int_to_ptr.hbm [resolvable:$true] %s602_s7  ;;  %s636_s30 = int_to_ptr.vmem [resolvable:$true] %s635_s30 }
  0x56   : > { %7076 = dma.hbm_to_vmem [thread:$0]  (!%p8412_p9), %s603_s7, 256, %s605_s6, [#allocation18], %s8137_s18, %s8137_s18, %s8138_s19  }
  0x57   : > { %7082 = dma.hbm_to_vmem [thread:$0]  (!%p8412_p9), %s634_s21, 256, %s636_s30, [#allocation21], %s8137_s18, %s8137_s18, %s8138_s19  }
  0x58   : > { %p6745_p5 = scmp.ge.s32.totalorder %s8134_s3, 4 }
  0x5a   : > { %648 = sbr.rel (%p6745_p5) target bundleno = 124 (0x7c), region = 76 }
  0x5f   : > { %s652_s5 = sand.u32 1, %s8114_s22   ;;  %s6748_s29 = sshll.u32 %s8130_s25, 1 }
  0x60   : > { %s6746_s7 = sshll.u32 %s652_s5, 5  ;;  %s6954_s23 = sshll.u32 %s8126_s24, 4 }
  0x61   : > { %s662_s0 = sadd.s32 %s6954_s23, %s6748_s29  ;;  %s656_s27 = scalar_lea.vmem [#allocation5], %s6746_s7 }
  0x62   : > { %s6750_s2 = sshll.u32 %s662_s0, 2  ;;  %s679_s18 = sshll.u32 %s656_s27, 4  ;;  %s680_s18 = int_to_ptr.vmem [resolvable:$true] %s679_s18 }
  0x63   : > { %s10740_s9 = sld [smem:[#allocation54_spill]]  ;;  %s8146_s6 = smov 256  }
  0x64   : > { %s7021_s26 = scalar_select %p8341_p3, [#allocation0], [#allocation28] }
  0x65   : > { %7022 = sst [smem:[#allocation25]] (%p8341_p3), %s8146_s6  ;;  %s8147_s29 = smov 128  }
  0x66   : > { %s669_s10 = sld [smem:[%s7021_s26]]   ;;  %s8148_s7 = smov 2  }
  0x67   : > { %7023 = sst [smem:[#allocation25 + $0x1]] (%p8341_p3), %s8147_s29  ;;  %s8149_s23 = smov 64  }
  0x68   : > { %7024 = sst [smem:[#allocation25 + $0x2]] (%p8341_p3), %s8148_s7  ;;  %s653_s19 = scalar_lea.sflag [#allocation6], %s652_s5 }
  0x69   : > { %s664_s21 = scalar_lea.hbm %s10740_s9, %s6750_s2  ;;  %7025 = sst [smem:[#allocation25 + $0x3]] (%p8341_p3), %s8149_s23 }
  0x6a   : > { %s677_s30 = sshll.u32 %s664_s21, 4  ;;  %7026 = sst [smem:[#allocation25 + $0x4]] (%p8341_p3), %s8149_s23  ;;  %s678_s30 = int_to_ptr.hbm [resolvable:$true] %s677_s30 }
  0x6b   : > { %s8150_s2 = smov 4   ;;  %s8151_s8 = smov [#allocation24]  }
  0x6c   : > { %s6751_s0 = sshll.u32 %s669_s10, 26  ;;  %7027 = sst [smem:[#allocation25 + $0x5]] (%p8341_p3), %s8150_s2 }
  0x6d   : > { %s6752_s27 = sadd.s32 134217728, %s6751_s0  ;;  %s702_s9 = sand.u32 1, %s8134_s3  }
  0x6e   : > { %7028 = dma.general (%p8341_p3), %s678_s30, 512, %s680_s18, %s653_s19, %s8151_s8, [#allocation25], %s6752_s27, 0  }
  0x6f   : > { %s704_s21 = sand.u32 1, %s8102_s20   ;;  %s6955_s6 = sshll.u32 %s8130_s25, 7 }
  0x70   : > { %s6753_s26 = sshll.u32 %s704_s21, 7  ;;  %s10741_s23 = sld [smem:[#allocation55_spill]] }
  0x71   : > { %s706_s11 = scalar_lea.vmem [#allocation8], %s6753_s26  ;;  %s703_s15 = scalar_lea.sflag [#allocation9], %s702_s9 }
  0x72   : > { %s714_s2 = sshll.u32 %s706_s11, 4  ;;  %s8152_s5 = smov 128   ;;  %s715_s2 = int_to_ptr.vmem [resolvable:$true] %s714_s2 }
  0x73   : > { %s8153_s18 = smov 8   ;;  %s10742_s19 = sld [smem:[#allocation56_spill]] }
  0x74   : > { %s728_s21 = scalar_lea.vmem [#allocation10], %s6753_s26 }
  0x75   : > { %s736_s12 = sshll.u32 %s728_s21, 4  ;;  %s737_s12 = int_to_ptr.vmem [resolvable:$true] %s736_s12 }
  0x76   : > { %s711_s10 = scalar_lea.hbm %s10741_s23, %s6955_s6 }
  0x77   : > { %s712_s0 = sshll.u32 %s711_s10, 4  ;;  %s713_s0 = int_to_ptr.hbm [resolvable:$true] %s712_s0 }
  0x78   : > { %7029 = dma.hbm_to_vmem [thread:$0]  (%p8368_p12), %s713_s0, 2048, %s715_s2, %s703_s15, %s8152_s5, %s8152_s5, %s8153_s18  }
  0x79   : > { %s733_s8 = scalar_lea.hbm %s10742_s19, %s6955_s6 }
  0x7a   : > { %s734_s14 = sshll.u32 %s733_s8, 4  ;;  %s735_s14 = int_to_ptr.hbm [resolvable:$true] %s734_s14 }
  0x7b   : > { %7030 = dma.hbm_to_vmem [thread:$0]  (%p8368_p12), %s735_s14, 2048, %s737_s12, %s703_s15, %s8152_s5, %s8152_s5, %s8153_s18  }
  0x7c PF: > { %757 = sbr.rel (%p8401_p11) target bundleno = 11764 (0x2df4), region = 96 }
  0x81   : > { %s8513_s11 = sand.u32 1, %s8110_s1   ;;  %p10743_p3 = scmp.ne.s32.totalorder %s10721_s28, 0 }
  0x82   : > { %s6760_s9 = sshll.u32 %s8513_s11, 5  ;;  %s760_s29 = scalar_lea.sflag [#allocation6], %s8513_s11 }
  0x83   : > { %s8517_s6 = scalar_lea.vmem [#allocation5], %s6760_s9 }
  0x84   : > { %8065 = dma.done.wait (%p10743_p3), %s760_s29, 512  }
  0x85   : > { %8067 = vsyncadd (%p10743_p3), %s760_s29, 4294966784  ;;  %s10744_s4 = sld [smem:[#allocation40_spill]] }
  0x86   : > { %s10745_s12 = sld [smem:[#allocation36_spill]] }
  0x8b   : > { %s769_s13 = sand.u32 1, %s10744_s4  }
  0x8c   : > { %s771_s26 = sand.u32 1, %s10745_s12   ;;  %s770_s23 = scalar_lea.sflag [#allocation9], %s769_s13 }
  0x8d   : > { %s6761_s7 = sshll.u32 %s771_s26, 7 }
  0x8e   : > { %s8525_s10 = scalar_lea.vmem [#allocation8], %s6761_s7 }
  0x8f   : > { %8069 = dma.done.wait (%p8380_p13), %s770_s23, 4096  }
  0x90   : > { %8071 = vsyncadd (%p8380_p13), %s770_s23, 4294963200  ;;  %s8531_s2 = scalar_lea.vmem [#allocation10], %s6761_s7 }
  0x91   : > { %8073 = dma.done.wait (%p77_p6), [#allocation12], 272  }
  0x92   : > { %8075 = vsyncadd (%p77_p6), [#allocation12], 4294967024 }
  0x93   : > { %8077 = dma.done.wait (%p77_p6), [#allocation15], 512  }
  0x94   : > { %8079 = vsyncadd (%p77_p6), [#allocation15], 4294966784 }
  0x95   : > { %8081 = dma.done.wait (%p77_p6), [#allocation18], 512  }
  0x96   : > { %8083 = vsyncadd (%p77_p6), [#allocation18], 4294966784 }
  0x97   : > { %8085 = dma.done.wait (%p77_p6), [#allocation21], 512  }
  0x98   : > { %8087 = vsyncadd (%p77_p6), [#allocation21], 4294966784  ;;  %s10747_s28 = sld [smem:[#allocation39_spill]]  ;;  %s8559_s8 = scalar_lea.vmem [#allocation23], %s6760_s9 }
  0x99   : > { %s10748_s27 = sld [smem:[#allocation57_spill]] }
  0x9a   : > { %s10749_s21 = sld [smem:[#allocation38_spill]] }
  0x9e   : > { %s8550_s0 = sshll.u32 %s10747_s28, 1 }
  0x9f   : > { %p899_p12 = scmp.lt.s32.totalorder %s8550_s0, 3 }
  0xa0   : > { %p6774_p13 = scmp.ne.s32.totalorder %s10749_s21, 0 }
  0xa1   : > { %s900_s15 = scalar_select %p899_p12, %s8550_s0, 3 }
  0xa2   : > { %910 = sbr.rel (%p6774_p13) target bundleno = 182 (0xb6), region = 144 }
  0xa3   : > { %s6773_s5 = sshll.u32 %s900_s15, 3 }
  0xa4   : > { %s8557_s19 = scalar_lea.vmem %s10748_s27, %s6773_s5 }
  0xa7   : > { %vm911_vm0 = vcmask 261120   ;;  %v8154_v0 = vmov 0.0  }
  0xa8   : > { %912 = vst.msk [vmem:[#allocation2] sm:$0xff] %vm911_vm0, %v8154_v0 }
  0xa9   : > { %913 = vst.msk [vmem:[#allocation2 + $0x8] sm:$0xff] %vm911_vm0, %v8154_v0 }
  0xaa   : > { %914 = vst.msk [vmem:[#allocation2 + $0x10] sm:$0xff] %vm911_vm0, %v8154_v0 }
  0xab   : > { %915 = vst.msk [vmem:[#allocation2 + $0x18] sm:$0xff] %vm911_vm0, %v8154_v0 }
  0xac   : > { %916 = vst.msk [vmem:[#allocation2 + $0x20] sm:$0xff] %vm911_vm0, %v8154_v0 }
  0xad   : > { %917 = vst.msk [vmem:[#allocation2 + $0x28] sm:$0xff] %vm911_vm0, %v8154_v0 }
  0xae   : > { %918 = vst.msk [vmem:[#allocation3] sm:$0xff] %vm911_vm0, %v8154_v0 }
  0xaf   : > { %919 = vst.msk [vmem:[#allocation3 + $0x8] sm:$0xff] %vm911_vm0, %v8154_v0 }
  0xb0   : > { %920 = vst.msk [vmem:[#allocation3 + $0x10] sm:$0xff] %vm911_vm0, %v8154_v0 }
  0xb1   : > { %921 = vst.msk [vmem:[#allocation3 + $0x18] sm:$0xff] %vm911_vm0, %v8154_v0 }
  0xb2   : > { %922 = vst.msk [vmem:[#allocation3 + $0x20] sm:$0xff] %vm911_vm0, %v8154_v0 }
  0xb3   : > { %923 = vst.msk [vmem:[#allocation3 + $0x28] sm:$0xff] %vm911_vm0, %v8154_v0 }
  0xb4   : > { %924 = vst.msk [vmem:[#allocation4] sm:$0xff] %vm911_vm0, %v8154_v0 }
  0xb5   : > { %925 = vst.msk [vmem:[#allocation4 + $0x8] sm:$0xff] %vm911_vm0, %v8154_v0 }
  0xb6 PF: > { %s10750_s4 = sld [smem:[#allocation59_spill]]  ;;  %v6962_v3 = vld [vmem:[#allocation11 + $0x8] sm:$0xff]  ;;  %v6961_v6 = vld [vmem:[#allocation11] sm:$0xff]  ;;  %v1089_v9 = vld [vmem:[#allocation2] sm:$0xff]  ;;  %s8155_s15 = smov 32   ;;  %vm1037_vm1 = vcmask 261120  }
  0xb7   : > { %s10751_s13 = sld [smem:[#allocation58_spill]]  ;;  %1113 = vmatpush.bf16.msra.mxu2 %v6962_v3  ;;  %v1090_v10 = vld [vmem:[#allocation2 + $0x8] sm:$0xff]  ;;  %v1165_v11 = vld [vmem:[#allocation3] sm:$0xff]  ;;  %v1166_v15 = vld [vmem:[#allocation3 + $0x8] sm:$0xff]  ;;  %s8156_s29 = smov 64  }
  0xb8   : > { %v6977_v12 = vld [vmem:[%s8517_s6] sm:$0xff]  ;;  %1169 = vrot.lane.b32.xlu1 %v1165_v11, %s8155_s15  ;;  %v1091_v14 = vpack.c.bf16 %v1090_v10, %v1089_v9  ;;  %v7228_v19 = vld [vmem:[#allocation13] ss:$0 sm:$0xff]  ;;  %s10752_s30 = sld [smem:[#allocation63_spill]] }
  0xb9   : > { %s10754_s26 = sld [smem:[#allocation64_spill]] }
  0xba   : > { %s10755_s28 = sld [smem:[#allocation67_spill]] }
  0xbb   : > { %v1022_v7 = vld [vmem:[#allocation4] sm:$0xff]  ;;  %1114 = vmatpush.bf16.msra.mxu2 %v6961_v6  ;;  %s10756_s18 = sld [smem:[#allocation69_spill]] }
  0xbc   : > { %v8565_v1 = vld [vmem:[%s10750_s4 + $0x8] sm:$0xff]  ;;  %v8575_v4 = vld [vmem:[%s10750_s4] sm:$0xff] }
  0xbd   : > { %v8570_v2 = vld [vmem:[%s10751_s13 + $0x8] sm:$0xff]  ;;  %v8580_v5 = vld [vmem:[%s10751_s13] sm:$0xff]  ;;  %1047 = vmatpush.bf16.msra.mxu0 %v8565_v1 }
  0xbe   : > { %1081 = vmatpush.bf16.msra.mxu1 %v8570_v2  ;;  %v1023_v8 = vld [vmem:[#allocation4 + $0x8] sm:$0xff]  ;;  %6805 = vmatmul.msk.bf16.vlgmr.msra.gmra.mxu2 %vm1037_vm1, %v1091_v14  ;;  %s10753_s27 = smov %s10752_s30  ;;  %v1231_v14 = vld [vmem:[#allocation2 + $0x10] sm:$0xff] }
  0xbf   : > { %v1024_v13 = vpack.c.bf16 %v1023_v8, %v1022_v7  ;;  %v8607_v11 = vld [vmem:[%s10752_s30 + $0x8] sm:$0xff]  ;;  %s8158_s30 = smov 96  }
  0xc0   : > { %1171 = vrot.lane.b32.xlu1 %v1166_v15, %s8155_s15  ;;  %1255 = vmatpush.bf16.msra.mxu3 %v8607_v11  ;;  %v1232_v15 = vld [vmem:[#allocation2 + $0x18] sm:$0xff] }
  0xc1   : > { %1048 = vmatpush.bf16.msra.mxu0 %v8575_v4 }
  0xc2   : > { %1082 = vmatpush.bf16.msra.mxu1 %v8580_v5 }
  0xc4   : > { %6783 = vmatmul.msk.bf16.vlgmr.msra.gmra.mxu0 %vm1037_vm1, %v1024_v13  ;;  %v8614_v13 = vld [vmem:[%s10753_s27] sm:$0xff] }
  0xc5   : > { %6796 = vmatmul.msk.bf16.vlgmr.msra.gmra.mxu1 %vm1037_vm1, %v6977_v12  ;;  %v8609_v12 = vld [vmem:[#allocation14 + $0x8] sm:$0xff]  ;;  %1256 = vmatpush.bf16.msra.mxu3 %v8614_v13 }
  0xc6   : > { %1287 = vmatpush.bf16.msrb.mxu0 %v8609_v12 }
 0x12a   : > { %v1170_v61 = vpop.permute.xlu1 %1169 }
 0x132   : > { %v1172_v3 = vpop.permute.xlu1 %1171 }
 0x141   : > { %v1050_v16 = vpop.f32.mrf.mxu0  ;;  %v1116_v20 = vpop.f32.mrf.mxu2 }
 0x142   : > { %v1084_v17 = vpop.f32.mrf.mxu1 }
 0x143   : > { %v1085_v18 = vadd.f32 %v1084_v17, %v1050_v16  ;;  %v8618_v16 = vld [vmem:[#allocation14] sm:$0xff]  ;;  %v1233_v17 = vpack.c.bf16 %v1232_v15, %v1231_v14 }
 0x144   : > { %1288 = vmatpush.bf16.msrb.mxu0 %v8618_v16 }
 0x145   : > { %v1121_v21 = vadd.f32 %v1116_v20, %v1085_v18  ;;  %6816 = vmatmul.msk.bf16.vlgmr.msra.gmra.mxu3 %vm1037_vm1, %v1233_v17 }
 0x147   : > { %v1123_v22 = vadd.f32 %v7228_v19, %v1121_v21 }
 0x149   : > { %v1052_v23 = vpop.f32.mrf.mxu0  ;;  %7233 = vtanh.f32 %v1123_v22  ;;  %v1118_v26 = vpop.f32.mrf.mxu2  ;;  %v6806_v31 = vmul.f32 -1.442695, %v1123_v22 }
 0x14a   : > { %v1086_v24 = vpop.f32.mrf.mxu1 }
 0x14b   : > { %v1087_v25 = vadd.f32 %v1086_v24, %v1052_v23  ;;  %v1338_v23 = vld [vmem:[#allocation3 + $0x10] sm:$0xff] }
 0x14d   : > { %v1122_v27 = vadd.f32 %v1118_v26, %v1087_v25  ;;  %v7229_v26 = vld [vmem:[%s10754_s26] ss:$0 sm:$0xff] }
 0x14f   : > { %v7234_v28 = vpop.eup %7233  ;;  %v1124_v29 = vadd.f32 %v7228_v19, %v1122_v27 }
 0x150   : > { %1179 = vrot.lane.b32.xlu0 %v7234_v28, %s8155_s15 }
 0x151   : > { %7235 = vtanh.f32 %v1124_v29  ;;  %v6807_v32 = vmul.f32 -1.442695, %v1124_v29 }
 0x152   : > { %7237 = vpow2.f32 %v6806_v31 }
 0x153   : > { %7239 = vpow2.f32 %v6807_v32 }
 0x157   : > { %v7236_v30 = vpop.eup %7235 }
 0x158   : > { %1181 = vrot.lane.b32.xlu0 %v7236_v30, %s8155_s15  ;;  %v7238_v33 = vpop.eup %7237 }
 0x159   : > { %v1131_v34 = vadd.f32 1.0, %v7238_v33  ;;  %v7240_v35 = vpop.eup %7239 }
 0x15a   : > { %v1132_v36 = vadd.f32 1.0, %v7240_v35  ;;  %v1339_v35 = vld [vmem:[#allocation3 + $0x18] sm:$0xff] }
 0x15b   : > { %7241 = vrcp.f32 %v1131_v34  ;;  %v1144_v45 = vand.u32 2147483648, %v1131_v34  ;;  %vm1138_vm3 = vweird.f32 %v1131_v34  ;;  %v1142_v46 = vand.u32 2147483647, %v1131_v34 }
 0x15c   : > { %7243 = vrcp.f32 %v1132_v36  ;;  %v1159_v54 = vand.u32 2147483648, %v1132_v36  ;;  %vm1153_vm7 = vweird.f32 %v1132_v36  ;;  %v1157_v55 = vand.u32 2147483647, %v1132_v36 }
 0x15d   : > { %v1145_v49 = vor.u32 1.1754944e-38, %v1144_v45  ;;  %vm1143_vm5 = vcmp.eq.f32.partialorder %v1142_v46, 8.507059e+37 }
 0x15e   : > { %v1160_v57 = vor.u32 1.1754944e-38, %v1159_v54  ;;  %vm1158_vm9 = vcmp.eq.f32.partialorder %v1157_v55, 8.507059e+37 }
 0x161   : > { %v7242_v37 = vpop.eup %7241 }
 0x162   : > { %v1134_v38 = vmul.f32 %v7242_v37, %v1131_v34  ;;  %v7244_v40 = vpop.eup %7243  ;;  %vm1139_vm2 = vweird.f32 %v7242_v37 }
 0x163   : > { %v1149_v42 = vmul.f32 %v7244_v40, %v1132_v36  ;;  %vm1140_vm4 = vmor %vm1138_vm3, %vm1139_vm2  ;;  %vm1154_vm6 = vweird.f32 %v7244_v40 }
 0x164   : > { %v1135_v39 = vsub.f32 1.0, %v1134_v38  ;;  %vm1155_vm8 = vmor %vm1153_vm7, %vm1154_vm6 }
 0x165   : > { %v1150_v44 = vsub.f32 1.0, %v1149_v42 }
 0x166   : > { %v1136_v41 = vmul.f32 %v7242_v37, %v1135_v39 }
 0x167   : > { %v1151_v48 = vmul.f32 %v7244_v40, %v1150_v44 }
 0x168   : > { %v1137_v43 = vadd.f32 %v7242_v37, %v1136_v41 }
 0x169   : > { %v1152_v52 = vadd.f32 %v7244_v40, %v1151_v48 }
 0x16a   : > { %v1141_v47 = vsel %vm1140_vm4, %v7242_v37, %v1137_v43 }
 0x16b   : > { %v1146_v50 = vsel %vm1143_vm5, %v1145_v49, %v1141_v47  ;;  %v1156_v56 = vsel %vm1155_vm8, %v7244_v40, %v1152_v52 }
 0x16c   : > { %v1161_v58 = vsel %vm1158_vm9, %v1160_v57, %v1156_v56  ;;  %v1175_v62 = vmul.f32 %v1170_v61, %v1146_v50 }
 0x16d   : > { %v1176_v6 = vmul.f32 %v1172_v3, %v1161_v58 }
 0x1c2   : > { %v1180_v51 = vpop.permute.xlu0 %1179 }
 0x1c3   : > { %v1185_v53 = vmul.f32 %v1180_v51, %v1146_v50 }
 0x1c5   : > { %1189 = vrot.lane.b32.xlu2 %v1185_v53, %s8155_s15 }
 0x1c8   : > { %v1258_v25 = vpop.f32.mrf.mxu3 }
 0x1ca   : > { %v1182_v59 = vpop.permute.xlu0 %1181 }
 0x1cb   : > { %v1186_v60 = vmul.f32 %v1182_v59, %v1161_v58 }
 0x1cd   : > { %1191 = vrot.lane.b32.xlu2 %v1186_v60, %s8155_s15 }
 0x1d0   : > { %v1260_v30 = vpop.f32.mrf.mxu3 }
 0x21f   : > { %v1190_v63 = vpop.permute.xlu2 %1189 }
 0x220   : > { %v8596_v0 = vadd.f32 %v1190_v63, %v1175_v62 }
 0x222   : > { %7245 = vtanh.f32 %v8596_v0 }
 0x227   : > { %v1192_v7 = vpop.permute.xlu2 %1191 }
 0x228   : > { %v7246_v8 = vpop.eup %7245  ;;  %v8599_v9 = vadd.f32 %v1192_v7, %v1176_v6 }
 0x229   : > { %1201 = vrot.lane.b32.xlu0 %v7246_v8, %s8155_s15 }
 0x22a   : > { %7247 = vtanh.f32 %v8599_v9 }
 0x230   : > { %v7248_v10 = vpop.eup %7247 }
 0x231   : > { %1203 = vrot.lane.b32.xlu1 %v7248_v10, %s8155_s15 }
 0x29b   : > { %v1202_v18 = vpop.permute.xlu0 %1201 }
 0x29c   : > { %v8623_v20 = vmul.f32 %v1202_v18, %v1146_v50 }
 0x2a3   : > { %v1204_v19 = vpop.permute.xlu1 %1203 }
 0x2a4   : > { %v8625_v21 = vmul.f32 %v1204_v19, %v1161_v58 }
 0x2a6   : > { %v1229_v22 = vpack.c.bf16 %v8625_v21, %v8623_v20 }
 0x2a8   : > { %1264 = vrot.lane.b32.xlu2 %v1229_v22, %s8156_s29 }
 0x2b0   : > { %1342 = vrot.lane.b32.xlu2 %v1338_v23, %s8155_s15 }
 0x302   : > { %v1265_v24 = vpop.permute.xlu2 %1264 }
 0x303   : > { %6825 = vmatmul.msk.bf16.vlgmr.msrb.gmra.mxu0 %vm1037_vm1, %v1265_v24 }
 0x30a   : > { %v1343_v8 = vpop.permute.xlu2 %1342 }
 0x380   : > { %v1290_v27 = vpop.f32.mrf.mxu0 }
 0x381   : > { %v1291_v28 = vadd.f32 %v1290_v27, %v1258_v25  ;;  %v6968_v25 = vld [vmem:[#allocation16 + $0x8] sm:$0xff]  ;;  %v6967_v27 = vld [vmem:[#allocation16] sm:$0xff] }
 0x382   : > { %1460 = vmatpush.bf16.msrb.mxu2 %v6968_v25 }
 0x383   : > { %v1295_v29 = vadd.f32 %v7229_v26, %v1291_v28  ;;  %v8651_v28 = vld [vmem:[#allocation17] sm:$0xff] }
 0x385   : > { %7249 = vtanh.f32 %v1295_v29  ;;  %v6826_v37 = vmul.f32 -1.442695, %v1295_v29  ;;  %v1404_v29 = vld [vmem:[#allocation2 + $0x20] sm:$0xff] }
 0x386   : > { %1461 = vmatpush.bf16.msrb.mxu2 %v6967_v27 }
 0x388   : > { %v1292_v31 = vpop.f32.mrf.mxu0 }
 0x389   : > { %v1293_v32 = vadd.f32 %v1292_v31, %v1260_v30  ;;  %v1405_v30 = vld [vmem:[#allocation2 + $0x28] sm:$0xff] }
 0x38a   : > { %v1406_v31 = vpack.c.bf16 %v1405_v30, %v1404_v29  ;;  %2595 = vmatpush.bf16.msra.mxu2 %v8565_v1 }
 0x38b   : > { %v7250_v33 = vpop.eup %7249  ;;  %v1296_v34 = vadd.f32 %v7229_v26, %v1293_v32  ;;  %v8648_v26 = vld [vmem:[#allocation17 + $0x8] sm:$0xff] }
 0x38c   : > { %1352 = vrot.lane.b32.xlu0 %v7250_v33, %s8155_s15  ;;  %1428 = vmatpush.bf16.msrb.mxu1 %v8648_v26 }
 0x38d   : > { %7251 = vtanh.f32 %v1296_v34  ;;  %v6827_v38 = vmul.f32 -1.442695, %v1296_v34 }
 0x38e   : > { %7253 = vpow2.f32 %v6826_v37  ;;  %2596 = vmatpush.bf16.msra.mxu2 %v8575_v4  ;;  %v1511_v37 = vld [vmem:[#allocation3 + $0x20] sm:$0xff]  ;;  %v7230_v4 = vld [vmem:[%s10755_s28] ss:$0 sm:$0xff] }
 0x38f   : > { %7255 = vpow2.f32 %v6827_v38 }
 0x390   : > { %1429 = vmatpush.bf16.msrb.mxu1 %v8651_v28 }
 0x393   : > { %v7252_v36 = vpop.eup %7251  ;;  %6836 = vmatmul.msk.bf16.vlgmr.msrb.gmra.mxu1 %vm1037_vm1, %v1406_v31 }
 0x394   : > { %1354 = vrot.lane.b32.xlu1 %v7252_v36, %s8155_s15  ;;  %1344 = vrot.lane.b32.xlu0 %v1339_v35, %s8155_s15  ;;  %v7254_v39 = vpop.eup %7253 }
 0x395   : > { %v1303_v40 = vadd.f32 1.0, %v7254_v39  ;;  %v7256_v41 = vpop.eup %7255 }
 0x396   : > { %v1304_v42 = vadd.f32 1.0, %v7256_v41 }
 0x397   : > { %7257 = vrcp.f32 %v1303_v40  ;;  %v1316_v51 = vand.u32 2147483648, %v1303_v40  ;;  %vm1310_vm11 = vweird.f32 %v1303_v40  ;;  %v1314_v52 = vand.u32 2147483647, %v1303_v40 }
 0x398   : > { %7259 = vrcp.f32 %v1304_v42  ;;  %v1331_v60 = vand.u32 2147483648, %v1304_v42  ;;  %vm1325_vm15 = vweird.f32 %v1304_v42  ;;  %v1329_v61 = vand.u32 2147483647, %v1304_v42 }
 0x399   : > { %v1317_v55 = vor.u32 1.1754944e-38, %v1316_v51  ;;  %vm1315_vm13 = vcmp.eq.f32.partialorder %v1314_v52, 8.507059e+37 }
 0x39a   : > { %v1332_v63 = vor.u32 1.1754944e-38, %v1331_v60  ;;  %vm1330_vm2 = vcmp.eq.f32.partialorder %v1329_v61, 8.507059e+37 }
 0x39d   : > { %v7258_v43 = vpop.eup %7257 }
 0x39e   : > { %v1306_v44 = vmul.f32 %v7258_v43, %v1303_v40  ;;  %v7260_v46 = vpop.eup %7259  ;;  %vm1311_vm10 = vweird.f32 %v7258_v43 }
 0x39f   : > { %v1321_v48 = vmul.f32 %v7260_v46, %v1304_v42  ;;  %vm1312_vm12 = vmor %vm1310_vm11, %vm1311_vm10  ;;  %vm1326_vm14 = vweird.f32 %v7260_v46  ;;  %vm1948_vm11 = vcmask 1041409  }
 0x3a0   : > { %v1307_v45 = vsub.f32 1.0, %v1306_v44  ;;  %vm1327_vm0 = vmor %vm1325_vm15, %vm1326_vm14  ;;  %vm1954_vm14 = vcmask 1044484   ;;  %vm1956_vm15 = vcmask 1045509  }
 0x3a1   : > { %v1322_v50 = vsub.f32 1.0, %v1321_v48 }
 0x3a2   : > { %v1308_v47 = vmul.f32 %v7258_v43, %v1307_v45 }
 0x3a3   : > { %v1323_v54 = vmul.f32 %v7260_v46, %v1322_v50 }
 0x3a4   : > { %v1309_v49 = vadd.f32 %v7258_v43, %v1308_v47 }
 0x3a5   : > { %v1324_v59 = vadd.f32 %v7260_v46, %v1323_v54 }
 0x3a6   : > { %v1313_v53 = vsel %vm1312_vm12, %v7258_v43, %v1309_v49  ;;  %vm1950_vm12 = vcmask 1042434  }
 0x3a7   : > { %v1318_v56 = vsel %vm1315_vm13, %v1317_v55, %v1313_v53  ;;  %v1328_v62 = vsel %vm1327_vm0, %v7260_v46, %v1324_v59  ;;  %vm1952_vm13 = vcmask 1043459   ;;  %vm1958_vm0 = vcmask 1046534  }
 0x3a8   : > { %v1333_v6 = vsel %vm1330_vm2, %v1332_v63, %v1328_v62  ;;  %v1348_v19 = vmul.f32 %v1343_v8, %v1318_v56  ;;  %vm1960_vm2 = vcmask 1047559  }
 0x3fe   : > { %v1353_v57 = vpop.permute.xlu0 %1352 }
 0x3ff   : > { %v1358_v58 = vmul.f32 %v1353_v57, %v1318_v56 }
 0x401   : > { %1362 = vrot.lane.b32.xlu1 %v1358_v58, %s8155_s15 }
 0x406   : > { %v1355_v3 = vpop.permute.xlu1 %1354  ;;  %v1345_v10 = vpop.permute.xlu0 %1344 }
 0x407   : > { %v1359_v7 = vmul.f32 %v1355_v3, %v1333_v6  ;;  %v1349_v14 = vmul.f32 %v1345_v10, %v1333_v6 }
 0x409   : > { %1364 = vrot.lane.b32.xlu2 %v1359_v7, %s8155_s15 }
 0x410   : > { %v1431_v1 = vpop.f32.mrf.mxu1 }
 0x418   : > { %v1433_v42 = vpop.f32.mrf.mxu1 }
 0x463   : > { %v1365_v15 = vpop.permute.xlu2 %1364 }
 0x464   : > { %v8640_v17 = vadd.f32 %v1365_v15, %v1349_v14 }
 0x466   : > { %7261 = vtanh.f32 %v8640_v17 }
 0x46c   : > { %v7262_v18 = vpop.eup %7261 }
 0x46d   : > { %1376 = vrot.lane.b32.xlu1 %v7262_v18, %s8155_s15 }
 0x473   : > { %v1363_v22 = vpop.permute.xlu1 %1362 }
 0x474   : > { %v8644_v23 = vadd.f32 %v1363_v22, %v1348_v19 }
 0x476   : > { %7263 = vtanh.f32 %v8644_v23 }
 0x47c   : > { %v7264_v24 = vpop.eup %7263 }
 0x47d   : > { %1374 = vrot.lane.b32.xlu0 %v7264_v24, %s8155_s15 }
 0x4df   : > { %v1377_v32 = vpop.permute.xlu1 %1376 }
 0x4e0   : > { %v8657_v34 = vmul.f32 %v1377_v32, %v1333_v6 }
 0x4ef   : > { %v1375_v33 = vpop.permute.xlu0 %1374 }
 0x4f0   : > { %v8659_v35 = vmul.f32 %v1375_v33, %v1318_v56 }
 0x4f2   : > { %v1402_v36 = vpack.c.bf16 %v8657_v34, %v8659_v35 }
 0x4f4   : > { %1437 = vrot.lane.b32.xlu2 %v1402_v36, %s8156_s29 }
 0x4fc   : > { %1515 = vrot.lane.b32.xlu2 %v1511_v37, %s8155_s15 }
 0x54e   : > { %v1438_v38 = vpop.permute.xlu2 %1437 }
 0x54f   : > { %6845 = vmatmul.msk.bf16.vlgmr.msrb.gmra.mxu2 %vm1037_vm1, %v1438_v38 }
 0x550   : > { %2786 = vmatpush.bf16.msrb.mxu2 %v8609_v12  ;;  %v1512_v12 = vld [vmem:[#allocation3 + $0x28] sm:$0xff] }
 0x554   : > { %2787 = vmatpush.bf16.msrb.mxu2 %v8618_v16 }
 0x556   : > { %v1516_v29 = vpop.permute.xlu2 %1515 }
 0x5d2   : > { %v1463_v39 = vpop.f32.mrf.mxu2 }
 0x5d3   : > { %v1464_v40 = vadd.f32 %v1463_v39, %v1431_v1  ;;  %v6972_v39 = vld [vmem:[#allocation19 + $0x8] sm:$0xff] }
 0x5d4   : > { %1600 = vmatpush.bf16.msrb.mxu3 %v6972_v39 }
 0x5d5   : > { %v1468_v41 = vadd.f32 %v7230_v4, %v1464_v40  ;;  %v6974_v40 = vld [vmem:[#allocation20 + $0x8] sm:$0xff] }
 0x5d6   : > { %2566 = vmatpush.bf16.msra.mxu1 %v6974_v40  ;;  %v933_v40 = vld [vmem:[%s8525_s10 + $0x38] sm:$0xff] }
 0x5d7   : > { %7265 = vtanh.f32 %v1468_v41  ;;  %v6846_v16 = vmul.f32 -1.442695, %v1468_v41  ;;  %v6971_v41 = vld [vmem:[#allocation19] sm:$0xff] }
 0x5d8   : > { %1601 = vmatpush.bf16.msrb.mxu3 %v6971_v41 }
 0x5da   : > { %v1465_v43 = vpop.f32.mrf.mxu2 }
 0x5db   : > { %v1466_v44 = vadd.f32 %v1465_v43, %v1433_v42  ;;  %v6973_v42 = vld [vmem:[#allocation20] sm:$0xff] }
 0x5dc   : > { %2567 = vmatpush.bf16.msra.mxu1 %v6973_v42  ;;  %2617 = vmatpush.bf16.msra.mxu3 %v8570_v2 }
 0x5dd   : > { %v7266_v45 = vpop.eup %7265  ;;  %v1469_v46 = vadd.f32 %v7230_v4, %v1466_v44 }
 0x5de   : > { %1525 = vrot.lane.b32.xlu0 %v7266_v45, %s8155_s15 }
 0x5df   : > { %7267 = vtanh.f32 %v1469_v46  ;;  %v6847_v48 = vmul.f32 -1.442695, %v1469_v46 }
 0x5e0   : > { %7269 = vpow2.f32 %v6846_v16  ;;  %2766 = vmatpush.bf16.msrb.mxu1 %v8607_v11  ;;  %2618 = vmatpush.bf16.msra.mxu3 %v8580_v5  ;;  %v959_v11 = vld [vmem:[%s8557_s19 + $0x8] sm:$0xff]  ;;  %v958_v5 = vld [vmem:[%s8557_s19] sm:$0xff]  ;;  %s10763_s19 = sld [smem:[#allocation70_spill]] }
 0x5e1   : > { %7271 = vpow2.f32 %v6847_v48  ;;  %v1729_v16 = vperm.slane %v958_v5, 1  ;;  %v1799_v48 = vperm.slane %v959_v11, 3 }
 0x5e4   : > { %2767 = vmatpush.bf16.msrb.mxu1 %v8614_v13  ;;  %v1778_v13 = vperm.slane %v959_v11, 0 }
 0x5e5   : > { %v7268_v47 = vpop.eup %7267 }
 0x5e6   : > { %1527 = vrot.lane.b32.xlu1 %v7268_v47, %s8155_s15  ;;  %1517 = vrot.lane.b32.xlu0 %v1512_v12, %s8155_s15  ;;  %v7270_v49 = vpop.eup %7269  ;;  %v1723_v47 = vlaneseq }
 0x5e7   : > { %v1476_v50 = vadd.f32 1.0, %v7270_v49  ;;  %v7272_v51 = vpop.eup %7271  ;;  %v1736_v49 = vperm.slane %v958_v5, 2 }
 0x5e8   : > { %v1477_v52 = vadd.f32 1.0, %v7272_v51  ;;  %v1724_v2 = vshrl.u32 %v1723_v47, 7  ;;  %v1792_v51 = vperm.slane %v959_v11, 2 }
 0x5e9   : > { %7273 = vrcp.f32 %v1476_v50  ;;  %v1489_v61 = vand.u32 2147483648, %v1476_v50  ;;  %vm1483_vm4 = vweird.f32 %v1476_v50  ;;  %v1487_v62 = vand.u32 2147483647, %v1476_v50 }
 0x5ea   : > { %7275 = vrcp.f32 %v1477_v52  ;;  %v1504_v15 = vand.u32 2147483648, %v1477_v52  ;;  %vm1498_vm8 = vweird.f32 %v1477_v52  ;;  %v1502_v18 = vand.u32 2147483647, %v1477_v52  ;;  %7224 = vset.pattern.permute.xlu1 %v1724_v2  ;;  %7223 = vset.pattern.permute.xlu0 %v1724_v2 }
 0x5eb   : > { %v1490_v6 = vor.u32 1.1754944e-38, %v1489_v61  ;;  %vm1488_vm6 = vcmp.eq.f32.partialorder %v1487_v62, 8.507059e+37  ;;  %7222 = vset.pattern.permute.xlu2 %v1724_v2  ;;  %v1757_v61 = vperm.slane %v958_v5, 5  ;;  %v1827_v62 = vperm.slane %v959_v11, 7 }
 0x5ec   : > { %v1505_v22 = vor.u32 1.1754944e-38, %v1504_v15  ;;  %vm1503_vm10 = vcmp.eq.f32.partialorder %v1502_v18, 8.507059e+37  ;;  %v927_v15 = vld [vmem:[%s8525_s10 + $0x8] sm:$0xff] }
 0x5ef   : > { %v7274_v53 = vpop.eup %7273 }
 0x5f0   : > { %v1479_v54 = vmul.f32 %v7274_v53, %v1476_v50  ;;  %v7276_v56 = vpop.eup %7275  ;;  %vm1484_vm3 = vweird.f32 %v7274_v53  ;;  %v1750_v50 = vperm.slane %v958_v5, 4 }
 0x5f1   : > { %v1494_v58 = vmul.f32 %v7276_v56, %v1477_v52  ;;  %vm1485_vm5 = vmor %vm1483_vm4, %vm1484_vm3  ;;  %vm1499_vm7 = vweird.f32 %v7276_v56  ;;  %v1722_v52 = vperm.slane %v958_v5, 0  ;;  %vm10690_vm3 = vcmask 64512  }
 0x5f2   : > { %v1480_v55 = vsub.f32 1.0, %v1479_v54  ;;  %vm1500_vm9 = vmor %vm1498_vm8, %vm1499_vm7  ;;  %v1806_v54 = vperm.slane %v959_v11, 4 }
 0x5f3   : > { %v1495_v60 = vsub.f32 1.0, %v1494_v58  ;;  %v1820_v58 = vperm.slane %v959_v11, 6 }
 0x5f4   : > { %v1481_v57 = vmul.f32 %v7274_v53, %v1480_v55 }
 0x5f5   : > { %v1496_v3 = vmul.f32 %v7276_v56, %v1495_v60  ;;  %v1771_v60 = vperm.slane %v958_v5, 7 }
 0x5f6   : > { %v1482_v59 = vadd.f32 %v7274_v53, %v1481_v57  ;;  %v1764_v57 = vperm.slane %v958_v5, 6 }
 0x5f7   : > { %v1497_v14 = vadd.f32 %v7276_v56, %v1496_v3 }
 0x5f8   : > { %v1486_v63 = vsel %vm1485_vm5, %v7274_v53, %v1482_v59  ;;  %v1813_v53 = vperm.slane %v959_v11, 5  ;;  %v1743_v59 = vperm.slane %v958_v5, 3 }
 0x5f9   : > { %v1491_v7 = vsel %vm1488_vm6, %v1490_v6, %v1486_v63  ;;  %v1501_v19 = vsel %vm1500_vm9, %v7276_v56, %v1497_v14  ;;  %v1785_v56 = vperm.slane %v959_v11, 1  ;;  %v931_v14 = vld [vmem:[%s8525_s10 + $0x28] sm:$0xff] }
 0x5fa   : > { %v1506_v25 = vsel %vm1503_vm10, %v1505_v22, %v1501_v19  ;;  %v1521_v37 = vmul.f32 %v1516_v29, %v1491_v7 }
 0x650   : > { %v1526_v8 = vpop.permute.xlu0 %1525 }
 0x651   : > { %v1531_v10 = vmul.f32 %v1526_v8, %v1491_v7 }
 0x653   : > { %1535 = vrot.lane.b32.xlu1 %v1531_v10, %s8155_s15 }
 0x658   : > { %v1528_v24 = vpop.permute.xlu1 %1527  ;;  %v1518_v30 = vpop.permute.xlu0 %1517 }
 0x659   : > { %v1532_v27 = vmul.f32 %v1528_v24, %v1506_v25  ;;  %v1522_v31 = vmul.f32 %v1518_v30, %v1506_v25 }
 0x65b   : > { %1537 = vrot.lane.b32.xlu2 %v1532_v27, %s8155_s15 }
 0x6b5   : > { %v1538_v32 = vpop.permute.xlu2 %1537 }
 0x6b6   : > { %v8676_v33 = vadd.f32 %v1538_v32, %v1522_v31  ;;  %v928_v32 = vld [vmem:[%s8525_s10 + $0x10] sm:$0xff] }
 0x6b8   : > { %7277 = vtanh.f32 %v8676_v33 }
 0x6be   : > { %v7278_v36 = vpop.eup %7277 }
 0x6bf   : > { %1549 = vrot.lane.b32.xlu1 %v7278_v36, %s8155_s15 }
 0x6c5   : > { %v1536_v38 = vpop.permute.xlu1 %1535 }
 0x6c6   : > { %v8680_v1 = vadd.f32 %v1536_v38, %v1521_v37 }
 0x6c7   : > { %1783 = vperm.xlu1 %7224, %v1778_v13  }
 0x6c8   : > { %7279 = vtanh.f32 %v8680_v1 }
 0x6ce   : > { %v7280_v4 = vpop.eup %7279 }
 0x6cf   : > { %1547 = vrot.lane.b32.xlu0 %v7280_v4, %s8155_s15  ;;  %1804 = vperm.xlu1 %7224, %v1799_v48  }
 0x6d7   : > { %1734 = vperm.xlu0 %7223, %v1729_v16   ;;  %1755 = vperm.xlu1 %7224, %v1750_v50   ;;  %v930_v16 = vld [vmem:[%s8525_s10 + $0x20] sm:$0xff] }
 0x6df   : > { %1741 = vperm.xlu0 %7223, %v1736_v49   ;;  %1818 = vperm.xlu1 %7224, %v1813_v53   ;;  %v932_v53 = vld [vmem:[%s8525_s10 + $0x30] sm:$0xff] }
 0x6e7   : > { %1797 = vperm.xlu0 %7223, %v1792_v51   ;;  %1769 = vperm.xlu1 %7224, %v1764_v57  }
 0x6ef   : > { %1811 = vperm.xlu0 %7223, %v1806_v54   ;;  %1776 = vperm.xlu1 %7224, %v1771_v60  }
 0x6f7   : > { %1825 = vperm.xlu0 %7223, %v1820_v58   ;;  %1832 = vperm.xlu1 %7224, %v1827_v62   ;;  %v939_v62 = vld [vmem:[%s8525_s10 + $0x68] sm:$0xff] }
 0x731   : > { %v1550_v43 = vpop.permute.xlu1 %1549 }
 0x732   : > { %v8688_v45 = vmul.f32 %v1550_v43, %v1506_v25 }
 0x741   : > { %v1548_v44 = vpop.permute.xlu0 %1547 }
 0x742   : > { %v8690_v46 = vmul.f32 %v1548_v44, %v1491_v7 }
 0x744   : > { %v1575_v12 = vpack.c.bf16 %v8688_v45, %v8690_v46 }
 0x746   : > { %1577 = vrot.lane.b32.xlu2 %v1575_v12, %s8156_s29 }
 0x74e   : > { %1727 = vperm.xlu2 %7222, %v1722_v52   ;;  %v934_v52 = vld [vmem:[%s8525_s10 + $0x40] sm:$0xff] }
 0x756   : > { %1790 = vperm.xlu2 %7222, %v1785_v56  }
 0x75e   : > { %1748 = vperm.xlu2 %7222, %v1743_v59  }
 0x766   : > { %1762 = vperm.xlu2 %7222, %v1757_v61  }
 0x7a0   : > { %v1578_v55 = vpop.permute.xlu2 %1577 }
 0x7a1   : > { %6856 = vmatmul.msk.bf16.vlgmr.msrb.gmra.mxu3 %vm1037_vm1, %v1578_v55  ;;  %6874 = vmatmul.msk.bf16.vlgmr.msra.gmra.mxu1 %vm1037_vm1, %v1578_v55 }
 0x7a2   : > { %2913 = vmatpush.bf16.msrb.mxu3 %v8648_v26  ;;  %3060 = vmatpush.bf16.msra.mxu1 %v6972_v39  ;;  %v7231_v26 = vld [vmem:[%s10756_s18] ss:$0 sm:$0xff] }
 0x7a6   : > { %2914 = vmatpush.bf16.msrb.mxu3 %v8651_v28  ;;  %3061 = vmatpush.bf16.msra.mxu1 %v6971_v41  ;;  %v926_v28 = vld [vmem:[%s8525_s10] sm:$0xff]  ;;  %v929_v41 = vld [vmem:[%s8525_s10 + $0x18] sm:$0xff] }
 0x824   : > { %v1603_v63 = vpop.f32.mrf.mxu3 }
 0x825   : > { %v1604_v3 = vadd.f32 %v7231_v26, %v1603_v63 }
 0x827   : > { %v1624_v6 = vperm.slane %v1604_v3, 0  ;;  %v1614_v7 = vrot.slane %v1604_v3, 5  ;;  %v1610_v8 = vrot.slane %v1604_v3, 1  ;;  %v1611_v10 = vrot.slane %v1604_v3, 2 }
 0x828   : > { %v1616_v18 = vrot.slane %v1604_v3, 7  ;;  %v1612_v25 = vrot.slane %v1604_v3, 3  ;;  %v1613_v43 = vrot.slane %v1604_v3, 4  ;;  %v1615_v11 = vrot.slane %v1604_v3, 6 }
 0x829   : > { %v1656_v19 = vmul.f32 %v1624_v6, %v926_v28  ;;  %v1629_v22 = vperm.slane %v1614_v7, 0  ;;  %v1625_v24 = vperm.slane %v1610_v8, 0  ;;  %v1626_v31 = vperm.slane %v1611_v10, 0  ;;  %v935_v6 = vld [vmem:[%s8525_s10 + $0x48] sm:$0xff]  ;;  %v936_v7 = vld [vmem:[%s8525_s10 + $0x50] sm:$0xff] }
 0x82a   : > { %v1631_v38 = vperm.slane %v1616_v18, 0  ;;  %v1627_v4 = vperm.slane %v1612_v25, 0  ;;  %v1628_v13 = vperm.slane %v1613_v43, 0  ;;  %v1630_v51 = vperm.slane %v1615_v11, 0  ;;  %v940_v25 = vld [vmem:[%s8525_s10 + $0x70] sm:$0xff] }
 0x82b   : > { %v1672_v27 = vsel %vm1037_vm1, %v1656_v19, 0.0  ;;  %v1661_v29 = vmul.f32 %v1629_v22, %v931_v14  ;;  %v1657_v30 = vmul.f32 %v1625_v24, %v927_v15  ;;  %v1658_v42 = vmul.f32 %v1626_v31, %v928_v32  ;;  %v937_v32 = vld [vmem:[%s8525_s10 + $0x58] sm:$0xff] }
 0x82c   : > { %1673 = vadd.xlane.f32.xlu0 %v1672_v27  ;;  %v1605_v39 = vpop.f32.mrf.mxu3  ;;  %v1663_v12 = vmul.f32 %v1631_v38, %v933_v40  ;;  %v1659_v2 = vmul.f32 %v1627_v4, %v929_v41  ;;  %v1660_v54 = vmul.f32 %v1628_v13, %v930_v16  ;;  %v1662_v57 = vmul.f32 %v1630_v51, %v932_v53  ;;  %v8741_v13 = vpop.permute.xlu0 %1734 }
 0x82d   : > { %v1687_v36 = vsel %vm1037_vm1, %v1661_v29, 0.0  ;;  %v1675_v37 = vsel %vm1037_vm1, %v1657_v30, 0.0  ;;  %v1606_v44 = vadd.f32 %v7231_v26, %v1605_v39  ;;  %v1678_v5 = vsel %vm1037_vm1, %v1658_v42, 0.0  ;;  %v941_v42 = vld [vmem:[%s8525_s10 + $0x78] sm:$0xff] }
 0x82e   : > { %1688 = vadd.xlane.f32.xlu2 %v1687_v36  ;;  %1676 = vadd.xlane.f32.xlu1 %v1675_v37  ;;  %v1693_v48 = vsel %vm1037_vm1, %v1663_v12, 0.0  ;;  %v1681_v49 = vsel %vm1037_vm1, %v1659_v2, 0.0  ;;  %v1684_v60 = vsel %vm1037_vm1, %v1660_v54, 0.0  ;;  %v1690_v63 = vsel %vm1037_vm1, %v1662_v57, 0.0  ;;  %v938_v36 = vld [vmem:[%s8525_s10 + $0x60] sm:$0xff] }
 0x82f   : > { %v1632_v50 = vperm.slane %v1606_v44, 0  ;;  %v1621_v55 = vrot.slane %v1606_v44, 5  ;;  %v1617_v58 = vrot.slane %v1606_v44, 1  ;;  %v1618_v59 = vrot.slane %v1606_v44, 2 }
 0x830   : > { %v1622_v10 = vrot.slane %v1606_v44, 6  ;;  %v1619_v18 = vrot.slane %v1606_v44, 3  ;;  %v1620_v19 = vrot.slane %v1606_v44, 4  ;;  %v1623_v38 = vrot.slane %v1606_v44, 7 }
 0x831   : > { %v1664_v56 = vmul.f32 %v1632_v50, %v934_v52  ;;  %v1637_v61 = vperm.slane %v1621_v55, 0  ;;  %v1633_v3 = vperm.slane %v1617_v58, 0  ;;  %v1634_v28 = vperm.slane %v1618_v59, 0  ;;  %v8749_v50 = vpop.permute.xlu2 %1727 }
 0x832   : > { %v1638_v24 = vperm.slane %v1622_v10, 0  ;;  %v1635_v30 = vperm.slane %v1619_v18, 0  ;;  %v1636_v31 = vperm.slane %v1620_v19, 0  ;;  %v1639_v41 = vperm.slane %v1623_v38, 0 }
 0x833   : > { %v1696_v26 = vsel %vm1037_vm1, %v1664_v56, 0.0  ;;  %v1669_v8 = vmul.f32 %v1637_v61, %v939_v62  ;;  %v1665_v14 = vmul.f32 %v1633_v3, %v935_v6  ;;  %v1666_v15 = vmul.f32 %v1634_v28, %v936_v7 }
 0x834   : > { %1679 = vadd.xlane.f32.xlu0 %v1678_v5  ;;  %v1670_v37 = vmul.f32 %v1638_v24, %v940_v25  ;;  %v1667_v4 = vmul.f32 %v1635_v30, %v937_v32  ;;  %v1668_v39 = vmul.f32 %v1636_v31, %v938_v36  ;;  %v1671_v2 = vmul.f32 %v1639_v41, %v941_v42  ;;  %v8737_v5 = vpop.permute.xlu1 %1783 }
 0x835   : > { %v1711_v22 = vsel %vm1037_vm1, %v1669_v8, 0.0  ;;  %v1699_v27 = vsel %vm1037_vm1, %v1665_v14, 0.0  ;;  %v1702_v29 = vsel %vm1037_vm1, %v1666_v15, 0.0  ;;  %v8157_v51 = vmov 0  }
 0x836   : > { %1694 = vadd.xlane.f32.xlu2 %v1693_v48  ;;  %1682 = vadd.xlane.f32.xlu1 %v1681_v49  ;;  %v1714_v40 = vsel %vm1037_vm1, %v1670_v37, 0.0  ;;  %v1705_v43 = vsel %vm1037_vm1, %v1667_v4, 0.0  ;;  %v1708_v12 = vsel %vm1037_vm1, %v1668_v39, 0.0  ;;  %v1717_v11 = vsel %vm1037_vm1, %v1671_v2, 0.0  ;;  %v8745_v48 = vpop.permute.xlu0 %1741 }
 0x837   : > { %7225 = vset.pattern.permute.xlu0 %v8157_v51  ;;  %7226 = vset.pattern.permute.xlu1 %v8157_v51 }
 0x838   : > { %7227 = vset.pattern.permute.xlu2 %v8157_v51 }
 0x839   : > { %v8755_v54 = vpop.permute.xlu2 %1790 }
 0x83c   : > { %1685 = vadd.xlane.f32.xlu0 %v1684_v60  ;;  %v8739_v44 = vpop.permute.xlu1 %1804 }
 0x83e   : > { %1697 = vadd.xlane.f32.xlu2 %v1696_v26  ;;  %1691 = vadd.xlane.f32.xlu1 %v1690_v63  ;;  %v8751_v52 = vpop.permute.xlu0 %1797 }
 0x841   : > { %v8761_v57 = vpop.permute.xlu2 %1748 }
 0x844   : > { %1712 = vadd.xlane.f32.xlu0 %v1711_v22  ;;  %v8743_v16 = vpop.permute.xlu1 %1755 }
 0x846   : > { %1700 = vadd.xlane.f32.xlu2 %v1699_v27  ;;  %1703 = vadd.xlane.f32.xlu1 %v1702_v29  ;;  %v8757_v55 = vpop.permute.xlu0 %1811 }
 0x847   : > { %10758 = vst [vmem:[#allocation49_spill] sm:$0xff] %v8757_v55 }
 0x849   : > { %v8767_v60 = vpop.permute.xlu2 %1762 }
 0x84c   : > { %1715 = vadd.xlane.f32.xlu0 %v1714_v40  ;;  %v8747_v49 = vpop.permute.xlu1 %1818 }
 0x84d   : > { %10757 = vst [vmem:[#allocation48_spill] sm:$0xff] %v8747_v49 }
 0x84e   : > { %1706 = vadd.xlane.f32.xlu2 %v1705_v43  ;;  %1709 = vadd.xlane.f32.xlu1 %v1708_v12  ;;  %v8763_v58 = vpop.permute.xlu0 %1825 }
 0x84f   : > { %10760 = vst [vmem:[#allocation51_spill] sm:$0xff] %v8763_v58 }
 0x854   : > { %1718 = vadd.xlane.f32.xlu0 %v1717_v11  ;;  %v8753_v53 = vpop.permute.xlu1 %1769 }
 0x85c   : > { %v8759_v56 = vpop.permute.xlu1 %1776 }
 0x85d   : > { %10759 = vst [vmem:[#allocation50_spill] sm:$0xff] %v8759_v56 }
 0x864   : > { %v8765_v59 = vpop.permute.xlu1 %1832 }
 0x865   : > { %10761 = vst [vmem:[#allocation52_spill] sm:$0xff] %v8765_v59 }
 0x89f   : > { %v1674_v61 = vpop.xlane.xlu0 %1673 }
 0x8a0   : > { %v8770_v62 = vadd.f32 %v8749_v50, %v1674_v61 }
 0x8a1   : > { %v1689_v26 = vpop.xlane.xlu2 %1688  ;;  %v1677_v63 = vpop.xlane.xlu1 %1676 }
 0x8a2   : > { %v8773_v3 = vadd.f32 %v8741_v13, %v1677_v63  ;;  %1883 = vperm.xlu0 %7225, %v8770_v62   ;;  %v8781_v10 = vadd.f32 %v8767_v60, %v1689_v26  ;;  %v8834_v63 = vand.u32 127, %v1723_v47 }
 0x8a4   : > { %1886 = vperm.xlu1 %7226, %v8773_v3   ;;  %10762 = vst [vmem:[#allocation53_spill] sm:$0xff] %v8834_v63 }
 0x8a7   : > { %v1680_v28 = vpop.xlane.xlu0 %1679 }
 0x8a8   : > { %v8778_v6 = vadd.f32 %v8745_v48, %v1680_v28 }
 0x8a9   : > { %v1695_v7 = vpop.xlane.xlu2 %1694  ;;  %v1683_v8 = vpop.xlane.xlu1 %1682 }
 0x8aa   : > { %1889 = vperm.xlu0 %7225, %v8778_v6   ;;  %v8786_v15 = vadd.f32 %v8761_v57, %v1683_v8  ;;  %v8818_v41 = vadd.f32 %v8759_v56, %v1695_v7 }
 0x8ac   : > { %1898 = vperm.xlu1 %7226, %v8781_v10  }
 0x8af   : > { %v1686_v14 = vpop.xlane.xlu0 %1685 }
 0x8b0   : > { %v8789_v18 = vadd.f32 %v8743_v16, %v1686_v14 }
 0x8b1   : > { %v1698_v19 = vpop.xlane.xlu2 %1697  ;;  %v1692_v22 = vpop.xlane.xlu1 %1691 }
 0x8b2   : > { %1892 = vperm.xlu0 %7225, %v8786_v15   ;;  %1895 = vperm.xlu2 %7227, %v8789_v18   ;;  %v8794_v25 = vadd.f32 %v8737_v5, %v1698_v19  ;;  %v8797_v27 = vadd.f32 %v8753_v53, %v1692_v22 }
 0x8b7   : > { %v1713_v24 = vpop.xlane.xlu0 %1712 }
 0x8b8   : > { %v8806_v36 = vadd.f32 %v8747_v49, %v1713_v24 }
 0x8b9   : > { %v1701_v29 = vpop.xlane.xlu2 %1700  ;;  %v1704_v30 = vpop.xlane.xlu1 %1703 }
 0x8ba   : > { %v8800_v31 = vadd.f32 %v8755_v54, %v1701_v29  ;;  %1901 = vperm.xlu0 %7225, %v8797_v27   ;;  %1907 = vperm.xlu2 %7227, %v8794_v25   ;;  %v8809_v38 = vadd.f32 %v8751_v52, %v1704_v30 }
 0x8bc   : > { %1910 = vperm.xlu1 %7226, %v8800_v31  }
 0x8bf   : > { %v1716_v32 = vpop.xlane.xlu0 %1715 }
 0x8c0   : > { %v8830_v12 = vadd.f32 %v8763_v58, %v1716_v32 }
 0x8c1   : > { %v1710_v37 = vpop.xlane.xlu1 %1709  ;;  %v1707_v39 = vpop.xlane.xlu2 %1706 }
 0x8c2   : > { %v8812_v4 = vadd.f32 %v8757_v55, %v1710_v37  ;;  %1922 = vperm.xlu2 %7227, %v8806_v36   ;;  %v8821_v42 = vadd.f32 %v8739_v44, %v1707_v39 }
 0x8c4   : > { %1913 = vperm.xlu1 %7226, %v8809_v38   ;;  %1919 = vperm.xlu0 %7225, %v8812_v4  }
 0x8c7   : > { %v1719_v40 = vpop.xlane.xlu0 %1718 }
 0x8c8   : > { %v8824_v43 = vadd.f32 %v8765_v59, %v1719_v40 }
 0x8ca   : > { %1904 = vperm.xlu2 %7227, %v8818_v41  }
 0x8cc   : > { %1916 = vperm.xlu1 %7226, %v8821_v42   ;;  %1928 = vperm.xlu0 %7225, %v8824_v43  }
 0x8d4   : > { %1925 = vperm.xlu1 %7226, %v8830_v12  }
 0x90c   : > { %v1896_v2 = vpop.permute.xlu2 %1895 }
 0x90d   : > { %v1936_v32 = vperm.slane %v1896_v2, %v8834_v63 }
 0x914   : > { %v1884_v11 = vpop.permute.xlu0 %1883  ;;  %v1908_v51 = vpop.permute.xlu2 %1907 }
 0x915   : > { %v1932_v14 = vperm.slane %v1884_v11, %v8834_v63 }
 0x916   : > { %v1887_v61 = vpop.permute.xlu1 %1886 }
 0x917   : > { %v1933_v7 = vperm.slane %v1887_v61, %v8834_v63 }
 0x919   : > { %v1949_v24 = vsel %vm1948_vm11, %v1933_v7, %v1932_v14 }
 0x91c   : > { %v1890_v26 = vpop.permute.xlu0 %1889  ;;  %v1923_v28 = vpop.permute.xlu2 %1922 }
 0x91d   : > { %v1934_v8 = vperm.slane %v1890_v26, %v8834_v63 }
 0x91e   : > { %v1899_v29 = vpop.permute.xlu1 %1898 }
 0x91f   : > { %v1951_v30 = vsel %vm1950_vm12, %v1934_v8, %v1949_v24  ;;  %v1937_v40 = vperm.slane %v1899_v29, %v8834_v63 }
 0x924   : > { %v1893_v19 = vpop.permute.xlu0 %1892  ;;  %v1905_v37 = vpop.permute.xlu2 %1904 }
 0x925   : > { %v1935_v22 = vperm.slane %v1893_v19, %v8834_v63  ;;  %v1939_v26 = vperm.slane %v1905_v37, %v8834_v63 }
 0x927   : > { %v1953_v47 = vsel %vm1952_vm13, %v1935_v22, %v1951_v30 }
 0x928   : > { %v1955_v39 = vsel %vm1954_vm14, %v1936_v32, %v1953_v47  ;;  %v1940_v47 = vperm.slane %v1908_v51, %v8834_v63 }
 0x929   : > { %v1957_v8 = vsel %vm1956_vm15, %v1937_v40, %v1955_v39 }
 0x92c   : > { %v1902_v11 = vpop.permute.xlu0 %1901 }
 0x92d   : > { %v1938_v61 = vperm.slane %v1902_v11, %v8834_v63 }
 0x92e   : > { %v1911_v7 = vpop.permute.xlu1 %1910 }
 0x92f   : > { %v1959_v14 = vsel %vm1958_vm0, %v1938_v61, %v1957_v8  ;;  %v1941_v29 = vperm.slane %v1911_v7, %v8834_v63  ;;  %v1945_v7 = vperm.slane %v1923_v28, %v8834_v63 }
 0x930   : > { %v1961_v2 = vsel %vm1960_vm2, %v1939_v26, %v1959_v14 }
 0x931   : > { %v1972_v19 = vsel %vm10690_vm3, %v1961_v2, -inf  ;;  %v1962_v39 = vsel %vm1948_vm11, %v1941_v29, %v1940_v47 }
 0x932   : > { %1973 = vmax.xlane.f32.xlu1 %v1972_v19 }
 0x936   : > { %v1914_v22 = vpop.permute.xlu1 %1913  ;;  %v1920_v24 = vpop.permute.xlu0 %1919 }
 0x937   : > { %v1942_v30 = vperm.slane %v1914_v22, %v8834_v63  ;;  %v1944_v61 = vperm.slane %v1920_v24, %v8834_v63 }
 0x939   : > { %v1963_v40 = vsel %vm1950_vm12, %v1942_v30, %v1962_v39 }
 0x93e   : > { %v1917_v32 = vpop.permute.xlu1 %1916  ;;  %v1929_v26 = vpop.permute.xlu0 %1928 }
 0x93f   : > { %v1943_v37 = vperm.slane %v1917_v32, %v8834_v63  ;;  %v1947_v51 = vperm.slane %v1929_v26, %v8834_v63 }
 0x941   : > { %v1964_v11 = vsel %vm1952_vm13, %v1943_v37, %v1963_v40 }
 0x942   : > { %v1965_v8 = vsel %vm1954_vm14, %v1944_v61, %v1964_v11 }
 0x943   : > { %v1966_v19 = vsel %vm1956_vm15, %v1945_v7, %v1965_v8 }
 0x946   : > { %v1926_v14 = vpop.permute.xlu1 %1925 }
 0x947   : > { %v1946_v2 = vperm.slane %v1926_v14, %v8834_v63 }
 0x949   : > { %v1967_v22 = vsel %vm1958_vm0, %v1946_v2, %v1966_v19 }
 0x94a   : > { %v1968_v29 = vsel %vm1960_vm2, %v1947_v51, %v1967_v22 }
 0x94b   : > { %v1975_v30 = vsel %vm10690_vm3, %v1968_v29, -inf }
 0x94c   : > { %1976 = vmax.xlane.f32.xlu2 %v1975_v30 }
 0x9a5   : > { %v1974_v24 = vpop.xlane.xlu1 %1973 }
 0x9a6   : > { %v1985_v47 = vperm.slane %v1974_v24, 5  ;;  %v1980_v32 = vperm.slane %v1974_v24, 0  ;;  %v1983_v37 = vperm.slane %v1974_v24, 3  ;;  %v1981_v11 = vperm.slane %v1974_v24, 1 }
 0x9a7   : > { %v1982_v2 = vperm.slane %v1974_v24, 2 }
 0x9a8   : > { %v2017_v28 = vsub.f32 %v8781_v10, %v1985_v47  ;;  %v2012_v39 = vsub.f32 %v8770_v62, %v1980_v32  ;;  %v2015_v40 = vsub.f32 %v8786_v15, %v1983_v37  ;;  %v2013_v7 = vsub.f32 %v8773_v3, %v1981_v11 }
 0x9a9   : > { %v2014_v10 = vsub.f32 %v8778_v6, %v1982_v2  ;;  %v1984_v3 = vperm.slane %v1974_v24, 4  ;;  %v1987_v11 = vperm.slane %v1974_v24, 7 }
 0x9aa   : > { %v2038_v61 = vmul.f32 1.442695, %v2017_v28  ;;  %v2028_v26 = vmul.f32 1.442695, %v2012_v39  ;;  %v2034_v8 = vmul.f32 1.442695, %v2015_v40 }
 0x9ab   : > { %v2030_v14 = vmul.f32 1.442695, %v2013_v7  ;;  %v2032_v15 = vmul.f32 1.442695, %v2014_v10  ;;  %v2016_v29 = vsub.f32 %v8789_v18, %v1984_v3  ;;  %v1986_v28 = vperm.slane %v1974_v24, 6 }
 0x9ac   : > { %7281 = vpow2.f32 %v2038_v61  ;;  %v2019_v7 = vsub.f32 %v8818_v41, %v1987_v11 }
 0x9ad   : > { %7283 = vpow2.f32 %v2028_v26  ;;  %v2036_v37 = vmul.f32 1.442695, %v2016_v29  ;;  %v2018_v18 = vsub.f32 %v8797_v27, %v1986_v28 }
 0x9ae   : > { %7285 = vpow2.f32 %v2034_v8 }
 0x9af   : > { %7287 = vpow2.f32 %v2030_v14 }
 0x9b0   : > { %7289 = vpow2.f32 %v2032_v15 }
 0x9b1   : > { %7291 = vpow2.f32 %v2036_v37 }
 0x9b2   : > { %v8872_v51 = vpop.eup %7281 }
 0x9b3   : > { %v8874_v19 = vpop.eup %7283  ;;  %2092 = vperm.xlu1 %7226, %v8872_v51  }
 0x9b4   : > { %v8877_v62 = vpop.eup %7285  ;;  %2077 = vperm.xlu0 %7225, %v8874_v19  }
 0x9b5   : > { %2086 = vperm.xlu2 %7227, %v8877_v62   ;;  %v8882_v22 = vpop.eup %7287 }
 0x9b6   : > { %v8888_v6 = vpop.eup %7289 }
 0x9b7   : > { %v8894_v24 = vpop.eup %7291 }
 0x9bc   : > { %2080 = vperm.xlu0 %7225, %v8882_v22  }
 0x9bf   : > { %v1977_v30 = vpop.xlane.xlu2 %1976 }
 0x9c0   : > { %v1993_v47 = vperm.slane %v1977_v30, 5  ;;  %v1990_v32 = vperm.slane %v1977_v30, 2  ;;  %v1994_v61 = vperm.slane %v1977_v30, 6  ;;  %v1988_v2 = vperm.slane %v1977_v30, 0 }
 0x9c1   : > { %v1991_v28 = vperm.slane %v1977_v30, 3 }
 0x9c2   : > { %v2025_v39 = vsub.f32 %v8806_v36, %v1993_v47  ;;  %v2022_v40 = vsub.f32 %v8809_v38, %v1990_v32  ;;  %v2026_v14 = vsub.f32 %v8830_v12, %v1994_v61  ;;  %v2040_v36 = vmul.f32 1.442695, %v2018_v18 }
 0x9c3   : > { %v2042_v38 = vmul.f32 1.442695, %v2019_v7  ;;  %v2020_v27 = vsub.f32 %v8794_v25, %v1988_v2  ;;  %v1989_v12 = vperm.slane %v1977_v30, 1  ;;  %v1992_v61 = vperm.slane %v1977_v30, 4 }
 0x9c4   : > { %2083 = vperm.xlu0 %7225, %v8888_v6   ;;  %v2054_v26 = vmul.f32 1.442695, %v2025_v39  ;;  %v2048_v8 = vmul.f32 1.442695, %v2022_v40  ;;  %v2056_v10 = vmul.f32 1.442695, %v2026_v14  ;;  %v2023_v40 = vsub.f32 %v8821_v42, %v1991_v28 }
 0x9c5   : > { %v2044_v41 = vmul.f32 1.442695, %v2020_v27  ;;  %v2021_v37 = vsub.f32 %v8800_v31, %v1989_v12  ;;  %v2024_v31 = vsub.f32 %v8812_v4, %v1992_v61  ;;  %v1995_v18 = vperm.slane %v1977_v30, 7 }
 0x9c6   : > { %7293 = vpow2.f32 %v2054_v26  ;;  %v2050_v11 = vmul.f32 1.442695, %v2023_v40 }
 0x9c7   : > { %7295 = vpow2.f32 %v2048_v8  ;;  %v2046_v25 = vmul.f32 1.442695, %v2021_v37  ;;  %v2052_v8 = vmul.f32 1.442695, %v2024_v31  ;;  %v2027_v14 = vsub.f32 %v8824_v43, %v1995_v18 }
 0x9c8   : > { %7297 = vpow2.f32 %v2040_v36 }
 0x9c9   : > { %7299 = vpow2.f32 %v2042_v38  ;;  %v2058_v36 = vmul.f32 1.442695, %v2027_v14 }
 0x9ca   : > { %7301 = vpow2.f32 %v2056_v10 }
 0x9cb   : > { %7303 = vpow2.f32 %v2044_v41 }
 0x9cc   : > { %v8896_v15 = vpop.eup %7293  ;;  %2089 = vperm.xlu0 %7225, %v8894_v24   ;;  %7305 = vpow2.f32 %v2046_v25 }
 0x9cd   : > { %v8899_v3 = vpop.eup %7295  ;;  %2116 = vperm.xlu2 %7227, %v8896_v15   ;;  %7307 = vpow2.f32 %v2050_v11 }
 0x9ce   : > { %2107 = vperm.xlu1 %7226, %v8899_v3   ;;  %v8904_v29 = vpop.eup %7297  ;;  %7309 = vpow2.f32 %v2052_v8 }
 0x9cf   : > { %v8906_v47 = vpop.eup %7299  ;;  %7311 = vpow2.f32 %v2058_v36 }
 0x9d0   : > { %v8909_v32 = vpop.eup %7301 }
 0x9d1   : > { %v8914_v39 = vpop.eup %7303 }
 0x9d2   : > { %v8918_v26 = vpop.eup %7305 }
 0x9d3   : > { %v8922_v7 = vpop.eup %7307 }
 0x9d4   : > { %2095 = vperm.xlu0 %7225, %v8904_v29   ;;  %v8926_v42 = vpop.eup %7309 }
 0x9d5   : > { %2098 = vperm.xlu2 %7227, %v8906_v47   ;;  %v8929_v2 = vpop.eup %7311 }
 0x9d6   : > { %2119 = vperm.xlu1 %7226, %v8909_v32  }
 0x9dc   : > { %2101 = vperm.xlu0 %7225, %v8914_v39  }
 0x9e4   : > { %2104 = vperm.xlu0 %7225, %v8918_v26  }
 0x9ec   : > { %2110 = vperm.xlu0 %7225, %v8922_v7  }
 0x9f4   : > { %2113 = vperm.xlu0 %7225, %v8926_v42  }
 0x9fc   : > { %2122 = vperm.xlu0 %7225, %v8929_v2  }
 0xa0f   : > { %v2087_v30 = vpop.permute.xlu2 %2086 }
 0xa10   : > { %v2127_v11 = vperm.slane %v2087_v30, %v8834_v63 }
 0xa25   : > { %v2093_v61 = vpop.permute.xlu1 %2092 }
 0xa26   : > { %v2078_v4 = vpop.permute.xlu0 %2077  ;;  %v2129_v14 = vperm.slane %v2093_v61, %v8834_v63 }
 0xa27   : > { %v2117_v27 = vpop.permute.xlu2 %2116  ;;  %v2124_v43 = vperm.slane %v2078_v4, %v8834_v63 }
 0xa2e   : > { %v2081_v38 = vpop.permute.xlu0 %2080 }
 0xa2f   : > { %v2125_v41 = vperm.slane %v2081_v38, %v8834_v63  ;;  %v2099_v8 = vpop.permute.xlu2 %2098 }
 0xa30   : > { %v2131_v38 = vperm.slane %v2099_v8, %v8834_v63 }
 0xa31   : > { %v2140_v25 = vsel %vm1948_vm11, %v2125_v41, %v2124_v43 }
 0xa36   : > { %v2084_v10 = vpop.permute.xlu0 %2083 }
 0xa37   : > { %v2126_v12 = vperm.slane %v2084_v10, %v8834_v63 }
 0xa39   : > { %v2141_v28 = vsel %vm1950_vm12, %v2126_v12, %v2140_v25 }
 0xa3a   : > { %v2142_v31 = vsel %vm1952_vm13, %v2127_v11, %v2141_v28 }
 0xa3e   : > { %v2090_v37 = vpop.permute.xlu0 %2089 }
 0xa3f   : > { %v2128_v40 = vperm.slane %v2090_v37, %v8834_v63 }
 0xa40   : > { %v2108_v28 = vpop.permute.xlu1 %2107 }
 0xa41   : > { %v2143_v18 = vsel %vm1954_vm14, %v2128_v40, %v2142_v31  ;;  %v2134_v8 = vperm.slane %v2108_v28, %v8834_v63 }
 0xa42   : > { %v2144_v10 = vsel %vm1956_vm15, %v2129_v14, %v2143_v18 }
 0xa46   : > { %v2096_v36 = vpop.permute.xlu0 %2095 }
 0xa47   : > { %v2130_v4 = vperm.slane %v2096_v36, %v8834_v63 }
 0xa49   : > { %v2145_v41 = vsel %vm1958_vm0, %v2130_v4, %v2144_v10  ;;  %v2137_v10 = vperm.slane %v2117_v27, %v8834_v63 }
 0xa4a   : > { %v2146_v12 = vsel %vm1960_vm2, %v2131_v38, %v2145_v41  ;;  %v2120_v41 = vpop.permute.xlu1 %2119 }
 0xa4b   : > { %v2156_v30 = vsel %vm10690_vm3, %v2146_v12, 0.0 }
 0xa4c   : > { %2157 = vadd.xlane.f32.xlu1 %v2156_v30  ;;  %v2138_v30 = vperm.slane %v2120_v41, %v8834_v63 }
 0xa4e   : > { %v2102_v43 = vpop.permute.xlu0 %2101 }
 0xa4f   : > { %v2132_v11 = vperm.slane %v2102_v43, %v8834_v63 }
 0xa56   : > { %v2105_v37 = vpop.permute.xlu0 %2104 }
 0xa57   : > { %v2133_v40 = vperm.slane %v2105_v37, %v8834_v63 }
 0xa59   : > { %v2147_v61 = vsel %vm1948_vm11, %v2133_v40, %v2132_v11 }
 0xa5a   : > { %v2148_v36 = vsel %vm1950_vm12, %v2134_v8, %v2147_v61 }
 0xa5e   : > { %v2111_v25 = vpop.permute.xlu0 %2110 }
 0xa5f   : > { %v2135_v31 = vperm.slane %v2111_v25, %v8834_v63 }
 0xa61   : > { %v2149_v4 = vsel %vm1952_vm13, %v2135_v31, %v2148_v36 }
 0xa66   : > { %v2114_v18 = vpop.permute.xlu0 %2113 }
 0xa67   : > { %v2136_v14 = vperm.slane %v2114_v18, %v8834_v63 }
 0xa69   : > { %v2150_v38 = vsel %vm1954_vm14, %v2136_v14, %v2149_v4 }
 0xa6a   : > { %v2151_v12 = vsel %vm1956_vm15, %v2137_v10, %v2150_v38 }
 0xa6b   : > { %v2152_v25 = vsel %vm1958_vm0, %v2138_v30, %v2151_v12 }
 0xa6e   : > { %v2123_v43 = vpop.permute.xlu0 %2122 }
 0xa6f   : > { %v2139_v37 = vperm.slane %v2123_v43, %v8834_v63 }
 0xa71   : > { %v2153_v28 = vsel %vm1960_vm2, %v2139_v37, %v2152_v25 }
 0xa72   : > { %v2159_v40 = vsel %vm10690_vm3, %v2153_v28, 0.0 }
 0xa73   : > { %2160 = vadd.xlane.f32.xlu2 %v2159_v40 }
 0xabf   : > { %v2158_v11 = vpop.xlane.xlu1 %2157 }
 0xac0   : > { %7313 = vrcp.f32 %v2158_v11 }
 0xac6   : > { %v7314_v61 = vpop.eup %7313 }
 0xac7   : > { %v2169_v31 = vperm.slane %v7314_v61, 3  ;;  %v2166_v27 = vperm.slane %v7314_v61, 0  ;;  %v2172_v14 = vperm.slane %v7314_v61, 6  ;;  %v2167_v36 = vperm.slane %v7314_v61, 1 }
 0xac8   : > { %v2168_v10 = vperm.slane %v7314_v61, 2  ;;  %v2170_v12 = vperm.slane %v7314_v61, 4 }
 0xac9   : > { %v2201_v8 = vmul.f32 %v8877_v62, %v2169_v31  ;;  %v2198_v18 = vmul.f32 %v8874_v19, %v2166_v27  ;;  %v2204_v4 = vmul.f32 %v8904_v29, %v2172_v14  ;;  %v2199_v38 = vmul.f32 %v8882_v22, %v2167_v36 }
 0xaca   : > { %v2200_v41 = vmul.f32 %v8888_v6, %v2168_v10  ;;  %v2202_v30 = vmul.f32 %v8894_v24, %v2170_v12  ;;  %v2171_v62 = vperm.slane %v7314_v61, 5 }
 0xacb   : > { %2231 = vperm.xlu1 %7226, %v2201_v8   ;;  %2216 = vperm.xlu0 %7225, %v2198_v18   ;;  %v942_v18 = vld [vmem:[%s8531_s2] sm:$0xff] }
 0xacc   : > { %v2203_v43 = vmul.f32 %v8872_v51, %v2171_v62 }
 0xad3   : > { %2246 = vperm.xlu1 %7226, %v2204_v4   ;;  %2221 = vperm.xlu0 %7225, %v2199_v38   ;;  %v945_v4 = vld [vmem:[%s8531_s2 + $0x18] sm:$0xff] }
 0xadb   : > { %2226 = vperm.xlu0 %7225, %v2200_v41   ;;  %v948_v41 = vld [vmem:[%s8531_s2 + $0x30] sm:$0xff] }
 0xae3   : > { %2236 = vperm.xlu0 %7225, %v2202_v30  }
 0xae6   : > { %v2161_v19 = vpop.xlane.xlu2 %2160 }
 0xae7   : > { %7315 = vrcp.f32 %v2161_v19 }
 0xaeb   : > { %2241 = vperm.xlu0 %7225, %v2203_v43  }
 0xaed   : > { %v7316_v37 = vpop.eup %7315 }
 0xaee   : > { %v2181_v29 = vperm.slane %v7316_v37, 7  ;;  %v2177_v25 = vperm.slane %v7316_v37, 3  ;;  %v2174_v22 = vperm.slane %v7316_v37, 0  ;;  %v2179_v24 = vperm.slane %v7316_v37, 5 }
 0xaef   : > { %v2175_v11 = vperm.slane %v7316_v37, 1  ;;  %v2176_v27 = vperm.slane %v7316_v37, 2  ;;  %v2178_v8 = vperm.slane %v7316_v37, 4 }
 0xaf0   : > { %v2213_v28 = vmul.f32 %v8929_v2, %v2181_v29  ;;  %v2209_v40 = vmul.f32 %v8922_v7, %v2177_v25  ;;  %v2206_v6 = vmul.f32 %v8914_v39, %v2174_v22  ;;  %v2211_v31 = vmul.f32 %v8896_v15, %v2179_v24  ;;  %v946_v22 = vld [vmem:[%s8531_s2 + $0x20] sm:$0xff] }
 0xaf1   : > { %v2207_v51 = vmul.f32 %v8918_v26, %v2175_v11  ;;  %v2173_v2 = vperm.slane %v7314_v61, 7  ;;  %v2208_v39 = vmul.f32 %v8899_v3, %v2176_v27  ;;  %v2210_v15 = vmul.f32 %v8926_v42, %v2178_v8  ;;  %v943_v42 = vld [vmem:[%s8531_s2 + $0x8] sm:$0xff] }
 0xaf2   : > { %2291 = vperm.xlu1 %7226, %v2213_v28   ;;  %2271 = vperm.xlu2 %7227, %v2209_v40  }
 0xaf3   : > { %2256 = vperm.xlu0 %7225, %v2206_v6   ;;  %v2205_v7 = vmul.f32 %v8906_v47, %v2173_v2 }
 0xafa   : > { %1221 = vrot.lane.b32.xlu1 %v8596_v0, %s8158_s30  ;;  %2281 = vperm.xlu2 %7227, %v2211_v31   ;;  %v2180_v0 = vperm.slane %v7316_v37, 6 }
 0xafb   : > { %2261 = vperm.xlu0 %7225, %v2207_v51  }
 0xafc   : > { %v2212_v26 = vmul.f32 %v8909_v32, %v2180_v0 }
 0xb02   : > { %2251 = vperm.xlu2 %7227, %v2205_v7  }
 0xb03   : > { %2266 = vperm.xlu0 %7225, %v2208_v39  }
 0xb0a   : > { %1213 = vrot.lane.b32.xlu2 %v8625_v21, %s8156_s29  ;;  %v944_v21 = vld [vmem:[%s8531_s2 + $0x10] sm:$0xff] }
 0xb0b   : > { %2276 = vperm.xlu0 %7225, %v2210_v15  }
 0xb13   : > { %2286 = vperm.xlu0 %7225, %v2212_v26  }
 0xb1b   : > { %1211 = vrot.lane.b32.xlu0 %v8623_v20, %s8156_s29 }
 0xb23   : > { %1223 = vrot.lane.b32.xlu0 %v8599_v9, %s8158_s30 }
 0xb3d   : > { %v2217_v3 = vpop.permute.xlu0 %2216  ;;  %v2232_v47 = vpop.permute.xlu1 %2231 }
 0xb3e   : > { %v2294_v36 = vmul.f32 %v2217_v3, %v942_v18  ;;  %v2297_v30 = vmul.f32 %v2232_v47, %v945_v4  ;;  %v949_v3 = vld [vmem:[%s8531_s2 + $0x38] sm:$0xff] }
 0xb40   : > { %v2310_v9 = vsel %vm1037_vm1, %v2294_v36, 0.0  ;;  %v2331_v25 = vsel %vm1037_vm1, %v2297_v30, 0.0 }
 0xb41   : > { %v2311_v29 = vrot.slane %v2310_v9, 4  ;;  %v2332_v31 = vrot.slane %v2331_v25, 4 }
 0xb43   : > { %v2312_v51 = vadd.f32 %v2311_v29, %v2310_v9  ;;  %v2333_v0 = vadd.f32 %v2332_v31, %v2331_v25 }
 0xb45   : > { %v2222_v61 = vpop.permute.xlu0 %2221  ;;  %v2247_v20 = vpop.permute.xlu1 %2246  ;;  %v2313_v26 = vrot.slane %v2312_v51, 2 }
 0xb46   : > { %v2295_v14 = vmul.f32 %v2222_v61, %v943_v42  ;;  %v2300_v43 = vmul.f32 %v2247_v20, %v948_v41  ;;  %v947_v61 = vld [vmem:[%s8531_s2 + $0x28] sm:$0xff] }
 0xb47   : > { %v2314_v41 = vadd.f32 %v2313_v26, %v2312_v51 }
 0xb48   : > { %v2317_v32 = vsel %vm1037_vm1, %v2295_v14, 0.0  ;;  %v2352_v6 = vsel %vm1037_vm1, %v2300_v43, 0.0 }
 0xb49   : > { %v2318_v62 = vrot.slane %v2317_v32, 4  ;;  %v2353_v27 = vrot.slane %v2352_v6, 4 }
 0xb4b   : > { %v2319_v28 = vadd.f32 %v2318_v62, %v2317_v32  ;;  %v2354_v42 = vadd.f32 %v2353_v27, %v2352_v6 }
 0xb4c   : > { %v8992_v38 = vpop.permute.xlu2 %2271 }
 0xb4d   : > { %v2227_v10 = vpop.permute.xlu0 %2226  ;;  %v2320_v7 = vrot.slane %v2319_v28, 2 }
 0xb4e   : > { %v2296_v12 = vmul.f32 %v2227_v10, %v944_v21  ;;  %v2334_v10 = vrot.slane %v2333_v0, 2 }
 0xb4f   : > { %v2321_v18 = vadd.f32 %v2320_v7, %v2319_v28 }
 0xb50   : > { %v2324_v19 = vsel %vm1037_vm1, %v2296_v12, 0.0  ;;  %v2355_v12 = vrot.slane %v2354_v42, 2  ;;  %v2335_v25 = vadd.f32 %v2334_v10, %v2333_v0  ;;  %v951_v10 = vld [vmem:[%s8531_s2 + $0x48] sm:$0xff] }
 0xb51   : > { %v2325_v37 = vrot.slane %v2324_v19, 4  ;;  %v2322_v30 = vrot.slane %v2321_v18, 1 }
 0xb52   : > { %v2356_v51 = vadd.f32 %v2355_v12, %v2354_v42 }
 0xb53   : > { %v2326_v24 = vadd.f32 %v2325_v37, %v2324_v19  ;;  %v9008_v6 = vadd.f32 %v2322_v30, %v2321_v18 }
 0xb54   : > { %v9000_v40 = vpop.permute.xlu2 %2281  ;;  %v2357_v42 = vrot.slane %v2356_v51, 1 }
 0xb55   : > { %v2237_v11 = vpop.permute.xlu0 %2236  ;;  %v2327_v8 = vrot.slane %v2326_v24, 2 }
 0xb56   : > { %v2298_v2 = vmul.f32 %v2237_v11, %v946_v22  ;;  %v2315_v22 = vrot.slane %v2314_v41, 1 }
 0xb57   : > { %v2328_v36 = vadd.f32 %v2327_v8, %v2326_v24  ;;  %v2336_v8 = vrot.slane %v2335_v25, 1 }
 0xb58   : > { %v2338_v39 = vsel %vm1037_vm1, %v2298_v2, 0.0 }
 0xb59   : > { %v2339_v15 = vrot.slane %v2338_v39, 4  ;;  %v2329_v19 = vrot.slane %v2328_v36, 1 }
 0xb5b   : > { %v2340_v47 = vadd.f32 %v2339_v15, %v2338_v39  ;;  %v9010_v2 = vadd.f32 %v2329_v19, %v2328_v36  ;;  %v9013_v15 = vadd.f32 %v2315_v22, %v2314_v41  ;;  %v9023_v36 = vadd.f32 %v2336_v8, %v2335_v25  ;;  %v953_v41 = vld [vmem:[%s8531_s2 + $0x58] sm:$0xff] }
 0xb5c   : > { %v2252_v14 = vpop.permute.xlu2 %2251  ;;  %v2305_v25 = vmul.f32 %v8992_v38, %v953_v41 }
 0xb5d   : > { %v2341_v21 = vrot.slane %v2340_v47, 2  ;;  %v2301_v4 = vmul.f32 %v2252_v14, %v949_v3  ;;  %v2242_v32 = vpop.permute.xlu0 %2241  ;;  %v2438_v3 = vsel %vm1948_vm11, %v9008_v6, %v9013_v15 }
 0xb5e   : > { %v2299_v20 = vmul.f32 %v2242_v32, %v947_v61  ;;  %v950_v61 = vld [vmem:[%s8531_s2 + $0x40] sm:$0xff]  ;;  %v2439_v18 = vsel %vm1950_vm12, %v9010_v2, %v2438_v3  ;;  %v2387_v8 = vsel %vm1037_vm1, %v2305_v25, 0.0 }
 0xb5f   : > { %v2359_v9 = vsel %vm1037_vm1, %v2301_v4, 0.0  ;;  %v2342_v43 = vadd.f32 %v2341_v21, %v2340_v47 }
 0xb60   : > { %v2345_v62 = vsel %vm1037_vm1, %v2299_v20, 0.0  ;;  %v2360_v37 = vrot.slane %v2359_v9, 4  ;;  %v2440_v20 = vsel %vm1952_vm13, %v9023_v36, %v2439_v18 }
 0xb61   : > { %v2346_v29 = vrot.slane %v2345_v62, 4  ;;  %v2343_v27 = vrot.slane %v2342_v43, 1 }
 0xb62   : > { %v2361_v28 = vadd.f32 %v2360_v37, %v2359_v9  ;;  %v9031_v9 = vadd.f32 %v2357_v42, %v2356_v51  ;;  %v2388_v42 = vrot.slane %v2387_v8, 4 }
 0xb63   : > { %v2347_v24 = vadd.f32 %v2346_v29, %v2345_v62  ;;  %v9021_v14 = vadd.f32 %v2343_v27, %v2342_v43 }
 0xb64   : > { %v2292_v11 = vpop.permute.xlu1 %2291  ;;  %v1214_v31 = vpop.permute.xlu2 %1213  ;;  %v2362_v7 = vrot.slane %v2361_v28, 2 }
 0xb65   : > { %1218 = vst.msk [vmem:[#allocation2 + $0x8] sm:$0xff] %vm1037_vm1, %v1214_v31  ;;  %v2257_v39 = vpop.permute.xlu0 %2256  ;;  %v2348_v0 = vrot.slane %v2347_v24, 2  ;;  %v2441_v62 = vsel %vm1954_vm14, %v9021_v14, %v2440_v20 }
 0xb66   : > { %v2363_v26 = vadd.f32 %v2362_v7, %v2361_v28  ;;  %v2302_v32 = vmul.f32 %v2257_v39, %v950_v61  ;;  %v957_v7 = vld [vmem:[%s8531_s2 + $0x78] sm:$0xff] }
 0xb67   : > { %v2349_v47 = vadd.f32 %v2348_v0, %v2347_v24  ;;  %v955_v24 = vld [vmem:[%s8531_s2 + $0x68] sm:$0xff]  ;;  %v952_v0 = vld [vmem:[%s8531_s2 + $0x50] sm:$0xff] }
 0xb68   : > { %v2364_v21 = vrot.slane %v2363_v26, 1  ;;  %v2366_v28 = vsel %vm1037_vm1, %v2302_v32, 0.0  ;;  %v2307_v38 = vmul.f32 %v9000_v40, %v955_v24  ;;  %v9055_v32 = vld [vmem:[#allocation22 + $0x8] sm:$0xff] }
 0xb69   : > { %v2350_v4 = vrot.slane %v2349_v47, 1  ;;  %v2367_v39 = vrot.slane %v2366_v28, 4  ;;  %2540 = vmatpush.bf16.msra.mxu0 %v9055_v32 }
 0xb6a   : > { %v9036_v43 = vadd.f32 %v2364_v21, %v2363_v26 }
 0xb6b   : > { %v9029_v12 = vadd.f32 %v2350_v4, %v2349_v47  ;;  %v2309_v47 = vmul.f32 %v2292_v11, %v957_v7  ;;  %v2368_v18 = vadd.f32 %v2367_v39, %v2366_v28  ;;  %v2401_v4 = vsel %vm1037_vm1, %v2307_v38, 0.0  ;;  %v9060_v11 = vld [vmem:[#allocation22] sm:$0xff] }
 0xb6c   : > { %v1222_v30 = vpop.permute.xlu1 %1221  ;;  %v9065_v38 = vld [vmem:[#allocation11 + $0x8] sm:$0xff] }
 0xb6d   : > { %1227 = vst.msk [vmem:[#allocation3] sm:$0xff] %vm1037_vm1, %v1222_v30  ;;  %v2262_v19 = vpop.permute.xlu0 %2261  ;;  %v2442_v37 = vsel %vm1956_vm15, %v9029_v12, %v2441_v62  ;;  %v2415_v40 = vsel %vm1037_vm1, %v2309_v47, 0.0  ;;  %v2389_v30 = vadd.f32 %v2388_v42, %v2387_v8  ;;  %v2402_v62 = vrot.slane %v2401_v4, 4  ;;  %2541 = vmatpush.bf16.msra.mxu0 %v9060_v11  ;;  %v7570_v47 = vld [vmem:[#allocation20 + $0x8] sm:$0xff] }
 0xb6e   : > { %v2303_v29 = vmul.f32 %v2262_v19, %v951_v10  ;;  %v2443_v22 = vsel %vm1958_vm0, %v9031_v9, %v2442_v37  ;;  %v2369_v19 = vrot.slane %v2368_v18, 2  ;;  %v2416_v25 = vrot.slane %v2415_v40, 4 }
 0xb6f   : > { %v2444_v31 = vsel %vm1960_vm2, %v9036_v43, %v2443_v22 }
 0xb70   : > { %v2373_v51 = vsel %vm1037_vm1, %v2303_v29, 0.0  ;;  %2454 = vst.msk [vmem:[#allocation4] sm:$0xff] %vm1037_vm1, %v2444_v31  ;;  %v954_v29 = vld [vmem:[%s8531_s2 + $0x60] sm:$0xff]  ;;  %v6978_v31 = vld [vmem:[%s8517_s6 + $0x8] sm:$0xff]  ;;  %v2370_v7 = vadd.f32 %v2369_v19, %v2368_v18 }
 0xb71   : > { %v2374_v27 = vrot.slane %v2373_v51, 4  ;;  %2637 = vmatpush.bf16.msrb.mxu0 %v9065_v38  ;;  %6882 = vmatmul.msk.bf16.vlgmr.msra.gmra.mxu3 %vm1037_vm1, %v6978_v31 }
 0xb72   : > { %3862 = vmatpush.bf16.msra.mxu3 %v7570_v47  ;;  %v2371_v18 = vrot.slane %v2370_v7, 1 }
 0xb73   : > { %v2375_v26 = vadd.f32 %v2374_v27, %v2373_v51  ;;  %v2390_v51 = vrot.slane %v2389_v30, 2  ;;  %v2403_v27 = vadd.f32 %v2402_v62, %v2401_v4  ;;  %v2459_v62 = vpack.c.bf16 %v9023_v36, %v9023_v36 }
 0xb74   : > { %v2689_v3 = vld [vmem:[#allocation3] sm:$0xff]  ;;  %v2458_v36 = vpack.c.bf16 %v9010_v2, %v9010_v2 }
 0xb75   : > { %2693 = vrot.lane.b32.xlu0 %v2689_v3, %s8155_s15  ;;  %v2267_v61 = vpop.permute.xlu0 %2266  ;;  %v2376_v10 = vrot.slane %v2375_v26, 2  ;;  %v2404_v4 = vrot.slane %v2403_v27, 2 }
 0xb76   : > { %v2304_v21 = vmul.f32 %v2267_v61, %v952_v0  ;;  %v2417_v0 = vadd.f32 %v2416_v25, %v2415_v40 }
 0xb77   : > { %v2377_v22 = vadd.f32 %v2376_v10, %v2375_v26  ;;  %v9070_v10 = vld [vmem:[#allocation11] sm:$0xff] }
 0xb78   : > { %v2380_v41 = vsel %vm1037_vm1, %v2304_v21, 0.0  ;;  %v2391_v21 = vadd.f32 %v2390_v51, %v2389_v30  ;;  %2638 = vmatpush.bf16.msrb.mxu0 %v9070_v10  ;;  %v2418_v40 = vrot.slane %v2417_v0, 2  ;;  %v2457_v30 = vpack.c.bf16 %v9008_v6, %v9008_v6 }
 0xb79   : > { %v2381_v20 = vrot.slane %v2380_v41, 4  ;;  %v2378_v3 = vrot.slane %v2377_v22, 1  ;;  %v2405_v51 = vadd.f32 %v2404_v4, %v2403_v27  ;;  %v2490_v27 = vunpack.c.l.b16 %v2458_v36 }
 0xb7a   : > { %v2392_v31 = vrot.slane %v2391_v21, 1 }
 0xb7b   : > { %v2382_v37 = vadd.f32 %v2381_v20, %v2380_v41  ;;  %v956_v20 = vld [vmem:[%s8531_s2 + $0x70] sm:$0xff]  ;;  %v2379_v19 = vadd.f32 %v2378_v3, %v2377_v22  ;;  %v2491_v22 = vunpack.c.l.b16 %v2459_v62  ;;  %v2419_v3 = vadd.f32 %v2418_v40, %v2417_v0 }
 0xb7c   : > { %v2406_v49 = vrot.slane %v2405_v51, 1  ;;  %v2461_v0 = vpack.c.bf16 %v9029_v12, %v9029_v12 }
 0xb7d   : > { %v2383_v28 = vrot.slane %v2382_v37, 2  ;;  %v2277_v24 = vpop.permute.xlu0 %2276 }
 0xb7e   : > { %v2306_v39 = vmul.f32 %v2277_v24, %v954_v29  ;;  %v2456_v29 = vpack.c.bf16 %v9013_v15, %v9013_v15 }
 0xb7f   : > { %v2384_v8 = vadd.f32 %v2383_v28, %v2382_v37  ;;  %v7572_v37 = vld [vmem:[#allocation20] sm:$0xff] }
 0xb80   : > { %v2394_v26 = vsel %vm1037_vm1, %v2306_v39, 0.0  ;;  %3863 = vmatpush.bf16.msra.mxu3 %v7572_v37  ;;  %v2372_v39 = vadd.f32 %v2371_v18, %v2370_v7  ;;  %v2488_v15 = vunpack.c.l.b16 %v2456_v29  ;;  %v2460_v7 = vpack.c.bf16 %v9021_v14, %v9021_v14 }
 0xb81   : > { %v2385_v61 = vrot.slane %v2384_v8, 1  ;;  %v2395_v42 = vrot.slane %v2394_v26, 4  ;;  %v2420_v18 = vrot.slane %v2419_v3, 1 }
 0xb82   : > { %v2464_v59 = vpack.c.bf16 %v2372_v39, %v2372_v39 }
 0xb83   : > { %v2396_v41 = vadd.f32 %v2395_v42, %v2394_v26  ;;  %v2386_v25 = vadd.f32 %v2385_v61, %v2384_v8  ;;  %v2465_v42 = vpack.c.bf16 %v2379_v19, %v2379_v19  ;;  %v2489_v8 = vunpack.c.l.b16 %v2457_v30 }
 0xb84   : > { %v2393_v61 = vadd.f32 %v2392_v31, %v2391_v21  ;;  %v2407_v31 = vadd.f32 %v2406_v49, %v2405_v51  ;;  %v2496_v14 = vunpack.c.l.b16 %v2464_v59 }
 0xb85   : > { %v2397_v28 = vrot.slane %v2396_v41, 2  ;;  %v2287_v24 = vpop.permute.xlu0 %2286  ;;  %v2466_v63 = vpack.c.bf16 %v2386_v25, %v2386_v25 }
 0xb86   : > { %v2308_v26 = vmul.f32 %v2287_v24, %v956_v20  ;;  %v2497_v20 = vunpack.c.l.b16 %v2465_v42  ;;  %v2467_v24 = vpack.c.bf16 %v2393_v61, %v2393_v61 }
 0xb87   : > { %v2398_v47 = vadd.f32 %v2397_v28, %v2396_v41  ;;  %v2445_v41 = vsel %vm1948_vm11, %v2379_v19, %v2372_v39  ;;  %v2498_v40 = vunpack.c.l.b16 %v2466_v63  ;;  %v2504_v28 = vsel %vm1948_vm11, %v2489_v8, %v2488_v15 }
 0xb88   : > { %v2408_v37 = vsel %vm1037_vm1, %v2308_v26, 0.0  ;;  %v2446_v62 = vsel %vm1950_vm12, %v2386_v25, %v2445_v41  ;;  %v2505_v12 = vsel %vm1950_vm12, %v2490_v27, %v2504_v28  ;;  %v2492_v19 = vunpack.c.l.b16 %v2460_v7 }
 0xb89   : > { %v2399_v56 = vrot.slane %v2398_v47, 1  ;;  %v2409_v6 = vrot.slane %v2408_v37, 4  ;;  %v2493_v26 = vunpack.c.l.b16 %v2461_v0  ;;  %v2421_v25 = vadd.f32 %v2420_v18, %v2419_v3 }
 0xb8a   : > { %v2511_v63 = vsel %vm1948_vm11, %v2497_v20, %v2496_v14  ;;  %v2447_v36 = vsel %vm1952_vm13, %v2393_v61, %v2446_v62  ;;  %v2499_v42 = vunpack.c.l.b16 %v2467_v24  ;;  %v2583_v14 = vld [vmem:[#allocation4] sm:$0xff] }
 0xb8b   : > { %v2400_v4 = vadd.f32 %v2399_v56, %v2398_v47  ;;  %v2410_v2 = vadd.f32 %v2409_v6, %v2408_v37  ;;  %v2462_v56 = vpack.c.bf16 %v9031_v9, %v9031_v9  ;;  %v2512_v47 = vsel %vm1950_vm12, %v2498_v40, %v2511_v63 }
 0xb8c   : > { %v2469_v37 = vpack.c.bf16 %v2407_v31, %v2407_v31  ;;  %v2506_v9 = vsel %vm1952_vm13, %v2491_v22, %v2505_v12  ;;  %v2463_v6 = vpack.c.bf16 %v9036_v43, %v9036_v43  ;;  %v2471_v27 = vpack.c.bf16 %v2421_v25, %v2421_v25  ;;  %v7573_v12 = vld [vmem:[#allocation16 + $0x8] sm:$0xff] }
 0xb8d   : > { %v2468_v29 = vpack.c.bf16 %v2400_v4, %v2400_v4  ;;  %v2411_v21 = vrot.slane %v2410_v2, 2  ;;  %v1212_v30 = vpop.permute.xlu0 %1211  ;;  %v2448_v49 = vsel %vm1954_vm14, %v2400_v4, %v2447_v36  ;;  %v2507_v15 = vsel %vm1954_vm14, %v2492_v19, %v2506_v9  ;;  %v7575_v36 = vld [vmem:[%s10750_s4 + $0x8] sm:$0xff] }
 0xb8e   : > { %1217 = vst.msk [vmem:[#allocation2] sm:$0xff] %vm1037_vm1, %v1212_v30  ;;  %v2508_v8 = vsel %vm1956_vm15, %v2493_v26, %v2507_v15  ;;  %v2513_v61 = vsel %vm1952_vm13, %v2499_v42, %v2512_v47  ;;  %v2449_v7 = vsel %vm1956_vm15, %v2407_v31, %v2448_v49  ;;  %v2494_v4 = vunpack.c.l.b16 %v2462_v56  ;;  %v7576_v47 = vld [vmem:[%s10750_s4] sm:$0xff]  ;;  %v2569_v49 = vpop.f32.mrf.mxu1 }
 0xb8f   : > { %v2412_v39 = vadd.f32 %v2411_v21, %v2410_v2  ;;  %v2500_v59 = vunpack.c.l.b16 %v2468_v29  ;;  %v2501_v41 = vunpack.c.l.b16 %v2469_v37  ;;  %v2495_v40 = vunpack.c.l.b16 %v2463_v6 }
 0xb90   : > { %v2509_v62 = vsel %vm1958_vm0, %v2494_v4, %v2508_v8  ;;  %v2503_v29 = vunpack.c.l.b16 %v2471_v27  ;;  %v7577_v4 = vld [vmem:[#allocation13] ss:$0 sm:$0xff] }
 0xb91   : > { %v2413_v51 = vrot.slane %v2412_v39, 1  ;;  %v2514_v2 = vsel %vm1954_vm14, %v2500_v59, %v2513_v61  ;;  %v2510_v28 = vsel %vm1960_vm2, %v2495_v40, %v2509_v62 }
 0xb92   : > { %v2515_v21 = vsel %vm1956_vm15, %v2501_v41, %v2514_v2 }
 0xb93   : > { %v2414_v3 = vadd.f32 %v2413_v51, %v2412_v39  ;;  %v7574_v39 = vld [vmem:[#allocation16] sm:$0xff] }
 0xb95   : > { %v2450_v0 = vsel %vm1958_vm0, %v2414_v3, %v2449_v7  ;;  %v2470_v18 = vpack.c.bf16 %v2414_v3, %v2414_v3  ;;  %v1224_v22 = vpop.permute.xlu0 %1223  ;;  %v2625_v26 = vld [vmem:[#allocation2] sm:$0xff] }
 0xb96   : > { %v2451_v20 = vsel %vm1960_vm2, %v2421_v25, %v2450_v0  ;;  %1228 = vst.msk [vmem:[#allocation3 + $0x8] sm:$0xff] %vm1037_vm1, %v1224_v22  ;;  %v2626_v25 = vld [vmem:[#allocation2 + $0x8] sm:$0xff]  ;;  %v2571_v51 = vpop.f32.mrf.mxu1 }
 0xb97   : > { %2455 = vst.msk [vmem:[#allocation4 + $0x8] sm:$0xff] %vm1037_vm1, %v2451_v20  ;;  %v2502_v43 = vunpack.c.l.b16 %v2470_v18  ;;  %v2627_v63 = vpack.c.bf16 %v2626_v25, %v2625_v26 }
 0xb99   : > { %v2516_v30 = vsel %vm1958_vm0, %v2502_v43, %v2515_v21 }
 0xb9a   : > { %v2517_v24 = vsel %vm1960_vm2, %v2503_v29, %v2516_v30 }
 0xb9b   : > { %v2518_v31 = vpack.c.b16 %v2517_v24, %v2510_v28 }
 0xb9d   : > { %6865 = vmatmul.msk.bf16.vlgmr.msra.gmra.mxu0 %vm1037_vm1, %v2518_v31  ;;  %v2690_v29 = vld [vmem:[#allocation3 + $0x8] sm:$0xff] }
 0xb9e   : > { %v2584_v56 = vld [vmem:[#allocation4 + $0x8] sm:$0xff]  ;;  %2933 = vmatpush.bf16.msra.mxu0 %v7573_v12 }
 0xb9f   : > { %v2585_v19 = vpack.c.bf16 %v2584_v56, %v2583_v14 }
 0xba1   : > { %6877 = vmatmul.msk.bf16.vlgmr.msra.gmra.mxu2 %vm1037_vm1, %v2585_v19 }
 0xba2   : > { %2934 = vmatpush.bf16.msra.mxu0 %v7574_v39  ;;  %3848 = vmatpush.bf16.msra.mxu2 %v9055_v32 }
 0xba6   : > { %3849 = vmatpush.bf16.msra.mxu2 %v9060_v11  ;;  %v7232_v11 = vld [vmem:[%s10763_s19] ss:$0 sm:$0xff] }
 0xbad   : > { %6883 = vmatmul.msk.bf16.vlgmr.msrb.gmra.mxu0 %vm1037_vm1, %v2627_v63 }
 0xbae   : > { %3892 = vmatpush.bf16.msrb.mxu0 %v7575_v36 }
 0xbb2   : > { %3893 = vmatpush.bf16.msrb.mxu0 %v7576_v47 }
 0xbf4   : > { %v2620_v3 = vpop.f32.mrf.mxu3 }
 0xbfc   : > { %v2622_v18 = vpop.f32.mrf.mxu3 }
 0xc1a   : > { %v2543_v32 = vpop.f32.mrf.mxu0 }
 0xc1b   : > { %v2570_v59 = vadd.f32 %v2569_v49, %v2543_v32 }
 0xc1d   : > { %v2574_v15 = vadd.f32 %v7232_v11, %v2570_v59 }
 0xc22   : > { %v2545_v42 = vpop.f32.mrf.mxu0 }
 0xc23   : > { %v2572_v37 = vadd.f32 %v2571_v51, %v2545_v42 }
 0xc24   : > { %v2598_v9 = vpop.f32.mrf.mxu2 }
 0xc25   : > { %v2575_v6 = vadd.f32 %v7232_v11, %v2572_v37  ;;  %v2621_v27 = vadd.f32 %v2620_v3, %v2598_v9 }
 0xc27   : > { %v6985_v8 = vpack.c.bf16 %v2575_v6, %v2574_v15 }
 0xc29   : > { %6986 = vst [vmem:[%s8559_s8] sm:$0xff] %v6985_v8  }
 0xc2a   : > { %v2640_v61 = vpop.f32.mrf.mxu0 }
 0xc2b   : > { %v2645_v7 = vadd.f32 %v2640_v61, %v2621_v27 }
 0xc2c   : > { %v2600_v0 = vpop.f32.mrf.mxu2 }
 0xc2d   : > { %v2647_v2 = vadd.f32 %v7577_v4, %v2645_v7  ;;  %v2623_v22 = vadd.f32 %v2622_v18, %v2600_v0 }
 0xc2f   : > { %7317 = vtanh.f32 %v2647_v2  ;;  %v6884_v21 = vmul.f32 -1.442695, %v2647_v2 }
 0xc32   : > { %v2642_v41 = vpop.f32.mrf.mxu0 }
 0xc33   : > { %v2646_v20 = vadd.f32 %v2642_v41, %v2623_v22 }
 0xc35   : > { %v7318_v43 = vpop.eup %7317  ;;  %v2648_v62 = vadd.f32 %v7577_v4, %v2646_v20  ;;  %v2694_v4 = vpop.permute.xlu0 %2693 }
 0xc36   : > { %2703 = vrot.lane.b32.xlu2 %v7318_v43, %s8155_s15 }
 0xc37   : > { %7319 = vtanh.f32 %v2648_v62  ;;  %v6885_v56 = vmul.f32 -1.442695, %v2648_v62 }
 0xc38   : > { %7321 = vpow2.f32 %v6884_v21 }
 0xc3d   : > { %v7320_v40 = vpop.eup %7319 }
 0xc3e   : > { %2705 = vrot.lane.b32.xlu1 %v7320_v40, %s8155_s15  ;;  %2695 = vrot.lane.b32.xlu2 %v2690_v29, %s8155_s15  ;;  %v7322_v30 = vpop.eup %7321 }
 0xc3f   : > { %v2655_v28 = vadd.f32 1.0, %v7322_v30 }
 0xc41   : > { %7323 = vrcp.f32 %v2655_v28  ;;  %v2668_v39 = vand.u32 2147483648, %v2655_v28  ;;  %vm2662_vm5 = vweird.f32 %v2655_v28  ;;  %v2666_v26 = vand.u32 2147483647, %v2655_v28 }
 0xc42   : > { %7325 = vpow2.f32 %v6885_v56 }
 0xc43   : > { %v2669_v36 = vor.u32 1.1754944e-38, %v2668_v39  ;;  %vm2667_vm7 = vcmp.eq.f32.partialorder %v2666_v26, 8.507059e+37 }
 0xc47   : > { %v7324_v24 = vpop.eup %7323 }
 0xc48   : > { %v2658_v31 = vmul.f32 %v7324_v24, %v2655_v28  ;;  %vm2663_vm4 = vweird.f32 %v7324_v24  ;;  %v7326_v25 = vpop.eup %7325 }
 0xc49   : > { %vm2664_vm6 = vmor %vm2662_vm5, %vm2663_vm4  ;;  %v2656_v47 = vadd.f32 1.0, %v7326_v25 }
 0xc4a   : > { %v2659_v14 = vsub.f32 1.0, %v2658_v31  ;;  %v7578_v31 = vld [vmem:[%s10751_s13 + $0x8] sm:$0xff] }
 0xc4b   : > { %7327 = vrcp.f32 %v2656_v47  ;;  %v2683_v15 = vand.u32 2147483648, %v2656_v47  ;;  %vm2677_vm9 = vweird.f32 %v2656_v47  ;;  %v2681_v6 = vand.u32 2147483647, %v2656_v47 }
 0xc4c   : > { %v2660_v12 = vmul.f32 %v7324_v24, %v2659_v14  ;;  %v7579_v14 = vld [vmem:[%s10751_s13] sm:$0xff] }
 0xc4d   : > { %v2684_v8 = vor.u32 1.1754944e-38, %v2683_v15  ;;  %vm2682_vm4 = vcmp.eq.f32.partialorder %v2681_v6, 8.507059e+37 }
 0xc4e   : > { %v2661_v19 = vadd.f32 %v7324_v24, %v2660_v12 }
 0xc50   : > { %v2665_v63 = vsel %vm2664_vm6, %v7324_v24, %v2661_v19 }
 0xc51   : > { %v2670_v32 = vsel %vm2667_vm7, %v2669_v36, %v2665_v63  ;;  %v7328_v59 = vpop.eup %7327 }
 0xc52   : > { %v2673_v51 = vmul.f32 %v7328_v59, %v2656_v47  ;;  %vm2678_vm8 = vweird.f32 %v7328_v59  ;;  %v2699_v2 = vmul.f32 %v2694_v4, %v2670_v32  ;;  %v7580_v47 = vld [vmem:[%s10754_s26] ss:$0 sm:$0xff] }
 0xc53   : > { %vm2679_vm10 = vmor %vm2677_vm9, %vm2678_vm8 }
 0xc54   : > { %v2674_v42 = vsub.f32 1.0, %v2673_v51 }
 0xc56   : > { %v2675_v37 = vmul.f32 %v7328_v59, %v2674_v42 }
 0xc58   : > { %v2676_v9 = vadd.f32 %v7328_v59, %v2675_v37 }
 0xc5a   : > { %v2680_v3 = vsel %vm2679_vm10, %v7328_v59, %v2676_v9 }
 0xc5b   : > { %v2685_v27 = vsel %vm2682_vm4, %v2684_v8, %v2680_v3 }
 0xc90   : > { %v2704_v49 = vpop.permute.xlu2 %2703 }
 0xc91   : > { %v2709_v11 = vmul.f32 %v2704_v49, %v2670_v32 }
 0xc93   : > { %2713 = vrot.lane.b32.xlu1 %v2709_v11, %s8155_s15 }
 0xcb0   : > { %v2706_v61 = vpop.permute.xlu1 %2705 }
 0xcb1   : > { %v2710_v7 = vmul.f32 %v2706_v61, %v2685_v27 }
 0xcb3   : > { %2715 = vrot.lane.b32.xlu0 %v2710_v7, %s8155_s15 }
 0xcbb   : > { %1384 = vrot.lane.b32.xlu0 %v8659_v35, %s8156_s29  ;;  %v2696_v35 = vpop.permute.xlu2 %2695 }
 0xcbc   : > { %v2700_v41 = vmul.f32 %v2696_v35, %v2685_v27 }
 0xcc3   : > { %1394 = vrot.lane.b32.xlu0 %v8644_v23, %s8158_s30 }
 0xd05   : > { %v2714_v0 = vpop.permute.xlu1 %2713 }
 0xd06   : > { %v9139_v18 = vadd.f32 %v2714_v0, %v2699_v2 }
 0xd08   : > { %7329 = vtanh.f32 %v9139_v18 }
 0xd0e   : > { %v7330_v22 = vpop.eup %7329 }
 0xd0f   : > { %2725 = vrot.lane.b32.xlu2 %v7330_v22, %s8155_s15 }
 0xd17   : > { %1386 = vrot.lane.b32.xlu2 %v8657_v34, %s8156_s29 }
 0xd1f   : > { %1396 = vrot.lane.b32.xlu2 %v8640_v17, %s8158_s30 }
 0xd25   : > { %v2716_v20 = vpop.permute.xlu0 %2715 }
 0xd26   : > { %v9147_v23 = vadd.f32 %v2716_v20, %v2700_v41 }
 0xd28   : > { %7331 = vtanh.f32 %v9147_v23 }
 0xd2d   : > { %v1385_v43 = vpop.permute.xlu0 %1384 }
 0xd2e   : > { %v7332_v62 = vpop.eup %7331  ;;  %1390 = vst.msk [vmem:[#allocation2 + $0x10] sm:$0xff] %vm1037_vm1, %v1385_v43 }
 0xd2f   : > { %2727 = vrot.lane.b32.xlu1 %v7332_v62, %s8155_s15 }
 0xd35   : > { %v1395_v40 = vpop.permute.xlu0 %1394  ;;  %v2754_v30 = vld [vmem:[#allocation2 + $0x10] sm:$0xff] }
 0xd36   : > { %1400 = vst.msk [vmem:[#allocation3 + $0x10] sm:$0xff] %vm1037_vm1, %v1395_v40 }
 0xd3d   : > { %v2836_v34 = vld [vmem:[#allocation3 + $0x10] sm:$0xff] }
 0xd3e   : > { %2840 = vrot.lane.b32.xlu2 %v2836_v34, %s8155_s15 }
 0xd69   : > { %v2726_v17 = vpop.permute.xlu2 %2725 }
 0xd6a   : > { %v9163_v12 = vmul.f32 %v2726_v17, %v2670_v32 }
 0xd71   : > { %v1387_v29 = vpop.permute.xlu2 %1386 }
 0xd72   : > { %1391 = vst.msk [vmem:[#allocation2 + $0x18] sm:$0xff] %vm1037_vm1, %v1387_v29 }
 0xd79   : > { %v1397_v21 = vpop.permute.xlu2 %1396  ;;  %v2755_v28 = vld [vmem:[#allocation2 + $0x18] sm:$0xff] }
 0xd7a   : > { %1401 = vst.msk [vmem:[#allocation3 + $0x18] sm:$0xff] %vm1037_vm1, %v1397_v21  ;;  %v2756_v24 = vpack.c.bf16 %v2755_v28, %v2754_v30 }
 0xd7c   : > { %6886 = vmatmul.msk.bf16.vlgmr.msrb.gmra.mxu1 %vm1037_vm1, %v2756_v24 }
 0xd7d   : > { %3914 = vmatpush.bf16.msrb.mxu1 %v7578_v31 }
 0xd81   : > { %3915 = vmatpush.bf16.msrb.mxu1 %v7579_v14  ;;  %v2837_v37 = vld [vmem:[#allocation3 + $0x18] sm:$0xff] }
 0xda1   : > { %v2728_v56 = vpop.permute.xlu1 %2727 }
 0xda2   : > { %v9165_v19 = vmul.f32 %v2728_v56, %v2685_v27 }
 0xda4   : > { %v2753_v39 = vpack.c.bf16 %v9165_v19, %v9163_v12 }
 0xda6   : > { %2775 = vrot.lane.b32.xlu1 %v2753_v39, %s8156_s29 }
 0xdf9   : > { %v2769_v25 = vpop.f32.mrf.mxu1 }
 0xe01   : > { %v2771_v32 = vpop.f32.mrf.mxu1 }
 0xe18   : > { %v2776_v26 = vpop.permute.xlu1 %2775 }
 0xe19   : > { %6887 = vmatmul.msk.bf16.vlgmr.msrb.gmra.mxu2 %vm1037_vm1, %v2776_v26  ;;  %v2841_v26 = vpop.permute.xlu2 %2840 }
 0xe1a   : > { %3934 = vmatpush.bf16.msrb.mxu2 %v9065_v38 }
 0xe1e   : > { %3935 = vmatpush.bf16.msrb.mxu2 %v9070_v10 }
 0xe9c   : > { %v2789_v63 = vpop.f32.mrf.mxu2 }
 0xe9d   : > { %v2790_v36 = vadd.f32 %v2789_v63, %v2769_v25 }
 0xe9f   : > { %v2794_v49 = vadd.f32 %v7580_v47, %v2790_v36 }
 0xea1   : > { %7333 = vtanh.f32 %v2794_v49  ;;  %v6888_v10 = vmul.f32 -1.442695, %v2794_v49 }
 0xea4   : > { %v2791_v11 = vpop.f32.mrf.mxu2 }
 0xea5   : > { %v2792_v59 = vadd.f32 %v2791_v11, %v2771_v32 }
 0xea7   : > { %v7334_v51 = vpop.eup %7333  ;;  %v2795_v42 = vadd.f32 %v7580_v47, %v2792_v59 }
 0xea8   : > { %2850 = vrot.lane.b32.xlu1 %v7334_v51, %s8155_s15 }
 0xea9   : > { %7335 = vtanh.f32 %v2795_v42  ;;  %v6889_v9 = vmul.f32 -1.442695, %v2795_v42 }
 0xeaa   : > { %7337 = vpow2.f32 %v6888_v10 }
 0xeab   : > { %7339 = vpow2.f32 %v6889_v9 }
 0xeaf   : > { %v7336_v38 = vpop.eup %7335 }
 0xeb0   : > { %2842 = vrot.lane.b32.xlu1 %v2837_v37, %s8155_s15  ;;  %2852 = vrot.lane.b32.xlu0 %v7336_v38, %s8155_s15  ;;  %v7338_v15 = vpop.eup %7337 }
 0xeb1   : > { %v2802_v6 = vadd.f32 1.0, %v7338_v15  ;;  %v7340_v3 = vpop.eup %7339 }
 0xeb2   : > { %v2803_v8 = vadd.f32 1.0, %v7340_v3 }
 0xeb3   : > { %7341 = vrcp.f32 %v2802_v6  ;;  %v2815_v41 = vand.u32 2147483648, %v2802_v6  ;;  %vm2809_vm6 = vweird.f32 %v2802_v6  ;;  %v2813_v20 = vand.u32 2147483647, %v2802_v6 }
 0xeb4   : > { %7343 = vrcp.f32 %v2803_v8  ;;  %v2830_v30 = vand.u32 2147483648, %v2803_v8  ;;  %vm2824_vm10 = vweird.f32 %v2803_v8  ;;  %v2828_v28 = vand.u32 2147483647, %v2803_v8 }
 0xeb5   : > { %v2816_v40 = vor.u32 1.1754944e-38, %v2815_v41  ;;  %vm2814_vm8 = vcmp.eq.f32.partialorder %v2813_v20, 8.507059e+37  ;;  %v7585_v41 = vld [vmem:[%s10755_s28] ss:$0 sm:$0xff] }
 0xeb6   : > { %v2831_v31 = vor.u32 1.1754944e-38, %v2830_v30  ;;  %vm2829_vm3 = vcmp.eq.f32.partialorder %v2828_v28, 8.507059e+37 }
 0xeb9   : > { %v7342_v27 = vpop.eup %7341 }
 0xeba   : > { %v2805_v61 = vmul.f32 %v7342_v27, %v2802_v6  ;;  %v7344_v4 = vpop.eup %7343  ;;  %vm2810_vm5 = vweird.f32 %v7342_v27 }
 0xebb   : > { %v2820_v0 = vmul.f32 %v7344_v4, %v2803_v8  ;;  %vm2811_vm7 = vmor %vm2809_vm6, %vm2810_vm5  ;;  %vm2825_vm9 = vweird.f32 %v7344_v4 }
 0xebc   : > { %v2806_v7 = vsub.f32 1.0, %v2805_v61  ;;  %vm2826_vm4 = vmor %vm2824_vm10, %vm2825_vm9  ;;  %v7582_v61 = vld [vmem:[%s10753_s27] sm:$0xff] }
 0xebd   : > { %v2821_v35 = vsub.f32 1.0, %v2820_v0 }
 0xebe   : > { %v2807_v2 = vmul.f32 %v7342_v27, %v2806_v7 }
 0xebf   : > { %v2822_v62 = vmul.f32 %v7344_v4, %v2821_v35 }
 0xec0   : > { %v2808_v22 = vadd.f32 %v7342_v27, %v2807_v2  ;;  %v7584_v2 = vld [vmem:[#allocation14] sm:$0xff] }
 0xec1   : > { %v2823_v21 = vadd.f32 %v7344_v4, %v2822_v62 }
 0xec2   : > { %v2812_v43 = vsel %vm2811_vm7, %v7342_v27, %v2808_v22  ;;  %v7581_v27 = vld [vmem:[%s10753_s27 + $0x8] sm:$0xff] }
 0xec3   : > { %v2817_v17 = vsel %vm2814_vm8, %v2816_v40, %v2812_v43  ;;  %v2827_v24 = vsel %vm2826_vm4, %v7344_v4, %v2823_v21  ;;  %v7583_v4 = vld [vmem:[#allocation14 + $0x8] sm:$0xff] }
 0xec4   : > { %v2832_v14 = vsel %vm2829_vm3, %v2831_v31, %v2827_v24  ;;  %v2846_v11 = vmul.f32 %v2841_v26, %v2817_v17 }
 0xf1a   : > { %v2851_v34 = vpop.permute.xlu1 %2850 }
 0xf1b   : > { %v2856_v29 = vmul.f32 %v2851_v34, %v2817_v17 }
 0xf1d   : > { %2860 = vrot.lane.b32.xlu0 %v2856_v29, %s8155_s15 }
 0xf22   : > { %v2853_v56 = vpop.permute.xlu0 %2852  ;;  %v2843_v25 = vpop.permute.xlu1 %2842 }
 0xf23   : > { %v2857_v39 = vmul.f32 %v2853_v56, %v2832_v14  ;;  %v2847_v63 = vmul.f32 %v2843_v25, %v2832_v14 }
 0xf25   : > { %2862 = vrot.lane.b32.xlu2 %v2857_v39, %s8155_s15 }
 0xf2d   : > { %1557 = vrot.lane.b32.xlu2 %v8690_v46, %s8156_s29 }
 0xf35   : > { %1567 = vrot.lane.b32.xlu2 %v8680_v1, %s8158_s30 }
 0xf7f   : > { %v2863_v36 = vpop.permute.xlu2 %2862 }
 0xf80   : > { %v9185_v47 = vadd.f32 %v2863_v36, %v2847_v63 }
 0xf82   : > { %7345 = vtanh.f32 %v9185_v47 }
 0xf87   : > { %v1558_v49 = vpop.permute.xlu2 %1557 }
 0xf88   : > { %v7346_v32 = vpop.eup %7345  ;;  %1563 = vst.msk [vmem:[#allocation2 + $0x20] sm:$0xff] %vm1037_vm1, %v1558_v49 }
 0xf89   : > { %2874 = vrot.lane.b32.xlu0 %v7346_v32, %s8155_s15 }
 0xf8f   : > { %v1568_v59 = vpop.permute.xlu2 %1567  ;;  %v2861_v46 = vpop.permute.xlu0 %2860  ;;  %v2901_v3 = vld [vmem:[#allocation2 + $0x20] sm:$0xff] }
 0xf90   : > { %1573 = vst.msk [vmem:[#allocation3 + $0x20] sm:$0xff] %vm1037_vm1, %v1568_v59  ;;  %v9191_v1 = vadd.f32 %v2861_v46, %v2846_v11 }
 0xf92   : > { %7347 = vtanh.f32 %v9191_v1 }
 0xf97   : > { %v2983_v42 = vld [vmem:[#allocation3 + $0x20] sm:$0xff] }
 0xf98   : > { %v7348_v51 = vpop.eup %7347 }
 0xf99   : > { %2872 = vrot.lane.b32.xlu1 %v7348_v51, %s8155_s15 }
 0xfa1   : > { %1559 = vrot.lane.b32.xlu1 %v8688_v45, %s8156_s29 }
 0xfa9   : > { %1569 = vrot.lane.b32.xlu1 %v8676_v33, %s8158_s30 }
 0xfb1   : > { %2987 = vrot.lane.b32.xlu1 %v2983_v42, %s8155_s15 }
 0xffb   : > { %v2875_v38 = vpop.permute.xlu0 %2874 }
 0xffc   : > { %v9200_v10 = vmul.f32 %v2875_v38, %v2832_v14 }
0x100b   : > { %v2873_v37 = vpop.permute.xlu1 %2872 }
0x100c   : > { %v9202_v9 = vmul.f32 %v2873_v37, %v2817_v17 }
0x100e   : > { %v2900_v15 = vpack.c.bf16 %v9200_v10, %v9202_v9 }
0x1010   : > { %2922 = vrot.lane.b32.xlu0 %v2900_v15, %s8156_s29 }
0x1013   : > { %v1560_v6 = vpop.permute.xlu1 %1559 }
0x1014   : > { %1564 = vst.msk [vmem:[#allocation2 + $0x28] sm:$0xff] %vm1037_vm1, %v1560_v6 }
0x101b   : > { %v1570_v45 = vpop.permute.xlu1 %1569  ;;  %v2902_v33 = vld [vmem:[#allocation2 + $0x28] sm:$0xff] }
0x101c   : > { %1574 = vst.msk [vmem:[#allocation3 + $0x28] sm:$0xff] %vm1037_vm1, %v1570_v45  ;;  %v2903_v8 = vpack.c.bf16 %v2902_v33, %v2901_v3 }
0x101e   : > { %6890 = vmatmul.msk.bf16.vlgmr.msrb.gmra.mxu3 %vm1037_vm1, %v2903_v8 }
0x101f   : > { %4063 = vmatpush.bf16.msrb.mxu3 %v7581_v27 }
0x1023   : > { %4064 = vmatpush.bf16.msrb.mxu3 %v7582_v61  ;;  %v2984_v21 = vld [vmem:[#allocation3 + $0x28] sm:$0xff] }
0x1082   : > { %v2923_v7 = vpop.permute.xlu0 %2922 }
0x1083   : > { %6891 = vmatmul.msk.bf16.vlgmr.msra.gmra.mxu0 %vm1037_vm1, %v2923_v7 }
0x1084   : > { %4083 = vmatpush.bf16.msra.mxu0 %v7583_v4 }
0x1088   : > { %4084 = vmatpush.bf16.msra.mxu0 %v7584_v2  ;;  %v2988_v2 = vpop.permute.xlu1 %2987 }
0x10a1   : > { %v2916_v0 = vpop.f32.mrf.mxu3 }
0x10a9   : > { %v2918_v43 = vpop.f32.mrf.mxu3 }
0x1100   : > { %v2936_v22 = vpop.f32.mrf.mxu0 }
0x1101   : > { %v2937_v35 = vadd.f32 %v2936_v22, %v2916_v0 }
0x1103   : > { %v2941_v20 = vadd.f32 %v7585_v41, %v2937_v35 }
0x1105   : > { %7349 = vtanh.f32 %v2941_v20  ;;  %v6892_v31 = vmul.f32 -1.442695, %v2941_v20 }
0x1108   : > { %v2938_v62 = vpop.f32.mrf.mxu0 }
0x1109   : > { %v2939_v40 = vadd.f32 %v2938_v62, %v2918_v43 }
0x110b   : > { %v7350_v34 = vpop.eup %7349  ;;  %v2942_v17 = vadd.f32 %v7585_v41, %v2939_v40 }
0x110c   : > { %2997 = vrot.lane.b32.xlu0 %v7350_v34, %s8155_s15 }
0x110d   : > { %7351 = vtanh.f32 %v2942_v17  ;;  %v6893_v30 = vmul.f32 -1.442695, %v2942_v17 }
0x110f   : > { %7353 = vpow2.f32 %v6893_v30 }
0x1113   : > { %v7352_v29 = vpop.eup %7351 }
0x1114   : > { %2999 = vrot.lane.b32.xlu2 %v7352_v29, %s8155_s15  ;;  %2989 = vrot.lane.b32.xlu0 %v2984_v21, %s8155_s15 }
0x1115   : > { %v7354_v28 = vpop.eup %7353 }
0x1116   : > { %v2950_v24 = vadd.f32 1.0, %v7354_v28 }
0x1118   : > { %7355 = vrcp.f32 %v2950_v24  ;;  %v2977_v32 = vand.u32 2147483648, %v2950_v24  ;;  %vm2971_vm5 = vweird.f32 %v2950_v24  ;;  %v2975_v11 = vand.u32 2147483647, %v2950_v24 }
0x1119   : > { %7357 = vpow2.f32 %v6892_v31  ;;  %v7586_v31 = vld [vmem:[#allocation17 + $0x8] sm:$0xff] }
0x111a   : > { %v2978_v51 = vor.u32 1.1754944e-38, %v2977_v32  ;;  %vm2976_vm7 = vcmp.eq.f32.partialorder %v2975_v11, 8.507059e+37 }
0x111e   : > { %v7356_v14 = vpop.eup %7355 }
0x111f   : > { %v7358_v56 = vpop.eup %7357  ;;  %v2967_v39 = vmul.f32 %v7356_v14, %v2950_v24  ;;  %vm2972_vm3 = vweird.f32 %v7356_v14 }
0x1120   : > { %v2949_v26 = vadd.f32 1.0, %v7358_v56  ;;  %vm2973_vm6 = vmor %vm2971_vm5, %vm2972_vm3  ;;  %v7588_v56 = vld [vmem:[#allocation17] sm:$0xff]  ;;  %vm10768_vm3 = vcmask 64512  }
0x1121   : > { %v2968_v25 = vsub.f32 1.0, %v2967_v39  ;;  %v7589_v39 = vld [vmem:[#allocation19] sm:$0xff]  ;;  %vm10769_vm5 = vmmov %vm10768_vm3 }
0x1122   : > { %7359 = vrcp.f32 %v2949_v26  ;;  %v2962_v3 = vand.u32 2147483648, %v2949_v26  ;;  %vm2956_vm9 = vweird.f32 %v2949_v26  ;;  %v2960_v33 = vand.u32 2147483647, %v2949_v26 }
0x1123   : > { %v2969_v63 = vmul.f32 %v7356_v14, %v2968_v25  ;;  %v7590_v25 = vld [vmem:[%s10756_s18] ss:$0 sm:$0xff] }
0x1124   : > { %v2963_v27 = vor.u32 1.1754944e-38, %v2962_v3  ;;  %vm2961_vm4 = vcmp.eq.f32.partialorder %v2960_v33, 8.507059e+37  ;;  %v7593_v3 = vld [vmem:[%s8525_s10 + $0x8] sm:$0xff] }
0x1125   : > { %v2970_v36 = vadd.f32 %v7356_v14, %v2969_v63 }
0x1127   : > { %v2974_v59 = vsel %vm2973_vm6, %v7356_v14, %v2970_v36  ;;  %v7587_v14 = vld [vmem:[#allocation19 + $0x8] sm:$0xff]  ;;  %vm10770_vm6 = vmmov %vm10768_vm3 }
0x1128   : > { %v7360_v49 = vpop.eup %7359  ;;  %v2979_v38 = vsel %vm2976_vm7, %v2978_v51, %v2974_v59  ;;  %vm10771_vm7 = vmmov %vm10768_vm3 }
0x1129   : > { %v2952_v46 = vmul.f32 %v7360_v49, %v2949_v26  ;;  %vm2957_vm8 = vweird.f32 %v7360_v49 }
0x112a   : > { %vm2958_vm10 = vmor %vm2956_vm9, %vm2957_vm8 }
0x112b   : > { %v2953_v15 = vsub.f32 1.0, %v2952_v46  ;;  %v7591_v46 = vld [vmem:[%s8525_s10] sm:$0xff] }
0x112d   : > { %v2954_v6 = vmul.f32 %v7360_v49, %v2953_v15 }
0x112f   : > { %v2955_v45 = vadd.f32 %v7360_v49, %v2954_v6  ;;  %v7592_v6 = vld [vmem:[%s8525_s10 + $0x20] sm:$0xff] }
0x1131   : > { %v2959_v8 = vsel %vm2958_vm10, %v7360_v49, %v2955_v45 }
0x1132   : > { %v2964_v7 = vsel %vm2961_vm4, %v2963_v27, %v2959_v8 }
0x1133   : > { %v2993_v0 = vmul.f32 %v2988_v2, %v2964_v7 }
0x116e   : > { %v3000_v42 = vpop.permute.xlu2 %2999 }
0x116f   : > { %v3004_v37 = vmul.f32 %v3000_v42, %v2979_v38 }
0x1171   : > { %3009 = vrot.lane.b32.xlu1 %v3004_v37, %s8155_s15 }
0x117e   : > { %v2998_v61 = vpop.permute.xlu0 %2997 }
0x117f   : > { %v3003_v4 = vmul.f32 %v2998_v61, %v2964_v7 }
0x1181   : > { %3007 = vrot.lane.b32.xlu2 %v3003_v4, %s8155_s15 }
0x1186   : > { %v2990_v41 = vpop.permute.xlu0 %2989 }
0x1187   : > { %v2994_v20 = vmul.f32 %v2990_v41, %v2979_v38 }
0x11db   : > { %v3008_v22 = vpop.permute.xlu2 %3007 }
0x11dc   : > { %v9225_v35 = vadd.f32 %v3008_v22, %v2993_v0  ;;  %v7594_v0 = vld [vmem:[%s8525_s10 + $0x10] sm:$0xff] }
0x11de   : > { %7361 = vtanh.f32 %v9225_v35 }
0x11e3   : > { %v3010_v43 = vpop.permute.xlu1 %3009 }
0x11e4   : > { %v7362_v62 = vpop.eup %7361  ;;  %v9228_v40 = vadd.f32 %v3010_v43, %v2994_v20  ;;  %v7595_v43 = vld [vmem:[%s8525_s10 + $0x38] sm:$0xff] }
0x11e5   : > { %3019 = vrot.lane.b32.xlu0 %v7362_v62, %s8155_s15 }
0x11e6   : > { %7363 = vtanh.f32 %v9228_v40 }
0x11ec   : > { %v7364_v34 = vpop.eup %7363 }
0x11ed   : > { %3021 = vrot.lane.b32.xlu2 %v7364_v34, %s8155_s15  ;;  %v7596_v34 = vld [vmem:[%s8525_s10 + $0x18] sm:$0xff] }
0x1247   : > { %v3022_v17 = vpop.permute.xlu2 %3021 }
0x1248   : > { %v9233_v21 = vmul.f32 %v3022_v17, %v2979_v38 }
0x1257   : > { %v3020_v29 = vpop.permute.xlu0 %3019 }
0x1258   : > { %v9235_v30 = vmul.f32 %v3020_v29, %v2964_v7 }
0x125a   : > { %v3047_v28 = vpack.c.bf16 %v9233_v21, %v9235_v30 }
0x125c   : > { %3049 = vrot.lane.b32.xlu1 %v3047_v28, %s8156_s29 }
0x12ce   : > { %v3050_v24 = vpop.permute.xlu1 %3049 }
0x12cf   : > { %6894 = vmatmul.msk.bf16.vlgmr.msra.gmra.mxu1 %vm1037_vm1, %v3050_v24  ;;  %6896 = vmatmul.msk.bf16.vlgmr.msra.gmra.mxu3 %vm1037_vm1, %v3050_v24 }
0x12d0   : > { %4210 = vmatpush.bf16.msra.mxu1 %v7586_v31  ;;  %4357 = vmatpush.bf16.msra.mxu3 %v7587_v14 }
0x12d4   : > { %4211 = vmatpush.bf16.msra.mxu1 %v7588_v56  ;;  %4358 = vmatpush.bf16.msra.mxu3 %v7589_v39 }
0x134c   : > { %v3063_v26 = vpop.f32.mrf.mxu1 }
0x134d   : > { %v3064_v63 = vadd.f32 %v7590_v25, %v3063_v26  ;;  %v7597_v26 = vld [vmem:[%s8525_s10 + $0x28] sm:$0xff] }
0x134f   : > { %v3084_v36 = vperm.slane %v3064_v63, 0  ;;  %v3073_v49 = vrot.slane %v3064_v63, 4  ;;  %v3070_v32 = vrot.slane %v3064_v63, 1  ;;  %v3071_v11 = vrot.slane %v3064_v63, 2 }
0x1350   : > { %v3076_v59 = vrot.slane %v3064_v63, 7  ;;  %v3072_v37 = vrot.slane %v3064_v63, 3  ;;  %v3074_v41 = vrot.slane %v3064_v63, 5  ;;  %v3075_v29 = vrot.slane %v3064_v63, 6 }
0x1351   : > { %v3116_v51 = vmul.f32 %v7591_v46, %v3084_v36  ;;  %v3088_v42 = vperm.slane %v3073_v49, 0  ;;  %v3085_v38 = vperm.slane %v3070_v32, 0  ;;  %v3086_v8 = vperm.slane %v3071_v11, 0  ;;  %v7598_v49 = vld [vmem:[%s8525_s10 + $0x40] sm:$0xff]  ;;  %v7599_v11 = vld [vmem:[%s8525_s10 + $0x30] sm:$0xff] }
0x1352   : > { %v3091_v7 = vperm.slane %v3076_v59, 0  ;;  %v3087_v4 = vperm.slane %v3072_v37, 0  ;;  %v3089_v24 = vperm.slane %v3074_v41, 0  ;;  %v3090_v39 = vperm.slane %v3075_v29, 0 }
0x1353   : > { %v3132_v15 = vsel %vm1037_vm1, %v3116_v51, 0.0  ;;  %v3120_v45 = vmul.f32 %v7592_v6, %v3088_v42  ;;  %v3117_v33 = vmul.f32 %v7593_v3, %v3085_v38  ;;  %v3118_v22 = vmul.f32 %v7594_v0, %v3086_v8  ;;  %v7601_v8 = vld [vmem:[%s8525_s10 + $0x50] sm:$0xff] }
0x1354   : > { %3133 = vadd.xlane.f32.xlu0 %v3132_v15  ;;  %v3065_v2 = vpop.f32.mrf.mxu1  ;;  %v3123_v62 = vmul.f32 %v7595_v43, %v3091_v7  ;;  %v3119_v17 = vmul.f32 %v7596_v34, %v3087_v4  ;;  %v3122_v63 = vmul.f32 %v7599_v11, %v3090_v39 }
0x1355   : > { %v3144_v27 = vsel %vm1037_vm1, %v3120_v45, 0.0  ;;  %v3135_v61 = vsel %vm1037_vm1, %v3117_v33, 0.0  ;;  %v3066_v20 = vadd.f32 %v7590_v25, %v3065_v2  ;;  %v3138_v28 = vsel %vm1037_vm1, %v3118_v22, 0.0  ;;  %v7600_v45 = vld [vmem:[%s8525_s10 + $0x58] sm:$0xff] }
0x1356   : > { %3145 = vadd.xlane.f32.xlu1 %v3144_v27  ;;  %3136 = vadd.xlane.f32.xlu2 %v3135_v61  ;;  %v3153_v31 = vsel %vm1037_vm1, %v3123_v62, 0.0  ;;  %v3141_v14 = vsel %vm1037_vm1, %v3119_v17, 0.0  ;;  %v3121_v25 = vmul.f32 %v7597_v26, %v3089_v24  ;;  %v3150_v37 = vsel %vm1037_vm1, %v3122_v63, 0.0  ;;  %v7602_v61 = vld [vmem:[%s8525_s10 + $0x48] sm:$0xff]  ;;  %v7603_v17 = vld [vmem:[%s8525_s10 + $0x70] sm:$0xff] }
0x1357   : > { %v3092_v56 = vperm.slane %v3066_v20, 0  ;;  %v3079_v36 = vrot.slane %v3066_v20, 3  ;;  %v3078_v59 = vrot.slane %v3066_v20, 2  ;;  %v3077_v46 = vrot.slane %v3066_v20, 1 }
0x1358   : > { %v3147_v51 = vsel %vm1037_vm1, %v3121_v25, 0.0  ;;  %v3082_v33 = vrot.slane %v3066_v20, 6  ;;  %v3081_v4 = vrot.slane %v3066_v20, 5  ;;  %v3080_v2 = vrot.slane %v3066_v20, 4 }
0x1359   : > { %v3124_v32 = vmul.f32 %v7598_v49, %v3092_v56  ;;  %v3095_v42 = vperm.slane %v3079_v36, 0  ;;  %v3094_v15 = vperm.slane %v3078_v59, 0  ;;  %v3093_v6 = vperm.slane %v3077_v46, 0  ;;  %v7606_v49 = vld [vmem:[%s8525_s10 + $0x78] sm:$0xff] }
0x135a   : > { %v3098_v22 = vperm.slane %v3082_v33, 0  ;;  %v3097_v62 = vperm.slane %v3081_v4, 0  ;;  %v3096_v34 = vperm.slane %v3080_v2, 0  ;;  %v3083_v56 = vrot.slane %v3066_v20, 7 }
0x135b   : > { %v3156_v38 = vsel %vm1037_vm1, %v3124_v32, 0.0  ;;  %v3127_v3 = vmul.f32 %v7600_v45, %v3095_v42  ;;  %v3126_v27 = vmul.f32 %v7601_v8, %v3094_v15  ;;  %v3125_v7 = vmul.f32 %v7602_v61, %v3093_v6 }
0x135c   : > { %3139 = vadd.xlane.f32.xlu0 %v3138_v28  ;;  %v3130_v29 = vmul.f32 %v7603_v17, %v3098_v22  ;;  %v7604_v28 = vld [vmem:[%s8525_s10 + $0x68] sm:$0xff]  ;;  %v3099_v36 = vperm.slane %v3083_v56, 0  ;;  %v10765_v56 = vld [vmem:[#allocation48_spill] sm:$0xff] }
0x135d   : > { %v3165_v0 = vsel %vm1037_vm1, %v3127_v3, 0.0  ;;  %v3162_v41 = vsel %vm1037_vm1, %v3126_v27, 0.0  ;;  %v3159_v43 = vsel %vm1037_vm1, %v3125_v7, 0.0  ;;  %v3129_v24 = vmul.f32 %v7604_v28, %v3097_v62 }
0x135e   : > { %3154 = vadd.xlane.f32.xlu1 %v3153_v31  ;;  %3142 = vadd.xlane.f32.xlu2 %v3141_v14  ;;  %v7605_v31 = vld [vmem:[%s8525_s10 + $0x60] sm:$0xff]  ;;  %v3174_v39 = vsel %vm1037_vm1, %v3130_v29, 0.0  ;;  %v3131_v32 = vmul.f32 %v7606_v49, %v3099_v36 }
0x135f   : > { %v3128_v14 = vmul.f32 %v7605_v31, %v3096_v34  ;;  %v3171_v26 = vsel %vm1037_vm1, %v3129_v24, 0.0  ;;  %v10764_v31 = vld [vmem:[#allocation52_spill] sm:$0xff] }
0x1360   : > { %v3177_v11 = vsel %vm1037_vm1, %v3131_v32, 0.0 }
0x1361   : > { %v3168_v25 = vsel %vm1037_vm1, %v3128_v14, 0.0 }
0x1364   : > { %3148 = vadd.xlane.f32.xlu0 %v3147_v51 }
0x1366   : > { %3157 = vadd.xlane.f32.xlu1 %v3156_v38  ;;  %3151 = vadd.xlane.f32.xlu2 %v3150_v37 }
0x136c   : > { %3166 = vadd.xlane.f32.xlu0 %v3165_v0 }
0x136e   : > { %3163 = vadd.xlane.f32.xlu1 %v3162_v41  ;;  %3160 = vadd.xlane.f32.xlu2 %v3159_v43 }
0x1374   : > { %3175 = vadd.xlane.f32.xlu0 %v3174_v39 }
0x1376   : > { %3172 = vadd.xlane.f32.xlu1 %v3171_v26  ;;  %3169 = vadd.xlane.f32.xlu2 %v3168_v25  ;;  %v10766_v26 = vld [vmem:[#allocation50_spill] sm:$0xff] }
0x137e   : > { %3178 = vadd.xlane.f32.xlu2 %v3177_v11 }
0x13c7   : > { %v3134_v63 = vpop.xlane.xlu0 %3133 }
0x13c8   : > { %v9278_v59 = vadd.f32 %v3134_v63, %v8749_v50 }
0x13c9   : > { %v3146_v20 = vpop.xlane.xlu1 %3145  ;;  %v3137_v46 = vpop.xlane.xlu2 %3136 }
0x13ca   : > { %v9281_v51 = vadd.f32 %v3137_v46, %v8741_v13  ;;  %3213 = vperm.xlu0 %7225, %v9278_v59   ;;  %v9286_v38 = vadd.f32 %v3146_v20, %v8743_v16 }
0x13cc   : > { %3216 = vperm.xlu1 %7226, %v9281_v51  }
0x13cf   : > { %v3140_v42 = vpop.xlane.xlu0 %3139 }
0x13d0   : > { %v9289_v15 = vadd.f32 %v3140_v42, %v8745_v48 }
0x13d1   : > { %v3143_v37 = vpop.xlane.xlu2 %3142  ;;  %v3155_v6 = vpop.xlane.xlu1 %3154 }
0x13d2   : > { %v9292_v45 = vadd.f32 %v3143_v37, %v8761_v57  ;;  %3225 = vperm.xlu0 %7225, %v9286_v38   ;;  %v9338_v25 = vadd.f32 %v3155_v6, %v10766_v26 }
0x13d4   : > { %3219 = vperm.xlu1 %7226, %v9289_v15   ;;  %3222 = vperm.xlu2 %7227, %v9292_v45  }
0x13d7   : > { %v3149_v3 = vpop.xlane.xlu0 %3148 }
0x13d8   : > { %v9298_v8 = vadd.f32 %v3149_v3, %v8767_v60 }
0x13d9   : > { %v3152_v33 = vpop.xlane.xlu2 %3151  ;;  %v3158_v61 = vpop.xlane.xlu1 %3157 }
0x13da   : > { %v9301_v27 = vadd.f32 %v3152_v33, %v8753_v53  ;;  %v9306_v2 = vadd.f32 %v3158_v61, %v8737_v5  ;;  %v10767_v61 = vld [vmem:[#allocation53_spill] sm:$0xff] }
0x13dc   : > { %3228 = vperm.xlu1 %7226, %v9298_v8   ;;  %3231 = vperm.xlu2 %7227, %v9301_v27  }
0x13df   : > { %v3167_v7 = vpop.xlane.xlu0 %3166 }
0x13e0   : > { %v9309_v0 = vadd.f32 %v3167_v7, %v8739_v44 }
0x13e1   : > { %v3161_v4 = vpop.xlane.xlu2 %3160  ;;  %v3164_v41 = vpop.xlane.xlu1 %3163 }
0x13e2   : > { %v9312_v22 = vadd.f32 %v3161_v4, %v8755_v54  ;;  %v9324_v29 = vadd.f32 %v3164_v41, %v8751_v52 }
0x13e4   : > { %3246 = vperm.xlu1 %7226, %v9309_v0   ;;  %3237 = vperm.xlu2 %7227, %v9306_v2  }
0x13e5   : > { %3240 = vperm.xlu0 %7225, %v9312_v22  }
0x13e7   : > { %v3176_v43 = vpop.xlane.xlu0 %3175 }
0x13e8   : > { %v9318_v34 = vadd.f32 %v3176_v43, %v8763_v58 }
0x13e9   : > { %v3170_v62 = vpop.xlane.xlu2 %3169  ;;  %v3173_v28 = vpop.xlane.xlu1 %3172 }
0x13ea   : > { %v9321_v17 = vadd.f32 %v3170_v62, %v8757_v55  ;;  %v9333_v39 = vadd.f32 %v3173_v28, %v10765_v56 }
0x13ec   : > { %3255 = vperm.xlu1 %7226, %v9318_v34   ;;  %3249 = vperm.xlu2 %7227, %v9321_v17  }
0x13ed   : > { %3243 = vperm.xlu0 %7225, %v9324_v29  }
0x13f1   : > { %v3179_v24 = vpop.xlane.xlu2 %3178 }
0x13f2   : > { %v9330_v14 = vadd.f32 %v3179_v24, %v10764_v31 }
0x13f4   : > { %3258 = vperm.xlu2 %7227, %v9330_v14  }
0x13f5   : > { %3252 = vperm.xlu0 %7225, %v9333_v39  }
0x13fd   : > { %3234 = vperm.xlu0 %7225, %v9338_v25  }
0x142e   : > { %v3223_v49 = vpop.permute.xlu2 %3222 }
0x1436   : > { %v3232_v63 = vpop.permute.xlu2 %3231 }
0x143c   : > { %v3214_v32 = vpop.permute.xlu0 %3213 }
0x143d   : > { %v3260_v31 = vperm.slane %v3214_v32, %v10767_v61 }
0x143e   : > { %v3217_v36 = vpop.permute.xlu1 %3216  ;;  %v3238_v42 = vpop.permute.xlu2 %3237 }
0x143f   : > { %v3268_v41 = vperm.slane %v3238_v42, %v10767_v61  ;;  %v3261_v43 = vperm.slane %v3217_v36, %v10767_v61 }
0x1441   : > { %v3276_v58 = vsel %vm1948_vm11, %v3261_v43, %v3260_v31 }
0x1444   : > { %v3226_v20 = vpop.permute.xlu0 %3225 }
0x1446   : > { %v3220_v11 = vpop.permute.xlu1 %3219  ;;  %v3250_v33 = vpop.permute.xlu2 %3249 }
0x1447   : > { %v3262_v28 = vperm.slane %v3220_v11, %v10767_v61 }
0x1449   : > { %v3277_v42 = vsel %vm1950_vm12, %v3262_v28, %v3276_v58 }
0x144e   : > { %v3229_v46 = vpop.permute.xlu1 %3228  ;;  %v3259_v36 = vpop.permute.xlu2 %3258 }
0x144f   : > { %v3265_v31 = vperm.slane %v3229_v46, %v10767_v61 }
0x1456   : > { %v3247_v3 = vpop.permute.xlu1 %3246 }
0x1457   : > { %v3241_v37 = vpop.permute.xlu0 %3240  ;;  %v3271_v26 = vperm.slane %v3247_v3, %v10767_v61 }
0x1458   : > { %v3269_v7 = vperm.slane %v3241_v37, %v10767_v61 }
0x145a   : > { %v3283_v62 = vsel %vm1948_vm11, %v3269_v7, %v3268_v41  ;;  %v3263_v7 = vperm.slane %v3223_v49, %v10767_v61 }
0x145c   : > { %v3278_v3 = vsel %vm1952_vm13, %v3263_v7, %v3277_v42 }
0x145e   : > { %v3256_v37 = vpop.permute.xlu1 %3255 }
0x145f   : > { %v3244_v4 = vpop.permute.xlu0 %3243  ;;  %v3274_v41 = vperm.slane %v3256_v37, %v10767_v61 }
0x1460   : > { %v3270_v6 = vperm.slane %v3244_v4, %v10767_v61  ;;  %v3272_v4 = vperm.slane %v3250_v33, %v10767_v61  ;;  %v3264_v33 = vperm.slane %v3226_v20, %v10767_v61 }
0x1462   : > { %v3284_v24 = vsel %vm1950_vm12, %v3270_v6, %v3283_v62  ;;  %v3266_v62 = vperm.slane %v3232_v63, %v10767_v61 }
0x1463   : > { %v3285_v56 = vsel %vm1952_vm13, %v3271_v26, %v3284_v24  ;;  %v3275_v26 = vperm.slane %v3259_v36, %v10767_v61 }
0x1464   : > { %v3286_v32 = vsel %vm1954_vm14, %v3272_v4, %v3285_v56 }
0x1467   : > { %v3253_v55 = vpop.permute.xlu0 %3252 }
0x1468   : > { %v3273_v11 = vperm.slane %v3253_v55, %v10767_v61  ;;  %v3279_v55 = vsel %vm1954_vm14, %v3264_v33, %v3278_v3 }
0x1469   : > { %v3280_v56 = vsel %vm1956_vm15, %v3265_v31, %v3279_v55 }
0x146a   : > { %v3287_v58 = vsel %vm1956_vm15, %v3273_v11, %v3286_v32  ;;  %v3281_v24 = vsel %vm1958_vm0, %v3266_v62, %v3280_v56 }
0x146b   : > { %v3288_v6 = vsel %vm1958_vm0, %v3274_v41, %v3287_v58 }
0x146c   : > { %v3289_v49 = vsel %vm1960_vm2, %v3275_v26, %v3288_v6 }
0x146d   : > { %v3295_v43 = vsel %vm10768_vm3, %v3289_v49, -inf }
0x146e   : > { %3296 = vmax.xlane.f32.xlu0 %v3295_v43 }
0x146f   : > { %v3235_v46 = vpop.permute.xlu0 %3234 }
0x1470   : > { %v3267_v28 = vperm.slane %v3235_v46, %v10767_v61 }
0x1472   : > { %v3282_v20 = vsel %vm1960_vm2, %v3267_v28, %v3281_v24 }
0x1473   : > { %v3292_v37 = vsel %vm10769_vm5, %v3282_v20, -inf }
0x1474   : > { %3293 = vmax.xlane.f32.xlu1 %v3292_v37 }
0x14e1   : > { %v9373_v42 = vpop.xlane.xlu0 %3296 }
0x14e2   : > { %v3310_v4 = vperm.slane %v9373_v42, 2  ;;  %v3313_v63 = vperm.slane %v9373_v42, 5 }
0x14e4   : > { %v3342_v36 = vsub.f32 %v9324_v29, %v3310_v4  ;;  %v3345_v6 = vsub.f32 %v9333_v39, %v3313_v63 }
0x14e6   : > { %v3368_v41 = vmul.f32 1.442695, %v3342_v36  ;;  %v3374_v43 = vmul.f32 1.442695, %v3345_v6 }
0x14e7   : > { %v3294_v7 = vpop.xlane.xlu1 %3293 }
0x14e8   : > { %v3300_v11 = vperm.slane %v3294_v7, 0  ;;  %v3303_v32 = vperm.slane %v3294_v7, 3  ;;  %v3301_v3 = vperm.slane %v3294_v7, 1  ;;  %v3305_v26 = vperm.slane %v3294_v7, 5 }
0x14e9   : > { %7365 = vpow2.f32 %v3368_v41  ;;  %v3307_v56 = vperm.slane %v3294_v7, 7  ;;  %v3302_v62 = vperm.slane %v3294_v7, 2  ;;  %v3304_v4 = vperm.slane %v3294_v7, 4 }
0x14ea   : > { %v3332_v31 = vsub.f32 %v9278_v59, %v3300_v11  ;;  %v3335_v58 = vsub.f32 %v9292_v45, %v3303_v32  ;;  %v3333_v55 = vsub.f32 %v9281_v51, %v3301_v3  ;;  %v3337_v29 = vsub.f32 %v9298_v8, %v3305_v26 }
0x14eb   : > { %v3314_v59 = vperm.slane %v9373_v42, 6  ;;  %v3339_v51 = vsub.f32 %v9338_v25, %v3307_v56  ;;  %v3334_v8 = vsub.f32 %v9289_v15, %v3302_v62  ;;  %v3336_v15 = vsub.f32 %v9286_v38, %v3304_v4 }
0x14ec   : > { %v3348_v33 = vmul.f32 1.442695, %v3332_v31  ;;  %v3354_v49 = vmul.f32 1.442695, %v3335_v58  ;;  %v3350_v46 = vmul.f32 1.442695, %v3333_v55 }
0x14ed   : > { %v3358_v45 = vmul.f32 1.442695, %v3337_v29  ;;  %v3346_v20 = vsub.f32 %v9318_v34, %v3314_v59  ;;  %v3362_v37 = vmul.f32 1.442695, %v3339_v51  ;;  %v3352_v36 = vmul.f32 1.442695, %v3334_v8 }
0x14ee   : > { %7367 = vpow2.f32 %v3348_v33  ;;  %v3306_v34 = vperm.slane %v3294_v7, 6  ;;  %v3356_v32 = vmul.f32 1.442695, %v3336_v15  ;;  %v3308_v38 = vperm.slane %v9373_v42, 0 }
0x14ef   : > { %7369 = vpow2.f32 %v3354_v49  ;;  %v9383_v28 = vpop.eup %7365  ;;  %v3376_v63 = vmul.f32 1.442695, %v3346_v20  ;;  %v3309_v49 = vperm.slane %v9373_v42, 1  ;;  %v3315_v51 = vperm.slane %v9373_v42, 7 }
0x14f0   : > { %3427 = vperm.xlu1 %7226, %v9383_v28   ;;  %7371 = vpow2.f32 %v3374_v43  ;;  %v3338_v58 = vsub.f32 %v9301_v27, %v3306_v34  ;;  %v3340_v6 = vsub.f32 %v9306_v2, %v3308_v38  ;;  %v3311_v43 = vperm.slane %v9373_v42, 3 }
0x14f1   : > { %7373 = vpow2.f32 %v3350_v46  ;;  %v3341_v27 = vsub.f32 %v9312_v22, %v3309_v49  ;;  %v3312_v46 = vperm.slane %v9373_v42, 4 }
0x14f2   : > { %7375 = vpow2.f32 %v3358_v45  ;;  %v3360_v33 = vmul.f32 1.442695, %v3338_v58  ;;  %v3364_v55 = vmul.f32 1.442695, %v3340_v6  ;;  %v3343_v2 = vsub.f32 %v9309_v0, %v3311_v43 }
0x14f3   : > { %7377 = vpow2.f32 %v3362_v37  ;;  %v3366_v56 = vmul.f32 1.442695, %v3341_v27  ;;  %v3344_v22 = vsub.f32 %v9321_v17, %v3312_v46  ;;  %v3347_v0 = vsub.f32 %v9330_v14, %v3315_v51 }
0x14f4   : > { %v9386_v24 = vpop.eup %7367  ;;  %7379 = vpow2.f32 %v3352_v36  ;;  %v3370_v59 = vmul.f32 1.442695, %v3343_v2 }
0x14f5   : > { %v9389_v39 = vpop.eup %7369  ;;  %3397 = vperm.xlu2 %7227, %v9386_v24   ;;  %7381 = vpow2.f32 %v3376_v63  ;;  %v3372_v8 = vmul.f32 1.442695, %v3344_v22  ;;  %v3378_v37 = vmul.f32 1.442695, %v3347_v0 }
0x14f6   : > { %3406 = vperm.xlu0 %7225, %v9389_v39   ;;  %v9396_v11 = vpop.eup %7371  ;;  %7383 = vpow2.f32 %v3356_v32 }
0x14f7   : > { %v9398_v41 = vpop.eup %7373  ;;  %7385 = vpow2.f32 %v3360_v33 }
0x14f8   : > { %3436 = vperm.xlu1 %7226, %v9396_v11   ;;  %v9401_v25 = vpop.eup %7375  ;;  %7387 = vpow2.f32 %v3364_v55 }
0x14f9   : > { %v9406_v3 = vpop.eup %7377  ;;  %7389 = vpow2.f32 %v3366_v56 }
0x14fa   : > { %v9408_v31 = vpop.eup %7379  ;;  %7391 = vpow2.f32 %v3370_v59 }
0x14fb   : > { %v9411_v26 = vpop.eup %7381  ;;  %7393 = vpow2.f32 %v3372_v8 }
0x14fc   : > { %v9417_v7 = vpop.eup %7383  ;;  %7395 = vpow2.f32 %v3378_v37 }
0x14fd   : > { %3400 = vperm.xlu2 %7227, %v9398_v41   ;;  %v9422_v29 = vpop.eup %7385 }
0x14fe   : > { %3412 = vperm.xlu0 %7225, %v9401_v25   ;;  %v9427_v62 = vpop.eup %7387 }
0x14ff   : > { %v9432_v45 = vpop.eup %7389 }
0x1500   : > { %3418 = vperm.xlu1 %7226, %v9406_v3   ;;  %v9437_v20 = vpop.eup %7391 }
0x1501   : > { %v9441_v4 = vpop.eup %7393 }
0x1502   : > { %v9444_v36 = vpop.eup %7395 }
0x1505   : > { %3403 = vperm.xlu2 %7227, %v9408_v31  }
0x1506   : > { %3439 = vperm.xlu0 %7225, %v9411_v26  }
0x150d   : > { %3409 = vperm.xlu2 %7227, %v9417_v7  }
0x1515   : > { %3415 = vperm.xlu2 %7227, %v9422_v29  }
0x151d   : > { %3421 = vperm.xlu2 %7227, %v9427_v62  }
0x1525   : > { %3424 = vperm.xlu2 %7227, %v9432_v45  }
0x152d   : > { %3430 = vperm.xlu2 %7227, %v9437_v20  }
0x1535   : > { %3433 = vperm.xlu2 %7227, %v9441_v4  }
0x153d   : > { %3442 = vperm.xlu2 %7227, %v9444_v36  }
0x154f   : > { %v3398_v17 = vpop.permute.xlu2 %3397 }
0x1550   : > { %v3444_v38 = vperm.slane %v3398_v17, %v10767_v61 }
0x1557   : > { %v3401_v42 = vpop.permute.xlu2 %3400 }
0x1558   : > { %v3445_v58 = vperm.slane %v3401_v42, %v10767_v61 }
0x155a   : > { %v3460_v6 = vsel %vm1948_vm11, %v3445_v58, %v3444_v38 }
0x155f   : > { %v3404_v63 = vpop.permute.xlu2 %3403 }
0x1560   : > { %v3446_v14 = vperm.slane %v3404_v63, %v10767_v61 }
0x1562   : > { %v3428_v15 = vpop.permute.xlu1 %3427  ;;  %v3461_v49 = vsel %vm1950_vm12, %v3446_v14, %v3460_v6 }
0x1563   : > { %v3454_v6 = vperm.slane %v3428_v15, %v10767_v61 }
0x1567   : > { %v3410_v34 = vpop.permute.xlu2 %3409 }
0x1568   : > { %v3407_v32 = vpop.permute.xlu0 %3406  ;;  %v3448_v55 = vperm.slane %v3410_v34, %v10767_v61 }
0x1569   : > { %v3447_v33 = vperm.slane %v3407_v32, %v10767_v61 }
0x156a   : > { %v3437_v27 = vpop.permute.xlu1 %3436 }
0x156b   : > { %v3462_v43 = vsel %vm1952_vm13, %v3447_v33, %v3461_v49 }
0x156c   : > { %v3463_v59 = vsel %vm1954_vm14, %v3448_v55, %v3462_v43 }
0x156f   : > { %v3416_v56 = vpop.permute.xlu2 %3415 }
0x1570   : > { %v3413_v2 = vpop.permute.xlu0 %3412  ;;  %v3450_v22 = vperm.slane %v3416_v56, %v10767_v61 }
0x1571   : > { %v3449_v46 = vperm.slane %v3413_v2, %v10767_v61 }
0x1572   : > { %v3419_v8 = vpop.permute.xlu1 %3418 }
0x1573   : > { %v3464_v51 = vsel %vm1956_vm15, %v3449_v46, %v3463_v59  ;;  %v3451_v37 = vperm.slane %v3419_v8, %v10767_v61  ;;  %v3457_v46 = vperm.slane %v3437_v27, %v10767_v61 }
0x1574   : > { %v3465_v0 = vsel %vm1958_vm0, %v3450_v22, %v3464_v51 }
0x1575   : > { %v3466_v42 = vsel %vm1960_vm2, %v3451_v37, %v3465_v0 }
0x1576   : > { %v3476_v63 = vsel %vm10770_vm6, %v3466_v42, 0.0 }
0x1577   : > { %v3422_v17 = vpop.permute.xlu2 %3421  ;;  %3477 = vadd.xlane.f32.xlu0 %v3476_v63 }
0x1578   : > { %v3452_v14 = vperm.slane %v3422_v17, %v10767_v61  ;;  %v3440_v59 = vpop.permute.xlu0 %3439 }
0x1579   : > { %v3458_v51 = vperm.slane %v3440_v59, %v10767_v61 }
0x157f   : > { %v3425_v34 = vpop.permute.xlu2 %3424 }
0x1580   : > { %v3453_v58 = vperm.slane %v3425_v34, %v10767_v61 }
0x1582   : > { %v3467_v38 = vsel %vm1948_vm11, %v3453_v58, %v3452_v14 }
0x1583   : > { %v3468_v43 = vsel %vm1950_vm12, %v3454_v6, %v3467_v38 }
0x1587   : > { %v3431_v32 = vpop.permute.xlu2 %3430 }
0x1588   : > { %v3455_v33 = vperm.slane %v3431_v32, %v10767_v61 }
0x158a   : > { %v3469_v56 = vsel %vm1952_vm13, %v3455_v33, %v3468_v43 }
0x158f   : > { %v3434_v49 = vpop.permute.xlu2 %3433 }
0x1590   : > { %v3456_v55 = vperm.slane %v3434_v49, %v10767_v61 }
0x1592   : > { %v3470_v2 = vsel %vm1954_vm14, %v3456_v55, %v3469_v56 }
0x1593   : > { %v3471_v22 = vsel %vm1956_vm15, %v3457_v46, %v3470_v2 }
0x1594   : > { %v3472_v15 = vsel %vm1958_vm0, %v3458_v51, %v3471_v22 }
0x1597   : > { %v3443_v8 = vpop.permute.xlu2 %3442 }
0x1598   : > { %v3459_v0 = vperm.slane %v3443_v8, %v10767_v61 }
0x159a   : > { %v3473_v37 = vsel %vm1960_vm2, %v3459_v0, %v3472_v15 }
0x159b   : > { %v3479_v17 = vsel %vm10771_vm7, %v3473_v37, 0.0 }
0x159c   : > { %3480 = vadd.xlane.f32.xlu1 %v3479_v17  ;;  %v7607_v17 = vld [vmem:[%s8531_s2] sm:$0xff] }
0x15ea   : > { %v3478_v42 = vpop.xlane.xlu0 %3477 }
0x15eb   : > { %7397 = vrcp.f32 %v3478_v42 }
0x15f1   : > { %v7398_v63 = vpop.eup %7397 }
0x15f2   : > { %v3491_v34 = vperm.slane %v7398_v63, 5  ;;  %v3486_v27 = vperm.slane %v7398_v63, 0  ;;  %v3489_v32 = vperm.slane %v7398_v63, 3  ;;  %v3492_v33 = vperm.slane %v7398_v63, 6 }
0x15f3   : > { %v3487_v6 = vperm.slane %v7398_v63, 1  ;;  %v3488_v43 = vperm.slane %v7398_v63, 2 }
0x15f4   : > { %v3523_v58 = vmul.f32 %v9401_v25, %v3491_v34  ;;  %v3518_v14 = vmul.f32 %v9386_v24, %v3486_v27  ;;  %v3521_v38 = vmul.f32 %v9389_v39, %v3489_v32  ;;  %v3524_v49 = vmul.f32 %v9422_v29, %v3492_v33  ;;  %v7608_v34 = vld [vmem:[%s8531_s2 + $0x8] sm:$0xff] }
0x15f5   : > { %v3519_v55 = vmul.f32 %v9398_v41, %v3487_v6  ;;  %v3520_v56 = vmul.f32 %v9408_v31, %v3488_v43  ;;  %v3490_v25 = vperm.slane %v7398_v63, 4 }
0x15f6   : > { %3561 = vperm.xlu0 %7225, %v3523_v58   ;;  %3536 = vperm.xlu2 %7227, %v3518_v14   ;;  %v7609_v14 = vld [vmem:[%s8531_s2 + $0x10] sm:$0xff] }
0x15f7   : > { %3551 = vperm.xlu1 %7226, %v3521_v38   ;;  %v3522_v24 = vmul.f32 %v9417_v7, %v3490_v25 }
0x15fe   : > { %3566 = vperm.xlu0 %7225, %v3524_v49   ;;  %3541 = vperm.xlu2 %7227, %v3519_v55  }
0x1606   : > { %3546 = vperm.xlu2 %7227, %v3520_v56  }
0x160e   : > { %3556 = vperm.xlu2 %7227, %v3522_v24  }
0x160f   : > { %v3481_v2 = vpop.xlane.xlu1 %3480 }
0x1610   : > { %7399 = vrcp.f32 %v3481_v2  ;;  %v7610_v2 = vld [vmem:[%s8531_s2 + $0x40] sm:$0xff] }
0x1616   : > { %v7400_v39 = vpop.eup %7399 }
0x1617   : > { %v3500_v46 = vperm.slane %v7400_v39, 6  ;;  %v3496_v59 = vperm.slane %v7400_v39, 2  ;;  %v3494_v22 = vperm.slane %v7400_v39, 0  ;;  %v3501_v31 = vperm.slane %v7400_v39, 7 }
0x1618   : > { %v3495_v8 = vperm.slane %v7400_v39, 1  ;;  %v3497_v15 = vperm.slane %v7400_v39, 3 }
0x1619   : > { %v3532_v29 = vmul.f32 %v9411_v26, %v3500_v46  ;;  %v3528_v41 = vmul.f32 %v9383_v28, %v3496_v59  ;;  %v3526_v51 = vmul.f32 %v9427_v62, %v3494_v22  ;;  %v3533_v0 = vmul.f32 %v9444_v36, %v3501_v31  ;;  %v7611_v22 = vld [vmem:[%s8531_s2 + $0x28] sm:$0xff] }
0x161a   : > { %v3527_v7 = vmul.f32 %v9432_v45, %v3495_v8  ;;  %v3529_v26 = vmul.f32 %v9437_v20, %v3497_v15  ;;  %v3498_v28 = vperm.slane %v7400_v39, 4  ;;  %v3499_v45 = vperm.slane %v7400_v39, 5  ;;  %v7613_v31 = vld [vmem:[%s8531_s2 + $0x48] sm:$0xff] }
0x161b   : > { %3606 = vperm.xlu1 %7226, %v3532_v29   ;;  %3586 = vperm.xlu0 %7225, %v3528_v41   ;;  %v3493_v36 = vperm.slane %v7398_v63, 7  ;;  %v7612_v41 = vld [vmem:[%s8531_s2 + $0x18] sm:$0xff] }
0x161c   : > { %3576 = vperm.xlu2 %7227, %v3526_v51   ;;  %v3530_v62 = vmul.f32 %v9441_v4, %v3498_v28 }
0x161d   : > { %v3525_v20 = vmul.f32 %v9406_v3, %v3493_v36 }
0x1623   : > { %2735 = vrot.lane.b32.xlu1 %v9163_v12, %s8156_s29  ;;  %3611 = vperm.xlu0 %7225, %v3533_v0   ;;  %v3531_v12 = vmul.f32 %v9396_v11, %v3499_v45 }
0x1624   : > { %3581 = vperm.xlu2 %7227, %v3527_v7  }
0x162b   : > { %2747 = vrot.lane.b32.xlu1 %v9147_v23, %s8158_s30  ;;  %2745 = vrot.lane.b32.xlu0 %v9139_v18, %s8158_s30 }
0x162c   : > { %3591 = vperm.xlu2 %7227, %v3529_v26  }
0x1634   : > { %3596 = vperm.xlu2 %7227, %v3530_v62   ;;  %v7614_v62 = vld [vmem:[%s8531_s2 + $0x20] sm:$0xff] }
0x163c   : > { %3601 = vperm.xlu2 %7227, %v3531_v12  }
0x1644   : > { %3571 = vperm.xlu2 %7227, %v3525_v20  }
0x164c   : > { %2737 = vrot.lane.b32.xlu2 %v9165_v19, %s8156_s29 }
0x1650   : > { %v3537_v23 = vpop.permute.xlu2 %3536 }
0x1651   : > { %v3614_v42 = vmul.f32 %v7607_v17, %v3537_v23 }
0x1653   : > { %v3630_v27 = vsel %vm1037_vm1, %v3614_v42, 0.0 }
0x1654   : > { %v3631_v32 = vrot.slane %v3630_v27, 4 }
0x1656   : > { %v3632_v58 = vadd.f32 %v3631_v32, %v3630_v27 }
0x1658   : > { %v3542_v18 = vpop.permute.xlu2 %3541  ;;  %v3633_v6 = vrot.slane %v3632_v58, 2 }
0x1659   : > { %v3615_v4 = vmul.f32 %v7608_v34, %v3542_v18 }
0x165a   : > { %v3634_v39 = vadd.f32 %v3633_v6, %v3632_v58 }
0x165b   : > { %v3637_v63 = vsel %vm1037_vm1, %v3615_v4, 0.0 }
0x165c   : > { %v3638_v3 = vrot.slane %v3637_v63, 4  ;;  %v3635_v15 = vrot.slane %v3634_v39, 1 }
0x165e   : > { %v3639_v19 = vadd.f32 %v3638_v3, %v3637_v63  ;;  %v7615_v3 = vld [vmem:[%s8531_s2 + $0x58] sm:$0xff] }
0x1660   : > { %v3547_v37 = vpop.permute.xlu2 %3546  ;;  %v3640_v55 = vrot.slane %v3639_v19, 2 }
0x1661   : > { %v3616_v38 = vmul.f32 %v7609_v14, %v3547_v37  ;;  %v3636_v37 = vadd.f32 %v3635_v15, %v3634_v39  ;;  %v7616_v14 = vld [vmem:[%s8531_s2 + $0x30] sm:$0xff] }
0x1662   : > { %v3641_v46 = vadd.f32 %v3640_v55, %v3639_v19  ;;  %v7617_v15 = vld [vmem:[%s8531_s2 + $0x50] sm:$0xff] }
0x1663   : > { %v3644_v49 = vsel %vm1037_vm1, %v3616_v38, 0.0 }
0x1664   : > { %v3645_v56 = vrot.slane %v3644_v49, 4  ;;  %v3642_v28 = vrot.slane %v3641_v46, 1 }
0x1666   : > { %v3646_v0 = vadd.f32 %v3645_v56, %v3644_v49  ;;  %v3643_v42 = vadd.f32 %v3642_v28, %v3641_v46 }
0x1668   : > { %v3557_v11 = vpop.permute.xlu2 %3556  ;;  %v3562_v43 = vpop.permute.xlu0 %3561  ;;  %v3647_v23 = vrot.slane %v3646_v0, 2  ;;  %v3777_v55 = vpack.c.bf16 %v3643_v42, %v3643_v42 }
0x1669   : > { %v3552_v25 = vpop.permute.xlu1 %3551  ;;  %v3619_v29 = vmul.f32 %v7611_v22, %v3562_v43  ;;  %v3618_v45 = vmul.f32 %v7614_v62, %v3557_v11 }
0x166a   : > { %v3617_v51 = vmul.f32 %v7612_v41, %v3552_v25  ;;  %v3648_v11 = vadd.f32 %v3647_v23, %v3646_v0 }
0x166b   : > { %v3665_v12 = vsel %vm1037_vm1, %v3619_v29, 0.0  ;;  %v3658_v27 = vsel %vm1037_vm1, %v3618_v45, 0.0  ;;  %v3758_v29 = vsel %vm1948_vm11, %v3643_v42, %v3636_v37 }
0x166c   : > { %v3651_v36 = vsel %vm1037_vm1, %v3617_v51, 0.0  ;;  %v3666_v34 = vrot.slane %v3665_v12, 4  ;;  %v3659_v6 = vrot.slane %v3658_v27, 4 }
0x166d   : > { %v3652_v4 = vrot.slane %v3651_v36, 4 }
0x166e   : > { %v3667_v43 = vadd.f32 %v3666_v34, %v3665_v12  ;;  %v3660_v41 = vadd.f32 %v3659_v6, %v3658_v27  ;;  %v7618_v12 = vld [vmem:[%s8531_s2 + $0x70] sm:$0xff] }
0x166f   : > { %v3653_v56 = vadd.f32 %v3652_v4, %v3651_v36 }
0x1670   : > { %v3567_v17 = vpop.permute.xlu0 %3566  ;;  %v3668_v0 = vrot.slane %v3667_v43, 2  ;;  %v3661_v42 = vrot.slane %v3660_v41, 2 }
0x1671   : > { %v3620_v38 = vmul.f32 %v7616_v14, %v3567_v17 }
0x1673   : > { %v3672_v39 = vsel %vm1037_vm1, %v3620_v38, 0.0 }
0x1674   : > { %v3673_v62 = vrot.slane %v3672_v39, 4 }
0x1676   : > { %v3577_v33 = vpop.permute.xlu2 %3576 }
0x1677   : > { %v3622_v24 = vmul.f32 %v7610_v2, %v3577_v33  ;;  %v3776_v33 = vpack.c.bf16 %v3636_v37, %v3636_v37 }
0x1679   : > { %v3686_v7 = vsel %vm1037_vm1, %v3622_v24, 0.0  ;;  %v3649_v24 = vrot.slane %v3648_v11, 1  ;;  %v3808_v22 = vunpack.c.l.b16 %v3776_v33  ;;  %v3674_v33 = vadd.f32 %v3673_v62, %v3672_v39  ;;  %v7620_v39 = vld [vmem:[%s8531_s2 + $0x78] sm:$0xff] }
0x167a   : > { %v3687_v20 = vrot.slane %v3686_v7, 4 }
0x167c   : > { %v3688_v32 = vadd.f32 %v3687_v20, %v3686_v7  ;;  %v3654_v7 = vrot.slane %v3653_v56, 2  ;;  %v7619_v20 = vld [vmem:[%s8531_s2 + $0x60] sm:$0xff] }
0x167e   : > { %v3582_v59 = vpop.permute.xlu2 %3581  ;;  %v3689_v2 = vrot.slane %v3688_v32, 2 }
0x167f   : > { %v3623_v8 = vmul.f32 %v7613_v31, %v3582_v59 }
0x1680   : > { %v3690_v45 = vadd.f32 %v3689_v2, %v3688_v32 }
0x1681   : > { %v3693_v26 = vsel %vm1037_vm1, %v3623_v8, 0.0  ;;  %v3809_v8 = vunpack.c.l.b16 %v3777_v55 }
0x1682   : > { %v3694_v18 = vrot.slane %v3693_v26, 4 }
0x1683   : > { %v9531_v32 = vsel %vm1948_vm11, %v3809_v8, %v3808_v22 }
0x1684   : > { %v3695_v19 = vadd.f32 %v3694_v18, %v3693_v26  ;;  %v3650_v18 = vadd.f32 %v3649_v24, %v3648_v11  ;;  %v3691_v11 = vrot.slane %v3690_v45, 1 }
0x1686   : > { %v3592_v63 = vpop.permute.xlu2 %3591  ;;  %v3696_v46 = vrot.slane %v3695_v19, 2  ;;  %v9534_v2 = vsel %vm1950_vm12, %v3650_v18, %v3758_v29  ;;  %v3778_v24 = vpack.c.bf16 %v3650_v18, %v3650_v18  ;;  %v7621_v29 = vld [vmem:[%s8531_s2 + $0x68] sm:$0xff] }
0x1687   : > { %v3625_v58 = vmul.f32 %v7615_v3, %v3592_v63  ;;  %v3669_v3 = vadd.f32 %v3668_v0, %v3667_v43  ;;  %v3662_v43 = vadd.f32 %v3661_v42, %v3660_v41 }
0x1688   : > { %v3697_v17 = vadd.f32 %v3696_v46, %v3695_v19  ;;  %v9542_v42 = vunpack.c.l.b16 %v3778_v24 }
0x1689   : > { %v3707_v49 = vsel %vm1037_vm1, %v3625_v58, 0.0  ;;  %v3655_v58 = vadd.f32 %v3654_v7, %v3653_v56  ;;  %v3675_v7 = vrot.slane %v3674_v33, 2 }
0x168a   : > { %v3708_v25 = vrot.slane %v3707_v49, 4  ;;  %v3698_v6 = vrot.slane %v3697_v17, 1 }
0x168b   : > { %v3656_v22 = vrot.slane %v3655_v58, 1 }
0x168c   : > { %v3709_v59 = vadd.f32 %v3708_v25, %v3707_v49  ;;  %v3699_v62 = vadd.f32 %v3698_v6, %v3697_v17 }
0x168d   : > { %v3587_v51 = vpop.permute.xlu0 %3586  ;;  %v3607_v31 = vpop.permute.xlu1 %3606 }
0x168e   : > { %v3624_v26 = vmul.f32 %v7617_v15, %v3587_v51  ;;  %v3597_v28 = vpop.permute.xlu2 %3596  ;;  %v3628_v36 = vmul.f32 %v7618_v12, %v3607_v31  ;;  %v3710_v34 = vrot.slane %v3709_v59, 2  ;;  %v3670_v31 = vrot.slane %v3669_v3, 1 }
0x168f   : > { %v3626_v23 = vmul.f32 %v7619_v20, %v3597_v28  ;;  %v3692_v15 = vadd.f32 %v3691_v11, %v3690_v45 }
0x1690   : > { %v3700_v37 = vsel %vm1037_vm1, %v3624_v26, 0.0  ;;  %v3728_v27 = vsel %vm1037_vm1, %v3628_v36, 0.0  ;;  %v3711_v49 = vadd.f32 %v3710_v34, %v3709_v59  ;;  %v9544_v45 = vadd.f32 %v3670_v31, %v3669_v3 }
0x1691   : > { %v3701_v4 = vrot.slane %v3700_v37, 4  ;;  %v3714_v63 = vsel %vm1037_vm1, %v3626_v23, 0.0  ;;  %v3729_v14 = vrot.slane %v3728_v27, 4  ;;  %v3784_v11 = vpack.c.bf16 %v3692_v15, %v3692_v15 }
0x1692   : > { %v3715_v38 = vrot.slane %v3714_v63, 4  ;;  %v3712_v12 = vrot.slane %v3711_v49, 1 }
0x1693   : > { %v3702_v19 = vadd.f32 %v3701_v4, %v3700_v37  ;;  %v3730_v55 = vadd.f32 %v3729_v14, %v3728_v27  ;;  %v6979_v37 = vld [vmem:[%s8517_s6 + $0x10] sm:$0xff]  ;;  %v3657_v4 = vadd.f32 %v3656_v22, %v3655_v58  ;;  %v3663_v27 = vrot.slane %v3662_v43, 1 }
0x1694   : > { %v3716_v25 = vadd.f32 %v3715_v38, %v3714_v63  ;;  %v3676_v14 = vadd.f32 %v3675_v7, %v3674_v33  ;;  %6906 = vmatmul.msk.bf16.vlgmr.msrb.gmra.mxu1 %vm1037_vm1, %v6979_v37  ;;  %v3713_v6 = vadd.f32 %v3712_v12, %v3711_v49  ;;  %v3765_v33 = vsel %vm1948_vm11, %v3699_v62, %v3692_v15 }
0x1695   : > { %v3703_v56 = vrot.slane %v3702_v19, 2  ;;  %v3612_v46 = vpop.permute.xlu0 %3611  ;;  %v2736_v51 = vpop.permute.xlu1 %2735  ;;  %v3731_v41 = vrot.slane %v3730_v55, 2  ;;  %v3779_v3 = vpack.c.bf16 %v3657_v4, %v3657_v4  ;;  %v3664_v31 = vadd.f32 %v3663_v27, %v3662_v43 }
0x1696   : > { %v3717_v8 = vrot.slane %v3716_v25, 2  ;;  %v3629_v0 = vmul.f32 %v7620_v39, %v3612_v46  ;;  %2741 = vst.msk [vmem:[#allocation2] sm:$0xff] %vm1037_vm1, %v2736_v51  ;;  %v3602_v59 = vpop.permute.xlu2 %3601  ;;  %v3787_v12 = vpack.c.bf16 %v3713_v6, %v3713_v6 }
0x1697   : > { %v3704_v26 = vadd.f32 %v3703_v56, %v3702_v19  ;;  %v3627_v28 = vmul.f32 %v7621_v29, %v3602_v59  ;;  %v3785_v19 = vpack.c.bf16 %v3699_v62, %v3699_v62  ;;  %v7622_v56 = vld [vmem:[#allocation20 + $0x8] sm:$0xff]  ;;  %v3732_v24 = vadd.f32 %v3731_v41, %v3730_v55 }
0x1698   : > { %v3735_v36 = vsel %vm1037_vm1, %v3629_v0, 0.0  ;;  %v3718_v23 = vadd.f32 %v3717_v8, %v3716_v25  ;;  %5159 = vmatpush.bf16.msrb.mxu1 %v7622_v56  ;;  %v3677_v59 = vrot.slane %v3676_v14, 1  ;;  %v3816_v29 = vunpack.c.l.b16 %v3784_v11 }
0x1699   : > { %v3705_v20 = vrot.slane %v3704_v26, 1  ;;  %v3736_v18 = vrot.slane %v3735_v36, 4  ;;  %v3721_v34 = vsel %vm1037_vm1, %v3627_v28, 0.0  ;;  %v3817_v28 = vunpack.c.l.b16 %v3785_v19 }
0x169a   : > { %v3722_v63 = vrot.slane %v3721_v34, 4  ;;  %v3719_v51 = vrot.slane %v3718_v23, 1  ;;  %v3733_v15 = vrot.slane %v3732_v24, 1  ;;  %v3678_v11 = vadd.f32 %v3677_v59, %v3676_v14 }
0x169b   : > { %v3706_v38 = vadd.f32 %v3705_v20, %v3704_v26  ;;  %v3737_v17 = vadd.f32 %v3736_v18, %v3735_v36  ;;  %v7623_v26 = vld [vmem:[%s8531_s2 + $0x38] sm:$0xff]  ;;  %v3831_v19 = vsel %vm1948_vm11, %v3817_v28, %v3816_v29  ;;  %v3825_v14 = vsel %vm1950_vm12, %v9542_v42, %v9531_v32 }
0x169c   : > { %v3723_v25 = vadd.f32 %v3722_v63, %v3721_v34  ;;  %v7624_v36 = vld [vmem:[#allocation20] sm:$0xff]  ;;  %v3720_v62 = vadd.f32 %v3719_v51, %v3718_v23  ;;  %v3760_v63 = vsel %vm1952_vm13, %v3657_v4, %v9534_v2  ;;  %v3734_v51 = vadd.f32 %v3733_v15, %v3732_v24 }
0x169d   : > { %v3786_v46 = vpack.c.bf16 %v3706_v38, %v3706_v38  ;;  %v3738_v58 = vrot.slane %v3737_v17, 2  ;;  %v2746_v22 = vpop.permute.xlu0 %2745  ;;  %v2748_v8 = vpop.permute.xlu1 %2747  ;;  %v3766_v49 = vsel %vm1950_vm12, %v3706_v38, %v3765_v33  ;;  %5160 = vmatpush.bf16.msrb.mxu1 %v7624_v36  ;;  %v3811_v38 = vunpack.c.l.b16 %v3779_v3 }
0x169e   : > { %v3724_v39 = vrot.slane %v3723_v25, 2  ;;  %2751 = vst.msk [vmem:[#allocation3] sm:$0xff] %vm1037_vm1, %v2746_v22  ;;  %v3572_v0 = vpop.permute.xlu2 %3571  ;;  %v3767_v18 = vsel %vm1952_vm13, %v3713_v6, %v3766_v49  ;;  %v3788_v6 = vpack.c.bf16 %v3720_v62, %v3720_v62  ;;  %v3761_v3 = vsel %vm1954_vm14, %v3664_v31, %v3760_v63 }
0x169f   : > { %v3739_v7 = vadd.f32 %v3738_v58, %v3737_v17  ;;  %2752 = vst.msk [vmem:[#allocation3 + $0x8] sm:$0xff] %vm1037_vm1, %v2748_v8  ;;  %v3621_v55 = vmul.f32 %v7623_v26, %v3572_v0  ;;  %v3818_v43 = vunpack.c.l.b16 %v3786_v46  ;;  %v3780_v17 = vpack.c.bf16 %v3664_v31, %v3664_v31 }
0x16a0   : > { %v3725_v41 = vadd.f32 %v3724_v39, %v3723_v25  ;;  %v3819_v25 = vunpack.c.l.b16 %v3787_v12  ;;  %v3768_v58 = vsel %vm1954_vm14, %v3720_v62, %v3767_v18  ;;  %v3790_v29 = vpack.c.bf16 %v3734_v51, %v3734_v51 }
0x16a1   : > { %v3679_v20 = vsel %vm1037_vm1, %v3621_v55, 0.0  ;;  %v3740_v34 = vrot.slane %v3739_v7, 1  ;;  %v3832_v23 = vsel %vm1950_vm12, %v3818_v43, %v3831_v19  ;;  %v3812_v26 = vunpack.c.l.b16 %v3780_v17 }
0x16a2   : > { %v3726_v37 = vrot.slane %v3725_v41, 1  ;;  %v3680_v27 = vrot.slane %v3679_v20, 4  ;;  %v3833_v0 = vsel %vm1952_vm13, %v3819_v25, %v3832_v23  ;;  %v3782_v55 = vpack.c.bf16 %v3678_v11, %v3678_v11 }
0x16a3   : > { %v3741_v8 = vadd.f32 %v3740_v34, %v3739_v7  ;;  %v3820_v28 = vunpack.c.l.b16 %v3788_v6  ;;  %v3781_v32 = vpack.c.bf16 %v9544_v45, %v9544_v45  ;;  %v3826_v42 = vsel %vm1952_vm13, %v3811_v38, %v3825_v14  ;;  %v7629_v14 = vld [vmem:[%s10750_s4 + $0x8] sm:$0xff] }
0x16a4   : > { %v3727_v56 = vadd.f32 %v3726_v37, %v3725_v41  ;;  %v3681_v46 = vadd.f32 %v3680_v27, %v3679_v20  ;;  %v3762_v41 = vsel %vm1956_vm15, %v9544_v45, %v3761_v3  ;;  %v3827_v62 = vsel %vm1954_vm14, %v3812_v26, %v3826_v42  ;;  %v7630_v3 = vld [vmem:[%s10750_s4] sm:$0xff] }
0x16a5   : > { %v3986_v22 = vld [vmem:[#allocation3] sm:$0xff]  ;;  %v3834_v12 = vsel %vm1954_vm14, %v3820_v28, %v3833_v0  ;;  %v3791_v36 = vpack.c.bf16 %v3741_v8, %v3741_v8  ;;  %v3763_v20 = vsel %vm1958_vm0, %v3678_v11, %v3762_v41  ;;  %v3814_v18 = vunpack.c.l.b16 %v3782_v55  ;;  %v7631_v28 = vld [vmem:[%s10763_s19] ss:$0 sm:$0xff] }
0x16a6   : > { %v3769_v33 = vsel %vm1956_vm15, %v3727_v56, %v3768_v58  ;;  %v3789_v39 = vpack.c.bf16 %v3727_v56, %v3727_v56  ;;  %v3682_v2 = vrot.slane %v3681_v46, 2  ;;  %v2738_v4 = vpop.permute.xlu2 %2737  ;;  %3990 = vrot.lane.b32.xlu1 %v3986_v22, %s8155_s15  ;;  %v3822_v34 = vunpack.c.l.b16 %v3790_v29  ;;  %v7625_v58 = vld [vmem:[#allocation16 + $0x8] sm:$0xff]  ;;  %v7626_v22 = vld [vmem:[#allocation16] sm:$0xff] }
0x16a7   : > { %v3770_v24 = vsel %vm1958_vm0, %v3734_v51, %v3769_v33  ;;  %2742 = vst.msk [vmem:[#allocation2 + $0x8] sm:$0xff] %vm1037_vm1, %v2738_v4  ;;  %v3813_v37 = vunpack.c.l.b16 %v3781_v32  ;;  %v3823_v17 = vunpack.c.l.b16 %v3791_v36  ;;  %v7628_v33 = vld [vmem:[#allocation22] sm:$0xff] }
0x16a8   : > { %v3771_v59 = vsel %vm1960_vm2, %v3741_v8, %v3770_v24  ;;  %v3821_v49 = vunpack.c.l.b16 %v3789_v39  ;;  %v3683_v7 = vadd.f32 %v3682_v2, %v3681_v46  ;;  %v7627_v8 = vld [vmem:[#allocation22 + $0x8] sm:$0xff]  ;;  %v3865_v24 = vpop.f32.mrf.mxu3 }
0x16a9   : > { %3775 = vst.msk [vmem:[#allocation4 + $0x8] sm:$0xff] %vm1037_vm1, %v3771_v59  ;;  %v3828_v19 = vsel %vm1956_vm15, %v3813_v37, %v3827_v62  ;;  %v3922_v2 = vld [vmem:[#allocation2] sm:$0xff] }
0x16aa   : > { %v3684_v31 = vrot.slane %v3683_v7, 1  ;;  %v3835_v43 = vsel %vm1956_vm15, %v3821_v49, %v3834_v12  ;;  %v3829_v25 = vsel %vm1958_vm0, %v3814_v18, %v3828_v19 }
0x16ab   : > { %v3836_v38 = vsel %vm1958_vm0, %v3822_v34, %v3835_v43  ;;  %v7632_v43 = vld [vmem:[#allocation13] ss:$0 sm:$0xff] }
0x16ac   : > { %v3685_v15 = vadd.f32 %v3684_v31, %v3683_v7  ;;  %v3837_v11 = vsel %vm1960_vm2, %v3823_v17, %v3836_v38  ;;  %v3987_v17 = vld [vmem:[#allocation3 + $0x8] sm:$0xff] }
0x16ae   : > { %v3764_v27 = vsel %vm1960_vm2, %v3685_v15, %v3763_v20  ;;  %v3783_v63 = vpack.c.bf16 %v3685_v15, %v3685_v15  ;;  %v3923_v39 = vld [vmem:[#allocation2 + $0x8] sm:$0xff] }
0x16af   : > { %3774 = vst.msk [vmem:[#allocation4] sm:$0xff] %vm1037_vm1, %v3764_v27  ;;  %v3924_v4 = vpack.c.bf16 %v3923_v39, %v3922_v2 }
0x16b0   : > { %v3815_v45 = vunpack.c.l.b16 %v3783_v63  ;;  %v3881_v51 = vld [vmem:[#allocation4 + $0x8] sm:$0xff]  ;;  %v3867_v49 = vpop.f32.mrf.mxu3 }
0x16b2   : > { %v3830_v56 = vsel %vm1960_vm2, %v3815_v45, %v3829_v25 }
0x16b3   : > { %v3838_v46 = vpack.c.b16 %v3837_v11, %v3830_v56 }
0x16b5   : > { %6895 = vmatmul.msk.bf16.vlgmr.msra.gmra.mxu2 %vm1037_vm1, %v3838_v46 }
0x16b6   : > { %v3880_v23 = vld [vmem:[#allocation4] sm:$0xff]  ;;  %4230 = vmatpush.bf16.msra.mxu2 %v7625_v58 }
0x16b7   : > { %v3882_v6 = vpack.c.bf16 %v3881_v51, %v3880_v23 }
0x16b9   : > { %6901 = vmatmul.msk.bf16.vlgmr.msrb.gmra.mxu0 %vm1037_vm1, %v3882_v6 }
0x16ba   : > { %4231 = vmatpush.bf16.msra.mxu2 %v7626_v22  ;;  %5145 = vmatpush.bf16.msrb.mxu0 %v7627_v8 }
0x16be   : > { %5146 = vmatpush.bf16.msrb.mxu0 %v7628_v33 }
0x16c5   : > { %6907 = vmatmul.msk.bf16.vlgmr.msrb.gmra.mxu2 %vm1037_vm1, %v3924_v4 }
0x16c6   : > { %5189 = vmatpush.bf16.msrb.mxu2 %v7629_v14 }
0x16ca   : > { %5190 = vmatpush.bf16.msrb.mxu2 %v7630_v3 }
0x1711   : > { %v3917_v29 = vpop.f32.mrf.mxu1 }
0x1719   : > { %v3919_v20 = vpop.f32.mrf.mxu1 }
0x1736   : > { %v3895_v55 = vpop.f32.mrf.mxu0 }
0x1737   : > { %v3918_v12 = vadd.f32 %v3917_v29, %v3895_v55 }
0x1738   : > { %v3851_v0 = vpop.f32.mrf.mxu2 }
0x1739   : > { %v3866_v59 = vadd.f32 %v3865_v24, %v3851_v0 }
0x173b   : > { %v3870_v32 = vadd.f32 %v7631_v28, %v3866_v59 }
0x173e   : > { %v3897_v62 = vpop.f32.mrf.mxu0 }
0x173f   : > { %v3920_v18 = vadd.f32 %v3919_v20, %v3897_v62 }
0x1740   : > { %v3853_v7 = vpop.f32.mrf.mxu2 }
0x1741   : > { %v3868_v26 = vadd.f32 %v3867_v49, %v3853_v7 }
0x1743   : > { %v3871_v42 = vadd.f32 %v7631_v28, %v3868_v26 }
0x1745   : > { %v6990_v31 = vpack.c.bf16 %v3871_v42, %v3870_v32 }
0x1747   : > { %7002 = vst [vmem:[%s8559_s8 + $0x8] sm:$0xff] %v6990_v31  }
0x1748   : > { %v3937_v41 = vpop.f32.mrf.mxu2 }
0x1749   : > { %v3942_v36 = vadd.f32 %v3937_v41, %v3918_v12  ;;  %v3991_v12 = vpop.permute.xlu1 %3990 }
0x174b   : > { %v3944_v15 = vadd.f32 %v7632_v43, %v3942_v36 }
0x174d   : > { %7401 = vtanh.f32 %v3944_v15  ;;  %v6908_v45 = vmul.f32 -1.442695, %v3944_v15 }
0x1750   : > { %v3939_v34 = vpop.f32.mrf.mxu2 }
0x1751   : > { %v3943_v37 = vadd.f32 %v3939_v34, %v3920_v18 }
0x1753   : > { %v7402_v27 = vpop.eup %7401  ;;  %v3945_v63 = vadd.f32 %v7632_v43, %v3943_v37 }
0x1754   : > { %4000 = vrot.lane.b32.xlu2 %v7402_v27, %s8155_s15 }
0x1755   : > { %7403 = vtanh.f32 %v3945_v63  ;;  %v6909_v23 = vmul.f32 -1.442695, %v3945_v63 }
0x1756   : > { %7405 = vpow2.f32 %v6908_v45 }
0x175b   : > { %v7404_v38 = vpop.eup %7403 }
0x175c   : > { %3992 = vrot.lane.b32.xlu2 %v3987_v17, %s8155_s15  ;;  %4002 = vrot.lane.b32.xlu0 %v7404_v38, %s8155_s15  ;;  %v7406_v19 = vpop.eup %7405 }
0x175d   : > { %v3952_v25 = vadd.f32 1.0, %v7406_v19  ;;  %v7633_v19 = vld [vmem:[%s10751_s13 + $0x8] sm:$0xff] }
0x175f   : > { %7407 = vrcp.f32 %v3952_v25  ;;  %v3965_v6 = vand.u32 2147483648, %v3952_v25  ;;  %vm3959_vm9 = vweird.f32 %v3952_v25  ;;  %v3963_v22 = vand.u32 2147483647, %v3952_v25 }
0x1760   : > { %7409 = vpow2.f32 %v6909_v23 }
0x1761   : > { %v3966_v39 = vor.u32 1.1754944e-38, %v3965_v6  ;;  %vm3964_vm4 = vcmp.eq.f32.partialorder %v3963_v22, 8.507059e+37  ;;  %v7636_v6 = vld [vmem:[#allocation11] sm:$0xff] }
0x1765   : > { %v7408_v56 = vpop.eup %7407 }
0x1766   : > { %v3955_v11 = vmul.f32 %v7408_v56, %v3952_v25  ;;  %vm3960_vm8 = vweird.f32 %v7408_v56  ;;  %v7410_v8 = vpop.eup %7409  ;;  %v7634_v25 = vld [vmem:[%s10751_s13] sm:$0xff] }
0x1767   : > { %vm3961_vm10 = vmor %vm3959_vm9, %vm3960_vm8  ;;  %v3953_v2 = vadd.f32 1.0, %v7410_v8 }
0x1768   : > { %v3956_v46 = vsub.f32 1.0, %v3955_v11 }
0x1769   : > { %7411 = vrcp.f32 %v3953_v2  ;;  %v3980_v26 = vand.u32 2147483648, %v3953_v2  ;;  %vm3974_vm5 = vweird.f32 %v3953_v2  ;;  %v3978_v55 = vand.u32 2147483647, %v3953_v2 }
0x176a   : > { %v3957_v51 = vmul.f32 %v7408_v56, %v3956_v46 }
0x176b   : > { %v3981_v28 = vor.u32 1.1754944e-38, %v3980_v26  ;;  %vm3979_vm7 = vcmp.eq.f32.partialorder %v3978_v55, 8.507059e+37 }
0x176c   : > { %v3958_v58 = vadd.f32 %v7408_v56, %v3957_v51 }
0x176e   : > { %v3962_v33 = vsel %vm3961_vm10, %v7408_v56, %v3958_v58  ;;  %v7635_v58 = vld [vmem:[#allocation11 + $0x8] sm:$0xff] }
0x176f   : > { %v3967_v14 = vsel %vm3964_vm4, %v3966_v39, %v3962_v33  ;;  %v7412_v24 = vpop.eup %7411  ;;  %v7637_v39 = vld [vmem:[%s10754_s26] ss:$0 sm:$0xff] }
0x1770   : > { %v3970_v0 = vmul.f32 %v7412_v24, %v3953_v2  ;;  %vm3975_vm3 = vweird.f32 %v7412_v24  ;;  %v3996_v41 = vmul.f32 %v3991_v12, %v3967_v14 }
0x1771   : > { %vm3976_vm6 = vmor %vm3974_vm5, %vm3975_vm3 }
0x1772   : > { %v3971_v59 = vsub.f32 1.0, %v3970_v0 }
0x1774   : > { %v3972_v49 = vmul.f32 %v7412_v24, %v3971_v59 }
0x1776   : > { %v3973_v7 = vadd.f32 %v7412_v24, %v3972_v49 }
0x1778   : > { %v3977_v29 = vsel %vm3976_vm6, %v7412_v24, %v3973_v7 }
0x1779   : > { %v3982_v32 = vsel %vm3979_vm7, %v3981_v28, %v3977_v29 }
0x17ae   : > { %v4001_v4 = vpop.permute.xlu2 %4000 }
0x17af   : > { %v4006_v3 = vmul.f32 %v4001_v4, %v3967_v14 }
0x17b1   : > { %4010 = vrot.lane.b32.xlu0 %v4006_v3, %s8155_s15 }
0x17ce   : > { %v4003_v42 = vpop.permute.xlu0 %4002 }
0x17cf   : > { %v4007_v31 = vmul.f32 %v4003_v42, %v3982_v32 }
0x17d1   : > { %4012 = vrot.lane.b32.xlu1 %v4007_v31, %s8155_s15 }
0x17d9   : > { %2882 = vrot.lane.b32.xlu1 %v9202_v9, %s8156_s29  ;;  %v3993_v9 = vpop.permute.xlu2 %3992 }
0x17da   : > { %v3997_v62 = vmul.f32 %v3993_v9, %v3982_v32 }
0x17e1   : > { %2892 = vrot.lane.b32.xlu1 %v9191_v1, %s8158_s30 }
0x1823   : > { %v4011_v36 = vpop.permute.xlu0 %4010 }
0x1824   : > { %v9608_v43 = vadd.f32 %v4011_v36, %v3996_v41 }
0x1826   : > { %7413 = vtanh.f32 %v9608_v43 }
0x182c   : > { %v7414_v15 = vpop.eup %7413 }
0x182d   : > { %4022 = vrot.lane.b32.xlu2 %v7414_v15, %s8155_s15 }
0x1835   : > { %2884 = vrot.lane.b32.xlu2 %v9200_v10, %s8156_s29 }
0x183d   : > { %2894 = vrot.lane.b32.xlu2 %v9185_v47, %s8158_s30 }
0x1843   : > { %v4013_v20 = vpop.permute.xlu1 %4012 }
0x1844   : > { %v9616_v1 = vadd.f32 %v4013_v20, %v3997_v62 }
0x1846   : > { %7415 = vtanh.f32 %v9616_v1 }
0x184b   : > { %v2883_v18 = vpop.permute.xlu1 %2882 }
0x184c   : > { %v7416_v34 = vpop.eup %7415  ;;  %2888 = vst.msk [vmem:[#allocation2 + $0x10] sm:$0xff] %vm1037_vm1, %v2883_v18 }
0x184d   : > { %4024 = vrot.lane.b32.xlu0 %v7416_v34, %s8155_s15 }
0x1853   : > { %v2893_v37 = vpop.permute.xlu1 %2892  ;;  %v4051_v38 = vld [vmem:[#allocation2 + $0x10] sm:$0xff] }
0x1854   : > { %2898 = vst.msk [vmem:[#allocation3 + $0x10] sm:$0xff] %vm1037_vm1, %v2893_v37 }
0x185b   : > { %v4133_v10 = vld [vmem:[#allocation3 + $0x10] sm:$0xff] }
0x185c   : > { %4137 = vrot.lane.b32.xlu2 %v4133_v10, %s8155_s15 }
0x1887   : > { %v4023_v47 = vpop.permute.xlu2 %4022 }
0x1888   : > { %v9632_v11 = vmul.f32 %v4023_v47, %v3967_v14 }
0x188f   : > { %v2885_v27 = vpop.permute.xlu2 %2884 }
0x1890   : > { %2889 = vst.msk [vmem:[#allocation2 + $0x18] sm:$0xff] %vm1037_vm1, %v2885_v27 }
0x1897   : > { %v2895_v63 = vpop.permute.xlu2 %2894  ;;  %v4052_v17 = vld [vmem:[#allocation2 + $0x18] sm:$0xff] }
0x1898   : > { %2899 = vst.msk [vmem:[#allocation3 + $0x18] sm:$0xff] %vm1037_vm1, %v2895_v63  ;;  %v4053_v45 = vpack.c.bf16 %v4052_v17, %v4051_v38 }
0x189a   : > { %6910 = vmatmul.msk.bf16.vlgmr.msrb.gmra.mxu3 %vm1037_vm1, %v4053_v45 }
0x189b   : > { %5211 = vmatpush.bf16.msrb.mxu3 %v7633_v19 }
0x189f   : > { %5212 = vmatpush.bf16.msrb.mxu3 %v7634_v25  ;;  %v4134_v49 = vld [vmem:[#allocation3 + $0x18] sm:$0xff] }
0x18bf   : > { %v4025_v56 = vpop.permute.xlu0 %4024 }
0x18c0   : > { %v9634_v46 = vmul.f32 %v4025_v56, %v3982_v32 }
0x18c2   : > { %v4050_v23 = vpack.c.bf16 %v9634_v46, %v9632_v11 }
0x18c4   : > { %4072 = vrot.lane.b32.xlu0 %v4050_v23, %s8156_s29 }
0x191d   : > { %v4066_v22 = vpop.f32.mrf.mxu3 }
0x1925   : > { %v4068_v4 = vpop.f32.mrf.mxu3 }
0x1936   : > { %v4073_v51 = vpop.permute.xlu0 %4072 }
0x1937   : > { %6911 = vmatmul.msk.bf16.vlgmr.msra.gmra.mxu0 %vm1037_vm1, %v4073_v51 }
0x1938   : > { %5231 = vmatpush.bf16.msra.mxu0 %v7635_v58  ;;  %v4138_v58 = vpop.permute.xlu2 %4137 }
0x193c   : > { %5232 = vmatpush.bf16.msra.mxu0 %v7636_v6 }
0x19b4   : > { %v4086_v8 = vpop.f32.mrf.mxu0 }
0x19b5   : > { %v4087_v33 = vadd.f32 %v4086_v8, %v4066_v22 }
0x19b7   : > { %v4091_v2 = vadd.f32 %v7637_v39, %v4087_v33 }
0x19b9   : > { %7417 = vtanh.f32 %v4091_v2  ;;  %v6912_v7 = vmul.f32 -1.442695, %v4091_v2 }
0x19bc   : > { %v4088_v14 = vpop.f32.mrf.mxu0 }
0x19bd   : > { %v4089_v3 = vadd.f32 %v4088_v14, %v4068_v4 }
0x19bf   : > { %v7418_v24 = vpop.eup %7417  ;;  %v4092_v0 = vadd.f32 %v7637_v39, %v4089_v3 }
0x19c0   : > { %4147 = vrot.lane.b32.xlu0 %v7418_v24, %s8155_s15 }
0x19c1   : > { %7419 = vtanh.f32 %v4092_v0  ;;  %v6913_v26 = vmul.f32 -1.442695, %v4092_v0 }
0x19c2   : > { %7421 = vpow2.f32 %v6912_v7 }
0x19c3   : > { %7423 = vpow2.f32 %v6913_v26 }
0x19c7   : > { %v7420_v59 = vpop.eup %7419 }
0x19c8   : > { %4149 = vrot.lane.b32.xlu1 %v7420_v59, %s8155_s15  ;;  %4139 = vrot.lane.b32.xlu0 %v4134_v49, %s8155_s15  ;;  %v7422_v55 = vpop.eup %7421 }
0x19c9   : > { %v4099_v29 = vadd.f32 1.0, %v7422_v55  ;;  %v7424_v28 = vpop.eup %7423 }
0x19ca   : > { %v4100_v32 = vadd.f32 1.0, %v7424_v28 }
0x19cb   : > { %7425 = vrcp.f32 %v4099_v29  ;;  %v4112_v20 = vand.u32 2147483648, %v4099_v29  ;;  %vm4106_vm9 = vweird.f32 %v4099_v29  ;;  %v4110_v18 = vand.u32 2147483647, %v4099_v29 }
0x19cc   : > { %7427 = vrcp.f32 %v4100_v32  ;;  %v4127_v17 = vand.u32 2147483648, %v4100_v32  ;;  %vm4121_vm5 = vweird.f32 %v4100_v32  ;;  %v4125_v45 = vand.u32 2147483647, %v4100_v32 }
0x19cd   : > { %v4113_v10 = vor.u32 1.1754944e-38, %v4112_v20  ;;  %vm4111_vm4 = vcmp.eq.f32.partialorder %v4110_v18, 8.507059e+37 }
0x19ce   : > { %v4128_v25 = vor.u32 1.1754944e-38, %v4127_v17  ;;  %vm4126_vm7 = vcmp.eq.f32.partialorder %v4125_v45, 8.507059e+37 }
0x19d1   : > { %v7426_v42 = vpop.eup %7425 }
0x19d2   : > { %v4102_v31 = vmul.f32 %v7426_v42, %v4099_v29  ;;  %v7428_v41 = vpop.eup %7427  ;;  %vm4107_vm8 = vweird.f32 %v7426_v42 }
0x19d3   : > { %v4117_v15 = vmul.f32 %v7428_v41, %v4100_v32  ;;  %vm4108_vm10 = vmor %vm4106_vm9, %vm4107_vm8  ;;  %vm4122_vm3 = vweird.f32 %v7428_v41  ;;  %v7638_v32 = vld [vmem:[%s10753_s27 + $0x8] sm:$0xff] }
0x19d4   : > { %v4103_v12 = vsub.f32 1.0, %v4102_v31  ;;  %vm4123_vm6 = vmor %vm4121_vm5, %vm4122_vm3 }
0x19d5   : > { %v4118_v62 = vsub.f32 1.0, %v4117_v15 }
0x19d6   : > { %v4104_v36 = vmul.f32 %v7426_v42, %v4103_v12  ;;  %v7640_v12 = vld [vmem:[#allocation14 + $0x8] sm:$0xff] }
0x19d7   : > { %v4119_v37 = vmul.f32 %v7428_v41, %v4118_v62  ;;  %v7642_v62 = vld [vmem:[%s10755_s28] ss:$0 sm:$0xff] }
0x19d8   : > { %v4105_v9 = vadd.f32 %v7426_v42, %v4104_v36 }
0x19d9   : > { %v4120_v38 = vadd.f32 %v7428_v41, %v4119_v37 }
0x19da   : > { %v4109_v34 = vsel %vm4108_vm10, %v7426_v42, %v4105_v9  ;;  %v7639_v42 = vld [vmem:[%s10753_s27] sm:$0xff] }
0x19db   : > { %v4114_v27 = vsel %vm4111_vm4, %v4113_v10, %v4109_v34  ;;  %v4124_v19 = vsel %vm4123_vm6, %v7428_v41, %v4120_v38  ;;  %v7641_v41 = vld [vmem:[#allocation14] sm:$0xff] }
0x19dc   : > { %v4129_v23 = vsel %vm4126_vm7, %v4128_v25, %v4124_v19  ;;  %v4143_v4 = vmul.f32 %v4138_v58, %v4114_v27 }
0x1a32   : > { %v4148_v47 = vpop.permute.xlu0 %4147 }
0x1a33   : > { %v4153_v63 = vmul.f32 %v4148_v47, %v4114_v27 }
0x1a35   : > { %4157 = vrot.lane.b32.xlu1 %v4153_v63, %s8155_s15 }
0x1a3a   : > { %v4150_v56 = vpop.permute.xlu1 %4149  ;;  %v4140_v6 = vpop.permute.xlu0 %4139 }
0x1a3b   : > { %v4154_v51 = vmul.f32 %v4150_v56, %v4129_v23  ;;  %v4144_v22 = vmul.f32 %v4140_v6, %v4129_v23 }
0x1a3d   : > { %4159 = vrot.lane.b32.xlu2 %v4154_v51, %s8155_s15 }
0x1a45   : > { %3029 = vrot.lane.b32.xlu2 %v9235_v30, %s8156_s29 }
0x1a4d   : > { %3039 = vrot.lane.b32.xlu2 %v9225_v35, %s8158_s30 }
0x1a97   : > { %v4160_v8 = vpop.permute.xlu2 %4159 }
0x1a98   : > { %v9652_v33 = vadd.f32 %v4160_v8, %v4144_v22 }
0x1a9a   : > { %7429 = vtanh.f32 %v9652_v33 }
0x1a9f   : > { %v3030_v39 = vpop.permute.xlu2 %3029 }
0x1aa0   : > { %v7430_v2 = vpop.eup %7429  ;;  %3035 = vst.msk [vmem:[#allocation2 + $0x20] sm:$0xff] %vm1037_vm1, %v3030_v39 }
0x1aa1   : > { %4171 = vrot.lane.b32.xlu1 %v7430_v2, %s8155_s15 }
0x1aa7   : > { %v3040_v14 = vpop.permute.xlu2 %3039  ;;  %v4158_v30 = vpop.permute.xlu1 %4157  ;;  %v4198_v29 = vld [vmem:[#allocation2 + $0x20] sm:$0xff] }
0x1aa8   : > { %3045 = vst.msk [vmem:[#allocation3 + $0x20] sm:$0xff] %vm1037_vm1, %v3040_v14  ;;  %v9658_v35 = vadd.f32 %v4158_v30, %v4143_v4 }
0x1aaa   : > { %7431 = vtanh.f32 %v9658_v35 }
0x1aaf   : > { %v4280_v24 = vld [vmem:[#allocation3 + $0x20] sm:$0xff] }
0x1ab0   : > { %v7432_v3 = vpop.eup %7431 }
0x1ab1   : > { %4169 = vrot.lane.b32.xlu0 %v7432_v3, %s8155_s15 }
0x1ab9   : > { %3031 = vrot.lane.b32.xlu0 %v9233_v21, %s8156_s29 }
0x1ac1   : > { %3041 = vrot.lane.b32.xlu0 %v9228_v40, %s8158_s30 }
0x1ac9   : > { %4284 = vrot.lane.b32.xlu0 %v4280_v24, %s8155_s15 }
0x1b13   : > { %v4172_v0 = vpop.permute.xlu1 %4171 }
0x1b14   : > { %v9667_v49 = vmul.f32 %v4172_v0, %v4129_v23 }
0x1b23   : > { %v4170_v59 = vpop.permute.xlu0 %4169 }
0x1b24   : > { %v9669_v7 = vmul.f32 %v4170_v59, %v4114_v27 }
0x1b26   : > { %v4197_v26 = vpack.c.bf16 %v9667_v49, %v9669_v7 }
0x1b28   : > { %4219 = vrot.lane.b32.xlu1 %v4197_v26, %s8156_s29 }
0x1b2b   : > { %v3032_v55 = vpop.permute.xlu0 %3031 }
0x1b2c   : > { %3036 = vst.msk [vmem:[#allocation2 + $0x28] sm:$0xff] %vm1037_vm1, %v3032_v55 }
0x1b33   : > { %v3042_v21 = vpop.permute.xlu0 %3041  ;;  %v4199_v40 = vld [vmem:[#allocation2 + $0x28] sm:$0xff] }
0x1b34   : > { %3046 = vst.msk [vmem:[#allocation3 + $0x28] sm:$0xff] %vm1037_vm1, %v3042_v21  ;;  %v4200_v28 = vpack.c.bf16 %v4199_v40, %v4198_v29 }
0x1b36   : > { %6914 = vmatmul.msk.bf16.vlgmr.msra.gmra.mxu1 %vm1037_vm1, %v4200_v28 }
0x1b37   : > { %5360 = vmatpush.bf16.msra.mxu1 %v7638_v32 }
0x1b3b   : > { %5361 = vmatpush.bf16.msra.mxu1 %v7639_v42  ;;  %v4281_v63 = vld [vmem:[#allocation3 + $0x28] sm:$0xff] }
0x1b9a   : > { %v4220_v31 = vpop.permute.xlu1 %4219 }
0x1b9b   : > { %6915 = vmatmul.msk.bf16.vlgmr.msra.gmra.mxu2 %vm1037_vm1, %v4220_v31 }
0x1b9c   : > { %5380 = vmatpush.bf16.msra.mxu2 %v7640_v12  ;;  %v4285_v12 = vpop.permute.xlu0 %4284 }
0x1ba0   : > { %5381 = vmatpush.bf16.msra.mxu2 %v7641_v41 }
0x1bb3   : > { %v4213_v36 = vpop.f32.mrf.mxu1 }
0x1bbb   : > { %v4215_v18 = vpop.f32.mrf.mxu1 }
0x1c1e   : > { %v4233_v15 = vpop.f32.mrf.mxu2 }
0x1c1f   : > { %v4234_v9 = vadd.f32 %v4233_v15, %v4213_v36 }
0x1c21   : > { %v4238_v20 = vadd.f32 %v7642_v62, %v4234_v9 }
0x1c23   : > { %7433 = vtanh.f32 %v4238_v20  ;;  %v6916_v19 = vmul.f32 -1.442695, %v4238_v20 }
0x1c26   : > { %v4235_v34 = vpop.f32.mrf.mxu2 }
0x1c27   : > { %v4236_v37 = vadd.f32 %v4235_v34, %v4215_v18 }
0x1c29   : > { %v7434_v10 = vpop.eup %7433  ;;  %v4239_v47 = vadd.f32 %v7642_v62, %v4236_v37 }
0x1c2a   : > { %4294 = vrot.lane.b32.xlu1 %v7434_v10, %s8155_s15 }
0x1c2b   : > { %7435 = vtanh.f32 %v4239_v47  ;;  %v6917_v38 = vmul.f32 -1.442695, %v4239_v47 }
0x1c2d   : > { %7437 = vpow2.f32 %v6917_v38 }
0x1c31   : > { %v7436_v27 = vpop.eup %7435 }
0x1c32   : > { %4296 = vrot.lane.b32.xlu2 %v7436_v27, %s8155_s15  ;;  %4286 = vrot.lane.b32.xlu1 %v4281_v63, %s8155_s15 }
0x1c33   : > { %v7438_v17 = vpop.eup %7437 }
0x1c34   : > { %v4247_v45 = vadd.f32 1.0, %v7438_v17 }
0x1c36   : > { %7439 = vrcp.f32 %v4247_v45  ;;  %v4274_v39 = vand.u32 2147483648, %v4247_v45  ;;  %vm4268_vm9 = vweird.f32 %v4247_v45  ;;  %v4272_v2 = vand.u32 2147483647, %v4247_v45 }
0x1c37   : > { %7441 = vpow2.f32 %v6916_v19  ;;  %v7644_v19 = vld [vmem:[#allocation19 + $0x8] sm:$0xff] }
0x1c38   : > { %v4275_v30 = vor.u32 1.1754944e-38, %v4274_v39  ;;  %vm4273_vm4 = vcmp.eq.f32.partialorder %v4272_v2, 8.507059e+37 }
0x1c3c   : > { %v7440_v25 = vpop.eup %7439 }
0x1c3d   : > { %v7442_v56 = vpop.eup %7441  ;;  %v4264_v23 = vmul.f32 %v7440_v25, %v4247_v45  ;;  %vm4269_vm8 = vweird.f32 %v7440_v25  ;;  %v7643_v45 = vld [vmem:[#allocation17 + $0x8] sm:$0xff] }
0x1c3e   : > { %v4246_v51 = vadd.f32 1.0, %v7442_v56  ;;  %vm4270_vm10 = vmor %vm4268_vm9, %vm4269_vm8  ;;  %v7646_v56 = vld [vmem:[#allocation19] sm:$0xff]  ;;  %vm10777_vm8 = vcmask 64512  }
0x1c3f   : > { %v4265_v58 = vsub.f32 1.0, %v4264_v23  ;;  %vm10778_vm9 = vmmov %vm10777_vm8 }
0x1c40   : > { %7443 = vrcp.f32 %v4246_v51  ;;  %v4259_v21 = vand.u32 2147483648, %v4246_v51  ;;  %vm4253_vm5 = vweird.f32 %v4246_v51  ;;  %v4257_v29 = vand.u32 2147483647, %v4246_v51 }
0x1c41   : > { %v4266_v6 = vmul.f32 %v7440_v25, %v4265_v58 }
0x1c42   : > { %v4260_v28 = vor.u32 1.1754944e-38, %v4259_v21  ;;  %vm4258_vm7 = vcmp.eq.f32.partialorder %v4257_v29, 8.507059e+37 }
0x1c43   : > { %v4267_v22 = vadd.f32 %v7440_v25, %v4266_v6 }
0x1c45   : > { %v4271_v4 = vsel %vm4270_vm10, %v7440_v25, %v4267_v22  ;;  %v7645_v25 = vld [vmem:[#allocation17] sm:$0xff]  ;;  %vm10779_vm10 = vmmov %vm10777_vm8 }
0x1c46   : > { %v7444_v8 = vpop.eup %7443  ;;  %v4276_v24 = vsel %vm4273_vm4, %v4275_v30, %v4271_v4  ;;  %v7648_v4 = vld [vmem:[%s8525_s10] sm:$0xff]  ;;  %vm10780_vm4 = vmmov %vm10777_vm8 }
0x1c47   : > { %v4249_v14 = vmul.f32 %v7444_v8, %v4246_v51  ;;  %vm4254_vm3 = vweird.f32 %v7444_v8  ;;  %v7647_v51 = vld [vmem:[%s10756_s18] ss:$0 sm:$0xff] }
0x1c48   : > { %vm4255_vm6 = vmor %vm4253_vm5, %vm4254_vm3 }
0x1c49   : > { %v4250_v59 = vsub.f32 1.0, %v4249_v14 }
0x1c4b   : > { %v4251_v26 = vmul.f32 %v7444_v8, %v4250_v59  ;;  %v7649_v59 = vld [vmem:[%s8525_s10 + $0x20] sm:$0xff] }
0x1c4d   : > { %v4252_v55 = vadd.f32 %v7444_v8, %v4251_v26 }
0x1c4f   : > { %v4256_v40 = vsel %vm4255_vm6, %v7444_v8, %v4252_v55  ;;  %v7650_v55 = vld [vmem:[%s8525_s10 + $0x8] sm:$0xff] }
0x1c50   : > { %v4261_v42 = vsel %vm4258_vm7, %v4260_v28, %v4256_v40 }
0x1c51   : > { %v4290_v41 = vmul.f32 %v4285_v12, %v4261_v42  ;;  %v7651_v12 = vld [vmem:[%s8525_s10 + $0x18] sm:$0xff] }
0x1c8c   : > { %v4297_v3 = vpop.permute.xlu2 %4296 }
0x1c8d   : > { %v4301_v0 = vmul.f32 %v4297_v3, %v4276_v24 }
0x1c8f   : > { %4306 = vrot.lane.b32.xlu0 %v4301_v0, %s8155_s15 }
0x1c9c   : > { %v4295_v32 = vpop.permute.xlu1 %4294 }
0x1c9d   : > { %v4300_v31 = vmul.f32 %v4295_v32, %v4261_v42 }
0x1c9f   : > { %4304 = vrot.lane.b32.xlu2 %v4300_v31, %s8155_s15 }
0x1ca4   : > { %v4287_v9 = vpop.permute.xlu1 %4286 }
0x1ca5   : > { %v4291_v62 = vmul.f32 %v4287_v9, %v4276_v24 }
0x1cf9   : > { %v4305_v36 = vpop.permute.xlu2 %4304 }
0x1cfa   : > { %v9692_v15 = vadd.f32 %v4305_v36, %v4290_v41 }
0x1cfc   : > { %7445 = vtanh.f32 %v9692_v15 }
0x1d01   : > { %v4307_v20 = vpop.permute.xlu0 %4306 }
0x1d02   : > { %v7446_v18 = vpop.eup %7445  ;;  %v9695_v34 = vadd.f32 %v4307_v20, %v4291_v62  ;;  %v7652_v62 = vld [vmem:[%s8525_s10 + $0x38] sm:$0xff] }
0x1d03   : > { %4316 = vrot.lane.b32.xlu1 %v7446_v18, %s8155_s15  ;;  %v7653_v18 = vld [vmem:[%s8525_s10 + $0x10] sm:$0xff] }
0x1d04   : > { %7447 = vtanh.f32 %v9695_v34 }
0x1d0a   : > { %v7448_v37 = vpop.eup %7447 }
0x1d0b   : > { %4318 = vrot.lane.b32.xlu2 %v7448_v37, %s8155_s15 }
0x1d65   : > { %v4319_v10 = vpop.permute.xlu2 %4318 }
0x1d66   : > { %v9700_v27 = vmul.f32 %v4319_v10, %v4276_v24 }
0x1d75   : > { %v4317_v47 = vpop.permute.xlu1 %4316 }
0x1d76   : > { %v9702_v63 = vmul.f32 %v4317_v47, %v4261_v42 }
0x1d78   : > { %v4344_v38 = vpack.c.bf16 %v9700_v27, %v9702_v63 }
0x1d7a   : > { %4346 = vrot.lane.b32.xlu0 %v4344_v38, %s8156_s29 }
0x1dec   : > { %v4347_v17 = vpop.permute.xlu0 %4346 }
0x1ded   : > { %6918 = vmatmul.msk.bf16.vlgmr.msra.gmra.mxu3 %vm1037_vm1, %v4347_v17  ;;  %6920 = vmatmul.msk.bf16.vlgmr.msrb.gmra.mxu1 %vm1037_vm1, %v4347_v17 }
0x1dee   : > { %5507 = vmatpush.bf16.msra.mxu3 %v7643_v45  ;;  %5654 = vmatpush.bf16.msrb.mxu1 %v7644_v19 }
0x1df2   : > { %5508 = vmatpush.bf16.msra.mxu3 %v7645_v25  ;;  %5655 = vmatpush.bf16.msrb.mxu1 %v7646_v56  ;;  %v7654_v56 = vld [vmem:[%s8525_s10 + $0x30] sm:$0xff] }
0x1e70   : > { %v4360_v23 = vpop.f32.mrf.mxu3 }
0x1e71   : > { %v4361_v58 = vadd.f32 %v7647_v51, %v4360_v23 }
0x1e73   : > { %v4381_v6 = vperm.slane %v4361_v58, 0  ;;  %v4370_v22 = vrot.slane %v4361_v58, 4  ;;  %v4367_v8 = vrot.slane %v4361_v58, 1  ;;  %v4369_v39 = vrot.slane %v4361_v58, 3 }
0x1e74   : > { %v4373_v2 = vrot.slane %v4361_v58, 7  ;;  %v4368_v24 = vrot.slane %v4361_v58, 2  ;;  %v4372_v36 = vrot.slane %v4361_v58, 6  ;;  %v4371_v10 = vrot.slane %v4361_v58, 5 }
0x1e75   : > { %v4413_v14 = vmul.f32 %v7648_v4, %v4381_v6  ;;  %v4385_v30 = vperm.slane %v4370_v22, 0  ;;  %v4382_v3 = vperm.slane %v4367_v8, 0  ;;  %v4384_v29 = vperm.slane %v4369_v39, 0  ;;  %v7655_v6 = vld [vmem:[%s8525_s10 + $0x40] sm:$0xff]  ;;  %v7656_v8 = vld [vmem:[%s8525_s10 + $0x28] sm:$0xff] }
0x1e76   : > { %v4388_v32 = vperm.slane %v4373_v2, 0  ;;  %v4383_v42 = vperm.slane %v4368_v24, 0  ;;  %v4387_v38 = vperm.slane %v4372_v36, 0  ;;  %v4386_v25 = vperm.slane %v4371_v10, 0 }
0x1e77   : > { %v4429_v0 = vsel %vm1037_vm1, %v4413_v14, 0.0  ;;  %v4417_v26 = vmul.f32 %v7649_v59, %v4385_v30  ;;  %v4414_v21 = vmul.f32 %v7650_v55, %v4382_v3  ;;  %v4416_v41 = vmul.f32 %v7651_v12, %v4384_v29  ;;  %v7657_v59 = vld [vmem:[%s8525_s10 + $0x48] sm:$0xff] }
0x1e78   : > { %4430 = vadd.xlane.f32.xlu1 %v4429_v0  ;;  %v4362_v31 = vpop.f32.mrf.mxu3  ;;  %v4420_v20 = vmul.f32 %v7652_v62, %v4388_v32  ;;  %v4415_v37 = vmul.f32 %v7653_v18, %v4383_v42  ;;  %v4419_v23 = vmul.f32 %v7654_v56, %v4387_v38  ;;  %v4418_v58 = vmul.f32 %v7656_v8, %v4386_v25  ;;  %v7660_v18 = vld [vmem:[%s8525_s10 + $0x60] sm:$0xff] }
0x1e79   : > { %v4441_v40 = vsel %vm1037_vm1, %v4417_v26, 0.0  ;;  %v4432_v28 = vsel %vm1037_vm1, %v4414_v21, 0.0  ;;  %v4363_v9 = vadd.f32 %v7647_v51, %v4362_v31  ;;  %v4438_v47 = vsel %vm1037_vm1, %v4416_v41, 0.0  ;;  %v7658_v21 = vld [vmem:[%s8525_s10 + $0x50] sm:$0xff] }
0x1e7a   : > { %4442 = vadd.xlane.f32.xlu0 %v4441_v40  ;;  %4433 = vadd.xlane.f32.xlu2 %v4432_v28  ;;  %v4450_v17 = vsel %vm1037_vm1, %v4420_v20, 0.0  ;;  %v4435_v45 = vsel %vm1037_vm1, %v4415_v37, 0.0  ;;  %v4447_v4 = vsel %vm1037_vm1, %v4419_v23, 0.0  ;;  %v4444_v3 = vsel %vm1037_vm1, %v4418_v58, 0.0  ;;  %v7659_v40 = vld [vmem:[%s8525_s10 + $0x58] sm:$0xff] }
0x1e7b   : > { %v4389_v19 = vperm.slane %v4363_v9, 0  ;;  %v4374_v51 = vrot.slane %v4363_v9, 1  ;;  %v4375_v39 = vrot.slane %v4363_v9, 2  ;;  %v4376_v2 = vrot.slane %v4363_v9, 3 }
0x1e7c   : > { %v4377_v55 = vrot.slane %v4363_v9, 4  ;;  %v4378_v32 = vrot.slane %v4363_v9, 5  ;;  %v4379_v42 = vrot.slane %v4363_v9, 6  ;;  %v4380_v10 = vrot.slane %v4363_v9, 7 }
0x1e7d   : > { %v4421_v22 = vmul.f32 %v7655_v6, %v4389_v19  ;;  %v4390_v14 = vperm.slane %v4374_v51, 0  ;;  %v4391_v24 = vperm.slane %v4375_v39, 0  ;;  %v4392_v0 = vperm.slane %v4376_v2, 0  ;;  %v7663_v51 = vld [vmem:[%s8525_s10 + $0x78] sm:$0xff] }
0x1e7e   : > { %v4393_v12 = vperm.slane %v4377_v55, 0  ;;  %v4394_v62 = vperm.slane %v4378_v32, 0  ;;  %v4395_v20 = vperm.slane %v4379_v42, 0  ;;  %v4396_v25 = vperm.slane %v4380_v10, 0  ;;  %v10773_v10 = vld [vmem:[#allocation48_spill] sm:$0xff] }
0x1e7f   : > { %v4453_v30 = vsel %vm1037_vm1, %v4421_v22, 0.0  ;;  %v4422_v26 = vmul.f32 %v7657_v59, %v4390_v14  ;;  %v4423_v29 = vmul.f32 %v7658_v21, %v4391_v24  ;;  %v4424_v28 = vmul.f32 %v7659_v40, %v4392_v0 }
0x1e80   : > { %4439 = vadd.xlane.f32.xlu1 %v4438_v47  ;;  %v4425_v37 = vmul.f32 %v7660_v18, %v4393_v12  ;;  %v7661_v47 = vld [vmem:[%s8525_s10 + $0x68] sm:$0xff]  ;;  %v4428_v6 = vmul.f32 %v7663_v51, %v4396_v25  ;;  %v10772_v18 = vld [vmem:[#allocation49_spill] sm:$0xff] }
0x1e81   : > { %v4456_v31 = vsel %vm1037_vm1, %v4422_v26, 0.0  ;;  %v4459_v41 = vsel %vm1037_vm1, %v4423_v29, 0.0  ;;  %v4462_v36 = vsel %vm1037_vm1, %v4424_v28, 0.0  ;;  %v4426_v38 = vmul.f32 %v7661_v47, %v4394_v62 }
0x1e82   : > { %4451 = vadd.xlane.f32.xlu0 %v4450_v17  ;;  %4436 = vadd.xlane.f32.xlu2 %v4435_v45  ;;  %v7662_v17 = vld [vmem:[%s8525_s10 + $0x70] sm:$0xff]  ;;  %v4465_v19 = vsel %vm1037_vm1, %v4425_v37, 0.0  ;;  %v4474_v22 = vsel %vm1037_vm1, %v4428_v6, 0.0 }
0x1e83   : > { %v4427_v45 = vmul.f32 %v7662_v17, %v4395_v20  ;;  %v4468_v56 = vsel %vm1037_vm1, %v4426_v38, 0.0  ;;  %v10774_v38 = vld [vmem:[#allocation51_spill] sm:$0xff] }
0x1e85   : > { %v4471_v23 = vsel %vm1037_vm1, %v4427_v45, 0.0 }
0x1e88   : > { %4448 = vadd.xlane.f32.xlu1 %v4447_v4 }
0x1e8a   : > { %4454 = vadd.xlane.f32.xlu0 %v4453_v30  ;;  %4445 = vadd.xlane.f32.xlu2 %v4444_v3 }
0x1e90   : > { %4457 = vadd.xlane.f32.xlu1 %v4456_v31 }
0x1e92   : > { %4460 = vadd.xlane.f32.xlu0 %v4459_v41  ;;  %4463 = vadd.xlane.f32.xlu2 %v4462_v36 }
0x1e98   : > { %4466 = vadd.xlane.f32.xlu1 %v4465_v19  ;;  %v10775_v19 = vld [vmem:[#allocation50_spill] sm:$0xff] }
0x1e9a   : > { %4469 = vadd.xlane.f32.xlu0 %v4468_v56  ;;  %4472 = vadd.xlane.f32.xlu2 %v4471_v23  ;;  %v10776_v56 = vld [vmem:[#allocation52_spill] sm:$0xff] }
0x1ea0   : > { %4475 = vadd.xlane.f32.xlu1 %v4474_v22 }
0x1eeb   : > { %v4431_v9 = vpop.xlane.xlu1 %4430 }
0x1eec   : > { %v9745_v8 = vadd.f32 %v4431_v9, %v8749_v50 }
0x1eed   : > { %v4443_v58 = vpop.xlane.xlu0 %4442  ;;  %v4434_v39 = vpop.xlane.xlu2 %4433 }
0x1eee   : > { %v9748_v2 = vadd.f32 %v4443_v58, %v8743_v16  ;;  %v9751_v4 = vadd.f32 %v4434_v39, %v8741_v13  ;;  %4510 = vperm.xlu2 %7227, %v9745_v8  }
0x1ef0   : > { %4522 = vperm.xlu1 %7226, %v9748_v2   ;;  %4513 = vperm.xlu0 %7225, %v9751_v4  }
0x1ef3   : > { %v4440_v14 = vpop.xlane.xlu1 %4439 }
0x1ef4   : > { %v9757_v24 = vadd.f32 %v4440_v14, %v8761_v57 }
0x1ef5   : > { %v4452_v30 = vpop.xlane.xlu0 %4451  ;;  %v4437_v3 = vpop.xlane.xlu2 %4436 }
0x1ef6   : > { %v9760_v0 = vadd.f32 %v4437_v3, %v8745_v48  ;;  %v9801_v25 = vadd.f32 %v4452_v30, %v10775_v19 }
0x1ef8   : > { %4519 = vperm.xlu0 %7225, %v9757_v24   ;;  %4516 = vperm.xlu2 %7227, %v9760_v0  }
0x1efb   : > { %v4449_v59 = vpop.xlane.xlu1 %4448 }
0x1efc   : > { %v9765_v21 = vadd.f32 %v4449_v59, %v8753_v53 }
0x1efd   : > { %v4455_v26 = vpop.xlane.xlu0 %4454  ;;  %v4446_v55 = vpop.xlane.xlu2 %4445 }
0x1efe   : > { %v9768_v29 = vadd.f32 %v4455_v26, %v8737_v5  ;;  %v9771_v40 = vadd.f32 %v4446_v55, %v8767_v60 }
0x1f00   : > { %4534 = vperm.xlu1 %7226, %v9768_v29   ;;  %4528 = vperm.xlu0 %7225, %v9765_v21  }
0x1f01   : > { %4525 = vperm.xlu2 %7227, %v9771_v40  }
0x1f03   : > { %v4458_v28 = vpop.xlane.xlu1 %4457 }
0x1f04   : > { %v9777_v31 = vadd.f32 %v4458_v28, %v8755_v54 }
0x1f05   : > { %v4461_v32 = vpop.xlane.xlu0 %4460  ;;  %v4464_v42 = vpop.xlane.xlu2 %4463 }
0x1f06   : > { %v9780_v12 = vadd.f32 %v4461_v32, %v8751_v52  ;;  %v9783_v41 = vadd.f32 %v4464_v42, %v8739_v44 }
0x1f08   : > { %4540 = vperm.xlu1 %7226, %v9780_v12   ;;  %4537 = vperm.xlu0 %7225, %v9777_v31  }
0x1f09   : > { %4543 = vperm.xlu2 %7227, %v9783_v41  }
0x1f0b   : > { %v4467_v36 = vpop.xlane.xlu1 %4466 }
0x1f0c   : > { %v9789_v37 = vadd.f32 %v4467_v36, %v10772_v18 }
0x1f0d   : > { %v4470_v62 = vpop.xlane.xlu0 %4469  ;;  %v4473_v20 = vpop.xlane.xlu2 %4472 }
0x1f0e   : > { %v9792_v47 = vadd.f32 %v4470_v62, %v10773_v10  ;;  %v9795_v17 = vadd.f32 %v4473_v20, %v10774_v38 }
0x1f10   : > { %4549 = vperm.xlu1 %7226, %v9792_v47   ;;  %4546 = vperm.xlu0 %7225, %v9789_v37  }
0x1f11   : > { %4552 = vperm.xlu2 %7227, %v9795_v17  }
0x1f13   : > { %v4476_v45 = vpop.xlane.xlu1 %4475 }
0x1f14   : > { %v9804_v23 = vadd.f32 %v4476_v45, %v10776_v56 }
0x1f18   : > { %4531 = vperm.xlu1 %7226, %v9801_v25   ;;  %4555 = vperm.xlu0 %7225, %v9804_v23  }
0x1f48   : > { %v4511_v51 = vpop.permute.xlu2 %4510 }
0x1f49   : > { %v4557_v36 = vperm.slane %v4511_v51, %v10767_v61 }
0x1f52   : > { %v4517_v22 = vpop.permute.xlu2 %4516 }
0x1f53   : > { %v4559_v19 = vperm.slane %v4517_v22, %v10767_v61 }
0x1f5b   : > { %v4526_v3 = vpop.permute.xlu2 %4525 }
0x1f62   : > { %v4514_v6 = vpop.permute.xlu0 %4513  ;;  %v4523_v9 = vpop.permute.xlu1 %4522 }
0x1f63   : > { %v4558_v55 = vperm.slane %v4514_v6, %v10767_v61  ;;  %v4544_v28 = vpop.permute.xlu2 %4543 }
0x1f64   : > { %v4568_v6 = vperm.slane %v4544_v28, %v10767_v61  ;;  %v4562_v28 = vperm.slane %v4526_v3, %v10767_v61 }
0x1f65   : > { %v4573_v20 = vsel %vm1948_vm11, %v4558_v55, %v4557_v36 }
0x1f6a   : > { %v4520_v58 = vpop.permute.xlu0 %4519 }
0x1f6b   : > { %v4560_v45 = vperm.slane %v4520_v58, %v10767_v61  ;;  %v4561_v58 = vperm.slane %v4523_v9, %v10767_v61 }
0x1f72   : > { %v4535_v39 = vpop.permute.xlu1 %4534  ;;  %v4529_v14 = vpop.permute.xlu0 %4528 }
0x1f73   : > { %v4565_v32 = vperm.slane %v4535_v39, %v10767_v61  ;;  %v4563_v36 = vperm.slane %v4529_v14, %v10767_v61 }
0x1f7a   : > { %v4541_v59 = vpop.permute.xlu1 %4540  ;;  %v4538_v26 = vpop.permute.xlu0 %4537 }
0x1f7b   : > { %v4566_v30 = vperm.slane %v4538_v26, %v10767_v61  ;;  %v4567_v42 = vperm.slane %v4541_v59, %v10767_v61  ;;  %v4574_v59 = vsel %vm1950_vm12, %v4559_v19, %v4573_v20 }
0x1f7c   : > { %v4575_v51 = vsel %vm1952_vm13, %v4560_v45, %v4574_v59 }
0x1f7d   : > { %v4580_v62 = vsel %vm1948_vm11, %v4566_v30, %v4565_v32  ;;  %v4553_v32 = vpop.permute.xlu2 %4552 }
0x1f7e   : > { %v4581_v56 = vsel %vm1950_vm12, %v4567_v42, %v4580_v62  ;;  %v4576_v42 = vsel %vm1954_vm14, %v4561_v58, %v4575_v51  ;;  %v4571_v19 = vperm.slane %v4553_v32, %v10767_v61 }
0x1f7f   : > { %v4582_v55 = vsel %vm1952_vm13, %v4568_v6, %v4581_v56  ;;  %v4577_v9 = vsel %vm1956_vm15, %v4562_v28, %v4576_v42 }
0x1f82   : > { %v4550_v26 = vpop.permute.xlu1 %4549  ;;  %v4547_v10 = vpop.permute.xlu0 %4546 }
0x1f83   : > { %v4569_v39 = vperm.slane %v4547_v10, %v10767_v61  ;;  %v4570_v30 = vperm.slane %v4550_v26, %v10767_v61  ;;  %v4578_v26 = vsel %vm1958_vm0, %v4563_v36, %v4577_v9 }
0x1f85   : > { %v4583_v22 = vsel %vm1954_vm14, %v4569_v39, %v4582_v55 }
0x1f86   : > { %v4584_v10 = vsel %vm1956_vm15, %v4570_v30, %v4583_v22 }
0x1f87   : > { %v4585_v6 = vsel %vm1958_vm0, %v4571_v19, %v4584_v10 }
0x1f8a   : > { %v4532_v62 = vpop.permute.xlu1 %4531  ;;  %v4556_v20 = vpop.permute.xlu0 %4555 }
0x1f8b   : > { %v4564_v45 = vperm.slane %v4532_v62, %v10767_v61  ;;  %v4572_v56 = vperm.slane %v4556_v20, %v10767_v61 }
0x1f8d   : > { %v4579_v14 = vsel %vm1960_vm2, %v4564_v45, %v4578_v26  ;;  %v4586_v3 = vsel %vm1960_vm2, %v4572_v56, %v4585_v6 }
0x1f8e   : > { %v4589_v39 = vsel %vm10777_vm8, %v4579_v14, -inf  ;;  %v4592_v59 = vsel %vm10778_vm9, %v4586_v3, -inf }
0x1f8f   : > { %4590 = vmax.xlane.f32.xlu2 %v4589_v39  ;;  %4593 = vmax.xlane.f32.xlu1 %v4592_v59 }
0x2002   : > { %v9840_v51 = vpop.xlane.xlu2 %4590  ;;  %v9843_v55 = vpop.xlane.xlu1 %4593 }
0x2003   : > { %v4597_v30 = vperm.slane %v9840_v51, 0  ;;  %v4600_v58 = vperm.slane %v9840_v51, 3  ;;  %v4602_v22 = vperm.slane %v9840_v51, 5  ;;  %v4598_v32 = vperm.slane %v9840_v51, 1 }
0x2004   : > { %v4603_v36 = vperm.slane %v9840_v51, 6  ;;  %v4607_v19 = vperm.slane %v9843_v55, 2  ;;  %v4611_v3 = vperm.slane %v9843_v55, 6 }
0x2005   : > { %v4629_v42 = vsub.f32 %v9745_v8, %v4597_v30  ;;  %v4632_v28 = vsub.f32 %v9757_v24, %v4600_v58  ;;  %v4634_v10 = vsub.f32 %v9771_v40, %v4602_v22  ;;  %v4630_v45 = vsub.f32 %v9751_v4, %v4598_v32 }
0x2006   : > { %v4635_v9 = vsub.f32 %v9765_v21, %v4603_v36  ;;  %v4639_v26 = vsub.f32 %v9780_v12, %v4607_v19  ;;  %v4599_v8 = vperm.slane %v9840_v51, 2  ;;  %v4612_v24 = vperm.slane %v9843_v55, 7 }
0x2007   : > { %v4645_v62 = vmul.f32 1.442695, %v4629_v42  ;;  %v4651_v20 = vmul.f32 1.442695, %v4632_v28  ;;  %v4655_v56 = vmul.f32 1.442695, %v4634_v10  ;;  %v4643_v30 = vsub.f32 %v9795_v17, %v4611_v3 }
0x2008   : > { %v4647_v6 = vmul.f32 1.442695, %v4630_v45  ;;  %v4657_v40 = vmul.f32 1.442695, %v4635_v9  ;;  %v4665_v39 = vmul.f32 1.442695, %v4639_v26  ;;  %v4631_v12 = vsub.f32 %v9760_v0, %v4599_v8 }
0x2009   : > { %7449 = vpow2.f32 %v4645_v62  ;;  %v4644_v59 = vsub.f32 %v9804_v23, %v4612_v24  ;;  %v4601_v58 = vperm.slane %v9840_v51, 4  ;;  %v4673_v36 = vmul.f32 1.442695, %v4643_v30 }
0x200a   : > { %7451 = vpow2.f32 %v4651_v20  ;;  %v4649_v22 = vmul.f32 1.442695, %v4631_v12  ;;  %v4605_v17 = vperm.slane %v9843_v55, 0  ;;  %v4606_v45 = vperm.slane %v9843_v55, 1 }
0x200b   : > { %7453 = vpow2.f32 %v4655_v56  ;;  %v4675_v32 = vmul.f32 1.442695, %v4644_v59  ;;  %v4633_v23 = vsub.f32 %v9748_v2, %v4601_v58  ;;  %v4608_v8 = vperm.slane %v9843_v55, 3 }
0x200c   : > { %7455 = vpow2.f32 %v4647_v6  ;;  %v4637_v2 = vsub.f32 %v9768_v29, %v4605_v17  ;;  %v4638_v26 = vsub.f32 %v9777_v31, %v4606_v45  ;;  %v4610_v12 = vperm.slane %v9843_v55, 5 }
0x200d   : > { %7457 = vpow2.f32 %v4657_v40  ;;  %v4653_v10 = vmul.f32 1.442695, %v4633_v23  ;;  %v4640_v29 = vsub.f32 %v9783_v41, %v4608_v8  ;;  %v4609_v40 = vperm.slane %v9843_v55, 4 }
0x200e   : > { %7459 = vpow2.f32 %v4665_v39  ;;  %v4661_v56 = vmul.f32 1.442695, %v4637_v2  ;;  %v4663_v6 = vmul.f32 1.442695, %v4638_v26  ;;  %v4642_v41 = vsub.f32 %v9792_v47, %v4610_v12 }
0x200f   : > { %v9858_v14 = vpop.eup %7449  ;;  %7461 = vpow2.f32 %v4649_v22  ;;  %v4667_v3 = vmul.f32 1.442695, %v4640_v29  ;;  %v4641_v31 = vsub.f32 %v9789_v37, %v4609_v40  ;;  %v4604_v22 = vperm.slane %v9840_v51, 7 }
0x2010   : > { %v9861_v4 = vpop.eup %7451  ;;  %4694 = vperm.xlu0 %7225, %v9858_v14   ;;  %7463 = vpow2.f32 %v4675_v32  ;;  %v4671_v58 = vmul.f32 1.442695, %v4642_v41 }
0x2011   : > { %v9864_v21 = vpop.eup %7453  ;;  %4703 = vperm.xlu1 %7226, %v9861_v4   ;;  %7465 = vpow2.f32 %v4673_v36  ;;  %v4669_v59 = vmul.f32 1.442695, %v4641_v31  ;;  %v4636_v37 = vsub.f32 %v9801_v25, %v4604_v22 }
0x2012   : > { %4709 = vperm.xlu2 %7227, %v9864_v21   ;;  %v9872_v42 = vpop.eup %7455  ;;  %7467 = vpow2.f32 %v4653_v10 }
0x2013   : > { %v9874_v28 = vpop.eup %7457  ;;  %7469 = vpow2.f32 %v4661_v56  ;;  %v4659_v36 = vmul.f32 1.442695, %v4636_v37 }
0x2014   : > { %v9877_v0 = vpop.eup %7459  ;;  %7471 = vpow2.f32 %v4663_v6 }
0x2015   : > { %v9883_v19 = vpop.eup %7461  ;;  %7473 = vpow2.f32 %v4667_v3 }
0x2016   : > { %v9885_v62 = vpop.eup %7463  ;;  %7475 = vpow2.f32 %v4669_v59 }
0x2017   : > { %v9888_v20 = vpop.eup %7465  ;;  %7477 = vpow2.f32 %v4671_v58 }
0x2018   : > { %4697 = vperm.xlu0 %7225, %v9872_v42   ;;  %v9894_v9 = vpop.eup %7467  ;;  %7479 = vpow2.f32 %v4659_v36 }
0x2019   : > { %4712 = vperm.xlu1 %7226, %v9874_v28   ;;  %v9899_v24 = vpop.eup %7469 }
0x201a   : > { %4724 = vperm.xlu2 %7227, %v9877_v0   ;;  %v9904_v39 = vpop.eup %7471 }
0x201b   : > { %v9909_v30 = vpop.eup %7473 }
0x201c   : > { %v9914_v32 = vpop.eup %7475 }
0x201d   : > { %v9918_v55 = vpop.eup %7477 }
0x201e   : > { %v9921_v23 = vpop.eup %7479 }
0x2020   : > { %4700 = vperm.xlu0 %7225, %v9883_v19  }
0x2021   : > { %4739 = vperm.xlu1 %7226, %v9885_v62  }
0x2022   : > { %4736 = vperm.xlu2 %7227, %v9888_v20  }
0x2028   : > { %4706 = vperm.xlu0 %7225, %v9894_v9  }
0x2030   : > { %4718 = vperm.xlu0 %7225, %v9899_v24  }
0x2038   : > { %4721 = vperm.xlu0 %7225, %v9904_v39  }
0x2040   : > { %4727 = vperm.xlu0 %7225, %v9909_v30  }
0x2048   : > { %4730 = vperm.xlu0 %7225, %v9914_v32  }
0x2050   : > { %4733 = vperm.xlu0 %7225, %v9918_v55  }
0x2058   : > { %4715 = vperm.xlu0 %7225, %v9921_v23  }
0x206c   : > { %v4710_v56 = vpop.permute.xlu2 %4709 }
0x2074   : > { %v4725_v8 = vpop.permute.xlu2 %4724 }
0x2075   : > { %v4751_v22 = vperm.slane %v4725_v8, %v10767_v61 }
0x207c   : > { %v4737_v36 = vpop.permute.xlu2 %4736 }
0x207d   : > { %v4755_v8 = vperm.slane %v4737_v36, %v10767_v61 }
0x2082   : > { %v4695_v47 = vpop.permute.xlu0 %4694 }
0x2083   : > { %v4704_v26 = vpop.permute.xlu1 %4703  ;;  %v4741_v59 = vperm.slane %v4695_v47, %v10767_v61 }
0x2084   : > { %v4744_v47 = vperm.slane %v4704_v26, %v10767_v61  ;;  %v4746_v26 = vperm.slane %v4710_v56, %v10767_v61 }
0x208a   : > { %v4698_v17 = vpop.permute.xlu0 %4697 }
0x208b   : > { %v4713_v6 = vpop.permute.xlu1 %4712  ;;  %v4742_v3 = vperm.slane %v4698_v17, %v10767_v61 }
0x208d   : > { %v4757_v38 = vsel %vm1948_vm11, %v4742_v3, %v4741_v59 }
0x2092   : > { %v4701_v51 = vpop.permute.xlu0 %4700 }
0x2093   : > { %v4743_v12 = vperm.slane %v4701_v51, %v10767_v61 }
0x2095   : > { %v4758_v17 = vsel %vm1950_vm12, %v4743_v12, %v4757_v38 }
0x209a   : > { %v4707_v10 = vpop.permute.xlu0 %4706 }
0x20a2   : > { %v4719_v2 = vpop.permute.xlu0 %4718 }
0x20a3   : > { %v4749_v31 = vperm.slane %v4719_v2, %v10767_v61  ;;  %v4745_v2 = vperm.slane %v4707_v10, %v10767_v61 }
0x20aa   : > { %v4722_v45 = vpop.permute.xlu0 %4721 }
0x20ab   : > { %v4750_v40 = vperm.slane %v4722_v45, %v10767_v61  ;;  %v4740_v45 = vpop.permute.xlu1 %4739 }
0x20ac   : > { %v4756_v3 = vperm.slane %v4740_v45, %v10767_v61 }
0x20ad   : > { %v4764_v41 = vsel %vm1948_vm11, %v4750_v40, %v4749_v31  ;;  %v4759_v31 = vsel %vm1952_vm13, %v4744_v47, %v4758_v17 }
0x20ae   : > { %v4765_v51 = vsel %vm1950_vm12, %v4751_v22, %v4764_v41  ;;  %v4760_v10 = vsel %vm1954_vm14, %v4745_v2, %v4759_v31 }
0x20af   : > { %v4761_v41 = vsel %vm1956_vm15, %v4746_v26, %v4760_v10 }
0x20b2   : > { %v4728_v25 = vpop.permute.xlu0 %4727 }
0x20b3   : > { %v4752_v58 = vperm.slane %v4728_v25, %v10767_v61 }
0x20b5   : > { %v4766_v40 = vsel %vm1952_vm13, %v4752_v58, %v4765_v51  ;;  %v4747_v58 = vperm.slane %v4713_v6, %v10767_v61 }
0x20b7   : > { %v4762_v36 = vsel %vm1958_vm0, %v4747_v58, %v4761_v41 }
0x20ba   : > { %v4731_v29 = vpop.permute.xlu0 %4730 }
0x20bb   : > { %v4753_v37 = vperm.slane %v4731_v29, %v10767_v61 }
0x20bd   : > { %v4767_v29 = vsel %vm1954_vm14, %v4753_v37, %v4766_v40 }
0x20c2   : > { %v4734_v18 = vpop.permute.xlu0 %4733 }
0x20c3   : > { %v4754_v25 = vperm.slane %v4734_v18, %v10767_v61 }
0x20c5   : > { %v4768_v38 = vsel %vm1956_vm15, %v4754_v25, %v4767_v29 }
0x20c6   : > { %v4769_v12 = vsel %vm1958_vm0, %v4755_v8, %v4768_v38 }
0x20c7   : > { %v4770_v59 = vsel %vm1960_vm2, %v4756_v3, %v4769_v12 }
0x20c8   : > { %v4776_v18 = vsel %vm10779_vm10, %v4770_v59, 0.0 }
0x20c9   : > { %4777 = vadd.xlane.f32.xlu0 %v4776_v18 }
0x20ca   : > { %v4716_v22 = vpop.permute.xlu0 %4715 }
0x20cb   : > { %v4748_v37 = vperm.slane %v4716_v22, %v10767_v61 }
0x20cd   : > { %v4763_v45 = vsel %vm1960_vm2, %v4748_v37, %v4762_v36 }
0x20ce   : > { %v4773_v17 = vsel %vm10780_vm4, %v4763_v45, 0.0 }
0x20cf   : > { %4774 = vadd.xlane.f32.xlu2 %v4773_v17 }
0x213c   : > { %v4778_v56 = vpop.xlane.xlu0 %4777 }
0x213d   : > { %7481 = vrcp.f32 %v4778_v56 }
0x2142   : > { %v4775_v2 = vpop.xlane.xlu2 %4774 }
0x2143   : > { %v7482_v51 = vpop.eup %7481  ;;  %7483 = vrcp.f32 %v4775_v2 }
0x2144   : > { %v4794_v47 = vperm.slane %v7482_v51, 3  ;;  %v4796_v29 = vperm.slane %v7482_v51, 5  ;;  %v4793_v12 = vperm.slane %v7482_v51, 2  ;;  %v4797_v41 = vperm.slane %v7482_v51, 6 }
0x2145   : > { %v4791_v22 = vperm.slane %v7482_v51, 0 }
0x2146   : > { %v4826_v40 = vmul.f32 %v9909_v30, %v4794_v47  ;;  %v4828_v38 = vmul.f32 %v9918_v55, %v4796_v29  ;;  %v4825_v30 = vmul.f32 %v9877_v0, %v4793_v12  ;;  %v4829_v58 = vmul.f32 %v9888_v20, %v4797_v41  ;;  %v7664_v47 = vld [vmem:[%s8531_s2 + $0x8] sm:$0xff]  ;;  %v7666_v29 = vld [vmem:[%s8531_s2] sm:$0xff] }
0x2148   : > { %4888 = vperm.xlu0 %7225, %v4826_v40  }
0x2149   : > { %v7484_v6 = vpop.eup %7483 }
0x214a   : > { %v4788_v25 = vperm.slane %v7484_v6, 5  ;;  %v4783_v8 = vperm.slane %v7484_v6, 0  ;;  %v4784_v10 = vperm.slane %v7484_v6, 1  ;;  %v4790_v26 = vperm.slane %v7484_v6, 7 }
0x214b   : > { %v4786_v55 = vperm.slane %v7484_v6, 3  ;;  %v4787_v0 = vperm.slane %v7484_v6, 4 }
0x214c   : > { %v4820_v3 = vmul.f32 %v9864_v21, %v4788_v25  ;;  %v4815_v31 = vmul.f32 %v9858_v14, %v4783_v8  ;;  %v4816_v59 = vmul.f32 %v9872_v42, %v4784_v10  ;;  %v4822_v18 = vmul.f32 %v9921_v23, %v4790_v26  ;;  %v7665_v25 = vld [vmem:[%s8531_s2 + $0x10] sm:$0xff] }
0x214d   : > { %v4785_v21 = vperm.slane %v7484_v6, 2  ;;  %v4818_v42 = vmul.f32 %v9861_v4, %v4786_v55  ;;  %v4819_v23 = vmul.f32 %v9894_v9, %v4787_v0  ;;  %v4792_v4 = vperm.slane %v7482_v51, 1  ;;  %v7669_v55 = vld [vmem:[%s8531_s2 + $0x38] sm:$0xff] }
0x214e   : > { %4858 = vperm.xlu2 %7227, %v4820_v3   ;;  %4833 = vperm.xlu1 %7226, %v4815_v31   ;;  %v4798_v9 = vperm.slane %v7482_v51, 7 }
0x214f   : > { %v4817_v14 = vmul.f32 %v9883_v19, %v4785_v21  ;;  %v4789_v19 = vperm.slane %v7484_v6, 6  ;;  %v4824_v37 = vmul.f32 %v9904_v39, %v4792_v4 }
0x2150   : > { %4898 = vperm.xlu0 %7225, %v4828_v38   ;;  %v4830_v45 = vmul.f32 %v9885_v62, %v4798_v9  ;;  %v7670_v9 = vld [vmem:[%s8531_s2 + $0x20] sm:$0xff] }
0x2151   : > { %v4821_v20 = vmul.f32 %v9874_v28, %v4789_v19 }
0x2156   : > { %4838 = vperm.xlu1 %7226, %v4816_v59   ;;  %4883 = vperm.xlu2 %7227, %v4825_v30   ;;  %v7667_v59 = vld [vmem:[%s8531_s2 + $0x18] sm:$0xff] }
0x2158   : > { %4868 = vperm.xlu0 %7225, %v4822_v18   ;;  %v7668_v18 = vld [vmem:[%s8531_s2 + $0x28] sm:$0xff] }
0x215e   : > { %4843 = vperm.xlu1 %7226, %v4817_v14   ;;  %4903 = vperm.xlu2 %7227, %v4829_v58  }
0x2160   : > { %4034 = vrot.lane.b32.xlu0 %v9634_v46, %s8156_s29  ;;  %v4823_v46 = vmul.f32 %v9899_v24, %v4791_v22 }
0x2166   : > { %4848 = vperm.xlu1 %7226, %v4818_v42   ;;  %4032 = vrot.lane.b32.xlu2 %v9632_v11, %s8156_s29  ;;  %v4795_v11 = vperm.slane %v7482_v51, 4 }
0x2168   : > { %v4827_v36 = vmul.f32 %v9914_v32, %v4795_v11 }
0x216e   : > { %4853 = vperm.xlu1 %7226, %v4819_v23   ;;  %4044 = vrot.lane.b32.xlu2 %v9616_v1, %s8158_s30 }
0x2176   : > { %4863 = vperm.xlu1 %7226, %v4821_v20  }
0x217e   : > { %4873 = vperm.xlu1 %7226, %v4823_v46  }
0x2186   : > { %4878 = vperm.xlu1 %7226, %v4824_v37  }
0x218e   : > { %4893 = vperm.xlu1 %7226, %v4827_v36  }
0x2196   : > { %4908 = vperm.xlu1 %7226, %v4830_v45  }
0x219e   : > { %4042 = vrot.lane.b32.xlu1 %v9608_v43, %s8158_s30 }
0x21a8   : > { %v4859_v1 = vpop.permute.xlu2 %4858 }
0x21a9   : > { %v4916_v21 = vmul.f32 %v7668_v18, %v4859_v1  ;;  %v7671_v1 = vld [vmem:[%s8531_s2 + $0x50] sm:$0xff] }
0x21aa   : > { %v7673_v18 = vld [vmem:[%s8531_s2 + $0x30] sm:$0xff] }
0x21ab   : > { %v4962_v19 = vsel %vm1037_vm1, %v4916_v21, 0.0 }
0x21ac   : > { %v4963_v11 = vrot.slane %v4962_v19, 4 }
0x21b0   : > { %v4884_v28 = vpop.permute.xlu2 %4883 }
0x21b8   : > { %v9980_v24 = vpop.permute.xlu2 %4903 }
0x21ba   : > { %v4889_v17 = vpop.permute.xlu0 %4888 }
0x21c0   : > { %v4834_v39 = vpop.permute.xlu1 %4833  ;;  %v4033_v56 = vpop.permute.xlu2 %4032 }
0x21c1   : > { %4038 = vst.msk [vmem:[#allocation2] sm:$0xff] %vm1037_vm1, %v4033_v56  ;;  %v4911_v3 = vmul.f32 %v7666_v29, %v4834_v39  ;;  %v4921_v39 = vmul.f32 %v7671_v1, %v4884_v28 }
0x21c2   : > { %v9983_v32 = vpop.permute.xlu0 %4898 }
0x21c3   : > { %v4927_v10 = vsel %vm1037_vm1, %v4911_v3, 0.0 }
0x21c4   : > { %v4928_v14 = vrot.slane %v4927_v10, 4 }
0x21c6   : > { %v4929_v22 = vadd.f32 %v4928_v14, %v4927_v10 }
0x21c8   : > { %v4839_v2 = vpop.permute.xlu1 %4838  ;;  %v4045_v62 = vpop.permute.xlu2 %4044 }
0x21c9   : > { %4049 = vst.msk [vmem:[#allocation3 + $0x8] sm:$0xff] %vm1037_vm1, %v4045_v62  ;;  %v4912_v40 = vmul.f32 %v7664_v47, %v4839_v2  ;;  %v4930_v2 = vrot.slane %v4929_v22, 2 }
0x21ca   : > { %v4869_v51 = vpop.permute.xlu0 %4868 }
0x21cb   : > { %v4934_v31 = vsel %vm1037_vm1, %v4912_v40, 0.0  ;;  %v4918_v42 = vmul.f32 %v7669_v55, %v4869_v51  ;;  %v4964_v40 = vadd.f32 %v4963_v11, %v4962_v19  ;;  %v7674_v19 = vld [vmem:[%s8531_s2 + $0x70] sm:$0xff] }
0x21cc   : > { %v4935_v26 = vrot.slane %v4934_v31, 4 }
0x21cd   : > { %v4976_v4 = vsel %vm1037_vm1, %v4918_v42, 0.0 }
0x21ce   : > { %v4936_v23 = vadd.f32 %v4935_v26, %v4934_v31  ;;  %v4977_v62 = vrot.slane %v4976_v4, 4  ;;  %v4997_v31 = vsel %vm1037_vm1, %v4921_v39, 0.0 }
0x21d0   : > { %v4844_v43 = vpop.permute.xlu1 %4843  ;;  %v4937_v36 = vrot.slane %v4936_v23, 2  ;;  %v4978_v10 = vadd.f32 %v4977_v62, %v4976_v4  ;;  %v7675_v62 = vld [vmem:[%s8531_s2 + $0x68] sm:$0xff] }
0x21d1   : > { %v4913_v8 = vmul.f32 %v7665_v25, %v4844_v43  ;;  %v7672_v25 = vld [vmem:[%s8531_s2 + $0x58] sm:$0xff] }
0x21d2   : > { %v4035_v6 = vpop.permute.xlu0 %4034  ;;  %v4979_v42 = vrot.slane %v4978_v10, 2 }
0x21d3   : > { %4039 = vst.msk [vmem:[#allocation2 + $0x8] sm:$0xff] %vm1037_vm1, %v4035_v6  ;;  %v4941_v38 = vsel %vm1037_vm1, %v4913_v8, 0.0  ;;  %v4938_v6 = vadd.f32 %v4937_v36, %v4936_v23  ;;  %v4922_v8 = vmul.f32 %v7672_v25, %v4889_v17 }
0x21d4   : > { %v4942_v41 = vrot.slane %v4941_v38, 4  ;;  %v4980_v39 = vadd.f32 %v4979_v42, %v4978_v10 }
0x21d5   : > { %v5004_v14 = vsel %vm1037_vm1, %v4922_v8, 0.0  ;;  %v7676_v8 = vld [vmem:[%s8531_s2 + $0x40] sm:$0xff] }
0x21d6   : > { %v4943_v20 = vadd.f32 %v4942_v41, %v4941_v38  ;;  %v4931_v38 = vadd.f32 %v4930_v2, %v4929_v22  ;;  %v4998_v41 = vrot.slane %v4997_v31, 4 }
0x21d8   : > { %v4849_v12 = vpop.permute.xlu1 %4848  ;;  %v4944_v56 = vrot.slane %v4943_v20, 2  ;;  %v4932_v17 = vrot.slane %v4931_v38, 1  ;;  %v4999_v36 = vadd.f32 %v4998_v41, %v4997_v31 }
0x21d9   : > { %v4914_v30 = vmul.f32 %v7667_v59, %v4849_v12  ;;  %v4965_v59 = vrot.slane %v4964_v40, 2 }
0x21da   : > { %v4945_v29 = vadd.f32 %v4944_v56, %v4943_v20  ;;  %v4925_v20 = vmul.f32 %v7674_v19, %v9980_v24  ;;  %v10013_v1 = vadd.f32 %v4932_v17, %v4931_v38  ;;  %v4924_v24 = vmul.f32 %v7675_v62, %v9983_v32 }
0x21db   : > { %v4948_v58 = vsel %vm1037_vm1, %v4914_v30, 0.0  ;;  %v4939_v30 = vrot.slane %v4938_v6, 1  ;;  %v4966_v4 = vadd.f32 %v4965_v59, %v4964_v40 }
0x21dc   : > { %v4949_v0 = vrot.slane %v4948_v58, 4  ;;  %v5025_v2 = vsel %vm1037_vm1, %v4925_v20, 0.0 }
0x21dd   : > { %v10009_v11 = vadd.f32 %v4939_v30, %v4938_v6  ;;  %v4967_v40 = vrot.slane %v4966_v4, 1  ;;  %v5026_v10 = vrot.slane %v5025_v2, 4 }
0x21de   : > { %v4950_v46 = vadd.f32 %v4949_v0, %v4948_v58  ;;  %v4946_v58 = vrot.slane %v4945_v29, 1 }
0x21df   : > { %v5055_v25 = vsel %vm1948_vm11, %v10009_v11, %v10013_v1 }
0x21e0   : > { %v4854_v37 = vpop.permute.xlu1 %4853  ;;  %v4951_v51 = vrot.slane %v4950_v46, 2 }
0x21e1   : > { %v4915_v45 = vmul.f32 %v7670_v9, %v4854_v37  ;;  %v5005_v37 = vrot.slane %v5004_v14, 4  ;;  %v10011_v9 = vadd.f32 %v4946_v58, %v4945_v29 }
0x21e2   : > { %v4952_v28 = vadd.f32 %v4951_v51, %v4950_v46 }
0x21e3   : > { %v4955_v43 = vsel %vm1037_vm1, %v4915_v45, 0.0  ;;  %v5006_v6 = vadd.f32 %v5005_v37, %v5004_v14  ;;  %v5056_v31 = vsel %vm1950_vm12, %v10011_v9, %v5055_v25  ;;  %v7677_v37 = vld [vmem:[%s8531_s2 + $0x48] sm:$0xff] }
0x21e4   : > { %v4956_v47 = vrot.slane %v4955_v43, 4  ;;  %v4953_v0 = vrot.slane %v4952_v28, 1 }
0x21e5   : > { %v5007_v41 = vrot.slane %v5006_v6, 2 }
0x21e6   : > { %v4957_v3 = vadd.f32 %v4956_v47, %v4955_v43  ;;  %v10015_v56 = vadd.f32 %v4953_v0, %v4952_v28  ;;  %v4981_v28 = vrot.slane %v4980_v39, 1 }
0x21e8   : > { %v4958_v12 = vrot.slane %v4957_v3, 2  ;;  %v4864_v26 = vpop.permute.xlu1 %4863  ;;  %v5057_v32 = vsel %vm1952_vm13, %v10015_v56, %v5056_v31  ;;  %v10038_v42 = vadd.f32 %v4981_v28, %v4980_v39  ;;  %v7678_v28 = vld [vmem:[%s8531_s2 + $0x60] sm:$0xff] }
0x21e9   : > { %v4917_v21 = vmul.f32 %v7673_v18, %v4864_v26  ;;  %v5018_v26 = vsel %vm1037_vm1, %v4924_v24, 0.0 }
0x21ea   : > { %v4959_v55 = vadd.f32 %v4958_v12, %v4957_v3  ;;  %v5000_v3 = vrot.slane %v4999_v36, 2  ;;  %v5019_v17 = vrot.slane %v5018_v26, 4 }
0x21eb   : > { %v4969_v23 = vsel %vm1037_vm1, %v4917_v21, 0.0  ;;  %v10034_v21 = vadd.f32 %v4967_v40, %v4966_v4 }
0x21ec   : > { %v4960_v22 = vrot.slane %v4959_v55, 1  ;;  %v4970_v46 = vrot.slane %v4969_v23, 4  ;;  %v5020_v62 = vadd.f32 %v5019_v17, %v5018_v26 }
0x21ee   : > { %v4971_v45 = vadd.f32 %v4970_v46, %v4969_v23  ;;  %v10020_v51 = vadd.f32 %v4960_v22, %v4959_v55  ;;  %v5001_v55 = vadd.f32 %v5000_v3, %v4999_v36  ;;  %v5027_v23 = vadd.f32 %v5026_v10, %v5025_v2 }
0x21ef   : > { %v5008_v46 = vadd.f32 %v5007_v41, %v5006_v6 }
0x21f0   : > { %v4972_v43 = vrot.slane %v4971_v45, 2  ;;  %v4874_v47 = vpop.permute.xlu1 %4873  ;;  %v5058_v59 = vsel %vm1954_vm14, %v10020_v51, %v5057_v32  ;;  %v5002_v39 = vrot.slane %v5001_v55, 1  ;;  %v5028_v24 = vrot.slane %v5027_v23, 2 }
0x21f1   : > { %v4919_v29 = vmul.f32 %v7676_v8, %v4874_v47  ;;  %v5059_v0 = vsel %vm1956_vm15, %v10034_v21, %v5058_v59  ;;  %v5009_v47 = vrot.slane %v5008_v46, 1  ;;  %v5021_v8 = vrot.slane %v5020_v62, 2  ;;  %v7679_v59 = vld [vmem:[#allocation20 + $0x8] sm:$0xff] }
0x21f2   : > { %v4973_v38 = vadd.f32 %v4972_v43, %v4971_v45  ;;  %v5003_v6 = vadd.f32 %v5002_v39, %v5001_v55  ;;  %v5029_v3 = vadd.f32 %v5028_v24, %v5027_v23  ;;  %v5074_v24 = vpack.c.bf16 %v10009_v11, %v10009_v11 }
0x21f3   : > { %v4983_v12 = vsel %vm1037_vm1, %v4919_v29, 0.0  ;;  %v6980_v29 = vld [vmem:[%s8517_s6 + $0x18] sm:$0xff]  ;;  %v5010_v10 = vadd.f32 %v5009_v47, %v5008_v46  ;;  %v5076_v11 = vpack.c.bf16 %v10015_v56, %v10015_v56 }
0x21f4   : > { %v4974_v30 = vrot.slane %v4973_v38, 1  ;;  %v4984_v18 = vrot.slane %v4983_v12, 4  ;;  %6930 = vmatmul.msk.bf16.vlgmr.msrb.gmra.mxu3 %vm1037_vm1, %v6980_v29  ;;  %v7681_v47 = vld [vmem:[%s8531_s2 + $0x78] sm:$0xff] }
0x21f5   : > { %6456 = vmatpush.bf16.msrb.mxu3 %v7679_v59 }
0x21f6   : > { %v10036_v14 = vadd.f32 %v4974_v30, %v4973_v38  ;;  %v4985_v58 = vadd.f32 %v4984_v18, %v4983_v12  ;;  %v5083_v30 = vpack.c.bf16 %v5003_v6, %v5003_v6  ;;  %v5022_v18 = vadd.f32 %v5021_v8, %v5020_v62 }
0x21f8   : > { %v5060_v19 = vsel %vm1958_vm0, %v10036_v14, %v5059_v0  ;;  %v4986_v20 = vrot.slane %v4985_v58, 2  ;;  %v4879_v22 = vpop.permute.xlu1 %4878  ;;  %v5084_v0 = vpack.c.bf16 %v5010_v10, %v5010_v10  ;;  %v5115_v46 = vunpack.c.l.b16 %v5083_v30 }
0x21f9   : > { %v5061_v4 = vsel %vm1960_vm2, %v10038_v42, %v5060_v19  ;;  %v4920_v45 = vmul.f32 %v7677_v37, %v4879_v22  ;;  %v7680_v22 = vld [vmem:[#allocation20] sm:$0xff]  ;;  %v5106_v30 = vunpack.c.l.b16 %v5074_v24 }
0x21fa   : > { %5071 = vst.msk [vmem:[#allocation4] sm:$0xff] %vm1037_vm1, %v5061_v4  ;;  %v4987_v36 = vadd.f32 %v4986_v20, %v4985_v58  ;;  %v5030_v58 = vrot.slane %v5029_v3, 1  ;;  %6457 = vmatpush.bf16.msrb.mxu3 %v7680_v22  ;;  %v5023_v4 = vrot.slane %v5022_v18, 1 }
0x21fb   : > { %v4990_v2 = vsel %vm1037_vm1, %v4920_v45, 0.0 }
0x21fc   : > { %v4991_v43 = vrot.slane %v4990_v2, 4  ;;  %v4988_v40 = vrot.slane %v4987_v36, 1  ;;  %v5031_v37 = vadd.f32 %v5030_v58, %v5029_v3  ;;  %v5073_v3 = vpack.c.bf16 %v10013_v1, %v10013_v1 }
0x21fe   : > { %v4992_v25 = vadd.f32 %v4991_v43, %v4990_v2  ;;  %v4989_v12 = vadd.f32 %v4988_v40, %v4987_v36  ;;  %v5116_v2 = vunpack.c.l.b16 %v5084_v0  ;;  %v5105_v58 = vunpack.c.l.b16 %v5073_v3 }
0x21ff   : > { %v5108_v0 = vunpack.c.l.b16 %v5076_v11 }
0x2200   : > { %v4993_v31 = vrot.slane %v4992_v25, 2  ;;  %v4894_v38 = vpop.permute.xlu1 %4893  ;;  %v5081_v23 = vpack.c.bf16 %v4989_v12, %v4989_v12 }
0x2201   : > { %v4923_v32 = vmul.f32 %v7678_v28, %v4894_v38  ;;  %v5024_v38 = vadd.f32 %v5023_v4, %v5022_v18  ;;  %v5075_v28 = vpack.c.bf16 %v10011_v9, %v10011_v9  ;;  %v5087_v9 = vpack.c.bf16 %v5031_v37, %v5031_v37 }
0x2202   : > { %v4994_v26 = vadd.f32 %v4993_v31, %v4992_v25  ;;  %v5113_v25 = vunpack.c.l.b16 %v5081_v23 }
0x2203   : > { %v5011_v41 = vsel %vm1037_vm1, %v4923_v32, 0.0 }
0x2204   : > { %v4995_v55 = vrot.slane %v4994_v26, 1  ;;  %v5012_v17 = vrot.slane %v5011_v41, 4 }
0x2206   : > { %v4996_v19 = vadd.f32 %v4995_v55, %v4994_v26  ;;  %v5013_v20 = vadd.f32 %v5012_v17, %v5011_v41  ;;  %v5086_v55 = vpack.c.bf16 %v5024_v38, %v5024_v38  ;;  %v5107_v17 = vunpack.c.l.b16 %v5075_v28 }
0x2208   : > { %v5062_v45 = vsel %vm1948_vm11, %v4996_v19, %v4989_v12  ;;  %v5082_v36 = vpack.c.bf16 %v4996_v19, %v4996_v19  ;;  %v5014_v39 = vrot.slane %v5013_v20, 2  ;;  %v4909_v62 = vpop.permute.xlu1 %4908 }
0x2209   : > { %v5063_v43 = vsel %vm1950_vm12, %v5003_v6, %v5062_v45  ;;  %v4926_v40 = vmul.f32 %v7681_v47, %v4909_v62  ;;  %v5121_v45 = vsel %vm1948_vm11, %v5106_v30, %v5105_v58  ;;  %v5177_v30 = vld [vmem:[#allocation4] sm:$0xff] }
0x220a   : > { %v5114_v8 = vunpack.c.l.b16 %v5082_v36  ;;  %v5064_v29 = vsel %vm1952_vm13, %v5010_v10, %v5063_v43  ;;  %v5015_v31 = vadd.f32 %v5014_v39, %v5013_v20  ;;  %v5077_v10 = vpack.c.bf16 %v10020_v51, %v10020_v51  ;;  %v7684_v58 = vld [vmem:[#allocation22 + $0x8] sm:$0xff] }
0x220b   : > { %v5032_v32 = vsel %vm1037_vm1, %v4926_v40, 0.0  ;;  %v5078_v51 = vpack.c.bf16 %v10034_v21, %v10034_v21  ;;  %v5122_v24 = vsel %vm1950_vm12, %v5107_v17, %v5121_v45  ;;  %v5119_v43 = vunpack.c.l.b16 %v5087_v9  ;;  %v7683_v9 = vld [vmem:[#allocation16] sm:$0xff]  ;;  %v5220_v17 = vld [vmem:[#allocation2 + $0x8] sm:$0xff]  ;;  %v7686_v45 = vld [vmem:[%s10763_s19] ss:$0 sm:$0xff] }
0x220c   : > { %v5128_v6 = vsel %vm1948_vm11, %v5114_v8, %v5113_v25  ;;  %v5016_v12 = vrot.slane %v5015_v31, 1  ;;  %v5033_v26 = vrot.slane %v5032_v32, 4  ;;  %v5109_v22 = vunpack.c.l.b16 %v5077_v10 }
0x220d   : > { %v5129_v59 = vsel %vm1950_vm12, %v5115_v46, %v5128_v6  ;;  %v5079_v46 = vpack.c.bf16 %v10036_v14, %v10036_v14  ;;  %v5123_v21 = vsel %vm1952_vm13, %v5108_v0, %v5122_v24  ;;  %v5219_v0 = vld [vmem:[#allocation2] sm:$0xff] }
0x220e   : > { %v5130_v1 = vsel %vm1952_vm13, %v5116_v2, %v5129_v59  ;;  %v5017_v18 = vadd.f32 %v5016_v12, %v5015_v31  ;;  %v5034_v41 = vadd.f32 %v5033_v26, %v5032_v32  ;;  %v5118_v2 = vunpack.c.l.b16 %v5086_v55  ;;  %v7685_v55 = vld [vmem:[#allocation22] sm:$0xff] }
0x220f   : > { %v5124_v14 = vsel %vm1954_vm14, %v5109_v22, %v5123_v21  ;;  %v5111_v25 = vunpack.c.l.b16 %v5079_v46  ;;  %v5080_v31 = vpack.c.bf16 %v10038_v42, %v10038_v42 }
0x2210   : > { %v5065_v56 = vsel %vm1954_vm14, %v5017_v18, %v5064_v29  ;;  %v5085_v23 = vpack.c.bf16 %v5017_v18, %v5017_v18  ;;  %v5035_v19 = vrot.slane %v5034_v41, 2  ;;  %v4043_v20 = vpop.permute.xlu1 %4042  ;;  %v5110_v29 = vunpack.c.l.b16 %v5078_v51  ;;  %v7682_v18 = vld [vmem:[#allocation16 + $0x8] sm:$0xff] }
0x2211   : > { %v5066_v4 = vsel %vm1956_vm15, %v5024_v38, %v5065_v56  ;;  %4048 = vst.msk [vmem:[#allocation3] sm:$0xff] %vm1037_vm1, %v4043_v20  ;;  %v5112_v12 = vunpack.c.l.b16 %v5080_v31  ;;  %v5221_v56 = vpack.c.bf16 %v5220_v17, %v5219_v0 }
0x2212   : > { %v5117_v36 = vunpack.c.l.b16 %v5085_v23  ;;  %v5067_v39 = vsel %vm1958_vm0, %v5031_v37, %v5066_v4  ;;  %v5036_v62 = vadd.f32 %v5035_v19, %v5034_v41  ;;  %v5125_v38 = vsel %vm1956_vm15, %v5110_v29, %v5124_v14  ;;  %v5162_v23 = vpop.f32.mrf.mxu1 }
0x2213   : > { %v5126_v6 = vsel %vm1958_vm0, %v5111_v25, %v5125_v38 }
0x2214   : > { %v5131_v47 = vsel %vm1954_vm14, %v5117_v36, %v5130_v1  ;;  %v5037_v40 = vrot.slane %v5036_v62, 1  ;;  %v5127_v10 = vsel %vm1960_vm2, %v5112_v12, %v5126_v6 }
0x2215   : > { %v5132_v8 = vsel %vm1956_vm15, %v5118_v2, %v5131_v47  ;;  %v7687_v47 = vld [vmem:[#allocation13] ss:$0 sm:$0xff] }
0x2216   : > { %v5038_v37 = vadd.f32 %v5037_v40, %v5036_v62  ;;  %v5133_v3 = vsel %vm1958_vm0, %v5119_v43, %v5132_v8 }
0x2218   : > { %v5068_v28 = vsel %vm1960_vm2, %v5038_v37, %v5067_v39  ;;  %v5088_v32 = vpack.c.bf16 %v5038_v37, %v5038_v37  ;;  %v5283_v11 = vld [vmem:[#allocation3] sm:$0xff] }
0x2219   : > { %5072 = vst.msk [vmem:[#allocation4 + $0x8] sm:$0xff] %vm1037_vm1, %v5068_v28  ;;  %5287 = vrot.lane.b32.xlu2 %v5283_v11, %s8155_s15  ;;  %v5284_v28 = vld [vmem:[#allocation3 + $0x8] sm:$0xff] }
0x221a   : > { %v5120_v26 = vunpack.c.l.b16 %v5088_v32  ;;  %v5164_v51 = vpop.f32.mrf.mxu1 }
0x221c   : > { %v5134_v42 = vsel %vm1960_vm2, %v5120_v26, %v5133_v3 }
0x221d   : > { %v5135_v59 = vpack.c.b16 %v5134_v42, %v5127_v10 }
0x221f   : > { %6919 = vmatmul.msk.bf16.vlgmr.msrb.gmra.mxu0 %vm1037_vm1, %v5135_v59 }
0x2220   : > { %v5178_v1 = vld [vmem:[#allocation4 + $0x8] sm:$0xff]  ;;  %5527 = vmatpush.bf16.msrb.mxu0 %v7682_v18 }
0x2221   : > { %v5179_v41 = vpack.c.bf16 %v5178_v1, %v5177_v30 }
0x2223   : > { %6925 = vmatmul.msk.bf16.vlgmr.msrb.gmra.mxu2 %vm1037_vm1, %v5179_v41 }
0x2224   : > { %5528 = vmatpush.bf16.msrb.mxu0 %v7683_v9  ;;  %6442 = vmatpush.bf16.msrb.mxu2 %v7684_v58 }
0x2228   : > { %6443 = vmatpush.bf16.msrb.mxu2 %v7685_v55 }
0x222f   : > { %6931 = vmatmul.msk.bf16.vlgmr.msra.gmra.mxu0 %vm1037_vm1, %v5221_v56 }
0x2277   : > { %v5214_v62 = vpop.f32.mrf.mxu3 }
0x227f   : > { %v5216_v25 = vpop.f32.mrf.mxu3 }
0x229c   : > { %v5148_v19 = vpop.f32.mrf.mxu0 }
0x229d   : > { %v5163_v20 = vadd.f32 %v5162_v23, %v5148_v19 }
0x229f   : > { %v5167_v36 = vadd.f32 %v7686_v45, %v5163_v20 }
0x22a4   : > { %v5150_v22 = vpop.f32.mrf.mxu0 }
0x22a5   : > { %v5165_v46 = vadd.f32 %v5164_v51, %v5150_v22 }
0x22a6   : > { %v5192_v4 = vpop.f32.mrf.mxu2 }
0x22a7   : > { %v5168_v39 = vadd.f32 %v7686_v45, %v5165_v46  ;;  %v5215_v24 = vadd.f32 %v5214_v62, %v5192_v4 }
0x22a9   : > { %v6995_v2 = vpack.c.bf16 %v5168_v39, %v5167_v36 }
0x22ab   : > { %7003 = vst [vmem:[%s8559_s8 + $0x10] sm:$0xff] %v6995_v2  }
0x22ac   : > { %v5234_v43 = vpop.f32.mrf.mxu0 }
0x22ad   : > { %v5239_v21 = vadd.f32 %v5234_v43, %v5215_v24  ;;  %v5288_v24 = vpop.permute.xlu2 %5287 }
0x22ae   : > { %v5194_v14 = vpop.f32.mrf.mxu2 }
0x22af   : > { %v5241_v40 = vadd.f32 %v7687_v47, %v5239_v21  ;;  %v5217_v8 = vadd.f32 %v5216_v25, %v5194_v14 }
0x22b1   : > { %7485 = vtanh.f32 %v5241_v40  ;;  %v6932_v32 = vmul.f32 -1.442695, %v5241_v40 }
0x22b4   : > { %v5236_v29 = vpop.f32.mrf.mxu0 }
0x22b5   : > { %v5240_v31 = vadd.f32 %v5236_v29, %v5217_v8 }
0x22b7   : > { %v7486_v37 = vpop.eup %7485  ;;  %v5242_v3 = vadd.f32 %v7687_v47, %v5240_v31 }
0x22b8   : > { %5297 = vrot.lane.b32.xlu0 %v7486_v37, %s8155_s15 }
0x22b9   : > { %7487 = vtanh.f32 %v5242_v3  ;;  %v6933_v11 = vmul.f32 -1.442695, %v5242_v3 }
0x22ba   : > { %7489 = vpow2.f32 %v6932_v32 }
0x22bb   : > { %7491 = vpow2.f32 %v6933_v11 }
0x22bf   : > { %v7488_v38 = vpop.eup %7487 }
0x22c0   : > { %5289 = vrot.lane.b32.xlu0 %v5284_v28, %s8155_s15  ;;  %5299 = vrot.lane.b32.xlu1 %v7488_v38, %s8155_s15  ;;  %v7490_v6 = vpop.eup %7489 }
0x22c1   : > { %v5249_v12 = vadd.f32 1.0, %v7490_v6  ;;  %v7492_v26 = vpop.eup %7491 }
0x22c2   : > { %v5250_v10 = vadd.f32 1.0, %v7492_v26 }
0x22c3   : > { %7493 = vrcp.f32 %v5249_v12  ;;  %v5262_v55 = vand.u32 2147483648, %v5249_v12  ;;  %vm5256_vm5 = vweird.f32 %v5249_v12  ;;  %v5260_v17 = vand.u32 2147483647, %v5249_v12 }
0x22c4   : > { %7495 = vrcp.f32 %v5250_v10  ;;  %v5277_v46 = vand.u32 2147483648, %v5250_v10  ;;  %vm5271_vm9 = vweird.f32 %v5250_v10  ;;  %v5275_v4 = vand.u32 2147483647, %v5250_v10 }
0x22c5   : > { %v5263_v23 = vor.u32 1.1754944e-38, %v5262_v55  ;;  %vm5261_vm7 = vcmp.eq.f32.partialorder %v5260_v17, 8.507059e+37 }
0x22c6   : > { %v5278_v36 = vor.u32 1.1754944e-38, %v5277_v46  ;;  %vm5276_vm4 = vcmp.eq.f32.partialorder %v5275_v4, 8.507059e+37 }
0x22c9   : > { %v7494_v42 = vpop.eup %7493 }
0x22ca   : > { %v5252_v59 = vmul.f32 %v7494_v42, %v5249_v12  ;;  %v7496_v1 = vpop.eup %7495  ;;  %vm5257_vm3 = vweird.f32 %v7494_v42 }
0x22cb   : > { %v5267_v41 = vmul.f32 %v7496_v1, %v5250_v10  ;;  %vm5258_vm6 = vmor %vm5256_vm5, %vm5257_vm3  ;;  %vm5272_vm8 = vweird.f32 %v7496_v1 }
0x22cc   : > { %v5253_v30 = vsub.f32 1.0, %v5252_v59  ;;  %vm5273_vm10 = vmor %vm5271_vm9, %vm5272_vm8 }
0x22cd   : > { %v5268_v58 = vsub.f32 1.0, %v5267_v41 }
0x22ce   : > { %v5254_v18 = vmul.f32 %v7494_v42, %v5253_v30 }
0x22cf   : > { %v5269_v56 = vmul.f32 %v7496_v1, %v5268_v58 }
0x22d0   : > { %v5255_v9 = vadd.f32 %v7494_v42, %v5254_v18 }
0x22d1   : > { %v5270_v22 = vadd.f32 %v7496_v1, %v5269_v56 }
0x22d2   : > { %v5259_v0 = vsel %vm5258_vm6, %v7494_v42, %v5255_v9 }
0x22d3   : > { %v5264_v20 = vsel %vm5261_vm7, %v5263_v23, %v5259_v0  ;;  %v5274_v45 = vsel %vm5273_vm10, %v7496_v1, %v5270_v22  ;;  %v7688_v1 = vld [vmem:[%s10754_s26] ss:$0 sm:$0xff] }
0x22d4   : > { %v5279_v39 = vsel %vm5276_vm4, %v5278_v36, %v5274_v45  ;;  %v5293_v8 = vmul.f32 %v5288_v24, %v5264_v20 }
0x232a   : > { %v5298_v19 = vpop.permute.xlu0 %5297 }
0x232b   : > { %v5303_v51 = vmul.f32 %v5298_v19, %v5264_v20 }
0x232d   : > { %5307 = vrot.lane.b32.xlu1 %v5303_v51, %s8155_s15 }
0x2332   : > { %v5300_v62 = vpop.permute.xlu1 %5299  ;;  %v5290_v43 = vpop.permute.xlu0 %5289 }
0x2333   : > { %v5304_v2 = vmul.f32 %v5300_v62, %v5279_v39  ;;  %v5294_v21 = vmul.f32 %v5290_v43, %v5279_v39 }
0x2335   : > { %5309 = vrot.lane.b32.xlu2 %v5304_v2, %s8155_s15 }
0x233d   : > { %4179 = vrot.lane.b32.xlu2 %v9669_v7, %s8156_s29 }
0x2345   : > { %4189 = vrot.lane.b32.xlu2 %v9658_v35, %s8158_s30 }
0x238f   : > { %v5310_v47 = vpop.permute.xlu2 %5309 }
0x2390   : > { %v10111_v40 = vadd.f32 %v5310_v47, %v5294_v21 }
0x2392   : > { %7497 = vtanh.f32 %v10111_v40 }
0x2397   : > { %v4180_v14 = vpop.permute.xlu2 %4179 }
0x2398   : > { %v7498_v25 = vpop.eup %7497  ;;  %4185 = vst.msk [vmem:[#allocation2 + $0x10] sm:$0xff] %vm1037_vm1, %v4180_v14 }
0x2399   : > { %5321 = vrot.lane.b32.xlu1 %v7498_v25, %s8155_s15 }
0x239f   : > { %v4190_v29 = vpop.permute.xlu2 %4189  ;;  %v5308_v7 = vpop.permute.xlu1 %5307  ;;  %v5348_v12 = vld [vmem:[#allocation2 + $0x10] sm:$0xff] }
0x23a0   : > { %4195 = vst.msk [vmem:[#allocation3 + $0x10] sm:$0xff] %vm1037_vm1, %v4190_v29  ;;  %v10117_v35 = vadd.f32 %v5308_v7, %v5293_v8 }
0x23a2   : > { %7499 = vtanh.f32 %v10117_v35 }
0x23a7   : > { %v5430_v37 = vld [vmem:[#allocation3 + $0x10] sm:$0xff] }
0x23a8   : > { %v7500_v31 = vpop.eup %7499 }
0x23a9   : > { %5319 = vrot.lane.b32.xlu0 %v7500_v31, %s8155_s15 }
0x23b1   : > { %4181 = vrot.lane.b32.xlu0 %v9667_v49, %s8156_s29 }
0x23b9   : > { %4191 = vrot.lane.b32.xlu0 %v9652_v33, %s8158_s30 }
0x23c1   : > { %5434 = vrot.lane.b32.xlu0 %v5430_v37, %s8155_s15 }
0x240b   : > { %v5322_v3 = vpop.permute.xlu1 %5321 }
0x240c   : > { %v10126_v28 = vmul.f32 %v5322_v3, %v5279_v39 }
0x241b   : > { %v5320_v38 = vpop.permute.xlu0 %5319 }
0x241c   : > { %v10128_v32 = vmul.f32 %v5320_v38, %v5264_v20 }
0x241e   : > { %v5347_v11 = vpack.c.bf16 %v10126_v28, %v10128_v32 }
0x2420   : > { %5369 = vrot.lane.b32.xlu1 %v5347_v11, %s8156_s29 }
0x2423   : > { %v4182_v6 = vpop.permute.xlu0 %4181 }
0x2424   : > { %4186 = vst.msk [vmem:[#allocation2 + $0x18] sm:$0xff] %vm1037_vm1, %v4182_v6 }
0x242b   : > { %v4192_v49 = vpop.permute.xlu0 %4191  ;;  %v5349_v33 = vld [vmem:[#allocation2 + $0x18] sm:$0xff] }
0x242c   : > { %4196 = vst.msk [vmem:[#allocation3 + $0x18] sm:$0xff] %vm1037_vm1, %v4192_v49  ;;  %v5350_v26 = vpack.c.bf16 %v5349_v33, %v5348_v12 }
0x242e   : > { %6934 = vmatmul.msk.bf16.vlgmr.msra.gmra.mxu1 %vm1037_vm1, %v5350_v26 }
0x2433   : > { %v5431_v56 = vld [vmem:[#allocation3 + $0x18] sm:$0xff]  ;;  %v5435_v26 = vpop.permute.xlu0 %5434 }
0x2492   : > { %v5370_v10 = vpop.permute.xlu1 %5369 }
0x2493   : > { %6935 = vmatmul.msk.bf16.vlgmr.msra.gmra.mxu2 %vm1037_vm1, %v5370_v10 }
0x24ab   : > { %v5363_v42 = vpop.f32.mrf.mxu1 }
0x24b3   : > { %v5365_v41 = vpop.f32.mrf.mxu1 }
0x2516   : > { %v5383_v59 = vpop.f32.mrf.mxu2 }
0x2517   : > { %v5384_v30 = vadd.f32 %v5383_v59, %v5363_v42 }
0x2519   : > { %v5388_v18 = vadd.f32 %v7688_v1, %v5384_v30 }
0x251b   : > { %7501 = vtanh.f32 %v5388_v18  ;;  %v6936_v51 = vmul.f32 -1.442695, %v5388_v18 }
0x251e   : > { %v5385_v9 = vpop.f32.mrf.mxu2 }
0x251f   : > { %v5386_v58 = vadd.f32 %v5385_v9, %v5365_v41 }
0x2521   : > { %v7502_v55 = vpop.eup %7501  ;;  %v5389_v17 = vadd.f32 %v7688_v1, %v5386_v58 }
0x2522   : > { %5444 = vrot.lane.b32.xlu1 %v7502_v55, %s8155_s15 }
0x2523   : > { %7503 = vtanh.f32 %v5389_v17  ;;  %v6937_v23 = vmul.f32 -1.442695, %v5389_v17 }
0x2525   : > { %7505 = vpow2.f32 %v6937_v23 }
0x2529   : > { %v7504_v0 = vpop.eup %7503 }
0x252a   : > { %5446 = vrot.lane.b32.xlu2 %v7504_v0, %s8155_s15  ;;  %5436 = vrot.lane.b32.xlu1 %v5431_v56, %s8155_s15 }
0x252b   : > { %v7506_v19 = vpop.eup %7505 }
0x252c   : > { %v5397_v20 = vadd.f32 1.0, %v7506_v19 }
0x252e   : > { %7507 = vrcp.f32 %v5397_v20  ;;  %v5424_v24 = vand.u32 2147483648, %v5397_v20  ;;  %vm5418_vm5 = vweird.f32 %v5397_v20  ;;  %v5422_v43 = vand.u32 2147483647, %v5397_v20 }
0x252f   : > { %7509 = vpow2.f32 %v6936_v51 }
0x2530   : > { %v5425_v14 = vor.u32 1.1754944e-38, %v5424_v24  ;;  %vm5423_vm7 = vcmp.eq.f32.partialorder %v5422_v43, 8.507059e+37 }
0x2534   : > { %v7508_v22 = vpop.eup %7507 }
0x2535   : > { %v7510_v46 = vpop.eup %7509  ;;  %v5414_v4 = vmul.f32 %v7508_v22, %v5397_v20  ;;  %vm5419_vm3 = vweird.f32 %v7508_v22 }
0x2536   : > { %v5396_v45 = vadd.f32 1.0, %v7510_v46  ;;  %vm5420_vm6 = vmor %vm5418_vm5, %vm5419_vm3 }
0x2537   : > { %v5415_v36 = vsub.f32 1.0, %v5414_v4 }
0x2538   : > { %7511 = vrcp.f32 %v5396_v45  ;;  %v5409_v3 = vand.u32 2147483648, %v5396_v45  ;;  %vm5403_vm9 = vweird.f32 %v5396_v45  ;;  %v5407_v38 = vand.u32 2147483647, %v5396_v45 }
0x2539   : > { %v5416_v39 = vmul.f32 %v7508_v22, %v5415_v36 }
0x253a   : > { %v5410_v6 = vor.u32 1.1754944e-38, %v5409_v3  ;;  %vm5408_vm4 = vcmp.eq.f32.partialorder %v5407_v38, 8.507059e+37 }
0x253b   : > { %v5417_v62 = vadd.f32 %v7508_v22, %v5416_v39  ;;  %v7689_v39 = vld [vmem:[%s10755_s28] ss:$0 sm:$0xff] }
0x253d   : > { %v5421_v21 = vsel %vm5420_vm6, %v7508_v22, %v5417_v62 }
0x253e   : > { %v7512_v2 = vpop.eup %7511  ;;  %v5426_v8 = vsel %vm5423_vm7, %v5425_v14, %v5421_v21 }
0x253f   : > { %v5399_v47 = vmul.f32 %v7512_v2, %v5396_v45  ;;  %vm5404_vm8 = vweird.f32 %v7512_v2 }
0x2540   : > { %vm5405_vm10 = vmor %vm5403_vm9, %vm5404_vm8 }
0x2541   : > { %v5400_v7 = vsub.f32 1.0, %v5399_v47 }
0x2543   : > { %v5401_v31 = vmul.f32 %v7512_v2, %v5400_v7 }
0x2545   : > { %v5402_v37 = vadd.f32 %v7512_v2, %v5401_v31 }
0x2547   : > { %v5406_v11 = vsel %vm5405_vm10, %v7512_v2, %v5402_v37 }
0x2548   : > { %v5411_v12 = vsel %vm5408_vm4, %v5410_v6, %v5406_v11 }
0x2549   : > { %v5440_v10 = vmul.f32 %v5435_v26, %v5411_v12 }
0x2584   : > { %v5447_v25 = vpop.permute.xlu2 %5446 }
0x2585   : > { %v5451_v29 = vmul.f32 %v5447_v25, %v5426_v8 }
0x2587   : > { %5456 = vrot.lane.b32.xlu0 %v5451_v29, %s8155_s15 }
0x258f   : > { %4326 = vrot.lane.b32.xlu0 %v9702_v63, %s8156_s29 }
0x2594   : > { %v5445_v49 = vpop.permute.xlu1 %5444 }
0x2595   : > { %v5450_v33 = vmul.f32 %v5445_v49, %v5411_v12 }
0x2597   : > { %4336 = vrot.lane.b32.xlu0 %v9692_v15, %s8158_s30  ;;  %5454 = vrot.lane.b32.xlu2 %v5450_v33, %s8155_s15 }
0x259c   : > { %v5437_v63 = vpop.permute.xlu1 %5436 }
0x259d   : > { %v5441_v30 = vmul.f32 %v5437_v63, %v5426_v8 }
0x25f1   : > { %v5455_v42 = vpop.permute.xlu2 %5454 }
0x25f2   : > { %v10149_v59 = vadd.f32 %v5455_v42, %v5440_v10 }
0x25f4   : > { %7513 = vtanh.f32 %v10149_v59 }
0x25f9   : > { %v5457_v1 = vpop.permute.xlu0 %5456 }
0x25fa   : > { %v7514_v18 = vpop.eup %7513  ;;  %v10152_v41 = vadd.f32 %v5457_v1, %v5441_v30 }
0x25fb   : > { %5466 = vrot.lane.b32.xlu1 %v7514_v18, %s8155_s15 }
0x25fc   : > { %7515 = vtanh.f32 %v10152_v41 }
0x2601   : > { %v4327_v15 = vpop.permute.xlu0 %4326 }
0x2602   : > { %v7516_v9 = vpop.eup %7515  ;;  %4332 = vst.msk [vmem:[#allocation2 + $0x20] sm:$0xff] %vm1037_vm1, %v4327_v15 }
0x2603   : > { %5468 = vrot.lane.b32.xlu2 %v7516_v9, %s8155_s15  ;;  %4328 = vrot.lane.b32.xlu1 %v9700_v27, %s8156_s29 }
0x2609   : > { %v4337_v58 = vpop.permute.xlu0 %4336  ;;  %v5495_v51 = vld [vmem:[#allocation2 + $0x20] sm:$0xff] }
0x260a   : > { %4342 = vst.msk [vmem:[#allocation3 + $0x20] sm:$0xff] %vm1037_vm1, %v4337_v58 }
0x260b   : > { %4338 = vrot.lane.b32.xlu1 %v9695_v34, %s8158_s30 }
0x2611   : > { %v5577_v55 = vld [vmem:[#allocation3 + $0x20] sm:$0xff] }
0x2613   : > { %5581 = vrot.lane.b32.xlu1 %v5577_v55, %s8155_s15 }
0x265d   : > { %v5469_v17 = vpop.permute.xlu2 %5468 }
0x265e   : > { %v10164_v56 = vmul.f32 %v5469_v17, %v5426_v8 }
0x266d   : > { %v5467_v0 = vpop.permute.xlu1 %5466 }
0x266e   : > { %v10166_v23 = vmul.f32 %v5467_v0, %v5411_v12 }
0x2670   : > { %v5494_v19 = vpack.c.bf16 %v10164_v56, %v10166_v23 }
0x2672   : > { %5516 = vrot.lane.b32.xlu2 %v5494_v19, %s8156_s29 }
0x2675   : > { %v4329_v27 = vpop.permute.xlu1 %4328 }
0x2676   : > { %4333 = vst.msk [vmem:[#allocation2 + $0x28] sm:$0xff] %vm1037_vm1, %v4329_v27 }
0x267d   : > { %v4339_v20 = vpop.permute.xlu1 %4338  ;;  %v5496_v34 = vld [vmem:[#allocation2 + $0x28] sm:$0xff] }
0x267e   : > { %4343 = vst.msk [vmem:[#allocation3 + $0x28] sm:$0xff] %vm1037_vm1, %v4339_v20  ;;  %v5497_v22 = vpack.c.bf16 %v5496_v34, %v5495_v51 }
0x2680   : > { %6938 = vmatmul.msk.bf16.vlgmr.msra.gmra.mxu3 %vm1037_vm1, %v5497_v22 }
0x2685   : > { %v5578_v25 = vld [vmem:[#allocation3 + $0x28] sm:$0xff]  ;;  %v5582_v22 = vpop.permute.xlu1 %5581 }
0x26cc   : > { %v5517_v46 = vpop.permute.xlu2 %5516 }
0x26cd   : > { %6939 = vmatmul.msk.bf16.vlgmr.msrb.gmra.mxu0 %vm1037_vm1, %v5517_v46 }
0x2703   : > { %v5510_v4 = vpop.f32.mrf.mxu3 }
0x270b   : > { %v5512_v2 = vpop.f32.mrf.mxu3 }
0x274a   : > { %v5530_v45 = vpop.f32.mrf.mxu0 }
0x274b   : > { %v5531_v36 = vadd.f32 %v5530_v45, %v5510_v4 }
0x274d   : > { %v5535_v62 = vadd.f32 %v7689_v39, %v5531_v36 }
0x274f   : > { %7517 = vtanh.f32 %v5535_v62  ;;  %v6940_v8 = vmul.f32 -1.442695, %v5535_v62 }
0x2752   : > { %v5532_v24 = vpop.f32.mrf.mxu0 }
0x2753   : > { %v5533_v43 = vadd.f32 %v5532_v24, %v5512_v2 }
0x2755   : > { %v7518_v21 = vpop.eup %7517  ;;  %v5536_v47 = vadd.f32 %v7689_v39, %v5533_v43 }
0x2756   : > { %5591 = vrot.lane.b32.xlu2 %v7518_v21, %s8155_s15 }
0x2757   : > { %7519 = vtanh.f32 %v5536_v47  ;;  %v6941_v38 = vmul.f32 -1.442695, %v5536_v47 }
0x2758   : > { %7521 = vpow2.f32 %v6940_v8 }
0x275d   : > { %v7520_v14 = vpop.eup %7519 }
0x275e   : > { %5593 = vrot.lane.b32.xlu0 %v7520_v14, %s8155_s15  ;;  %5583 = vrot.lane.b32.xlu2 %v5578_v25, %s8155_s15  ;;  %v7522_v29 = vpop.eup %7521 }
0x275f   : > { %v5543_v7 = vadd.f32 1.0, %v7522_v29 }
0x2761   : > { %7523 = vrcp.f32 %v5543_v7  ;;  %v5556_v49 = vand.u32 2147483648, %v5543_v7  ;;  %vm5550_vm5 = vweird.f32 %v5543_v7  ;;  %v5554_v12 = vand.u32 2147483647, %v5543_v7 }
0x2762   : > { %7525 = vpow2.f32 %v6941_v38 }
0x2763   : > { %v5557_v10 = vor.u32 1.1754944e-38, %v5556_v49  ;;  %vm5555_vm7 = vcmp.eq.f32.partialorder %v5554_v12, 8.507059e+37  ;;  %v7691_v12 = vld [vmem:[%s8525_s10] sm:$0xff] }
0x2767   : > { %v7524_v31 = vpop.eup %7523 }
0x2768   : > { %v5546_v37 = vmul.f32 %v7524_v31, %v5543_v7  ;;  %vm5551_vm3 = vweird.f32 %v7524_v31  ;;  %v7526_v33 = vpop.eup %7525 }
0x2769   : > { %vm5552_vm6 = vmor %vm5550_vm5, %vm5551_vm3  ;;  %v5544_v42 = vadd.f32 1.0, %v7526_v33  ;;  %vm10786_vm3 = vcmask 64512  }
0x276a   : > { %v5547_v3 = vsub.f32 1.0, %v5546_v37  ;;  %vm10787_vm5 = vmmov %vm10786_vm3 }
0x276b   : > { %7527 = vrcp.f32 %v5544_v42  ;;  %v5571_v17 = vand.u32 2147483648, %v5544_v42  ;;  %vm5565_vm9 = vweird.f32 %v5544_v42  ;;  %v5569_v0 = vand.u32 2147483647, %v5544_v42 }
0x276c   : > { %v5548_v11 = vmul.f32 %v7524_v31, %v5547_v3 }
0x276d   : > { %v5572_v27 = vor.u32 1.1754944e-38, %v5571_v17  ;;  %vm5570_vm4 = vcmp.eq.f32.partialorder %v5569_v0, 8.507059e+37 }
0x276e   : > { %v5549_v6 = vadd.f32 %v7524_v31, %v5548_v11 }
0x2770   : > { %v5553_v26 = vsel %vm5552_vm6, %v7524_v31, %v5549_v6  ;;  %v7690_v31 = vld [vmem:[%s10756_s18] ss:$0 sm:$0xff]  ;;  %vm10788_vm6 = vmmov %vm10786_vm3 }
0x2771   : > { %v5558_v30 = vsel %vm5555_vm7, %v5557_v10, %v5553_v26  ;;  %v7528_v18 = vpop.eup %7527  ;;  %vm10789_vm7 = vmmov %vm10786_vm3 }
0x2772   : > { %v5561_v15 = vmul.f32 %v7528_v18, %v5544_v42  ;;  %vm5566_vm8 = vweird.f32 %v7528_v18  ;;  %v5587_v46 = vmul.f32 %v5582_v22, %v5558_v30  ;;  %v7695_v22 = vld [vmem:[%s8525_s10 + $0x38] sm:$0xff] }
0x2773   : > { %vm5567_vm10 = vmor %vm5565_vm9, %vm5566_vm8 }
0x2774   : > { %v5562_v9 = vsub.f32 1.0, %v5561_v15 }
0x2776   : > { %v5563_v58 = vmul.f32 %v7528_v18, %v5562_v9 }
0x2778   : > { %v5564_v55 = vadd.f32 %v7528_v18, %v5563_v58 }
0x277a   : > { %v5568_v19 = vsel %vm5567_vm10, %v7528_v18, %v5564_v55  ;;  %v7693_v18 = vld [vmem:[%s8525_s10 + $0x8] sm:$0xff] }
0x277b   : > { %v5573_v20 = vsel %vm5570_vm4, %v5572_v27, %v5568_v19  ;;  %v7694_v27 = vld [vmem:[%s8525_s10 + $0x18] sm:$0xff] }
0x27b0   : > { %v5592_v63 = vpop.permute.xlu2 %5591 }
0x27b1   : > { %v5597_v1 = vmul.f32 %v5592_v63, %v5558_v30 }
0x27b3   : > { %5601 = vrot.lane.b32.xlu0 %v5597_v1, %s8155_s15 }
0x27b8   : > { %v5584_v39 = vpop.permute.xlu2 %5583 }
0x27b9   : > { %v5588_v62 = vmul.f32 %v5584_v39, %v5573_v20 }
0x27d0   : > { %v5594_v51 = vpop.permute.xlu0 %5593 }
0x27d1   : > { %v5598_v34 = vmul.f32 %v5594_v51, %v5573_v20 }
0x27d3   : > { %5603 = vrot.lane.b32.xlu1 %v5598_v34, %s8155_s15 }
0x2825   : > { %v5602_v4 = vpop.permute.xlu0 %5601 }
0x2826   : > { %v10183_v45 = vadd.f32 %v5602_v4, %v5587_v46  ;;  %v7696_v4 = vld [vmem:[%s8525_s10 + $0x10] sm:$0xff] }
0x2828   : > { %7529 = vtanh.f32 %v10183_v45 }
0x282e   : > { %v7530_v36 = vpop.eup %7529 }
0x282f   : > { %5613 = vrot.lane.b32.xlu2 %v7530_v36, %s8155_s15 }
0x2845   : > { %v5604_v2 = vpop.permute.xlu1 %5603 }
0x2846   : > { %v10187_v24 = vadd.f32 %v5604_v2, %v5588_v62 }
0x2848   : > { %7531 = vtanh.f32 %v10187_v24 }
0x284e   : > { %v7532_v43 = vpop.eup %7531 }
0x284f   : > { %5615 = vrot.lane.b32.xlu0 %v7532_v43, %s8155_s15 }
0x2889   : > { %v5614_v21 = vpop.permute.xlu2 %5613 }
0x288a   : > { %v10191_v14 = vmul.f32 %v5614_v21, %v5558_v30  ;;  %v7692_v30 = vld [vmem:[%s8525_s10 + $0x20] sm:$0xff] }
0x28c1   : > { %v5616_v47 = vpop.permute.xlu0 %5615 }
0x28c2   : > { %v10193_v25 = vmul.f32 %v5616_v47, %v5573_v20 }
0x28c4   : > { %v5641_v8 = vpack.c.bf16 %v10193_v25, %v10191_v14 }
0x28c6   : > { %5643 = vrot.lane.b32.xlu1 %v5641_v8, %s8156_s29 }
0x2938   : > { %v5644_v29 = vpop.permute.xlu1 %5643 }
0x2939   : > { %6942 = vmatmul.msk.bf16.vlgmr.msrb.gmra.mxu1 %vm1037_vm1, %v5644_v29  ;;  %6944 = vmatmul.msk.bf16.vlgmr.msrb.gmra.mxu3 %vm1037_vm1, %v5644_v29  ;;  %v7697_v29 = vld [vmem:[%s8525_s10 + $0x30] sm:$0xff] }
0x29b6   : > { %v5657_v7 = vpop.f32.mrf.mxu1 }
0x29b7   : > { %v5658_v37 = vadd.f32 %v7690_v31, %v5657_v7 }
0x29b9   : > { %v5678_v3 = vperm.slane %v5658_v37, 0  ;;  %v5667_v38 = vrot.slane %v5658_v37, 4  ;;  %v5664_v11 = vrot.slane %v5658_v37, 1  ;;  %v5666_v6 = vrot.slane %v5658_v37, 3 }
0x29ba   : > { %v5670_v49 = vrot.slane %v5658_v37, 7  ;;  %v5665_v42 = vrot.slane %v5658_v37, 2  ;;  %v5669_v51 = vrot.slane %v5658_v37, 6  ;;  %v5668_v39 = vrot.slane %v5658_v37, 5 }
0x29bb   : > { %v5710_v33 = vmul.f32 %v7691_v12, %v5678_v3  ;;  %v5682_v26 = vperm.slane %v5667_v38, 0  ;;  %v5679_v10 = vperm.slane %v5664_v11, 0  ;;  %v5681_v9 = vperm.slane %v5666_v6, 0  ;;  %v7698_v3 = vld [vmem:[%s8525_s10 + $0x40] sm:$0xff]  ;;  %v7699_v11 = vld [vmem:[%s8525_s10 + $0x28] sm:$0xff] }
0x29bc   : > { %v5685_v17 = vperm.slane %v5670_v49, 0  ;;  %v5680_v0 = vperm.slane %v5665_v42, 0  ;;  %v5684_v2 = vperm.slane %v5669_v51, 0  ;;  %v5683_v8 = vperm.slane %v5668_v39, 0 }
0x29bd   : > { %v5726_v63 = vsel %vm1037_vm1, %v5710_v33, 0.0  ;;  %v5714_v1 = vmul.f32 %v7692_v30, %v5682_v26  ;;  %v5711_v15 = vmul.f32 %v7693_v18, %v5679_v10  ;;  %v5713_v20 = vmul.f32 %v7694_v27, %v5681_v9  ;;  %v7700_v30 = vld [vmem:[%s8525_s10 + $0x48] sm:$0xff] }
0x29be   : > { %5727 = vadd.xlane.f32.xlu2 %v5726_v63  ;;  %v5659_v19 = vpop.f32.mrf.mxu1  ;;  %v5717_v46 = vmul.f32 %v7695_v22, %v5685_v17  ;;  %v5712_v36 = vmul.f32 %v7696_v4, %v5680_v0  ;;  %v5716_v7 = vmul.f32 %v7697_v29, %v5684_v2  ;;  %v5715_v37 = vmul.f32 %v7699_v11, %v5683_v8  ;;  %v7703_v4 = vld [vmem:[%s8525_s10 + $0x60] sm:$0xff] }
0x29bf   : > { %v5738_v58 = vsel %vm1037_vm1, %v5714_v1, 0.0  ;;  %v5729_v55 = vsel %vm1037_vm1, %v5711_v15, 0.0  ;;  %v5660_v34 = vadd.f32 %v7690_v31, %v5659_v19  ;;  %v5735_v62 = vsel %vm1037_vm1, %v5713_v20, 0.0  ;;  %v7701_v15 = vld [vmem:[%s8525_s10 + $0x50] sm:$0xff] }
0x29c0   : > { %5739 = vadd.xlane.f32.xlu1 %v5738_v58  ;;  %5730 = vadd.xlane.f32.xlu0 %v5729_v55  ;;  %v5747_v43 = vsel %vm1037_vm1, %v5717_v46, 0.0  ;;  %v5732_v21 = vsel %vm1037_vm1, %v5712_v36, 0.0  ;;  %v5744_v12 = vsel %vm1037_vm1, %v5716_v7, 0.0  ;;  %v5741_v10 = vsel %vm1037_vm1, %v5715_v37, 0.0  ;;  %v7702_v58 = vld [vmem:[%s8525_s10 + $0x58] sm:$0xff] }
0x29c1   : > { %v5686_v47 = vperm.slane %v5660_v34, 0  ;;  %v5671_v31 = vrot.slane %v5660_v34, 1  ;;  %v5672_v6 = vrot.slane %v5660_v34, 2  ;;  %v5673_v49 = vrot.slane %v5660_v34, 3 }
0x29c2   : > { %v5674_v18 = vrot.slane %v5660_v34, 4  ;;  %v5675_v17 = vrot.slane %v5660_v34, 5  ;;  %v5676_v0 = vrot.slane %v5660_v34, 6  ;;  %v5677_v39 = vrot.slane %v5660_v34, 7 }
0x29c3   : > { %v5718_v38 = vmul.f32 %v7698_v3, %v5686_v47  ;;  %v5687_v33 = vperm.slane %v5671_v31, 0  ;;  %v5688_v42 = vperm.slane %v5672_v6, 0  ;;  %v5689_v63 = vperm.slane %v5673_v49, 0  ;;  %v7706_v31 = vld [vmem:[%s8525_s10 + $0x78] sm:$0xff] }
0x29c4   : > { %v5690_v27 = vperm.slane %v5674_v18, 0  ;;  %v5691_v22 = vperm.slane %v5675_v17, 0  ;;  %v5692_v46 = vperm.slane %v5676_v0, 0  ;;  %v5693_v8 = vperm.slane %v5677_v39, 0  ;;  %v10782_v17 = vld [vmem:[#allocation51_spill] sm:$0xff] }
0x29c5   : > { %v5750_v26 = vsel %vm1037_vm1, %v5718_v38, 0.0  ;;  %v5719_v1 = vmul.f32 %v7700_v30, %v5687_v33  ;;  %v5720_v9 = vmul.f32 %v7701_v15, %v5688_v42  ;;  %v5721_v55 = vmul.f32 %v7702_v58, %v5689_v63 }
0x29c6   : > { %5736 = vadd.xlane.f32.xlu2 %v5735_v62  ;;  %v5722_v36 = vmul.f32 %v7703_v4, %v5690_v27  ;;  %v7704_v62 = vld [vmem:[%s8525_s10 + $0x68] sm:$0xff]  ;;  %v5725_v3 = vmul.f32 %v7706_v31, %v5693_v8  ;;  %v10783_v27 = vld [vmem:[#allocation48_spill] sm:$0xff] }
0x29c7   : > { %v5753_v19 = vsel %vm1037_vm1, %v5719_v1, 0.0  ;;  %v5756_v20 = vsel %vm1037_vm1, %v5720_v9, 0.0  ;;  %v5759_v51 = vsel %vm1037_vm1, %v5721_v55, 0.0  ;;  %v5723_v2 = vmul.f32 %v7704_v62, %v5691_v22  ;;  %v10785_v22 = vld [vmem:[#allocation50_spill] sm:$0xff] }
0x29c8   : > { %5748 = vadd.xlane.f32.xlu1 %v5747_v43  ;;  %5733 = vadd.xlane.f32.xlu0 %v5732_v21  ;;  %v7705_v43 = vld [vmem:[%s8525_s10 + $0x70] sm:$0xff]  ;;  %v5762_v47 = vsel %vm1037_vm1, %v5722_v36, 0.0  ;;  %v5771_v38 = vsel %vm1037_vm1, %v5725_v3, 0.0 }
0x29c9   : > { %v5724_v21 = vmul.f32 %v7705_v43, %v5692_v46  ;;  %v5765_v29 = vsel %vm1037_vm1, %v5723_v2, 0.0 }
0x29cb   : > { %v5768_v7 = vsel %vm1037_vm1, %v5724_v21, 0.0 }
0x29ce   : > { %5745 = vadd.xlane.f32.xlu2 %v5744_v12 }
0x29d0   : > { %5751 = vadd.xlane.f32.xlu1 %v5750_v26  ;;  %5742 = vadd.xlane.f32.xlu0 %v5741_v10 }
0x29d6   : > { %5754 = vadd.xlane.f32.xlu2 %v5753_v19 }
0x29d8   : > { %5757 = vadd.xlane.f32.xlu1 %v5756_v20  ;;  %5760 = vadd.xlane.f32.xlu0 %v5759_v51 }
0x29de   : > { %5763 = vadd.xlane.f32.xlu2 %v5762_v47 }
0x29e0   : > { %5766 = vadd.xlane.f32.xlu1 %v5765_v29  ;;  %5769 = vadd.xlane.f32.xlu0 %v5768_v7 }
0x29e6   : > { %5772 = vadd.xlane.f32.xlu2 %v5771_v38 }
0x2a31   : > { %v5728_v34 = vpop.xlane.xlu2 %5727 }
0x2a32   : > { %v10236_v11 = vadd.f32 %v5728_v34, %v8749_v50 }
0x2a33   : > { %v5740_v37 = vpop.xlane.xlu1 %5739  ;;  %v5731_v6 = vpop.xlane.xlu0 %5730 }
0x2a34   : > { %v10239_v49 = vadd.f32 %v5731_v6, %v8741_v13  ;;  %5807 = vperm.xlu0 %7225, %v10236_v11   ;;  %v10244_v33 = vadd.f32 %v5740_v37, %v8743_v16 }
0x2a36   : > { %5810 = vperm.xlu1 %7226, %v10239_v49  }
0x2a39   : > { %v5737_v12 = vpop.xlane.xlu2 %5736 }
0x2a3a   : > { %v10247_v26 = vadd.f32 %v5737_v12, %v8761_v57 }
0x2a3b   : > { %v5749_v10 = vpop.xlane.xlu1 %5748  ;;  %v5734_v42 = vpop.xlane.xlu0 %5733 }
0x2a3c   : > { %v10250_v50 = vadd.f32 %v5734_v42, %v8745_v48  ;;  %5816 = vperm.xlu2 %7227, %v10247_v26   ;;  %5819 = vperm.xlu0 %7225, %v10244_v33   ;;  %v10296_v46 = vadd.f32 %v5749_v10, %v10785_v22 }
0x2a3e   : > { %5813 = vperm.xlu1 %7226, %v10250_v50  }
0x2a41   : > { %v5746_v13 = vpop.xlane.xlu2 %5745 }
0x2a42   : > { %v10256_v63 = vadd.f32 %v5746_v13, %v8753_v53 }
0x2a43   : > { %v5752_v16 = vpop.xlane.xlu1 %5751  ;;  %v5743_v30 = vpop.xlane.xlu0 %5742 }
0x2a44   : > { %v10259_v57 = vadd.f32 %v5743_v30, %v8767_v60  ;;  %5825 = vperm.xlu2 %7227, %v10256_v63   ;;  %v10264_v1 = vadd.f32 %v5752_v16, %v8737_v5  ;;  %v10781_v5 = vld [vmem:[#allocation49_spill] sm:$0xff] }
0x2a46   : > { %5822 = vperm.xlu1 %7226, %v10259_v57  }
0x2a49   : > { %v5755_v48 = vpop.xlane.xlu2 %5754 }
0x2a4a   : > { %v10267_v18 = vadd.f32 %v5755_v48, %v8755_v54 }
0x2a4b   : > { %v5761_v15 = vpop.xlane.xlu0 %5760  ;;  %v5758_v60 = vpop.xlane.xlu1 %5757 }
0x2a4c   : > { %v10270_v53 = vadd.f32 %v5761_v15, %v8739_v44  ;;  %5831 = vperm.xlu2 %7227, %v10264_v1   ;;  %5834 = vperm.xlu0 %7225, %v10267_v18   ;;  %v10276_v58 = vadd.f32 %v5758_v60, %v8751_v52  ;;  %v10784_v52 = vld [vmem:[#allocation52_spill] sm:$0xff] }
0x2a4e   : > { %5840 = vperm.xlu1 %7226, %v10270_v53  }
0x2a51   : > { %v5764_v9 = vpop.xlane.xlu2 %5763 }
0x2a52   : > { %v10279_v55 = vadd.f32 %v5764_v9, %v10781_v5 }
0x2a53   : > { %v5770_v54 = vpop.xlane.xlu0 %5769  ;;  %v5767_v44 = vpop.xlane.xlu1 %5766 }
0x2a54   : > { %v10282_v0 = vadd.f32 %v5770_v54, %v10782_v17  ;;  %5843 = vperm.xlu2 %7227, %v10279_v55   ;;  %5837 = vperm.xlu0 %7225, %v10276_v58   ;;  %v10288_v20 = vadd.f32 %v5767_v44, %v10783_v27 }
0x2a56   : > { %5849 = vperm.xlu1 %7226, %v10282_v0  }
0x2a59   : > { %v5773_v19 = vpop.xlane.xlu2 %5772 }
0x2a5a   : > { %v10291_v51 = vadd.f32 %v5773_v19, %v10784_v52 }
0x2a5c   : > { %5852 = vperm.xlu2 %7227, %v10291_v51   ;;  %5846 = vperm.xlu0 %7225, %v10288_v20  }
0x2a64   : > { %5828 = vperm.xlu0 %7225, %v10296_v46  }
0x2a96   : > { %v5817_v4 = vpop.permute.xlu2 %5816 }
0x2a97   : > { %v5857_v54 = vperm.slane %v5817_v4, %v10767_v61 }
0x2a9e   : > { %v5826_v62 = vpop.permute.xlu2 %5825 }
0x2aa6   : > { %v5808_v39 = vpop.permute.xlu0 %5807  ;;  %v5832_v47 = vpop.permute.xlu2 %5831 }
0x2aa7   : > { %v5862_v38 = vperm.slane %v5832_v47, %v10767_v61  ;;  %v5854_v42 = vperm.slane %v5808_v39, %v10767_v61 }
0x2aa8   : > { %v5811_v36 = vpop.permute.xlu1 %5810 }
0x2aa9   : > { %v5855_v37 = vperm.slane %v5811_v36, %v10767_v61 }
0x2aab   : > { %v5870_v16 = vsel %vm1948_vm11, %v5855_v37, %v5854_v42 }
0x2aae   : > { %v5820_v43 = vpop.permute.xlu0 %5819  ;;  %v5844_v7 = vpop.permute.xlu2 %5843 }
0x2aaf   : > { %v5866_v15 = vperm.slane %v5844_v7, %v10767_v61  ;;  %v5858_v39 = vperm.slane %v5820_v43, %v10767_v61  ;;  %v5860_v7 = vperm.slane %v5826_v62, %v10767_v61 }
0x2ab0   : > { %v5814_v2 = vpop.permute.xlu1 %5813 }
0x2ab1   : > { %v5856_v12 = vperm.slane %v5814_v2, %v10767_v61 }
0x2ab3   : > { %v5871_v60 = vsel %vm1950_vm12, %v5856_v12, %v5870_v16 }
0x2ab4   : > { %v5872_v27 = vsel %vm1952_vm13, %v5857_v54, %v5871_v60 }
0x2ab5   : > { %v5873_v47 = vsel %vm1954_vm14, %v5858_v39, %v5872_v27 }
0x2ab6   : > { %v5853_v9 = vpop.permute.xlu2 %5852 }
0x2ab7   : > { %v5869_v52 = vperm.slane %v5853_v9, %v10767_v61 }
0x2ab8   : > { %v5823_v21 = vpop.permute.xlu1 %5822 }
0x2ab9   : > { %v5859_v22 = vperm.slane %v5823_v21, %v10767_v61 }
0x2abe   : > { %v5835_v8 = vpop.permute.xlu0 %5834 }
0x2abf   : > { %v5863_v31 = vperm.slane %v5835_v8, %v10767_v61 }
0x2ac0   : > { %v5841_v29 = vpop.permute.xlu1 %5840 }
0x2ac1   : > { %v5877_v6 = vsel %vm1948_vm11, %v5863_v31, %v5862_v38  ;;  %v5865_v13 = vperm.slane %v5841_v29, %v10767_v61  ;;  %v5874_v29 = vsel %vm1956_vm15, %v5859_v22, %v5873_v47 }
0x2ac6   : > { %v5838_v3 = vpop.permute.xlu0 %5837 }
0x2ac7   : > { %v5864_v34 = vperm.slane %v5838_v3, %v10767_v61  ;;  %v5875_v3 = vsel %vm1958_vm0, %v5860_v7, %v5874_v29 }
0x2ac8   : > { %v5850_v48 = vpop.permute.xlu1 %5849 }
0x2ac9   : > { %v5878_v10 = vsel %vm1950_vm12, %v5864_v34, %v5877_v6  ;;  %v5868_v44 = vperm.slane %v5850_v48, %v10767_v61 }
0x2aca   : > { %v5879_v30 = vsel %vm1952_vm13, %v5865_v13, %v5878_v10 }
0x2acb   : > { %v5880_v19 = vsel %vm1954_vm14, %v5866_v15, %v5879_v30 }
0x2ace   : > { %v5847_v5 = vpop.permute.xlu0 %5846 }
0x2acf   : > { %v5867_v17 = vperm.slane %v5847_v5, %v10767_v61 }
0x2ad1   : > { %v5881_v36 = vsel %vm1956_vm15, %v5867_v17, %v5880_v19 }
0x2ad2   : > { %v5882_v2 = vsel %vm1958_vm0, %v5868_v44, %v5881_v36 }
0x2ad3   : > { %v5883_v4 = vsel %vm1960_vm2, %v5869_v52, %v5882_v2 }
0x2ad4   : > { %v5889_v8 = vsel %vm10786_vm3, %v5883_v4, -inf }
0x2ad5   : > { %5890 = vmax.xlane.f32.xlu0 %v5889_v8 }
0x2ad6   : > { %v5829_v31 = vpop.permute.xlu0 %5828 }
0x2ad7   : > { %v5861_v21 = vperm.slane %v5829_v31, %v10767_v61 }
0x2ad9   : > { %v5876_v43 = vsel %vm1960_vm2, %v5861_v21, %v5875_v3 }
0x2ada   : > { %v5886_v38 = vsel %vm10787_vm5, %v5876_v43, -inf }
0x2adb   : > { %5887 = vmax.xlane.f32.xlu1 %v5886_v38 }
0x2b48   : > { %v10339_v13 = vpop.xlane.xlu0 %5890 }
0x2b49   : > { %v5905_v15 = vperm.slane %v10339_v13, 3  ;;  %v5904_v9 = vperm.slane %v10339_v13, 2  ;;  %v5908_v44 = vperm.slane %v10339_v13, 6  ;;  %v5909_v27 = vperm.slane %v10339_v13, 7 }
0x2b4a   : > { %v5902_v43 = vperm.slane %v10339_v13, 0 }
0x2b4b   : > { %v5937_v17 = vsub.f32 %v10270_v53, %v5905_v15  ;;  %v5941_v2 = vsub.f32 %v10291_v51, %v5909_v27 }
0x2b4d   : > { %v5964_v19 = vmul.f32 1.442695, %v5937_v17  ;;  %v5972_v8 = vmul.f32 1.442695, %v5941_v2 }
0x2b4e   : > { %v10331_v34 = vpop.xlane.xlu1 %5887 }
0x2b4f   : > { %v5894_v37 = vperm.slane %v10331_v34, 0  ;;  %v5899_v6 = vperm.slane %v10331_v34, 5  ;;  %v5900_v12 = vperm.slane %v10331_v34, 6  ;;  %v5895_v10 = vperm.slane %v10331_v34, 1 }
0x2b50   : > { %v5897_v36 = vperm.slane %v10331_v34, 3 }
0x2b51   : > { %v5926_v62 = vsub.f32 %v10236_v11, %v5894_v37  ;;  %v5931_v42 = vsub.f32 %v10259_v57, %v5899_v6  ;;  %v5932_v16 = vsub.f32 %v10256_v63, %v5900_v12  ;;  %v5927_v48 = vsub.f32 %v10239_v49, %v5895_v10 }
0x2b52   : > { %v5896_v11 = vperm.slane %v10331_v34, 2  ;;  %v5936_v63 = vsub.f32 %v10276_v58, %v5904_v9  ;;  %v5940_v58 = vsub.f32 %v10282_v0, %v5908_v44  ;;  %v5929_v4 = vsub.f32 %v10247_v26, %v5897_v36 }
0x2b53   : > { %v5942_v30 = vmul.f32 1.442695, %v5926_v62  ;;  %v5952_v60 = vmul.f32 1.442695, %v5931_v42  ;;  %v5954_v5 = vmul.f32 1.442695, %v5932_v16  ;;  %v5934_v6 = vsub.f32 %v10264_v1, %v5902_v43 }
0x2b54   : > { %v5944_v54 = vmul.f32 1.442695, %v5927_v48  ;;  %v5928_v49 = vsub.f32 %v10250_v50, %v5896_v11  ;;  %v5962_v52 = vmul.f32 1.442695, %v5936_v63  ;;  %v5970_v47 = vmul.f32 1.442695, %v5940_v58 }
0x2b55   : > { %7533 = vpow2.f32 %v5942_v30  ;;  %v5898_v0 = vperm.slane %v10331_v34, 4  ;;  %v5948_v31 = vmul.f32 1.442695, %v5929_v4  ;;  %v5958_v12 = vmul.f32 1.442695, %v5934_v6 }
0x2b56   : > { %7535 = vpow2.f32 %v5952_v60  ;;  %v5946_v39 = vmul.f32 1.442695, %v5928_v49  ;;  %v5906_v42 = vperm.slane %v10339_v13, 4  ;;  %v5907_v48 = vperm.slane %v10339_v13, 5 }
0x2b57   : > { %7537 = vpow2.f32 %v5954_v5  ;;  %v5930_v26 = vsub.f32 %v10244_v33, %v5898_v0  ;;  %v5903_v33 = vperm.slane %v10339_v13, 1  ;;  %v5901_v5 = vperm.slane %v10331_v34, 7 }
0x2b58   : > { %7539 = vpow2.f32 %v5944_v54  ;;  %v5938_v1 = vsub.f32 %v10279_v55, %v5906_v42 }
0x2b59   : > { %7541 = vpow2.f32 %v5964_v19  ;;  %v5950_v38 = vmul.f32 1.442695, %v5930_v26  ;;  %v5935_v10 = vsub.f32 %v10267_v18, %v5903_v33  ;;  %v5939_v18 = vsub.f32 %v10288_v20, %v5907_v48 }
0x2b5a   : > { %7543 = vpow2.f32 %v5962_v52  ;;  %v5966_v15 = vmul.f32 1.442695, %v5938_v1  ;;  %v5933_v55 = vsub.f32 %v10296_v46, %v5901_v5 }
0x2b5b   : > { %v10347_v57 = vpop.eup %7533  ;;  %7545 = vpow2.f32 %v5946_v39  ;;  %v5960_v16 = vmul.f32 1.442695, %v5935_v10  ;;  %v5968_v9 = vmul.f32 1.442695, %v5939_v18 }
0x2b5c   : > { %5991 = vperm.xlu2 %7227, %v10347_v57   ;;  %v10354_v22 = vpop.eup %7535  ;;  %7547 = vpow2.f32 %v5970_v47  ;;  %v5956_v54 = vmul.f32 1.442695, %v5933_v55 }
0x2b5d   : > { %v10356_v53 = vpop.eup %7537  ;;  %6006 = vperm.xlu0 %7225, %v10354_v22   ;;  %7549 = vpow2.f32 %v5972_v8 }
0x2b5e   : > { %6009 = vperm.xlu1 %7226, %v10356_v53   ;;  %v10362_v50 = vpop.eup %7539  ;;  %7551 = vpow2.f32 %v5948_v31 }
0x2b5f   : > { %v10367_v29 = vpop.eup %7541  ;;  %7553 = vpow2.f32 %v5950_v38 }
0x2b60   : > { %v10369_v7 = vpop.eup %7543  ;;  %7555 = vpow2.f32 %v5958_v12 }
0x2b61   : > { %v10374_v51 = vpop.eup %7545  ;;  %7557 = vpow2.f32 %v5960_v16 }
0x2b62   : > { %v10378_v21 = vpop.eup %7547  ;;  %7559 = vpow2.f32 %v5966_v15 }
0x2b63   : > { %v10380_v3 = vpop.eup %7549  ;;  %7561 = vpow2.f32 %v5968_v9 }
0x2b64   : > { %5994 = vperm.xlu2 %7227, %v10362_v50   ;;  %v10385_v37 = vpop.eup %7551  ;;  %7563 = vpow2.f32 %v5956_v54 }
0x2b65   : > { %6024 = vperm.xlu0 %7225, %v10367_v29   ;;  %v10390_v62 = vpop.eup %7553 }
0x2b66   : > { %6021 = vperm.xlu1 %7226, %v10369_v7   ;;  %v10395_v30 = vpop.eup %7555 }
0x2b67   : > { %v10400_v60 = vpop.eup %7557 }
0x2b68   : > { %v10405_v11 = vpop.eup %7559 }
0x2b69   : > { %v10409_v13 = vpop.eup %7561 }
0x2b6a   : > { %v10412_v17 = vpop.eup %7563 }
0x2b6c   : > { %5997 = vperm.xlu2 %7227, %v10374_v51  }
0x2b6d   : > { %6033 = vperm.xlu0 %7225, %v10378_v21  }
0x2b6e   : > { %6036 = vperm.xlu1 %7226, %v10380_v3  }
0x2b74   : > { %6000 = vperm.xlu2 %7227, %v10385_v37  }
0x2b7c   : > { %6003 = vperm.xlu2 %7227, %v10390_v62  }
0x2b84   : > { %6015 = vperm.xlu2 %7227, %v10395_v30  }
0x2b8c   : > { %6018 = vperm.xlu2 %7227, %v10400_v60  }
0x2b94   : > { %6027 = vperm.xlu2 %7227, %v10405_v11  }
0x2b9c   : > { %6030 = vperm.xlu2 %7227, %v10409_v13  }
0x2ba4   : > { %6012 = vperm.xlu2 %7227, %v10412_v17  }
0x2bb6   : > { %v5992_v20 = vpop.permute.xlu2 %5991 }
0x2bb7   : > { %v6038_v38 = vperm.slane %v5992_v20, %v10767_v61 }
0x2bbe   : > { %v5995_v63 = vpop.permute.xlu2 %5994 }
0x2bbf   : > { %v6039_v0 = vperm.slane %v5995_v63, %v10767_v61 }
0x2bc1   : > { %v6054_v1 = vsel %vm1948_vm11, %v6039_v0, %v6038_v38 }
0x2bc6   : > { %v5998_v34 = vpop.permute.xlu2 %5997 }
0x2bc7   : > { %v6040_v31 = vperm.slane %v5998_v34, %v10767_v61 }
0x2bc9   : > { %v6055_v18 = vsel %vm1950_vm12, %v6040_v31, %v6054_v1 }
0x2bce   : > { %v6001_v49 = vpop.permute.xlu2 %6000 }
0x2bcf   : > { %v6007_v27 = vpop.permute.xlu0 %6006  ;;  %v6041_v6 = vperm.slane %v6001_v49, %v10767_v61 }
0x2bd0   : > { %v6010_v52 = vpop.permute.xlu1 %6009  ;;  %v6043_v49 = vperm.slane %v6007_v27, %v10767_v61 }
0x2bd1   : > { %v6056_v55 = vsel %vm1952_vm13, %v6041_v6, %v6055_v18 }
0x2bd6   : > { %v6004_v44 = vpop.permute.xlu2 %6003 }
0x2bd7   : > { %v6025_v46 = vpop.permute.xlu0 %6024  ;;  %v6042_v10 = vperm.slane %v6004_v44, %v10767_v61 }
0x2bd8   : > { %v6022_v39 = vpop.permute.xlu1 %6021  ;;  %v6049_v33 = vperm.slane %v6025_v46, %v10767_v61  ;;  %v6044_v46 = vperm.slane %v6010_v52, %v10767_v61 }
0x2bd9   : > { %v6048_v8 = vperm.slane %v6022_v39, %v10767_v61  ;;  %v6057_v63 = vsel %vm1954_vm14, %v6042_v10, %v6056_v55 }
0x2bde   : > { %v6016_v19 = vpop.permute.xlu2 %6015 }
0x2bdf   : > { %v6046_v4 = vperm.slane %v6016_v19, %v10767_v61  ;;  %v6034_v12 = vpop.permute.xlu0 %6033 }
0x2be0   : > { %v6037_v42 = vpop.permute.xlu1 %6036  ;;  %v6052_v9 = vperm.slane %v6034_v12, %v10767_v61 }
0x2be1   : > { %v6053_v54 = vperm.slane %v6037_v42, %v10767_v61 }
0x2be6   : > { %v6019_v36 = vpop.permute.xlu2 %6018 }
0x2be7   : > { %v6047_v58 = vperm.slane %v6019_v36, %v10767_v61  ;;  %v6058_v36 = vsel %vm1956_vm15, %v6043_v49, %v6057_v63  ;;  %v7710_v49 = vld [vmem:[%s8531_s2 + $0x28] sm:$0xff] }
0x2be9   : > { %v6061_v47 = vsel %vm1948_vm11, %v6047_v58, %v6046_v4 }
0x2bea   : > { %v6062_v26 = vsel %vm1950_vm12, %v6048_v8, %v6061_v47 }
0x2beb   : > { %v6063_v48 = vsel %vm1952_vm13, %v6049_v33, %v6062_v26 }
0x2bee   : > { %v6028_v2 = vpop.permute.xlu2 %6027 }
0x2bef   : > { %v6050_v43 = vperm.slane %v6028_v2, %v10767_v61  ;;  %v6059_v2 = vsel %vm1958_vm0, %v6044_v46, %v6058_v36 }
0x2bf1   : > { %v6064_v5 = vsel %vm1954_vm14, %v6050_v43, %v6063_v48 }
0x2bf6   : > { %v6031_v16 = vpop.permute.xlu2 %6030 }
0x2bf7   : > { %v6051_v15 = vperm.slane %v6031_v16, %v10767_v61 }
0x2bf9   : > { %v6065_v20 = vsel %vm1956_vm15, %v6051_v15, %v6064_v5  ;;  %v7708_v5 = vld [vmem:[%s8531_s2] sm:$0xff] }
0x2bfa   : > { %v6066_v34 = vsel %vm1958_vm0, %v6052_v9, %v6065_v20 }
0x2bfb   : > { %v6067_v44 = vsel %vm1960_vm2, %v6053_v54, %v6066_v34 }
0x2bfc   : > { %v6073_v19 = vsel %vm10788_vm6, %v6067_v44, 0.0 }
0x2bfd   : > { %6074 = vadd.xlane.f32.xlu2 %v6073_v19 }
0x2bfe   : > { %v6013_v39 = vpop.permute.xlu2 %6012 }
0x2bff   : > { %v6045_v58 = vperm.slane %v6013_v39, %v10767_v61  ;;  %v7711_v39 = vld [vmem:[%s8531_s2 + $0x10] sm:$0xff] }
0x2c01   : > { %v6060_v4 = vsel %vm1960_vm2, %v6045_v58, %v6059_v2 }
0x2c02   : > { %v6070_v47 = vsel %vm10789_vm7, %v6060_v4, 0.0 }
0x2c03   : > { %6071 = vadd.xlane.f32.xlu0 %v6070_v47 }
0x2c70   : > { %v6075_v8 = vpop.xlane.xlu2 %6074 }
0x2c76   : > { %v6072_v27 = vpop.xlane.xlu0 %6071 }
0x2c77   : > { %7565 = vrcp.f32 %v6072_v27 }
0x2c78   : > { %7567 = vrcp.f32 %v6075_v8 }
0x2c7d   : > { %v7566_v0 = vpop.eup %7565 }
0x2c7e   : > { %v6086_v31 = vperm.slane %v7566_v0, 6  ;;  %v6085_v26 = vperm.slane %v7566_v0, 5  ;;  %v6080_v43 = vperm.slane %v7566_v0, 0  ;;  %v7568_v6 = vpop.eup %7567  ;;  %v6081_v10 = vperm.slane %v7566_v0, 1 }
0x2c7f   : > { %v6091_v33 = vperm.slane %v7568_v6, 3  ;;  %v6090_v12 = vperm.slane %v7568_v6, 2  ;;  %v6082_v48 = vperm.slane %v7566_v0, 2 }
0x2c80   : > { %v6118_v52 = vmul.f32 %v10356_v53, %v6086_v31  ;;  %v6117_v38 = vmul.f32 %v10354_v22, %v6085_v26  ;;  %v6112_v61 = vmul.f32 %v10347_v57, %v6080_v43  ;;  %v6113_v1 = vmul.f32 %v10362_v50, %v6081_v10  ;;  %v7712_v10 = vld [vmem:[%s8531_s2 + $0x18] sm:$0xff] }
0x2c81   : > { %v6123_v42 = vmul.f32 %v10367_v29, %v6091_v33  ;;  %v6122_v16 = vmul.f32 %v10369_v7, %v6090_v12  ;;  %v6095_v53 = vperm.slane %v7568_v6, 7  ;;  %v6094_v22 = vperm.slane %v7568_v6, 6 }
0x2c82   : > { %6160 = vperm.xlu2 %7227, %v6118_v52   ;;  %6155 = vperm.xlu0 %7225, %v6117_v38   ;;  %v6114_v18 = vmul.f32 %v10374_v51, %v6082_v48  ;;  %v6083_v29 = vperm.slane %v7566_v0, 3  ;;  %v6084_v50 = vperm.slane %v7566_v0, 4  ;;  %v6088_v51 = vperm.slane %v7568_v6, 0 }
0x2c83   : > { %6130 = vperm.xlu1 %7226, %v6112_v61   ;;  %v6127_v57 = vmul.f32 %v10380_v3, %v6095_v53  ;;  %v6126_v15 = vmul.f32 %v10378_v21, %v6094_v22 }
0x2c84   : > { %v6115_v7 = vmul.f32 %v10385_v37, %v6083_v29  ;;  %v6116_v3 = vmul.f32 %v10390_v62, %v6084_v50  ;;  %v6120_v21 = vmul.f32 %v10395_v30, %v6088_v51  ;;  %v6093_v37 = vperm.slane %v7568_v6, 5 }
0x2c8a   : > { %6185 = vperm.xlu2 %7227, %v6123_v42   ;;  %6180 = vperm.xlu0 %7225, %v6122_v16  }
0x2c8b   : > { %6135 = vperm.xlu1 %7226, %v6113_v1  }
0x2c92   : > { %6205 = vperm.xlu2 %7227, %v6127_v57   ;;  %6200 = vperm.xlu0 %7225, %v6126_v15  }
0x2c93   : > { %6140 = vperm.xlu1 %7226, %v6114_v18  }
0x2c9a   : > { %5339 = vrot.lane.b32.xlu2 %v10117_v35, %s8158_s30  ;;  %5329 = vrot.lane.b32.xlu0 %v10128_v32, %s8156_s29  ;;  %v6089_v35 = vperm.slane %v7568_v6, 1 }
0x2c9b   : > { %6145 = vperm.xlu1 %7226, %v6115_v7  }
0x2c9c   : > { %v6121_v32 = vmul.f32 %v10400_v60, %v6089_v35 }
0x2ca2   : > { %5478 = vrot.lane.b32.xlu2 %v10164_v56, %s8156_s29  ;;  %5341 = vrot.lane.b32.xlu0 %v10111_v40, %s8158_s30  ;;  %v6092_v40 = vperm.slane %v7568_v6, 4 }
0x2ca3   : > { %6150 = vperm.xlu1 %7226, %v6116_v3  }
0x2ca4   : > { %v6124_v56 = vmul.f32 %v10405_v11, %v6092_v40  ;;  %v7713_v40 = vld [vmem:[%s8531_s2 + $0x20] sm:$0xff] }
0x2caa   : > { %5623 = vrot.lane.b32.xlu2 %v10191_v14, %s8156_s29  ;;  %5486 = vrot.lane.b32.xlu0 %v10149_v59, %s8158_s30  ;;  %v6125_v14 = vmul.f32 %v10409_v13, %v6093_v37  ;;  %v6087_v59 = vperm.slane %v7566_v0, 7 }
0x2cab   : > { %6170 = vperm.xlu1 %7226, %v6120_v21  }
0x2cac   : > { %v6119_v62 = vmul.f32 %v10412_v17, %v6087_v59  ;;  %v7707_v17 = vld [vmem:[%s8531_s2 + $0x8] sm:$0xff] }
0x2cb2   : > { %5635 = vrot.lane.b32.xlu2 %v10187_v24, %s8158_s30  ;;  %5625 = vrot.lane.b32.xlu0 %v10193_v25, %s8156_s29 }
0x2cb3   : > { %6175 = vperm.xlu1 %7226, %v6121_v32  }
0x2cbb   : > { %6190 = vperm.xlu1 %7226, %v6124_v56  }
0x2cc3   : > { %6195 = vperm.xlu1 %7226, %v6125_v14  }
0x2ccb   : > { %6165 = vperm.xlu1 %7226, %v6119_v62  }
0x2cd3   : > { %5331 = vrot.lane.b32.xlu1 %v10126_v28, %s8156_s29 }
0x2cdb   : > { %5476 = vrot.lane.b32.xlu1 %v10166_v23, %s8156_s29  ;;  %s6472_s29 = scalar_lea.sflag [#allocation7], %s8513_s11 }
0x2cdc   : > { %v6161_v24 = vpop.permute.xlu2 %6160 }
0x2ce3   : > { %5488 = vrot.lane.b32.xlu1 %v10152_v41, %s8158_s30 }
0x2ce4   : > { %v10485_v25 = vpop.permute.xlu2 %6185 }
0x2ceb   : > { %5633 = vrot.lane.b32.xlu1 %v10183_v45, %s8158_s30  ;;  %v7709_v45 = vld [vmem:[%s8531_s2 + $0x30] sm:$0xff] }
0x2cec   : > { %v10489_v30 = vpop.permute.xlu2 %6205  ;;  %v6214_v54 = vmul.f32 %v7709_v45, %v6161_v24 }
0x2cee   : > { %v6266_v2 = vsel %vm1037_vm1, %v6214_v54, 0.0 }
0x2cef   : > { %v6267_v0 = vrot.slane %v6266_v2, 4 }
0x2cf1   : > { %v6268_v33 = vadd.f32 %v6267_v0, %v6266_v2 }
0x2cf3   : > { %v6269_v57 = vrot.slane %v6268_v33, 2 }
0x2cf4   : > { %v5340_v60 = vpop.permute.xlu2 %5339  ;;  %v6156_v11 = vpop.permute.xlu0 %6155 }
0x2cf5   : > { %5345 = vst.msk [vmem:[#allocation3] sm:$0xff] %vm1037_vm1, %v5340_v60  ;;  %v6131_v28 = vpop.permute.xlu1 %6130  ;;  %v6213_v44 = vmul.f32 %v7710_v49, %v6156_v11  ;;  %v6270_v35 = vadd.f32 %v6269_v57, %v6268_v33  ;;  %v7714_v60 = vld [vmem:[%s8531_s2 + $0x58] sm:$0xff]  ;;  %v7718_v57 = vld [vmem:[%s8531_s2 + $0x70] sm:$0xff] }
0x2cf6   : > { %v6208_v55 = vmul.f32 %v7708_v5, %v6131_v28  ;;  %v6219_v11 = vmul.f32 %v7714_v60, %v10485_v25  ;;  %v7715_v25 = vld [vmem:[%s8531_s2 + $0x50] sm:$0xff] }
0x2cf7   : > { %v6259_v27 = vsel %vm1037_vm1, %v6213_v44, 0.0 }
0x2cf8   : > { %v6224_v19 = vsel %vm1037_vm1, %v6208_v55, 0.0  ;;  %v6260_v43 = vrot.slane %v6259_v27, 4 }
0x2cf9   : > { %v6225_v4 = vrot.slane %v6224_v19, 4 }
0x2cfa   : > { %v6261_v1 = vadd.f32 %v6260_v43, %v6259_v27 }
0x2cfb   : > { %v6226_v52 = vadd.f32 %v6225_v4, %v6224_v19 }
0x2cfc   : > { %v5479_v23 = vpop.permute.xlu2 %5478  ;;  %v10492_v13 = vpop.permute.xlu0 %6180  ;;  %v6262_v7 = vrot.slane %v6261_v1, 2 }
0x2cfd   : > { %5483 = vst.msk [vmem:[#allocation2 + $0x18] sm:$0xff] %vm1037_vm1, %v5479_v23  ;;  %v6136_v41 = vpop.permute.xlu1 %6135  ;;  %v6227_v53 = vrot.slane %v6226_v52, 2 }
0x2cfe   : > { %v6209_v9 = vmul.f32 %v7707_v17, %v6136_v41  ;;  %v6263_v59 = vadd.f32 %v6262_v7, %v6261_v1  ;;  %v6271_v41 = vrot.slane %v6270_v35, 1 }
0x2cff   : > { %v6228_v50 = vadd.f32 %v6227_v53, %v6226_v52 }
0x2d00   : > { %v6231_v20 = vsel %vm1037_vm1, %v6209_v9, 0.0  ;;  %v6264_v55 = vrot.slane %v6263_v59, 1  ;;  %v6272_v19 = vadd.f32 %v6271_v41, %v6270_v35 }
0x2d01   : > { %v6232_v46 = vrot.slane %v6231_v20, 4  ;;  %v6229_v62 = vrot.slane %v6228_v50, 1 }
0x2d02   : > { %v6376_v43 = vpack.c.bf16 %v6272_v19, %v6272_v19 }
0x2d03   : > { %v6233_v31 = vadd.f32 %v6232_v46, %v6231_v20  ;;  %v6230_v45 = vadd.f32 %v6229_v62, %v6228_v50 }
0x2d04   : > { %v5624_v63 = vpop.permute.xlu2 %5623  ;;  %v10499_v34 = vpop.permute.xlu0 %6200 }
0x2d05   : > { %5629 = vst.msk [vmem:[#allocation2 + $0x20] sm:$0xff] %vm1037_vm1, %v5624_v63  ;;  %v6141_v36 = vpop.permute.xlu1 %6140  ;;  %v6234_v12 = vrot.slane %v6233_v31, 2  ;;  %v6301_v63 = vsel %vm1037_vm1, %v6219_v11, 0.0  ;;  %v6370_v27 = vpack.c.bf16 %v6230_v45, %v6230_v45 }
0x2d06   : > { %v6210_v58 = vmul.f32 %v7711_v39, %v6141_v36  ;;  %v6218_v36 = vmul.f32 %v7715_v25, %v10492_v13  ;;  %v7716_v39 = vld [vmem:[%s8531_s2 + $0x40] sm:$0xff] }
0x2d07   : > { %v6235_v15 = vadd.f32 %v6234_v12, %v6233_v31  ;;  %v6302_v31 = vrot.slane %v6301_v63, 4 }
0x2d08   : > { %v6238_v47 = vsel %vm1037_vm1, %v6210_v58, 0.0  ;;  %v6294_v52 = vsel %vm1037_vm1, %v6218_v36, 0.0 }
0x2d09   : > { %v6239_v8 = vrot.slane %v6238_v47, 4  ;;  %v6236_v32 = vrot.slane %v6235_v15, 1  ;;  %v6295_v50 = vrot.slane %v6294_v52, 4  ;;  %v6303_v41 = vadd.f32 %v6302_v31, %v6301_v63 }
0x2d0b   : > { %v6240_v26 = vadd.f32 %v6239_v8, %v6238_v47  ;;  %v6237_v17 = vadd.f32 %v6236_v32, %v6235_v15  ;;  %v6265_v47 = vadd.f32 %v6264_v55, %v6263_v59  ;;  %v6222_v15 = vmul.f32 %v7718_v57, %v10499_v34 }
0x2d0c   : > { %v5636_v38 = vpop.permute.xlu2 %5635  ;;  %v5330_v61 = vpop.permute.xlu0 %5329  ;;  %v6408_v59 = vunpack.c.l.b16 %v6376_v43  ;;  %v6304_v25 = vrot.slane %v6303_v41, 2 }
0x2d0d   : > { %5640 = vst.msk [vmem:[#allocation3 + $0x28] sm:$0xff] %vm1037_vm1, %v5636_v38  ;;  %v6146_v6 = vpop.permute.xlu1 %6145  ;;  %v6241_v16 = vrot.slane %v6240_v26, 2  ;;  %v6371_v46 = vpack.c.bf16 %v6237_v17, %v6237_v17  ;;  %v6352_v38 = vsel %vm1948_vm11, %v6237_v17, %v6230_v45  ;;  %v6322_v62 = vsel %vm1037_vm1, %v6222_v15, 0.0 }
0x2d0e   : > { %5335 = vst.msk [vmem:[#allocation2] sm:$0xff] %vm1037_vm1, %v5330_v61  ;;  %v6211_v42 = vmul.f32 %v7712_v10, %v6146_v6  ;;  %v6375_v10 = vpack.c.bf16 %v6265_v47, %v6265_v47  ;;  %v6323_v55 = vrot.slane %v6322_v62, 4 }
0x2d0f   : > { %v6242_v18 = vadd.f32 %v6241_v16, %v6240_v26  ;;  %v6403_v13 = vunpack.c.l.b16 %v6371_v46 }
0x2d10   : > { %v6245_v22 = vsel %vm1037_vm1, %v6211_v42, 0.0  ;;  %v6402_v42 = vunpack.c.l.b16 %v6370_v27  ;;  %v6407_v34 = vunpack.c.l.b16 %v6375_v10  ;;  %v6305_v27 = vadd.f32 %v6304_v25, %v6303_v41 }
0x2d11   : > { %v6246_v48 = vrot.slane %v6245_v22, 4  ;;  %v6243_v37 = vrot.slane %v6242_v18, 1 }
0x2d13   : > { %v6247_v29 = vadd.f32 %v6246_v48, %v6245_v22  ;;  %v6244_v9 = vadd.f32 %v6243_v37, %v6242_v18  ;;  %v7717_v22 = vld [vmem:[%s8531_s2 + $0x78] sm:$0xff] }
0x2d14   : > { %v5342_v3 = vpop.permute.xlu0 %5341  ;;  %v6223_v48 = vmul.f32 %v7717_v22, %v10489_v30 }
0x2d15   : > { %v6248_v51 = vrot.slane %v6247_v29, 2  ;;  %5346 = vst.msk [vmem:[#allocation3 + $0x8] sm:$0xff] %vm1037_vm1, %v5342_v3  ;;  %v6151_v21 = vpop.permute.xlu1 %6150  ;;  %v6372_v2 = vpack.c.bf16 %v6244_v9, %v6244_v9  ;;  %v6353_v61 = vsel %vm1950_vm12, %v6244_v9, %v6352_v38  ;;  %v6418_v3 = vsel %vm1948_vm11, %v6403_v13, %v6402_v42 }
0x2d16   : > { %v6212_v56 = vmul.f32 %v7713_v40, %v6151_v21  ;;  %v7719_v21 = vld [vmem:[%s8531_s2 + $0x48] sm:$0xff]  ;;  %v6329_v11 = vsel %vm1037_vm1, %v6223_v48, 0.0 }
0x2d17   : > { %v6249_v14 = vadd.f32 %v6248_v51, %v6247_v29  ;;  %v6404_v6 = vunpack.c.l.b16 %v6372_v2  ;;  %v6330_v45 = vrot.slane %v6329_v11, 4 }
0x2d18   : > { %v6252_v24 = vsel %vm1037_vm1, %v6212_v56, 0.0 }
0x2d19   : > { %v6250_v28 = vrot.slane %v6249_v14, 1  ;;  %v6253_v23 = vrot.slane %v6252_v24, 4  ;;  %v6419_v32 = vsel %vm1950_vm12, %v6404_v6, %v6418_v3  ;;  %v6331_v63 = vadd.f32 %v6330_v45, %v6329_v11 }
0x2d1b   : > { %v6254_v5 = vadd.f32 %v6253_v23, %v6252_v24  ;;  %v6251_v54 = vadd.f32 %v6250_v28, %v6249_v14  ;;  %v6296_v28 = vadd.f32 %v6295_v50, %v6294_v52 }
0x2d1c   : > { %v5487_v20 = vpop.permute.xlu0 %5486 }
0x2d1d   : > { %v6255_v49 = vrot.slane %v6254_v5, 2  ;;  %5492 = vst.msk [vmem:[#allocation3 + $0x10] sm:$0xff] %vm1037_vm1, %v5487_v20  ;;  %v6171_v44 = vpop.permute.xlu1 %6170  ;;  %v6373_v8 = vpack.c.bf16 %v6251_v54, %v6251_v54  ;;  %v6354_v16 = vsel %vm1952_vm13, %v6251_v54, %v6353_v61  ;;  %v7721_v61 = vld [vmem:[%s8531_s2 + $0x68] sm:$0xff] }
0x2d1e   : > { %v6216_v58 = vmul.f32 %v7716_v39, %v6171_v44  ;;  %v7720_v44 = vld [vmem:[%s8531_s2 + $0x60] sm:$0xff]  ;;  %v6324_v39 = vadd.f32 %v6323_v55, %v6322_v62 }
0x2d1f   : > { %v6256_v4 = vadd.f32 %v6255_v49, %v6254_v5  ;;  %v6405_v1 = vunpack.c.l.b16 %v6373_v8  ;;  %v6297_v49 = vrot.slane %v6296_v28, 2 }
0x2d20   : > { %v6280_v0 = vsel %vm1037_vm1, %v6216_v58, 0.0  ;;  %v6325_v31 = vrot.slane %v6324_v39, 2 }
0x2d21   : > { %v6257_v26 = vrot.slane %v6256_v4, 1  ;;  %v6281_v12 = vrot.slane %v6280_v0, 4  ;;  %v6420_v37 = vsel %vm1952_vm13, %v6405_v1, %v6419_v32 }
0x2d22   : > { %v6326_v42 = vadd.f32 %v6325_v31, %v6324_v39 }
0x2d23   : > { %v6258_v33 = vadd.f32 %v6257_v26, %v6256_v4  ;;  %v6282_v30 = vadd.f32 %v6281_v12, %v6280_v0  ;;  %v6332_v26 = vrot.slane %v6331_v63, 2 }
0x2d24   : > { %v5626_v53 = vpop.permute.xlu0 %5625 }
0x2d25   : > { %v6355_v18 = vsel %vm1954_vm14, %v6258_v33, %v6354_v16  ;;  %v6374_v29 = vpack.c.bf16 %v6258_v33, %v6258_v33  ;;  %5630 = vst.msk [vmem:[#allocation2 + $0x28] sm:$0xff] %vm1037_vm1, %v5626_v53  ;;  %v6176_v7 = vpop.permute.xlu1 %6175  ;;  %v6283_v17 = vrot.slane %v6282_v30, 2  ;;  %v6306_v33 = vrot.slane %v6305_v27, 1 }
0x2d26   : > { %v6356_v51 = vsel %vm1956_vm15, %v6265_v47, %v6355_v18  ;;  %v6217_v35 = vmul.f32 %v7719_v21, %v6176_v7  ;;  %v6298_v47 = vadd.f32 %v6297_v49, %v6296_v28  ;;  %v6333_v1 = vadd.f32 %v6332_v26, %v6331_v63 }
0x2d27   : > { %v6406_v40 = vunpack.c.l.b16 %v6374_v29  ;;  %v10538_v56 = vsel %vm1958_vm0, %v6272_v19, %v6356_v51  ;;  %v6284_v36 = vadd.f32 %v6283_v17, %v6282_v30  ;;  %v6307_v15 = vadd.f32 %v6306_v33, %v6305_v27  ;;  %v7722_v30 = vld [vmem:[%s8531_s2 + $0x38] sm:$0xff] }
0x2d28   : > { %v6287_v14 = vsel %vm1037_vm1, %v6217_v35, 0.0  ;;  %v6299_v13 = vrot.slane %v6298_v47, 1  ;;  %v6327_v7 = vrot.slane %v6326_v42, 1  ;;  %v6334_v3 = vrot.slane %v6333_v1, 1 }
0x2d29   : > { %v6421_v24 = vsel %vm1954_vm14, %v6406_v40, %v6420_v37  ;;  %v6288_v60 = vrot.slane %v6287_v14, 4  ;;  %v6285_v8 = vrot.slane %v6284_v36, 1  ;;  %v6381_v37 = vpack.c.bf16 %v6307_v15, %v6307_v15 }
0x2d2a   : > { %v6422_v23 = vsel %vm1956_vm15, %v6407_v34, %v6421_v24  ;;  %v6300_v57 = vadd.f32 %v6299_v13, %v6298_v47  ;;  %v6328_v62 = vadd.f32 %v6327_v7, %v6326_v42  ;;  %v6335_v28 = vadd.f32 %v6334_v3, %v6333_v1 }
0x2d2b   : > { %v6289_v9 = vadd.f32 %v6288_v60, %v6287_v14  ;;  %v10547_v5 = vsel %vm1958_vm0, %v6408_v59, %v6422_v23  ;;  %v6286_v12 = vadd.f32 %v6285_v8, %v6284_v36  ;;  %v6413_v55 = vunpack.c.l.b16 %v6381_v37 }
0x2d2c   : > { %v6380_v40 = vpack.c.bf16 %v6300_v57, %v6300_v57  ;;  %v6384_v49 = vpack.c.bf16 %v6328_v62, %v6328_v62  ;;  %v6385_v36 = vpack.c.bf16 %v6335_v28, %v6335_v28 }
0x2d2d   : > { %v6290_v54 = vrot.slane %v6289_v9, 2  ;;  %v6191_v20 = vpop.permute.xlu1 %6190  ;;  %v6378_v18 = vpack.c.bf16 %v6286_v12, %v6286_v12 }
0x2d2e   : > { %v6220_v19 = vmul.f32 %v7720_v44, %v6191_v20  ;;  %v6417_v26 = vunpack.c.l.b16 %v6385_v36 }
0x2d2f   : > { %v6291_v46 = vadd.f32 %v6290_v54, %v6289_v9  ;;  %v6410_v14 = vunpack.c.l.b16 %v6378_v18  ;;  %v6412_v9 = vunpack.c.l.b16 %v6380_v40 }
0x2d30   : > { %v6308_v58 = vsel %vm1037_vm1, %v6220_v19, 0.0 }
0x2d31   : > { %v6292_v2 = vrot.slane %v6291_v46, 1  ;;  %v6309_v4 = vrot.slane %v6308_v58, 4 }
0x2d33   : > { %v6310_v0 = vadd.f32 %v6309_v4, %v6308_v58  ;;  %v6293_v43 = vadd.f32 %v6292_v2, %v6291_v46 }
0x2d35   : > { %v6311_v52 = vrot.slane %v6310_v0, 2  ;;  %v6196_v38 = vpop.permute.xlu1 %6195  ;;  %v6379_v53 = vpack.c.bf16 %v6293_v43, %v6293_v43  ;;  %v6359_v51 = vsel %vm1948_vm11, %v6293_v43, %v6286_v12 }
0x2d36   : > { %v6221_v6 = vmul.f32 %v7721_v61, %v6196_v38  ;;  %v6360_v24 = vsel %vm1950_vm12, %v6300_v57, %v6359_v51 }
0x2d37   : > { %v6312_v10 = vadd.f32 %v6311_v52, %v6310_v0  ;;  %v6411_v21 = vunpack.c.l.b16 %v6379_v53  ;;  %v6361_v45 = vsel %vm1952_vm13, %v6307_v15, %v6360_v24  ;;  %v6416_v0 = vunpack.c.l.b16 %v6384_v49 }
0x2d38   : > { %v6315_v16 = vsel %vm1037_vm1, %v6221_v6, 0.0 }
0x2d39   : > { %v6313_v22 = vrot.slane %v6312_v10, 1  ;;  %v6316_v48 = vrot.slane %v6315_v16, 4  ;;  %v6425_v23 = vsel %vm1948_vm11, %v6411_v21, %v6410_v14 }
0x2d3a   : > { %v6426_v44 = vsel %vm1950_vm12, %v6412_v9, %v6425_v23 }
0x2d3b   : > { %v6317_v29 = vadd.f32 %v6316_v48, %v6315_v16  ;;  %v6314_v50 = vadd.f32 %v6313_v22, %v6312_v10  ;;  %v6427_v4 = vsel %vm1952_vm13, %v6413_v55, %v6426_v44 }
0x2d3d   : > { %v6318_v35 = vrot.slane %v6317_v29, 2  ;;  %v6166_v32 = vpop.permute.xlu1 %6165  ;;  %v6382_v60 = vpack.c.bf16 %v6314_v50, %v6314_v50  ;;  %v6362_v19 = vsel %vm1954_vm14, %v6314_v50, %v6361_v45 }
0x2d3e   : > { %v6215_v34 = vmul.f32 %v7722_v30, %v6166_v32 }
0x2d3f   : > { %v6319_v59 = vadd.f32 %v6318_v35, %v6317_v29  ;;  %v6414_v25 = vunpack.c.l.b16 %v6382_v60 }
0x2d40   : > { %v6273_v11 = vsel %vm1037_vm1, %v6215_v34, 0.0 }
0x2d41   : > { %v6320_v41 = vrot.slane %v6319_v59, 1  ;;  %v6274_v17 = vrot.slane %v6273_v11, 4  ;;  %v6428_v31 = vsel %vm1954_vm14, %v6414_v25, %v6427_v4 }
0x2d43   : > { %v6321_v54 = vadd.f32 %v6320_v41, %v6319_v59  ;;  %v6275_v20 = vadd.f32 %v6274_v17, %v6273_v11 }
0x2d45   : > { %v6363_v46 = vsel %vm1956_vm15, %v6321_v54, %v6362_v19  ;;  %v6383_v39 = vpack.c.bf16 %v6321_v54, %v6321_v54  ;;  %v6276_v58 = vrot.slane %v6275_v20, 2  ;;  %v5332_v63 = vpop.permute.xlu1 %5331 }
0x2d46   : > { %v6364_v2 = vsel %vm1958_vm0, %v6328_v62, %v6363_v46  ;;  %5336 = vst.msk [vmem:[#allocation2 + $0x8] sm:$0xff] %vm1037_vm1, %v5332_v63 }
0x2d47   : > { %v6365_v47 = vsel %vm1960_vm2, %v6335_v28, %v6364_v2  ;;  %v6415_v27 = vunpack.c.l.b16 %v6383_v39  ;;  %v6277_v8 = vadd.f32 %v6276_v58, %v6275_v20 }
0x2d48   : > { %6369 = vst.msk [vmem:[#allocation4 + $0x8] sm:$0xff] %vm1037_vm1, %v6365_v47 }
0x2d49   : > { %v6429_v43 = vsel %vm1956_vm15, %v6415_v27, %v6428_v31  ;;  %v6278_v52 = vrot.slane %v6277_v8, 1 }
0x2d4a   : > { %v6430_v38 = vsel %vm1958_vm0, %v6416_v0, %v6429_v43 }
0x2d4b   : > { %v6279_v13 = vadd.f32 %v6278_v52, %v6277_v8  ;;  %v6431_v61 = vsel %vm1960_vm2, %v6417_v26, %v6430_v38 }
0x2d4d   : > { %v6358_v6 = vsel %vm1960_vm2, %v6279_v13, %v10538_v56  ;;  %v6377_v33 = vpack.c.bf16 %v6279_v13, %v6279_v13  ;;  %v5477_v12 = vpop.permute.xlu1 %5476  ;;  %v6459_v56 = vpop.f32.mrf.mxu3 }
0x2d4e   : > { %6368 = vst.msk [vmem:[#allocation4] sm:$0xff] %vm1037_vm1, %v6358_v6 }
0x2d4f   : > { %v6409_v10 = vunpack.c.l.b16 %v6377_v33  ;;  %5482 = vst.msk [vmem:[#allocation2 + $0x10] sm:$0xff] %vm1037_vm1, %v5477_v12 }
0x2d51   : > { %v6424_v42 = vsel %vm1960_vm2, %v6409_v10, %v10547_v5  ;;  %v7723_v5 = vld [vmem:[%s10763_s19] ss:$0 sm:$0xff] }
0x2d52   : > { %v6432_v16 = vpack.c.b16 %v6431_v61, %v6424_v42 }
0x2d54   : > { %6943 = vmatmul.msk.bf16.vlgmr.msrb.gmra.mxu2 %vm1037_vm1, %v6432_v16 }
0x2d55   : > { %v5489_v1 = vpop.permute.xlu1 %5488  ;;  %v6461_v57 = vpop.f32.mrf.mxu3 }
0x2d56   : > { %5493 = vst.msk [vmem:[#allocation3 + $0x18] sm:$0xff] %vm1037_vm1, %v5489_v1 }
0x2d5d   : > { %v5634_v53 = vpop.permute.xlu1 %5633 }
0x2d5e   : > { %5639 = vst.msk [vmem:[#allocation3 + $0x20] sm:$0xff] %vm1037_vm1, %v5634_v53 }
0x2dd7   : > { %v6445_v22 = vpop.f32.mrf.mxu2 }
0x2dd8   : > { %v6460_v48 = vadd.f32 %v6459_v56, %v6445_v22 }
0x2dda   : > { %v6464_v29 = vadd.f32 %v7723_v5, %v6460_v48 }
0x2ddf   : > { %v6447_v15 = vpop.f32.mrf.mxu2 }
0x2de0   : > { %v6462_v18 = vadd.f32 %v6461_v57, %v6447_v15 }
0x2de2   : > { %v6465_v7 = vadd.f32 %v7723_v5, %v6462_v18 }
0x2de4   : > { %v7000_v50 = vpack.c.bf16 %v6465_v7, %v6464_v29 }
0x2de6   : > { %7004 = vst [vmem:[%s8559_s8 + $0x18] sm:$0xff] %v7000_v50  }
0x2de7   : > { %s10790_s30 = sld [smem:[#allocation38_spill]]  ;;  %s6497_s23 = sshll.u32 %s8559_s8, 4  ;;  %s6498_s23 = int_to_ptr.vmem [resolvable:$true] %s6497_s23 }
0x2de8   : > { %s10792_s15 = sld [smem:[#allocation71_spill]]  ;;  %s8159_s11 = smov 128  }
0x2de9   : > { %7050 = sst [smem:[#allocation27]] (%p8389_p7), %s8159_s11  ;;  %s8160_s2 = smov 256  }
0x2dea   : > { %7051 = sst [smem:[#allocation27 + $0x1]] (%p8389_p7), %s8160_s2  ;;  %s8163_s8 = smov 4  }
0x2deb   : > { %7055 = sst [smem:[#allocation27 + $0x5]] (%p8389_p7), %s8163_s8 }
0x2ded   : > { %s6981_s6 = sshll.u32 %s10790_s30, 4  ;;  %s8161_s30 = smov 2  }
0x2dee   : > { %s6484_s5 = sadd.s32 %s6981_s6, %s8550_s0  ;;  %7052 = sst [smem:[#allocation27 + $0x2]] (%p8389_p7), %s8161_s30 }
0x2def   : > { %s6951_s21 = sshll.u32 %s6484_s5, 2  ;;  %s8162_s0 = smov 64  }
0x2df0   : > { %s6486_s14 = scalar_lea.hbm %s10792_s15, %s6951_s21  ;;  %7053 = sst [smem:[#allocation27 + $0x3]] (%p8389_p7), %s8162_s0 }
0x2df1   : > { %s6499_s10 = sshll.u32 %s6486_s14, 4  ;;  %7054 = sst [smem:[#allocation27 + $0x4]] (%p8389_p7), %s8162_s0  ;;  %s6500_s10 = int_to_ptr.hbm [resolvable:$true] %s6499_s10 }
0x2df2   : > { %s8164_s6 = smov [#allocation26]   ;;  %s8165_s5 = smov 0  }
0x2df3   : > { %7056 = dma.general (%p8389_p7), %s6498_s23, 512, %s6500_s10, %s6472_s29, %s8164_s6, [#allocation27], %s8165_s5, 0  }
0x2df4 PF: > { %s10793_s21 = sld [smem:[#allocation37_spill]]  ;;  %p7103_p6 = scmp.ge.s32.totalorder %s8134_s3, 2 }
0x2df6   : > { %p7084_p0 = pnand %p7103_p6, %p8397_p10 }
0x2df8   : > { %p7085_p4 = pneg %p7084_p0 }
0x2dfa   : > { %s6527_s12 = sand.u32 1, %s10793_s21  }
0x2dfb   : > { %s6528_s15 = scalar_lea.sflag [#allocation7], %s6527_s12 }
0x2dfc   : > { %8089 = dma.done.wait (%p7085_p4), %s6528_s15, 512  }
0x2dfd   : > { %8091 = vsyncadd (%p7085_p4), %s6528_s15, 4294966784  ;;  %s42_s3 = sadd.s32 1, %s8134_s3   ;;  %s10795_s0 = sld [smem:[#allocation36_spill]] }
0x2dfe   : > { %p39_p2 = scmp.ge.s32.totalorder %s42_s3, 6   ;;  %s10796_s14 = sld [smem:[#allocation43_spill]] }
0x2dff   : > { %s10797_s29 = sld [smem:[#allocation44_spill]]  ;;  %s10800_s30 = smov %s8102_s20 }
0x2e00   : > { %s10798_s7 = sld [smem:[#allocation41_spill]]  ;;  %s10802_s21 = smov %s8110_s1 }
0x2e01   : > { %s10799_s11 = sld [smem:[#allocation42_spill]]  ;;  %s10803_s1 = smov %s8114_s22 }
0x2e02   : > { %s10805_s2 = smov %s8126_s24  ;;  %s10806_s23 = smov %s8130_s25 }
0x2e03   :  { %41 = sbr.rel (!%p39_p2) target bundleno = 34 (0x22), region = 224 }
0x2e04   : > { %s10801_s20 = smov %s10796_s14 }
0x2e05   : > { %s10804_s22 = smov %s10797_s29 }
0x2e06   : > { %s10807_s24 = smov %s10798_s7 }
0x2e07   : > { %s10808_s25 = smov %s10799_s11 }
0x2e08   :  { %6534 = vsyncpa [#allocation6], 1 }
0x2e09   :  { %6536 = vsyncpa [#allocation6 + $0x1], 1 }
0x2e0a   :  { %6537 = vsyncpa [#allocation9], 1 }
0x2e0b   :  { %6539 = vsyncpa [#allocation9 + $0x1], 1 }
0x2e0c   :  { %6540 = vsyncpa [#allocation12], 1 }
0x2e0d   :  { %6541 = vsyncpa [#allocation15], 1 }
0x2e0e   :  { %6542 = vsyncpa [#allocation18], 1 }
0x2e0f   :  { %6543 = vsyncpa [#allocation21], 1 }
0x2e10   :  { %6544 = vsyncpa [#allocation7], 1 }
0x2e11   :  { %6546 = vsyncpa [#allocation7 + $0x1], 1 }

</bundles_post_ra>
